<compile_context>
chip_gen: v6e
topology: v6e:2x2x1
jax: 0.10.0
libtpu: 0.0.40
codegen_flags: <defaults>
</compile_context>

<pallas_src>
import numpy as np
import jax
import jax.numpy as jnp
from jax.experimental import pallas as pl
from jax.experimental.pallas import tpu as pltpu

BT = 8  # images processed per grid step (batch is zero-padded to a multiple)


# ----------------------------- fused Pallas kernel ---------------------------
def _convnet_kernel(x_ref, t1_ref, b1_ref, sh1_ref, sw1_ref,
                    t2_ref, b2_ref, sh2_ref, sw2_ref,
                    wfc1_ref, bfc1_ref, wfc2_ref, bfc2_ref,
                    out_ref, p1_scr, fcin_scr):
    f32 = jnp.float32

    for b in range(BT):
        # ---- conv1 (1->8, 3x3) as 3 Toeplitz matmuls along W: (26,28)@(28,208)
        acc1 = None
        for ki in range(3):
            term = jnp.dot(x_ref[b, ki:ki + 26, :], t1_ref[ki],
                           preferred_element_type=f32)
            acc1 = term if acc1 is None else acc1 + term
        v1 = jnp.maximum(acc1 + b1_ref[...], 0.0)          # (26, 26*8) relu

        # ---- 2x2 max-pool: rows via left selection, cols via right selection
        ph = jnp.maximum(jnp.dot(sh1_ref[0], v1, preferred_element_type=f32),
                         jnp.dot(sh1_ref[1], v1, preferred_element_type=f32))
        p1 = jnp.maximum(jnp.dot(ph, sw1_ref[0], preferred_element_type=f32),
                         jnp.dot(ph, sw1_ref[1], preferred_element_type=f32))
        p1_scr[...] = p1                                    # (13, 13*8) in VMEM
        # dropout1: eval-mode identity

        # ---- conv2 (8->8, 3x3) as 3 Toeplitz matmuls: (11,104)@(104,88)
        acc2 = None
        for ki in range(3):
            term = jnp.dot(p1_scr[ki:ki + 11, :], t2_ref[ki],
                           preferred_element_type=f32)
            acc2 = term if acc2 is None else acc2 + term
        v2 = jnp.maximum(acc2 + b2_ref[...], 0.0)           # (11, 11*8)

        qh = jnp.maximum(jnp.dot(sh2_ref[0], v2, preferred_element_type=f32),
                         jnp.dot(sh2_ref[1], v2, preferred_element_type=f32))
        p2 = jnp.maximum(jnp.dot(qh, sw2_ref[0], preferred_element_type=f32),
                         jnp.dot(qh, sw2_ref[1], preferred_element_type=f32))
        # dropout2: eval-mode identity
        fcin_scr[b, :, :] = p2                              # (5, 5*8) per image

    # ---- fc1 + relu, batched over the BT tile (flatten order baked into wfc1)
    acc = None
    for h in range(5):
        term = jnp.dot(fcin_scr[:, h, :], wfc1_ref[h], preferred_element_type=f32)
        acc = term if acc is None else acc + term
    hfc = jnp.maximum(acc + bfc1_ref[...], 0.0)             # (BT, 64)

    # ---- fc2 + numerically stable log_softmax
    logits = jnp.dot(hfc, wfc2_ref[...], preferred_element_type=f32) + bfc2_ref[...]
    m = jnp.max(logits, axis=1, keepdims=True)
    lse = m + jnp.log(jnp.sum(jnp.exp(logits - m), axis=1, keepdims=True))
    out_ref[...] = logits - lse


# --------------------------- weight pre-processing ---------------------------
def _conv1_toeplitz(w1):
    """(8,1,3,3) -> (3, 28, 26*8); T[ki][w, j*8+o] = w1[o,0,ki,w-j]."""
    mats = []
    for ki in range(3):
        t = jnp.zeros((28, 26, 8), jnp.float32)
        for kj in range(3):
            t = t.at[jnp.arange(26) + kj, jnp.arange(26), :].add(w1[:, 0, ki, kj])
        mats.append(t.reshape(28, 26 * 8))
    return jnp.stack(mats)


def _conv2_toeplitz(w2):
    """(8,8,3,3) -> (3, 13*8, 11*8); T[ki][(j+kj)*8+c, j*8+o] = w2[o,c,ki,kj]."""
    mats = []
    for ki in range(3):
        t = jnp.zeros((13, 11, 8, 8), jnp.float32)  # [src_j, out_j, c_in, c_out]
        for kj in range(3):
            t = t.at[jnp.arange(11) + kj, jnp.arange(11), :, :].add(w2[:, :, ki, kj].T)
        mats.append(t.transpose(0, 2, 1, 3).reshape(13 * 8, 11 * 8))
    return jnp.stack(mats)


def _pool_row_select(rows_out, rows_in):
    s = np.zeros((2, rows_out, rows_in), np.float32)
    s[0, np.arange(rows_out), 2 * np.arange(rows_out)] = 1.0
    s[1, np.arange(rows_out), 2 * np.arange(rows_out) + 1] = 1.0
    return jnp.asarray(s)


def _pool_col_select(groups_out, groups_in, c):
    s = np.zeros((2, groups_in * c, groups_out * c), np.float32)
    for pj in range(groups_out):
        for o in range(c):
            s[0, (2 * pj) * c + o, pj * c + o] = 1.0
            s[1, (2 * pj + 1) * c + o, pj * c + o] = 1.0
    return jnp.asarray(s)


# --------------------------------- forward -----------------------------------
def convnet_forward(params, x_nchw):
    n = x_nchw.shape[0]
    x = x_nchw.reshape(n, 28, 28).astype(jnp.float32)       # C==1 -> squeeze
    n_pad = ((n + BT - 1) // BT) * BT
    if n_pad != n:
        x = jnp.pad(x, ((0, n_pad - n), (0, 0), (0, 0)))

    t1 = _conv1_toeplitz(params["conv1_w"].astype(jnp.float32))      # (3,28,208)
    t2 = _conv2_toeplitz(params["conv2_w"].astype(jnp.float32))      # (3,104,88)
    b1row = jnp.tile(params["conv1_b"].astype(jnp.float32), 26).reshape(1, 208)
    b2row = jnp.tile(params["conv2_b"].astype(jnp.float32), 11).reshape(1, 88)
    sh1 = _pool_row_select(13, 26)                                   # (2,13,26)
    sw1 = _pool_col_select(13, 26, 8)                                # (2,208,104)
    sh2 = _pool_row_select(5, 11)                                    # (2,5,11)
    sw2 = _pool_col_select(5, 11, 8)                                 # (2,88,40)
    # fc1 expects torch.flatten of NCHW (c*25+h*5+w); re-lay out to (h, w*8+c, out)
    wfc1 = (params["fc1_w"].astype(jnp.float32)
            .reshape(64, 8, 5, 5).transpose(2, 3, 1, 0).reshape(5, 40, 64))
    bfc1 = params["fc1_b"].astype(jnp.float32).reshape(1, 64)
    wfc2 = params["fc2_w"].astype(jnp.float32).T                     # (64, 10)
    bfc2 = params["fc2_b"].astype(jnp.float32).reshape(1, 10)

    grid = (n_pad // BT,)
    out = pl.pallas_call(
        _convnet_kernel,
        out_shape=jax.ShapeDtypeStruct((n_pad, 10), jnp.float32),
        grid=grid,
        in_specs=[
            pl.BlockSpec((BT, 28, 28), lambda i: (i, 0, 0)),   # x batch tile
            pl.BlockSpec((3, 28, 208), lambda i: (0, 0, 0)),   # conv1 Toeplitz
            pl.BlockSpec((1, 208), lambda i: (0, 0)),          # conv1 bias row
            pl.BlockSpec((2, 13, 26), lambda i: (0, 0, 0)),    # pool1 row select
            pl.BlockSpec((2, 208, 104), lambda i: (0, 0, 0)),  # pool1 col select
            pl.BlockSpec((3, 104, 88), lambda i: (0, 0, 0)),   # conv2 Toeplitz
            pl.BlockSpec((1, 88), lambda i: (0, 0)),           # conv2 bias row
            pl.BlockSpec((2, 5, 11), lambda i: (0, 0, 0)),     # pool2 row select
            pl.BlockSpec((2, 88, 40), lambda i: (0, 0, 0)),    # pool2 col select
            pl.BlockSpec((5, 40, 64), lambda i: (0, 0, 0)),    # fc1 weight (per h)
            pl.BlockSpec((1, 64), lambda i: (0, 0)),           # fc1 bias
            pl.BlockSpec((64, 10), lambda i: (0, 0)),          # fc2 weight
            pl.BlockSpec((1, 10), lambda i: (0, 0)),           # fc2 bias
        ],
        out_specs=pl.BlockSpec((BT, 10), lambda i: (i, 0)),
        scratch_shapes=[pltpu.VMEM((13, 104), jnp.float32),    # pooled conv1
                        pltpu.VMEM((BT, 5, 40), jnp.float32)], # fc input tile
        compiler_params=pltpu.CompilerParams(
            dimension_semantics=("parallel",),
            vmem_limit_bytes=32 * 1024 * 1024),
        cost_estimate=pl.CostEstimate(
            flops=int(n_pad) * 3_000_000,
            transcendentals=int(n_pad) * 16,
            bytes_accessed=int(x.size * 4 + n_pad * 40 + 600_000)),
    )(x, t1, b1row, sh1, sw1, t2, b2row, sh2, sw2, wfc1, bfc1, wfc2, bfc2)
    return out[:n]


# ------------------------------ params / reference ---------------------------
def init_params(key):
    ks = jax.random.split(key, 8)

    def u(k, shape, fan_in):
        bound = 1.0 / jnp.sqrt(jnp.float32(fan_in))
        return jax.random.uniform(k, shape, jnp.float32, -bound, bound)

    return {
        "conv1_w": u(ks[0], (8, 1, 3, 3), 1 * 3 * 3),
        "conv1_b": u(ks[1], (8,), 1 * 3 * 3),
        "conv2_w": u(ks[2], (8, 8, 3, 3), 8 * 3 * 3),
        "conv2_b": u(ks[3], (8,), 8 * 3 * 3),
        "fc1_w":   u(ks[4], (64, 200), 200),
        "fc1_b":   u(ks[5], (64,), 200),
        "fc2_w":   u(ks[6], (10, 64), 64),
        "fc2_b":   u(ks[7], (10,), 64),
    }


def _reference_forward(params, x_nchw):
    """Plain-JAX reference matching the PyTorch module (eval mode)."""
    dn = ("NCHW", "OIHW", "NCHW")
    x = x_nchw.astype(jnp.float32)
    h = jax.lax.conv_general_dilated(x, params["conv1_w"], (1, 1), "VALID",
                                     dimension_numbers=dn)
    h = jax.nn.relu(h + params["conv1_b"][None, :, None, None])
    h = jax.lax.reduce_window(h, -jnp.inf, jax.lax.max,
                              (1, 1, 2, 2), (1, 1, 2, 2), "VALID")
    h = jax.lax.conv_general_dilated(h, params["conv2_w"], (1, 1), "VALID",
                                     dimension_numbers=dn)
    h = jax.nn.relu(h + params["conv2_b"][None, :, None, None])
    h = jax.lax.reduce_window(h, -jnp.inf, jax.lax.max,
                              (1, 1, 2, 2), (1, 1, 2, 2), "VALID")
    h = h.reshape(h.shape[0], -1)                       # torch.flatten(x, 1)
    h = jax.nn.relu(h @ params["fc1_w"].T + params["fc1_b"])
    logits = h @ params["fc2_w"].T + params["fc2_b"]
    return jax.nn.log_softmax(logits, axis=1)


if __name__ == "__main__":
    key = jax.random.PRNGKey(0)
    pkey, xkey = jax.random.split(key)
    params = init_params(pkey)
    # fc1 in_features=200 => 8*5*5 => input must be 28x28 single channel (MNIST)
    x = jax.random.normal(xkey, (2, 1, 28, 28), dtype=jnp.float32)

    out = jax.jit(convnet_forward)(params, x)
    out = jax.block_until_ready(out)
    assert out.shape == (2, 10)
    # log-softmax rows should (log-)sum to ~0
    assert jnp.allclose(jnp.sum(jnp.exp(out), axis=1), 1.0, atol=1e-4)
    # sanity-check against a plain-JAX reference (loose tol: MXU f32 rounding)
    ref = jax.block_until_ready(_reference_forward(params, x))
    assert float(jnp.max(jnp.abs(jnp.exp(out) - jnp.exp(ref)))) < 5e-2
    print("KERNEL_OK")
</pallas_src>

<mosaic_0001>
module attributes {stable_mosaic.version = 11 : i64} {
  func.func @_convnet_kernel(%arg0: i32, %arg1: memref<8x28x28xf32, #tpu.memory_space<vmem>>, %arg2: memref<3x28x208xf32, #tpu.memory_space<vmem>>, %arg3: memref<1x208xf32, #tpu.memory_space<vmem>>, %arg4: memref<2x13x26xf32, #tpu.memory_space<vmem>>, %arg5: memref<2x208x104xf32, #tpu.memory_space<vmem>>, %arg6: memref<3x104x88xf32, #tpu.memory_space<vmem>>, %arg7: memref<1x88xf32, #tpu.memory_space<vmem>>, %arg8: memref<2x5x11xf32, #tpu.memory_space<vmem>>, %arg9: memref<2x88x40xf32, #tpu.memory_space<vmem>>, %arg10: memref<5x40x64xf32, #tpu.memory_space<vmem>>, %arg11: memref<1x64xf32, #tpu.memory_space<vmem>>, %arg12: memref<64x10xf32, #tpu.memory_space<vmem>>, %arg13: memref<1x10xf32, #tpu.memory_space<vmem>>, %arg14: memref<8x10xf32, #tpu.memory_space<vmem>>, %arg15: memref<13x104xf32, #tpu.memory_space<vmem>>, %arg16: memref<8x5x40xf32, #tpu.memory_space<vmem>>) attributes {dimension_semantics = [#tpu.dimension_semantics<parallel>], iteration_bounds = array<i64: 1>, scalar_prefetch = 0 : i64, scratch_operands = 2 : i64, tpu.core_type = #tpu.core_type<tc>, window_params = [{transform_indices = @transform_0, window_bounds = array<i64: 8, 28, 28>}, {pipeline_mode = #tpu.pipeline_mode<synchronous>, transform_indices = @transform_1, window_bounds = array<i64: 3, 28, 208>}, {pipeline_mode = #tpu.pipeline_mode<synchronous>, transform_indices = @transform_2, window_bounds = array<i64: 1, 208>}, {pipeline_mode = #tpu.pipeline_mode<synchronous>, transform_indices = @transform_3, window_bounds = array<i64: 2, 13, 26>}, {pipeline_mode = #tpu.pipeline_mode<synchronous>, transform_indices = @transform_4, window_bounds = array<i64: 2, 208, 104>}, {pipeline_mode = #tpu.pipeline_mode<synchronous>, transform_indices = @transform_5, window_bounds = array<i64: 3, 104, 88>}, {pipeline_mode = #tpu.pipeline_mode<synchronous>, transform_indices = @transform_6, window_bounds = array<i64: 1, 88>}, {pipeline_mode = #tpu.pipeline_mode<synchronous>, transform_indices = @transform_7, window_bounds = array<i64: 2, 5, 11>}, {pipeline_mode = #tpu.pipeline_mode<synchronous>, transform_indices = @transform_8, window_bounds = array<i64: 2, 88, 40>}, {pipeline_mode = #tpu.pipeline_mode<synchronous>, transform_indices = @transform_9, window_bounds = array<i64: 5, 40, 64>}, {pipeline_mode = #tpu.pipeline_mode<synchronous>, transform_indices = @transform_10, window_bounds = array<i64: 1, 64>}, {pipeline_mode = #tpu.pipeline_mode<synchronous>, transform_indices = @transform_11, window_bounds = array<i64: 64, 10>}, {pipeline_mode = #tpu.pipeline_mode<synchronous>, transform_indices = @transform_12, window_bounds = array<i64: 1, 10>}, {transform_indices = @transform_13, window_bounds = array<i64: 8, 10>}]} {
    %c0 = arith.constant 0 : index
    %c0_0 = arith.constant 0 : index
    %c0_1 = arith.constant 0 : index
    %0 = vector.load %arg1[%c0, %c0_0, %c0_1] : memref<8x28x28xf32, #tpu.memory_space<vmem>>, vector<1x26x28xf32>
    %1 = vector.shape_cast %0 : vector<1x26x28xf32> to vector<26x28xf32>
    %c0_2 = arith.constant 0 : index
    %c0_3 = arith.constant 0 : index
    %c0_4 = arith.constant 0 : index
    %2 = vector.load %arg2[%c0_2, %c0_3, %c0_4] : memref<3x28x208xf32, #tpu.memory_space<vmem>>, vector<1x28x208xf32>
    %3 = vector.shape_cast %2 : vector<1x28x208xf32> to vector<28x208xf32>
    %cst = arith.constant dense<0.000000e+00> : vector<26x208xf32>
    %4 = tpu.matmul %1, %3, %cst {dimension_numbers = #tpu.dot_dimension_numbers<[1], [0], [0], [1], [0, 0, 1, 1], [], []>} : vector<26x28xf32>, vector<28x208xf32>, vector<26x208xf32> -> vector<26x208xf32>
    %c0_5 = arith.constant 0 : index
    %c1 = arith.constant 1 : index
    %c0_6 = arith.constant 0 : index
    %5 = vector.load %arg1[%c0_5, %c1, %c0_6] : memref<8x28x28xf32, #tpu.memory_space<vmem>>, vector<1x26x28xf32>
    %6 = vector.shape_cast %5 : vector<1x26x28xf32> to vector<26x28xf32>
    %c1_7 = arith.constant 1 : index
    %c0_8 = arith.constant 0 : index
    %c0_9 = arith.constant 0 : index
    %7 = vector.load %arg2[%c1_7, %c0_8, %c0_9] : memref<3x28x208xf32, #tpu.memory_space<vmem>>, vector<1x28x208xf32>
    %8 = vector.shape_cast %7 : vector<1x28x208xf32> to vector<28x208xf32>
    %cst_10 = arith.constant dense<0.000000e+00> : vector<26x208xf32>
    %9 = tpu.matmul %6, %8, %cst_10 {dimension_numbers = #tpu.dot_dimension_numbers<[1], [0], [0], [1], [0, 0, 1, 1], [], []>} : vector<26x28xf32>, vector<28x208xf32>, vector<26x208xf32> -> vector<26x208xf32>
    %10 = arith.addf %4, %9 : vector<26x208xf32>
    %c0_11 = arith.constant 0 : index
    %c2 = arith.constant 2 : index
    %c0_12 = arith.constant 0 : index
    %11 = vector.load %arg1[%c0_11, %c2, %c0_12] : memref<8x28x28xf32, #tpu.memory_space<vmem>>, vector<1x26x28xf32>
    %12 = vector.shape_cast %11 : vector<1x26x28xf32> to vector<26x28xf32>
    %c2_13 = arith.constant 2 : index
    %c0_14 = arith.constant 0 : index
    %c0_15 = arith.constant 0 : index
    %13 = vector.load %arg2[%c2_13, %c0_14, %c0_15] : memref<3x28x208xf32, #tpu.memory_space<vmem>>, vector<1x28x208xf32>
    %14 = vector.shape_cast %13 : vector<1x28x208xf32> to vector<28x208xf32>
    %cst_16 = arith.constant dense<0.000000e+00> : vector<26x208xf32>
    %15 = tpu.matmul %12, %14, %cst_16 {dimension_numbers = #tpu.dot_dimension_numbers<[1], [0], [0], [1], [0, 0, 1, 1], [], []>} : vector<26x28xf32>, vector<28x208xf32>, vector<26x208xf32> -> vector<26x208xf32>
    %16 = arith.addf %10, %15 : vector<26x208xf32>
    %c0_17 = arith.constant 0 : index
    %c0_18 = arith.constant 0 : index
    %17 = vector.load %arg3[%c0_17, %c0_18] : memref<1x208xf32, #tpu.memory_space<vmem>>, vector<1x208xf32>
    %18 = vector.broadcast %17 : vector<1x208xf32> to vector<26x208xf32>
    %19 = arith.addf %16, %18 : vector<26x208xf32>
    %cst_19 = arith.constant 0.000000e+00 : f32
    %20 = vector.broadcast %cst_19 : f32 to vector<26x208xf32>
    %21 = arith.maximumf %19, %20 : vector<26x208xf32>
    %c0_20 = arith.constant 0 : index
    %c0_21 = arith.constant 0 : index
    %c0_22 = arith.constant 0 : index
    %22 = vector.load %arg4[%c0_20, %c0_21, %c0_22] : memref<2x13x26xf32, #tpu.memory_space<vmem>>, vector<1x13x26xf32>
    %23 = vector.shape_cast %22 : vector<1x13x26xf32> to vector<13x26xf32>
    %cst_23 = arith.constant dense<0.000000e+00> : vector<13x208xf32>
    %24 = tpu.matmul %23, %21, %cst_23 {dimension_numbers = #tpu.dot_dimension_numbers<[1], [0], [0], [1], [0, 0, 1, 1], [], []>} : vector<13x26xf32>, vector<26x208xf32>, vector<13x208xf32> -> vector<13x208xf32>
    %c1_24 = arith.constant 1 : index
    %c0_25 = arith.constant 0 : index
    %c0_26 = arith.constant 0 : index
    %25 = vector.load %arg4[%c1_24, %c0_25, %c0_26] : memref<2x13x26xf32, #tpu.memory_space<vmem>>, vector<1x13x26xf32>
    %26 = vector.shape_cast %25 : vector<1x13x26xf32> to vector<13x26xf32>
    %cst_27 = arith.constant dense<0.000000e+00> : vector<13x208xf32>
    %27 = tpu.matmul %26, %21, %cst_27 {dimension_numbers = #tpu.dot_dimension_numbers<[1], [0], [0], [1], [0, 0, 1, 1], [], []>} : vector<13x26xf32>, vector<26x208xf32>, vector<13x208xf32> -> vector<13x208xf32>
    %28 = arith.maximumf %24, %27 : vector<13x208xf32>
    %c0_28 = arith.constant 0 : index
    %c0_29 = arith.constant 0 : index
    %c0_30 = arith.constant 0 : index
    %29 = vector.load %arg5[%c0_28, %c0_29, %c0_30] : memref<2x208x104xf32, #tpu.memory_space<vmem>>, vector<1x208x104xf32>
    %30 = vector.shape_cast %29 : vector<1x208x104xf32> to vector<208x104xf32>
    %cst_31 = arith.constant dense<0.000000e+00> : vector<13x104xf32>
    %31 = tpu.matmul %28, %30, %cst_31 {dimension_numbers = #tpu.dot_dimension_numbers<[1], [0], [0], [1], [0, 0, 1, 1], [], []>} : vector<13x208xf32>, vector<208x104xf32>, vector<13x104xf32> -> vector<13x104xf32>
    %c1_32 = arith.constant 1 : index
    %c0_33 = arith.constant 0 : index
    %c0_34 = arith.constant 0 : index
    %32 = vector.load %arg5[%c1_32, %c0_33, %c0_34] : memref<2x208x104xf32, #tpu.memory_space<vmem>>, vector<1x208x104xf32>
    %33 = vector.shape_cast %32 : vector<1x208x104xf32> to vector<208x104xf32>
    %cst_35 = arith.constant dense<0.000000e+00> : vector<13x104xf32>
    %34 = tpu.matmul %28, %33, %cst_35 {dimension_numbers = #tpu.dot_dimension_numbers<[1], [0], [0], [1], [0, 0, 1, 1], [], []>} : vector<13x208xf32>, vector<208x104xf32>, vector<13x104xf32> -> vector<13x104xf32>
    %35 = arith.maximumf %31, %34 : vector<13x104xf32>
    %c0_36 = arith.constant 0 : index
    %c0_37 = arith.constant 0 : index
    %36 = vector.load %arg15[%c0_36, %c0_37] : memref<13x104xf32, #tpu.memory_space<vmem>>, vector<13x104xf32>
    tpu.vector_store %arg15[%c0_36, %c0_37], %35 {strides = array<i32>} : memref<13x104xf32, #tpu.memory_space<vmem>>, vector<13x104xf32>,
    %c0_38 = arith.constant 0 : index
    %c0_39 = arith.constant 0 : index
    %37 = vector.load %arg15[%c0_38, %c0_39] : memref<13x104xf32, #tpu.memory_space<vmem>>, vector<11x104xf32>
    %c0_40 = arith.constant 0 : index
    %c0_41 = arith.constant 0 : index
    %c0_42 = arith.constant 0 : index
    %38 = vector.load %arg6[%c0_40, %c0_41, %c0_42] : memref<3x104x88xf32, #tpu.memory_space<vmem>>, vector<1x104x88xf32>
    %39 = vector.shape_cast %38 : vector<1x104x88xf32> to vector<104x88xf32>
    %cst_43 = arith.constant dense<0.000000e+00> : vector<11x88xf32>
    %40 = tpu.matmul %37, %39, %cst_43 {dimension_numbers = #tpu.dot_dimension_numbers<[1], [0], [0], [1], [0, 0, 1, 1], [], []>} : vector<11x104xf32>, vector<104x88xf32>, vector<11x88xf32> -> vector<11x88xf32>
    %c1_44 = arith.constant 1 : index
    %c0_45 = arith.constant 0 : index
    %41 = vector.load %arg15[%c1_44, %c0_45] : memref<13x104xf32, #tpu.memory_space<vmem>>, vector<11x104xf32>
    %c1_46 = arith.constant 1 : index
    %c0_47 = arith.constant 0 : index
    %c0_48 = arith.constant 0 : index
    %42 = vector.load %arg6[%c1_46, %c0_47, %c0_48] : memref<3x104x88xf32, #tpu.memory_space<vmem>>, vector<1x104x88xf32>
    %43 = vector.shape_cast %42 : vector<1x104x88xf32> to vector<104x88xf32>
    %cst_49 = arith.constant dense<0.000000e+00> : vector<11x88xf32>
    %44 = tpu.matmul %41, %43, %cst_49 {dimension_numbers = #tpu.dot_dimension_numbers<[1], [0], [0], [1], [0, 0, 1, 1], [], []>} : vector<11x104xf32>, vector<104x88xf32>, vector<11x88xf32> -> vector<11x88xf32>
    %45 = arith.addf %40, %44 : vector<11x88xf32>
    %c2_50 = arith.constant 2 : index
    %c0_51 = arith.constant 0 : index
    %46 = vector.load %arg15[%c2_50, %c0_51] : memref<13x104xf32, #tpu.memory_space<vmem>>, vector<11x104xf32>
    %c2_52 = arith.constant 2 : index
    %c0_53 = arith.constant 0 : index
    %c0_54 = arith.constant 0 : index
    %47 = vector.load %arg6[%c2_52, %c0_53, %c0_54] : memref<3x104x88xf32, #tpu.memory_space<vmem>>, vector<1x104x88xf32>
    %48 = vector.shape_cast %47 : vector<1x104x88xf32> to vector<104x88xf32>
    %cst_55 = arith.constant dense<0.000000e+00> : vector<11x88xf32>
    %49 = tpu.matmul %46, %48, %cst_55 {dimension_numbers = #tpu.dot_dimension_numbers<[1], [0], [0], [1], [0, 0, 1, 1], [], []>} : vector<11x104xf32>, vector<104x88xf32>, vector<11x88xf32> -> vector<11x88xf32>
    %50 = arith.addf %45, %49 : vector<11x88xf32>
    %c0_56 = arith.constant 0 : index
    %c0_57 = arith.constant 0 : index
    %51 = vector.load %arg7[%c0_56, %c0_57] : memref<1x88xf32, #tpu.memory_space<vmem>>, vector<1x88xf32>
    %52 = vector.broadcast %51 : vector<1x88xf32> to vector<11x88xf32>
    %53 = arith.addf %50, %52 : vector<11x88xf32>
    %cst_58 = arith.constant 0.000000e+00 : f32
    %54 = vector.broadcast %cst_58 : f32 to vector<11x88xf32>
    %55 = arith.maximumf %53, %54 : vector<11x88xf32>
    %c0_59 = arith.constant 0 : index
    %c0_60 = arith.constant 0 : index
    %c0_61 = arith.constant 0 : index
    %56 = vector.load %arg8[%c0_59, %c0_60, %c0_61] : memref<2x5x11xf32, #tpu.memory_space<vmem>>, vector<1x5x11xf32>
    %57 = vector.shape_cast %56 : vector<1x5x11xf32> to vector<5x11xf32>
    %cst_62 = arith.constant dense<0.000000e+00> : vector<5x88xf32>
    %58 = tpu.matmul %57, %55, %cst_62 {dimension_numbers = #tpu.dot_dimension_numbers<[1], [0], [0], [1], [0, 0, 1, 1], [], []>} : vector<5x11xf32>, vector<11x88xf32>, vector<5x88xf32> -> vector<5x88xf32>
    %c1_63 = arith.constant 1 : index
    %c0_64 = arith.constant 0 : index
    %c0_65 = arith.constant 0 : index
    %59 = vector.load %arg8[%c1_63, %c0_64, %c0_65] : memref<2x5x11xf32, #tpu.memory_space<vmem>>, vector<1x5x11xf32>
    %60 = vector.shape_cast %59 : vector<1x5x11xf32> to vector<5x11xf32>
    %cst_66 = arith.constant dense<0.000000e+00> : vector<5x88xf32>
    %61 = tpu.matmul %60, %55, %cst_66 {dimension_numbers = #tpu.dot_dimension_numbers<[1], [0], [0], [1], [0, 0, 1, 1], [], []>} : vector<5x11xf32>, vector<11x88xf32>, vector<5x88xf32> -> vector<5x88xf32>
    %62 = arith.maximumf %58, %61 : vector<5x88xf32>
    %c0_67 = arith.constant 0 : index
    %c0_68 = arith.constant 0 : index
    %c0_69 = arith.constant 0 : index
    %63 = vector.load %arg9[%c0_67, %c0_68, %c0_69] : memref<2x88x40xf32, #tpu.memory_space<vmem>>, vector<1x88x40xf32>
    %64 = vector.shape_cast %63 : vector<1x88x40xf32> to vector<88x40xf32>
    %cst_70 = arith.constant dense<0.000000e+00> : vector<5x40xf32>
    %65 = tpu.matmul %62, %64, %cst_70 {dimension_numbers = #tpu.dot_dimension_numbers<[1], [0], [0], [1], [0, 0, 1, 1], [], []>} : vector<5x88xf32>, vector<88x40xf32>, vector<5x40xf32> -> vector<5x40xf32>
    %c1_71 = arith.constant 1 : index
    %c0_72 = arith.constant 0 : index
    %c0_73 = arith.constant 0 : index
    %66 = vector.load %arg9[%c1_71, %c0_72, %c0_73] : memref<2x88x40xf32, #tpu.memory_space<vmem>>, vector<1x88x40xf32>
    %67 = vector.shape_cast %66 : vector<1x88x40xf32> to vector<88x40xf32>
    %cst_74 = arith.constant dense<0.000000e+00> : vector<5x40xf32>
    %68 = tpu.matmul %62, %67, %cst_74 {dimension_numbers = #tpu.dot_dimension_numbers<[1], [0], [0], [1], [0, 0, 1, 1], [], []>} : vector<5x88xf32>, vector<88x40xf32>, vector<5x40xf32> -> vector<5x40xf32>
    %69 = arith.maximumf %65, %68 : vector<5x40xf32>
    %c0_75 = arith.constant 0 : index
    %c0_76 = arith.constant 0 : index
    %c0_77 = arith.constant 0 : index
    %70 = vector.load %arg16[%c0_75, %c0_76, %c0_77] : memref<8x5x40xf32, #tpu.memory_space<vmem>>, vector<1x5x40xf32>
    %71 = vector.shape_cast %70 : vector<1x5x40xf32> to vector<5x40xf32>
    %72 = vector.shape_cast %69 : vector<5x40xf32> to vector<1x5x40xf32>
    tpu.vector_store %arg16[%c0_75, %c0_76, %c0_77], %72 {strides = array<i32>} : memref<8x5x40xf32, #tpu.memory_space<vmem>>, vector<1x5x40xf32>,
    %c1_78 = arith.constant 1 : index
    %c0_79 = arith.constant 0 : index
    %c0_80 = arith.constant 0 : index
    %73 = vector.load %arg1[%c1_78, %c0_79, %c0_80] : memref<8x28x28xf32, #tpu.memory_space<vmem>>, vector<1x26x28xf32>
    %74 = vector.shape_cast %73 : vector<1x26x28xf32> to vector<26x28xf32>
    %c0_81 = arith.constant 0 : index
    %c0_82 = arith.constant 0 : index
    %c0_83 = arith.constant 0 : index
    %75 = vector.load %arg2[%c0_81, %c0_82, %c0_83] : memref<3x28x208xf32, #tpu.memory_space<vmem>>, vector<1x28x208xf32>
    %76 = vector.shape_cast %75 : vector<1x28x208xf32> to vector<28x208xf32>
    %cst_84 = arith.constant dense<0.000000e+00> : vector<26x208xf32>
    %77 = tpu.matmul %74, %76, %cst_84 {dimension_numbers = #tpu.dot_dimension_numbers<[1], [0], [0], [1], [0, 0, 1, 1], [], []>} : vector<26x28xf32>, vector<28x208xf32>, vector<26x208xf32> -> vector<26x208xf32>
    %c1_85 = arith.constant 1 : index
    %c1_86 = arith.constant 1 : index
    %c0_87 = arith.constant 0 : index
    %78 = vector.load %arg1[%c1_85, %c1_86, %c0_87] : memref<8x28x28xf32, #tpu.memory_space<vmem>>, vector<1x26x28xf32>
    %79 = vector.shape_cast %78 : vector<1x26x28xf32> to vector<26x28xf32>
    %c1_88 = arith.constant 1 : index
    %c0_89 = arith.constant 0 : index
    %c0_90 = arith.constant 0 : index
    %80 = vector.load %arg2[%c1_88, %c0_89, %c0_90] : memref<3x28x208xf32, #tpu.memory_space<vmem>>, vector<1x28x208xf32>
    %81 = vector.shape_cast %80 : vector<1x28x208xf32> to vector<28x208xf32>
    %cst_91 = arith.constant dense<0.000000e+00> : vector<26x208xf32>
    %82 = tpu.matmul %79, %81, %cst_91 {dimension_numbers = #tpu.dot_dimension_numbers<[1], [0], [0], [1], [0, 0, 1, 1], [], []>} : vector<26x28xf32>, vector<28x208xf32>, vector<26x208xf32> -> vector<26x208xf32>
    %83 = arith.addf %77, %82 : vector<26x208xf32>
    %c1_92 = arith.constant 1 : index
    %c2_93 = arith.constant 2 : index
    %c0_94 = arith.constant 0 : index
    %84 = vector.load %arg1[%c1_92, %c2_93, %c0_94] : memref<8x28x28xf32, #tpu.memory_space<vmem>>, vector<1x26x28xf32>
    %85 = vector.shape_cast %84 : vector<1x26x28xf32> to vector<26x28xf32>
    %c2_95 = arith.constant 2 : index
    %c0_96 = arith.constant 0 : index
    %c0_97 = arith.constant 0 : index
    %86 = vector.load %arg2[%c2_95, %c0_96, %c0_97] : memref<3x28x208xf32, #tpu.memory_space<vmem>>, vector<1x28x208xf32>
    %87 = vector.shape_cast %86 : vector<1x28x208xf32> to vector<28x208xf32>
    %cst_98 = arith.constant dense<0.000000e+00> : vector<26x208xf32>
    %88 = tpu.matmul %85, %87, %cst_98 {dimension_numbers = #tpu.dot_dimension_numbers<[1], [0], [0], [1], [0, 0, 1, 1], [], []>} : vector<26x28xf32>, vector<28x208xf32>, vector<26x208xf32> -> vector<26x208xf32>
    %89 = arith.addf %83, %88 : vector<26x208xf32>
    %c0_99 = arith.constant 0 : index
    %c0_100 = arith.constant 0 : index
    %90 = vector.load %arg3[%c0_99, %c0_100] : memref<1x208xf32, #tpu.memory_space<vmem>>, vector<1x208xf32>
    %91 = vector.broadcast %90 : vector<1x208xf32> to vector<26x208xf32>
    %92 = arith.addf %89, %91 : vector<26x208xf32>
    %cst_101 = arith.constant 0.000000e+00 : f32
    %93 = vector.broadcast %cst_101 : f32 to vector<26x208xf32>
    %94 = arith.maximumf %92, %93 : vector<26x208xf32>
    %c0_102 = arith.constant 0 : index
    %c0_103 = arith.constant 0 : index
    %c0_104 = arith.constant 0 : index
    %95 = vector.load %arg4[%c0_102, %c0_103, %c0_104] : memref<2x13x26xf32, #tpu.memory_space<vmem>>, vector<1x13x26xf32>
    %96 = vector.shape_cast %95 : vector<1x13x26xf32> to vector<13x26xf32>
    %cst_105 = arith.constant dense<0.000000e+00> : vector<13x208xf32>
    %97 = tpu.matmul %96, %94, %cst_105 {dimension_numbers = #tpu.dot_dimension_numbers<[1], [0], [0], [1], [0, 0, 1, 1], [], []>} : vector<13x26xf32>, vector<26x208xf32>, vector<13x208xf32> -> vector<13x208xf32>
    %c1_106 = arith.constant 1 : index
    %c0_107 = arith.constant 0 : index
    %c0_108 = arith.constant 0 : index
    %98 = vector.load %arg4[%c1_106, %c0_107, %c0_108] : memref<2x13x26xf32, #tpu.memory_space<vmem>>, vector<1x13x26xf32>
    %99 = vector.shape_cast %98 : vector<1x13x26xf32> to vector<13x26xf32>
    %cst_109 = arith.constant dense<0.000000e+00> : vector<13x208xf32>
    %100 = tpu.matmul %99, %94, %cst_109 {dimension_numbers = #tpu.dot_dimension_numbers<[1], [0], [0], [1], [0, 0, 1, 1], [], []>} : vector<13x26xf32>, vector<26x208xf32>, vector<13x208xf32> -> vector<13x208xf32>
    %101 = arith.maximumf %97, %100 : vector<13x208xf32>
    %c0_110 = arith.constant 0 : index
    %c0_111 = arith.constant 0 : index
    %c0_112 = arith.constant 0 : index
    %102 = vector.load %arg5[%c0_110, %c0_111, %c0_112] : memref<2x208x104xf32, #tpu.memory_space<vmem>>, vector<1x208x104xf32>
    %103 = vector.shape_cast %102 : vector<1x208x104xf32> to vector<208x104xf32>
    %cst_113 = arith.constant dense<0.000000e+00> : vector<13x104xf32>
    %104 = tpu.matmul %101, %103, %cst_113 {dimension_numbers = #tpu.dot_dimension_numbers<[1], [0], [0], [1], [0, 0, 1, 1], [], []>} : vector<13x208xf32>, vector<208x104xf32>, vector<13x104xf32> -> vector<13x104xf32>
    %c1_114 = arith.constant 1 : index
    %c0_115 = arith.constant 0 : index
    %c0_116 = arith.constant 0 : index
    %105 = vector.load %arg5[%c1_114, %c0_115, %c0_116] : memref<2x208x104xf32, #tpu.memory_space<vmem>>, vector<1x208x104xf32>
    %106 = vector.shape_cast %105 : vector<1x208x104xf32> to vector<208x104xf32>
    %cst_117 = arith.constant dense<0.000000e+00> : vector<13x104xf32>
    %107 = tpu.matmul %101, %106, %cst_117 {dimension_numbers = #tpu.dot_dimension_numbers<[1], [0], [0], [1], [0, 0, 1, 1], [], []>} : vector<13x208xf32>, vector<208x104xf32>, vector<13x104xf32> -> vector<13x104xf32>
    %108 = arith.maximumf %104, %107 : vector<13x104xf32>
    %c0_118 = arith.constant 0 : index
    %c0_119 = arith.constant 0 : index
    %109 = vector.load %arg15[%c0_118, %c0_119] : memref<13x104xf32, #tpu.memory_space<vmem>>, vector<13x104xf32>
    tpu.vector_store %arg15[%c0_118, %c0_119], %108 {strides = array<i32>} : memref<13x104xf32, #tpu.memory_space<vmem>>, vector<13x104xf32>,
    %c0_120 = arith.constant 0 : index
    %c0_121 = arith.constant 0 : index
    %110 = vector.load %arg15[%c0_120, %c0_121] : memref<13x104xf32, #tpu.memory_space<vmem>>, vector<11x104xf32>
    %c0_122 = arith.constant 0 : index
    %c0_123 = arith.constant 0 : index
    %c0_124 = arith.constant 0 : index
    %111 = vector.load %arg6[%c0_122, %c0_123, %c0_124] : memref<3x104x88xf32, #tpu.memory_space<vmem>>, vector<1x104x88xf32>
    %112 = vector.shape_cast %111 : vector<1x104x88xf32> to vector<104x88xf32>
    %cst_125 = arith.constant dense<0.000000e+00> : vector<11x88xf32>
    %113 = tpu.matmul %110, %112, %cst_125 {dimension_numbers = #tpu.dot_dimension_numbers<[1], [0], [0], [1], [0, 0, 1, 1], [], []>} : vector<11x104xf32>, vector<104x88xf32>, vector<11x88xf32> -> vector<11x88xf32>
    %c1_126 = arith.constant 1 : index
    %c0_127 = arith.constant 0 : index
    %114 = vector.load %arg15[%c1_126, %c0_127] : memref<13x104xf32, #tpu.memory_space<vmem>>, vector<11x104xf32>
    %c1_128 = arith.constant 1 : index
    %c0_129 = arith.constant 0 : index
    %c0_130 = arith.constant 0 : index
    %115 = vector.load %arg6[%c1_128, %c0_129, %c0_130] : memref<3x104x88xf32, #tpu.memory_space<vmem>>, vector<1x104x88xf32>
    %116 = vector.shape_cast %115 : vector<1x104x88xf32> to vector<104x88xf32>
    %cst_131 = arith.constant dense<0.000000e+00> : vector<11x88xf32>
    %117 = tpu.matmul %114, %116, %cst_131 {dimension_numbers = #tpu.dot_dimension_numbers<[1], [0], [0], [1], [0, 0, 1, 1], [], []>} : vector<11x104xf32>, vector<104x88xf32>, vector<11x88xf32> -> vector<11x88xf32>
    %118 = arith.addf %113, %117 : vector<11x88xf32>
    %c2_132 = arith.constant 2 : index
    %c0_133 = arith.constant 0 : index
    %119 = vector.load %arg15[%c2_132, %c0_133] : memref<13x104xf32, #tpu.memory_space<vmem>>, vector<11x104xf32>
    %c2_134 = arith.constant 2 : index
    %c0_135 = arith.constant 0 : index
    %c0_136 = arith.constant 0 : index
    %120 = vector.load %arg6[%c2_134, %c0_135, %c0_136] : memref<3x104x88xf32, #tpu.memory_space<vmem>>, vector<1x104x88xf32>
    %121 = vector.shape_cast %120 : vector<1x104x88xf32> to vector<104x88xf32>
    %cst_137 = arith.constant dense<0.000000e+00> : vector<11x88xf32>
    %122 = tpu.matmul %119, %121, %cst_137 {dimension_numbers = #tpu.dot_dimension_numbers<[1], [0], [0], [1], [0, 0, 1, 1], [], []>} : vector<11x104xf32>, vector<104x88xf32>, vector<11x88xf32> -> vector<11x88xf32>
    %123 = arith.addf %118, %122 : vector<11x88xf32>
    %c0_138 = arith.constant 0 : index
    %c0_139 = arith.constant 0 : index
    %124 = vector.load %arg7[%c0_138, %c0_139] : memref<1x88xf32, #tpu.memory_space<vmem>>, vector<1x88xf32>
    %125 = vector.broadcast %124 : vector<1x88xf32> to vector<11x88xf32>
    %126 = arith.addf %123, %125 : vector<11x88xf32>
    %cst_140 = arith.constant 0.000000e+00 : f32
    %127 = vector.broadcast %cst_140 : f32 to vector<11x88xf32>
    %128 = arith.maximumf %126, %127 : vector<11x88xf32>
    %c0_141 = arith.constant 0 : index
    %c0_142 = arith.constant 0 : index
    %c0_143 = arith.constant 0 : index
    %129 = vector.load %arg8[%c0_141, %c0_142, %c0_143] : memref<2x5x11xf32, #tpu.memory_space<vmem>>, vector<1x5x11xf32>
    %130 = vector.shape_cast %129 : vector<1x5x11xf32> to vector<5x11xf32>
    %cst_144 = arith.constant dense<0.000000e+00> : vector<5x88xf32>
    %131 = tpu.matmul %130, %128, %cst_144 {dimension_numbers = #tpu.dot_dimension_numbers<[1], [0], [0], [1], [0, 0, 1, 1], [], []>} : vector<5x11xf32>, vector<11x88xf32>, vector<5x88xf32> -> vector<5x88xf32>
    %c1_145 = arith.constant 1 : index
    %c0_146 = arith.constant 0 : index
    %c0_147 = arith.constant 0 : index
    %132 = vector.load %arg8[%c1_145, %c0_146, %c0_147] : memref<2x5x11xf32, #tpu.memory_space<vmem>>, vector<1x5x11xf32>
    %133 = vector.shape_cast %132 : vector<1x5x11xf32> to vector<5x11xf32>
    %cst_148 = arith.constant dense<0.000000e+00> : vector<5x88xf32>
    %134 = tpu.matmul %133, %128, %cst_148 {dimension_numbers = #tpu.dot_dimension_numbers<[1], [0], [0], [1], [0, 0, 1, 1], [], []>} : vector<5x11xf32>, vector<11x88xf32>, vector<5x88xf32> -> vector<5x88xf32>
    %135 = arith.maximumf %131, %134 : vector<5x88xf32>
    %c0_149 = arith.constant 0 : index
    %c0_150 = arith.constant 0 : index
    %c0_151 = arith.constant 0 : index
    %136 = vector.load %arg9[%c0_149, %c0_150, %c0_151] : memref<2x88x40xf32, #tpu.memory_space<vmem>>, vector<1x88x40xf32>
    %137 = vector.shape_cast %136 : vector<1x88x40xf32> to vector<88x40xf32>
    %cst_152 = arith.constant dense<0.000000e+00> : vector<5x40xf32>
    %138 = tpu.matmul %135, %137, %cst_152 {dimension_numbers = #tpu.dot_dimension_numbers<[1], [0], [0], [1], [0, 0, 1, 1], [], []>} : vector<5x88xf32>, vector<88x40xf32>, vector<5x40xf32> -> vector<5x40xf32>
    %c1_153 = arith.constant 1 : index
    %c0_154 = arith.constant 0 : index
    %c0_155 = arith.constant 0 : index
    %139 = vector.load %arg9[%c1_153, %c0_154, %c0_155] : memref<2x88x40xf32, #tpu.memory_space<vmem>>, vector<1x88x40xf32>
    %140 = vector.shape_cast %139 : vector<1x88x40xf32> to vector<88x40xf32>
    %cst_156 = arith.constant dense<0.000000e+00> : vector<5x40xf32>
    %141 = tpu.matmul %135, %140, %cst_156 {dimension_numbers = #tpu.dot_dimension_numbers<[1], [0], [0], [1], [0, 0, 1, 1], [], []>} : vector<5x88xf32>, vector<88x40xf32>, vector<5x40xf32> -> vector<5x40xf32>
    %142 = arith.maximumf %138, %141 : vector<5x40xf32>
    %c1_157 = arith.constant 1 : index
    %c0_158 = arith.constant 0 : index
    %c0_159 = arith.constant 0 : index
    %143 = vector.load %arg16[%c1_157, %c0_158, %c0_159] : memref<8x5x40xf32, #tpu.memory_space<vmem>>, vector<1x5x40xf32>
    %144 = vector.shape_cast %143 : vector<1x5x40xf32> to vector<5x40xf32>
    %145 = vector.shape_cast %142 : vector<5x40xf32> to vector<1x5x40xf32>
    tpu.vector_store %arg16[%c1_157, %c0_158, %c0_159], %145 {strides = array<i32>} : memref<8x5x40xf32, #tpu.memory_space<vmem>>, vector<1x5x40xf32>,
    %c2_160 = arith.constant 2 : index
    %c0_161 = arith.constant 0 : index
    %c0_162 = arith.constant 0 : index
    %146 = vector.load %arg1[%c2_160, %c0_161, %c0_162] : memref<8x28x28xf32, #tpu.memory_space<vmem>>, vector<1x26x28xf32>
    %147 = vector.shape_cast %146 : vector<1x26x28xf32> to vector<26x28xf32>
    %c0_163 = arith.constant 0 : index
    %c0_164 = arith.constant 0 : index
    %c0_165 = arith.constant 0 : index
    %148 = vector.load %arg2[%c0_163, %c0_164, %c0_165] : memref<3x28x208xf32, #tpu.memory_space<vmem>>, vector<1x28x208xf32>
    %149 = vector.shape_cast %148 : vector<1x28x208xf32> to vector<28x208xf32>
    %cst_166 = arith.constant dense<0.000000e+00> : vector<26x208xf32>
    %150 = tpu.matmul %147, %149, %cst_166 {dimension_numbers = #tpu.dot_dimension_numbers<[1], [0], [0], [1], [0, 0, 1, 1], [], []>} : vector<26x28xf32>, vector<28x208xf32>, vector<26x208xf32> -> vector<26x208xf32>
    %c2_167 = arith.constant 2 : index
    %c1_168 = arith.constant 1 : index
    %c0_169 = arith.constant 0 : index
    %151 = vector.load %arg1[%c2_167, %c1_168, %c0_169] : memref<8x28x28xf32, #tpu.memory_space<vmem>>, vector<1x26x28xf32>
    %152 = vector.shape_cast %151 : vector<1x26x28xf32> to vector<26x28xf32>
    %c1_170 = arith.constant 1 : index
    %c0_171 = arith.constant 0 : index
    %c0_172 = arith.constant 0 : index
    %153 = vector.load %arg2[%c1_170, %c0_171, %c0_172] : memref<3x28x208xf32, #tpu.memory_space<vmem>>, vector<1x28x208xf32>
    %154 = vector.shape_cast %153 : vector<1x28x208xf32> to vector<28x208xf32>
    %cst_173 = arith.constant dense<0.000000e+00> : vector<26x208xf32>
    %155 = tpu.matmul %152, %154, %cst_173 {dimension_numbers = #tpu.dot_dimension_numbers<[1], [0], [0], [1], [0, 0, 1, 1], [], []>} : vector<26x28xf32>, vector<28x208xf32>, vector<26x208xf32> -> vector<26x208xf32>
    %156 = arith.addf %150, %155 : vector<26x208xf32>
    %c2_174 = arith.constant 2 : index
    %c2_175 = arith.constant 2 : index
    %c0_176 = arith.constant 0 : index
    %157 = vector.load %arg1[%c2_174, %c2_175, %c0_176] : memref<8x28x28xf32, #tpu.memory_space<vmem>>, vector<1x26x28xf32>
    %158 = vector.shape_cast %157 : vector<1x26x28xf32> to vector<26x28xf32>
    %c2_177 = arith.constant 2 : index
    %c0_178 = arith.constant 0 : index
    %c0_179 = arith.constant 0 : index
    %159 = vector.load %arg2[%c2_177, %c0_178, %c0_179] : memref<3x28x208xf32, #tpu.memory_space<vmem>>, vector<1x28x208xf32>
    %160 = vector.shape_cast %159 : vector<1x28x208xf32> to vector<28x208xf32>
    %cst_180 = arith.constant dense<0.000000e+00> : vector<26x208xf32>
    %161 = tpu.matmul %158, %160, %cst_180 {dimension_numbers = #tpu.dot_dimension_numbers<[1], [0], [0], [1], [0, 0, 1, 1], [], []>} : vector<26x28xf32>, vector<28x208xf32>, vector<26x208xf32> -> vector<26x208xf32>
    %162 = arith.addf %156, %161 : vector<26x208xf32>
    %c0_181 = arith.constant 0 : index
    %c0_182 = arith.constant 0 : index
    %163 = vector.load %arg3[%c0_181, %c0_182] : memref<1x208xf32, #tpu.memory_space<vmem>>, vector<1x208xf32>
    %164 = vector.broadcast %163 : vector<1x208xf32> to vector<26x208xf32>
    %165 = arith.addf %162, %164 : vector<26x208xf32>
    %cst_183 = arith.constant 0.000000e+00 : f32
    %166 = vector.broadcast %cst_183 : f32 to vector<26x208xf32>
    %167 = arith.maximumf %165, %166 : vector<26x208xf32>
    %c0_184 = arith.constant 0 : index
    %c0_185 = arith.constant 0 : index
    %c0_186 = arith.constant 0 : index
    %168 = vector.load %arg4[%c0_184, %c0_185, %c0_186] : memref<2x13x26xf32, #tpu.memory_space<vmem>>, vector<1x13x26xf32>
    %169 = vector.shape_cast %168 : vector<1x13x26xf32> to vector<13x26xf32>
    %cst_187 = arith.constant dense<0.000000e+00> : vector<13x208xf32>
    %170 = tpu.matmul %169, %167, %cst_187 {dimension_numbers = #tpu.dot_dimension_numbers<[1], [0], [0], [1], [0, 0, 1, 1], [], []>} : vector<13x26xf32>, vector<26x208xf32>, vector<13x208xf32> -> vector<13x208xf32>
    %c1_188 = arith.constant 1 : index
    %c0_189 = arith.constant 0 : index
    %c0_190 = arith.constant 0 : index
    %171 = vector.load %arg4[%c1_188, %c0_189, %c0_190] : memref<2x13x26xf32, #tpu.memory_space<vmem>>, vector<1x13x26xf32>
    %172 = vector.shape_cast %171 : vector<1x13x26xf32> to vector<13x26xf32>
    %cst_191 = arith.constant dense<0.000000e+00> : vector<13x208xf32>
    %173 = tpu.matmul %172, %167, %cst_191 {dimension_numbers = #tpu.dot_dimension_numbers<[1], [0], [0], [1], [0, 0, 1, 1], [], []>} : vector<13x26xf32>, vector<26x208xf32>, vector<13x208xf32> -> vector<13x208xf32>
    %174 = arith.maximumf %170, %173 : vector<13x208xf32>
    %c0_192 = arith.constant 0 : index
    %c0_193 = arith.constant 0 : index
    %c0_194 = arith.constant 0 : index
    %175 = vector.load %arg5[%c0_192, %c0_193, %c0_194] : memref<2x208x104xf32, #tpu.memory_space<vmem>>, vector<1x208x104xf32>
    %176 = vector.shape_cast %175 : vector<1x208x104xf32> to vector<208x104xf32>
    %cst_195 = arith.constant dense<0.000000e+00> : vector<13x104xf32>
    %177 = tpu.matmul %174, %176, %cst_195 {dimension_numbers = #tpu.dot_dimension_numbers<[1], [0], [0], [1], [0, 0, 1, 1], [], []>} : vector<13x208xf32>, vector<208x104xf32>, vector<13x104xf32> -> vector<13x104xf32>
    %c1_196 = arith.constant 1 : index
    %c0_197 = arith.constant 0 : index
    %c0_198 = arith.constant 0 : index
    %178 = vector.load %arg5[%c1_196, %c0_197, %c0_198] : memref<2x208x104xf32, #tpu.memory_space<vmem>>, vector<1x208x104xf32>
    %179 = vector.shape_cast %178 : vector<1x208x104xf32> to vector<208x104xf32>
    %cst_199 = arith.constant dense<0.000000e+00> : vector<13x104xf32>
    %180 = tpu.matmul %174, %179, %cst_199 {dimension_numbers = #tpu.dot_dimension_numbers<[1], [0], [0], [1], [0, 0, 1, 1], [], []>} : vector<13x208xf32>, vector<208x104xf32>, vector<13x104xf32> -> vector<13x104xf32>
    %181 = arith.maximumf %177, %180 : vector<13x104xf32>
    %c0_200 = arith.constant 0 : index
    %c0_201 = arith.constant 0 : index
    %182 = vector.load %arg15[%c0_200, %c0_201] : memref<13x104xf32, #tpu.memory_space<vmem>>, vector<13x104xf32>
    tpu.vector_store %arg15[%c0_200, %c0_201], %181 {strides = array<i32>} : memref<13x104xf32, #tpu.memory_space<vmem>>, vector<13x104xf32>,
    %c0_202 = arith.constant 0 : index
    %c0_203 = arith.constant 0 : index
    %183 = vector.load %arg15[%c0_202, %c0_203] : memref<13x104xf32, #tpu.memory_space<vmem>>, vector<11x104xf32>
    %c0_204 = arith.constant 0 : index
    %c0_205 = arith.constant 0 : index
    %c0_206 = arith.constant 0 : index
    %184 = vector.load %arg6[%c0_204, %c0_205, %c0_206] : memref<3x104x88xf32, #tpu.memory_space<vmem>>, vector<1x104x88xf32>
    %185 = vector.shape_cast %184 : vector<1x104x88xf32> to vector<104x88xf32>
    %cst_207 = arith.constant dense<0.000000e+00> : vector<11x88xf32>
    %186 = tpu.matmul %183, %185, %cst_207 {dimension_numbers = #tpu.dot_dimension_numbers<[1], [0], [0], [1], [0, 0, 1, 1], [], []>} : vector<11x104xf32>, vector<104x88xf32>, vector<11x88xf32> -> vector<11x88xf32>
    %c1_208 = arith.constant 1 : index
    %c0_209 = arith.constant 0 : index
    %187 = vector.load %arg15[%c1_208, %c0_209] : memref<13x104xf32, #tpu.memory_space<vmem>>, vector<11x104xf32>
    %c1_210 = arith.constant 1 : index
    %c0_211 = arith.constant 0 : index
    %c0_212 = arith.constant 0 : index
    %188 = vector.load %arg6[%c1_210, %c0_211, %c0_212] : memref<3x104x88xf32, #tpu.memory_space<vmem>>, vector<1x104x88xf32>
    %189 = vector.shape_cast %188 : vector<1x104x88xf32> to vector<104x88xf32>
    %cst_213 = arith.constant dense<0.000000e+00> : vector<11x88xf32>
    %190 = tpu.matmul %187, %189, %cst_213 {dimension_numbers = #tpu.dot_dimension_numbers<[1], [0], [0], [1], [0, 0, 1, 1], [], []>} : vector<11x104xf32>, vector<104x88xf32>, vector<11x88xf32> -> vector<11x88xf32>
    %191 = arith.addf %186, %190 : vector<11x88xf32>
    %c2_214 = arith.constant 2 : index
    %c0_215 = arith.constant 0 : index
    %192 = vector.load %arg15[%c2_214, %c0_215] : memref<13x104xf32, #tpu.memory_space<vmem>>, vector<11x104xf32>
    %c2_216 = arith.constant 2 : index
    %c0_217 = arith.constant 0 : index
    %c0_218 = arith.constant 0 : index
    %193 = vector.load %arg6[%c2_216, %c0_217, %c0_218] : memref<3x104x88xf32, #tpu.memory_space<vmem>>, vector<1x104x88xf32>
    %194 = vector.shape_cast %193 : vector<1x104x88xf32> to vector<104x88xf32>
    %cst_219 = arith.constant dense<0.000000e+00> : vector<11x88xf32>
    %195 = tpu.matmul %192, %194, %cst_219 {dimension_numbers = #tpu.dot_dimension_numbers<[1], [0], [0], [1], [0, 0, 1, 1], [], []>} : vector<11x104xf32>, vector<104x88xf32>, vector<11x88xf32> -> vector<11x88xf32>
    %196 = arith.addf %191, %195 : vector<11x88xf32>
    %c0_220 = arith.constant 0 : index
    %c0_221 = arith.constant 0 : index
    %197 = vector.load %arg7[%c0_220, %c0_221] : memref<1x88xf32, #tpu.memory_space<vmem>>, vector<1x88xf32>
    %198 = vector.broadcast %197 : vector<1x88xf32> to vector<11x88xf32>
    %199 = arith.addf %196, %198 : vector<11x88xf32>
    %cst_222 = arith.constant 0.000000e+00 : f32
    %200 = vector.broadcast %cst_222 : f32 to vector<11x88xf32>
    %201 = arith.maximumf %199, %200 : vector<11x88xf32>
    %c0_223 = arith.constant 0 : index
    %c0_224 = arith.constant 0 : index
    %c0_225 = arith.constant 0 : index
    %202 = vector.load %arg8[%c0_223, %c0_224, %c0_225] : memref<2x5x11xf32, #tpu.memory_space<vmem>>, vector<1x5x11xf32>
    %203 = vector.shape_cast %202 : vector<1x5x11xf32> to vector<5x11xf32>
    %cst_226 = arith.constant dense<0.000000e+00> : vector<5x88xf32>
    %204 = tpu.matmul %203, %201, %cst_226 {dimension_numbers = #tpu.dot_dimension_numbers<[1], [0], [0], [1], [0, 0, 1, 1], [], []>} : vector<5x11xf32>, vector<11x88xf32>, vector<5x88xf32> -> vector<5x88xf32>
    %c1_227 = arith.constant 1 : index
    %c0_228 = arith.constant 0 : index
    %c0_229 = arith.constant 0 : index
    %205 = vector.load %arg8[%c1_227, %c0_228, %c0_229] : memref<2x5x11xf32, #tpu.memory_space<vmem>>, vector<1x5x11xf32>
    %206 = vector.shape_cast %205 : vector<1x5x11xf32> to vector<5x11xf32>
    %cst_230 = arith.constant dense<0.000000e+00> : vector<5x88xf32>
    %207 = tpu.matmul %206, %201, %cst_230 {dimension_numbers = #tpu.dot_dimension_numbers<[1], [0], [0], [1], [0, 0, 1, 1], [], []>} : vector<5x11xf32>, vector<11x88xf32>, vector<5x88xf32> -> vector<5x88xf32>
    %208 = arith.maximumf %204, %207 : vector<5x88xf32>
    %c0_231 = arith.constant 0 : index
    %c0_232 = arith.constant 0 : index
    %c0_233 = arith.constant 0 : index
    %209 = vector.load %arg9[%c0_231, %c0_232, %c0_233] : memref<2x88x40xf32, #tpu.memory_space<vmem>>, vector<1x88x40xf32>
    %210 = vector.shape_cast %209 : vector<1x88x40xf32> to vector<88x40xf32>
    %cst_234 = arith.constant dense<0.000000e+00> : vector<5x40xf32>
    %211 = tpu.matmul %208, %210, %cst_234 {dimension_numbers = #tpu.dot_dimension_numbers<[1], [0], [0], [1], [0, 0, 1, 1], [], []>} : vector<5x88xf32>, vector<88x40xf32>, vector<5x40xf32> -> vector<5x40xf32>
    %c1_235 = arith.constant 1 : index
    %c0_236 = arith.constant 0 : index
    %c0_237 = arith.constant 0 : index
    %212 = vector.load %arg9[%c1_235, %c0_236, %c0_237] : memref<2x88x40xf32, #tpu.memory_space<vmem>>, vector<1x88x40xf32>
    %213 = vector.shape_cast %212 : vector<1x88x40xf32> to vector<88x40xf32>
    %cst_238 = arith.constant dense<0.000000e+00> : vector<5x40xf32>
    %214 = tpu.matmul %208, %213, %cst_238 {dimension_numbers = #tpu.dot_dimension_numbers<[1], [0], [0], [1], [0, 0, 1, 1], [], []>} : vector<5x88xf32>, vector<88x40xf32>, vector<5x40xf32> -> vector<5x40xf32>
    %215 = arith.maximumf %211, %214 : vector<5x40xf32>
    %c2_239 = arith.constant 2 : index
    %c0_240 = arith.constant 0 : index
    %c0_241 = arith.constant 0 : index
    %216 = vector.load %arg16[%c2_239, %c0_240, %c0_241] : memref<8x5x40xf32, #tpu.memory_space<vmem>>, vector<1x5x40xf32>
    %217 = vector.shape_cast %216 : vector<1x5x40xf32> to vector<5x40xf32>
    %218 = vector.shape_cast %215 : vector<5x40xf32> to vector<1x5x40xf32>
    tpu.vector_store %arg16[%c2_239, %c0_240, %c0_241], %218 {strides = array<i32>} : memref<8x5x40xf32, #tpu.memory_space<vmem>>, vector<1x5x40xf32>,
    %c3 = arith.constant 3 : index
    %c0_242 = arith.constant 0 : index
    %c0_243 = arith.constant 0 : index
    %219 = vector.load %arg1[%c3, %c0_242, %c0_243] : memref<8x28x28xf32, #tpu.memory_space<vmem>>, vector<1x26x28xf32>
    %220 = vector.shape_cast %219 : vector<1x26x28xf32> to vector<26x28xf32>
    %c0_244 = arith.constant 0 : index
    %c0_245 = arith.constant 0 : index
    %c0_246 = arith.constant 0 : index
    %221 = vector.load %arg2[%c0_244, %c0_245, %c0_246] : memref<3x28x208xf32, #tpu.memory_space<vmem>>, vector<1x28x208xf32>
    %222 = vector.shape_cast %221 : vector<1x28x208xf32> to vector<28x208xf32>
    %cst_247 = arith.constant dense<0.000000e+00> : vector<26x208xf32>
    %223 = tpu.matmul %220, %222, %cst_247 {dimension_numbers = #tpu.dot_dimension_numbers<[1], [0], [0], [1], [0, 0, 1, 1], [], []>} : vector<26x28xf32>, vector<28x208xf32>, vector<26x208xf32> -> vector<26x208xf32>
    %c3_248 = arith.constant 3 : index
    %c1_249 = arith.constant 1 : index
    %c0_250 = arith.constant 0 : index
    %224 = vector.load %arg1[%c3_248, %c1_249, %c0_250] : memref<8x28x28xf32, #tpu.memory_space<vmem>>, vector<1x26x28xf32>
    %225 = vector.shape_cast %224 : vector<1x26x28xf32> to vector<26x28xf32>
    %c1_251 = arith.constant 1 : index
    %c0_252 = arith.constant 0 : index
    %c0_253 = arith.constant 0 : index
    %226 = vector.load %arg2[%c1_251, %c0_252, %c0_253] : memref<3x28x208xf32, #tpu.memory_space<vmem>>, vector<1x28x208xf32>
    %227 = vector.shape_cast %226 : vector<1x28x208xf32> to vector<28x208xf32>
    %cst_254 = arith.constant dense<0.000000e+00> : vector<26x208xf32>
    %228 = tpu.matmul %225, %227, %cst_254 {dimension_numbers = #tpu.dot_dimension_numbers<[1], [0], [0], [1], [0, 0, 1, 1], [], []>} : vector<26x28xf32>, vector<28x208xf32>, vector<26x208xf32> -> vector<26x208xf32>
    %229 = arith.addf %223, %228 : vector<26x208xf32>
    %c3_255 = arith.constant 3 : index
    %c2_256 = arith.constant 2 : index
    %c0_257 = arith.constant 0 : index
    %230 = vector.load %arg1[%c3_255, %c2_256, %c0_257] : memref<8x28x28xf32, #tpu.memory_space<vmem>>, vector<1x26x28xf32>
    %231 = vector.shape_cast %230 : vector<1x26x28xf32> to vector<26x28xf32>
    %c2_258 = arith.constant 2 : index
    %c0_259 = arith.constant 0 : index
    %c0_260 = arith.constant 0 : index
    %232 = vector.load %arg2[%c2_258, %c0_259, %c0_260] : memref<3x28x208xf32, #tpu.memory_space<vmem>>, vector<1x28x208xf32>
    %233 = vector.shape_cast %232 : vector<1x28x208xf32> to vector<28x208xf32>
    %cst_261 = arith.constant dense<0.000000e+00> : vector<26x208xf32>
    %234 = tpu.matmul %231, %233, %cst_261 {dimension_numbers = #tpu.dot_dimension_numbers<[1], [0], [0], [1], [0, 0, 1, 1], [], []>} : vector<26x28xf32>, vector<28x208xf32>, vector<26x208xf32> -> vector<26x208xf32>
    %235 = arith.addf %229, %234 : vector<26x208xf32>
    %c0_262 = arith.constant 0 : index
    %c0_263 = arith.constant 0 : index
    %236 = vector.load %arg3[%c0_262, %c0_263] : memref<1x208xf32, #tpu.memory_space<vmem>>, vector<1x208xf32>
    %237 = vector.broadcast %236 : vector<1x208xf32> to vector<26x208xf32>
    %238 = arith.addf %235, %237 : vector<26x208xf32>
    %cst_264 = arith.constant 0.000000e+00 : f32
    %239 = vector.broadcast %cst_264 : f32 to vector<26x208xf32>
    %240 = arith.maximumf %238, %239 : vector<26x208xf32>
    %c0_265 = arith.constant 0 : index
    %c0_266 = arith.constant 0 : index
    %c0_267 = arith.constant 0 : index
    %241 = vector.load %arg4[%c0_265, %c0_266, %c0_267] : memref<2x13x26xf32, #tpu.memory_space<vmem>>, vector<1x13x26xf32>
    %242 = vector.shape_cast %241 : vector<1x13x26xf32> to vector<13x26xf32>
    %cst_268 = arith.constant dense<0.000000e+00> : vector<13x208xf32>
    %243 = tpu.matmul %242, %240, %cst_268 {dimension_numbers = #tpu.dot_dimension_numbers<[1], [0], [0], [1], [0, 0, 1, 1], [], []>} : vector<13x26xf32>, vector<26x208xf32>, vector<13x208xf32> -> vector<13x208xf32>
    %c1_269 = arith.constant 1 : index
    %c0_270 = arith.constant 0 : index
    %c0_271 = arith.constant 0 : index
    %244 = vector.load %arg4[%c1_269, %c0_270, %c0_271] : memref<2x13x26xf32, #tpu.memory_space<vmem>>, vector<1x13x26xf32>
    %245 = vector.shape_cast %244 : vector<1x13x26xf32> to vector<13x26xf32>
    %cst_272 = arith.constant dense<0.000000e+00> : vector<13x208xf32>
    %246 = tpu.matmul %245, %240, %cst_272 {dimension_numbers = #tpu.dot_dimension_numbers<[1], [0], [0], [1], [0, 0, 1, 1], [], []>} : vector<13x26xf32>, vector<26x208xf32>, vector<13x208xf32> -> vector<13x208xf32>
    %247 = arith.maximumf %243, %246 : vector<13x208xf32>
    %c0_273 = arith.constant 0 : index
    %c0_274 = arith.constant 0 : index
    %c0_275 = arith.constant 0 : index
    %248 = vector.load %arg5[%c0_273, %c0_274, %c0_275] : memref<2x208x104xf32, #tpu.memory_space<vmem>>, vector<1x208x104xf32>
    %249 = vector.shape_cast %248 : vector<1x208x104xf32> to vector<208x104xf32>
    %cst_276 = arith.constant dense<0.000000e+00> : vector<13x104xf32>
    %250 = tpu.matmul %247, %249, %cst_276 {dimension_numbers = #tpu.dot_dimension_numbers<[1], [0], [0], [1], [0, 0, 1, 1], [], []>} : vector<13x208xf32>, vector<208x104xf32>, vector<13x104xf32> -> vector<13x104xf32>
    %c1_277 = arith.constant 1 : index
    %c0_278 = arith.constant 0 : index
    %c0_279 = arith.constant 0 : index
    %251 = vector.load %arg5[%c1_277, %c0_278, %c0_279] : memref<2x208x104xf32, #tpu.memory_space<vmem>>, vector<1x208x104xf32>
    %252 = vector.shape_cast %251 : vector<1x208x104xf32> to vector<208x104xf32>
    %cst_280 = arith.constant dense<0.000000e+00> : vector<13x104xf32>
    %253 = tpu.matmul %247, %252, %cst_280 {dimension_numbers = #tpu.dot_dimension_numbers<[1], [0], [0], [1], [0, 0, 1, 1], [], []>} : vector<13x208xf32>, vector<208x104xf32>, vector<13x104xf32> -> vector<13x104xf32>
    %254 = arith.maximumf %250, %253 : vector<13x104xf32>
    %c0_281 = arith.constant 0 : index
    %c0_282 = arith.constant 0 : index
    %255 = vector.load %arg15[%c0_281, %c0_282] : memref<13x104xf32, #tpu.memory_space<vmem>>, vector<13x104xf32>
    tpu.vector_store %arg15[%c0_281, %c0_282], %254 {strides = array<i32>} : memref<13x104xf32, #tpu.memory_space<vmem>>, vector<13x104xf32>,
    %c0_283 = arith.constant 0 : index
    %c0_284 = arith.constant 0 : index
    %256 = vector.load %arg15[%c0_283, %c0_284] : memref<13x104xf32, #tpu.memory_space<vmem>>, vector<11x104xf32>
    %c0_285 = arith.constant 0 : index
    %c0_286 = arith.constant 0 : index
    %c0_287 = arith.constant 0 : index
    %257 = vector.load %arg6[%c0_285, %c0_286, %c0_287] : memref<3x104x88xf32, #tpu.memory_space<vmem>>, vector<1x104x88xf32>
    %258 = vector.shape_cast %257 : vector<1x104x88xf32> to vector<104x88xf32>
    %cst_288 = arith.constant dense<0.000000e+00> : vector<11x88xf32>
    %259 = tpu.matmul %256, %258, %cst_288 {dimension_numbers = #tpu.dot_dimension_numbers<[1], [0], [0], [1], [0, 0, 1, 1], [], []>} : vector<11x104xf32>, vector<104x88xf32>, vector<11x88xf32> -> vector<11x88xf32>
    %c1_289 = arith.constant 1 : index
    %c0_290 = arith.constant 0 : index
    %260 = vector.load %arg15[%c1_289, %c0_290] : memref<13x104xf32, #tpu.memory_space<vmem>>, vector<11x104xf32>
    %c1_291 = arith.constant 1 : index
    %c0_292 = arith.constant 0 : index
    %c0_293 = arith.constant 0 : index
    %261 = vector.load %arg6[%c1_291, %c0_292, %c0_293] : memref<3x104x88xf32, #tpu.memory_space<vmem>>, vector<1x104x88xf32>
    %262 = vector.shape_cast %261 : vector<1x104x88xf32> to vector<104x88xf32>
    %cst_294 = arith.constant dense<0.000000e+00> : vector<11x88xf32>
    %263 = tpu.matmul %260, %262, %cst_294 {dimension_numbers = #tpu.dot_dimension_numbers<[1], [0], [0], [1], [0, 0, 1, 1], [], []>} : vector<11x104xf32>, vector<104x88xf32>, vector<11x88xf32> -> vector<11x88xf32>
    %264 = arith.addf %259, %263 : vector<11x88xf32>
    %c2_295 = arith.constant 2 : index
    %c0_296 = arith.constant 0 : index
    %265 = vector.load %arg15[%c2_295, %c0_296] : memref<13x104xf32, #tpu.memory_space<vmem>>, vector<11x104xf32>
    %c2_297 = arith.constant 2 : index
    %c0_298 = arith.constant 0 : index
    %c0_299 = arith.constant 0 : index
    %266 = vector.load %arg6[%c2_297, %c0_298, %c0_299] : memref<3x104x88xf32, #tpu.memory_space<vmem>>, vector<1x104x88xf32>
    %267 = vector.shape_cast %266 : vector<1x104x88xf32> to vector<104x88xf32>
    %cst_300 = arith.constant dense<0.000000e+00> : vector<11x88xf32>
    %268 = tpu.matmul %265, %267, %cst_300 {dimension_numbers = #tpu.dot_dimension_numbers<[1], [0], [0], [1], [0, 0, 1, 1], [], []>} : vector<11x104xf32>, vector<104x88xf32>, vector<11x88xf32> -> vector<11x88xf32>
    %269 = arith.addf %264, %268 : vector<11x88xf32>
    %c0_301 = arith.constant 0 : index
    %c0_302 = arith.constant 0 : index
    %270 = vector.load %arg7[%c0_301, %c0_302] : memref<1x88xf32, #tpu.memory_space<vmem>>, vector<1x88xf32>
    %271 = vector.broadcast %270 : vector<1x88xf32> to vector<11x88xf32>
    %272 = arith.addf %269, %271 : vector<11x88xf32>
    %cst_303 = arith.constant 0.000000e+00 : f32
    %273 = vector.broadcast %cst_303 : f32 to vector<11x88xf32>
    %274 = arith.maximumf %272, %273 : vector<11x88xf32>
    %c0_304 = arith.constant 0 : index
    %c0_305 = arith.constant 0 : index
    %c0_306 = arith.constant 0 : index
    %275 = vector.load %arg8[%c0_304, %c0_305, %c0_306] : memref<2x5x11xf32, #tpu.memory_space<vmem>>, vector<1x5x11xf32>
    %276 = vector.shape_cast %275 : vector<1x5x11xf32> to vector<5x11xf32>
    %cst_307 = arith.constant dense<0.000000e+00> : vector<5x88xf32>
    %277 = tpu.matmul %276, %274, %cst_307 {dimension_numbers = #tpu.dot_dimension_numbers<[1], [0], [0], [1], [0, 0, 1, 1], [], []>} : vector<5x11xf32>, vector<11x88xf32>, vector<5x88xf32> -> vector<5x88xf32>
    %c1_308 = arith.constant 1 : index
    %c0_309 = arith.constant 0 : index
    %c0_310 = arith.constant 0 : index
    %278 = vector.load %arg8[%c1_308, %c0_309, %c0_310] : memref<2x5x11xf32, #tpu.memory_space<vmem>>, vector<1x5x11xf32>
    %279 = vector.shape_cast %278 : vector<1x5x11xf32> to vector<5x11xf32>
    %cst_311 = arith.constant dense<0.000000e+00> : vector<5x88xf32>
    %280 = tpu.matmul %279, %274, %cst_311 {dimension_numbers = #tpu.dot_dimension_numbers<[1], [0], [0], [1], [0, 0, 1, 1], [], []>} : vector<5x11xf32>, vector<11x88xf32>, vector<5x88xf32> -> vector<5x88xf32>
    %281 = arith.maximumf %277, %280 : vector<5x88xf32>
    %c0_312 = arith.constant 0 : index
    %c0_313 = arith.constant 0 : index
    %c0_314 = arith.constant 0 : index
    %282 = vector.load %arg9[%c0_312, %c0_313, %c0_314] : memref<2x88x40xf32, #tpu.memory_space<vmem>>, vector<1x88x40xf32>
    %283 = vector.shape_cast %282 : vector<1x88x40xf32> to vector<88x40xf32>
    %cst_315 = arith.constant dense<0.000000e+00> : vector<5x40xf32>
    %284 = tpu.matmul %281, %283, %cst_315 {dimension_numbers = #tpu.dot_dimension_numbers<[1], [0], [0], [1], [0, 0, 1, 1], [], []>} : vector<5x88xf32>, vector<88x40xf32>, vector<5x40xf32> -> vector<5x40xf32>
    %c1_316 = arith.constant 1 : index
    %c0_317 = arith.constant 0 : index
    %c0_318 = arith.constant 0 : index
    %285 = vector.load %arg9[%c1_316, %c0_317, %c0_318] : memref<2x88x40xf32, #tpu.memory_space<vmem>>, vector<1x88x40xf32>
    %286 = vector.shape_cast %285 : vector<1x88x40xf32> to vector<88x40xf32>
    %cst_319 = arith.constant dense<0.000000e+00> : vector<5x40xf32>
    %287 = tpu.matmul %281, %286, %cst_319 {dimension_numbers = #tpu.dot_dimension_numbers<[1], [0], [0], [1], [0, 0, 1, 1], [], []>} : vector<5x88xf32>, vector<88x40xf32>, vector<5x40xf32> -> vector<5x40xf32>
    %288 = arith.maximumf %284, %287 : vector<5x40xf32>
    %c3_320 = arith.constant 3 : index
    %c0_321 = arith.constant 0 : index
    %c0_322 = arith.constant 0 : index
    %289 = vector.load %arg16[%c3_320, %c0_321, %c0_322] : memref<8x5x40xf32, #tpu.memory_space<vmem>>, vector<1x5x40xf32>
    %290 = vector.shape_cast %289 : vector<1x5x40xf32> to vector<5x40xf32>
    %291 = vector.shape_cast %288 : vector<5x40xf32> to vector<1x5x40xf32>
    tpu.vector_store %arg16[%c3_320, %c0_321, %c0_322], %291 {strides = array<i32>} : memref<8x5x40xf32, #tpu.memory_space<vmem>>, vector<1x5x40xf32>,
    %c4 = arith.constant 4 : index
    %c0_323 = arith.constant 0 : index
    %c0_324 = arith.constant 0 : index
    %292 = vector.load %arg1[%c4, %c0_323, %c0_324] : memref<8x28x28xf32, #tpu.memory_space<vmem>>, vector<1x26x28xf32>
    %293 = vector.shape_cast %292 : vector<1x26x28xf32> to vector<26x28xf32>
    %c0_325 = arith.constant 0 : index
    %c0_326 = arith.constant 0 : index
    %c0_327 = arith.constant 0 : index
    %294 = vector.load %arg2[%c0_325, %c0_326, %c0_327] : memref<3x28x208xf32, #tpu.memory_space<vmem>>, vector<1x28x208xf32>
    %295 = vector.shape_cast %294 : vector<1x28x208xf32> to vector<28x208xf32>
    %cst_328 = arith.constant dense<0.000000e+00> : vector<26x208xf32>
    %296 = tpu.matmul %293, %295, %cst_328 {dimension_numbers = #tpu.dot_dimension_numbers<[1], [0], [0], [1], [0, 0, 1, 1], [], []>} : vector<26x28xf32>, vector<28x208xf32>, vector<26x208xf32> -> vector<26x208xf32>
    %c4_329 = arith.constant 4 : index
    %c1_330 = arith.constant 1 : index
    %c0_331 = arith.constant 0 : index
    %297 = vector.load %arg1[%c4_329, %c1_330, %c0_331] : memref<8x28x28xf32, #tpu.memory_space<vmem>>, vector<1x26x28xf32>
    %298 = vector.shape_cast %297 : vector<1x26x28xf32> to vector<26x28xf32>
    %c1_332 = arith.constant 1 : index
    %c0_333 = arith.constant 0 : index
    %c0_334 = arith.constant 0 : index
    %299 = vector.load %arg2[%c1_332, %c0_333, %c0_334] : memref<3x28x208xf32, #tpu.memory_space<vmem>>, vector<1x28x208xf32>
    %300 = vector.shape_cast %299 : vector<1x28x208xf32> to vector<28x208xf32>
    %cst_335 = arith.constant dense<0.000000e+00> : vector<26x208xf32>
    %301 = tpu.matmul %298, %300, %cst_335 {dimension_numbers = #tpu.dot_dimension_numbers<[1], [0], [0], [1], [0, 0, 1, 1], [], []>} : vector<26x28xf32>, vector<28x208xf32>, vector<26x208xf32> -> vector<26x208xf32>
    %302 = arith.addf %296, %301 : vector<26x208xf32>
    %c4_336 = arith.constant 4 : index
    %c2_337 = arith.constant 2 : index
    %c0_338 = arith.constant 0 : index
    %303 = vector.load %arg1[%c4_336, %c2_337, %c0_338] : memref<8x28x28xf32, #tpu.memory_space<vmem>>, vector<1x26x28xf32>
    %304 = vector.shape_cast %303 : vector<1x26x28xf32> to vector<26x28xf32>
    %c2_339 = arith.constant 2 : index
    %c0_340 = arith.constant 0 : index
    %c0_341 = arith.constant 0 : index
    %305 = vector.load %arg2[%c2_339, %c0_340, %c0_341] : memref<3x28x208xf32, #tpu.memory_space<vmem>>, vector<1x28x208xf32>
    %306 = vector.shape_cast %305 : vector<1x28x208xf32> to vector<28x208xf32>
    %cst_342 = arith.constant dense<0.000000e+00> : vector<26x208xf32>
    %307 = tpu.matmul %304, %306, %cst_342 {dimension_numbers = #tpu.dot_dimension_numbers<[1], [0], [0], [1], [0, 0, 1, 1], [], []>} : vector<26x28xf32>, vector<28x208xf32>, vector<26x208xf32> -> vector<26x208xf32>
    %308 = arith.addf %302, %307 : vector<26x208xf32>
    %c0_343 = arith.constant 0 : index
    %c0_344 = arith.constant 0 : index
    %309 = vector.load %arg3[%c0_343, %c0_344] : memref<1x208xf32, #tpu.memory_space<vmem>>, vector<1x208xf32>
    %310 = vector.broadcast %309 : vector<1x208xf32> to vector<26x208xf32>
    %311 = arith.addf %308, %310 : vector<26x208xf32>
    %cst_345 = arith.constant 0.000000e+00 : f32
    %312 = vector.broadcast %cst_345 : f32 to vector<26x208xf32>
    %313 = arith.maximumf %311, %312 : vector<26x208xf32>
    %c0_346 = arith.constant 0 : index
    %c0_347 = arith.constant 0 : index
    %c0_348 = arith.constant 0 : index
    %314 = vector.load %arg4[%c0_346, %c0_347, %c0_348] : memref<2x13x26xf32, #tpu.memory_space<vmem>>, vector<1x13x26xf32>
    %315 = vector.shape_cast %314 : vector<1x13x26xf32> to vector<13x26xf32>
    %cst_349 = arith.constant dense<0.000000e+00> : vector<13x208xf32>
    %316 = tpu.matmul %315, %313, %cst_349 {dimension_numbers = #tpu.dot_dimension_numbers<[1], [0], [0], [1], [0, 0, 1, 1], [], []>} : vector<13x26xf32>, vector<26x208xf32>, vector<13x208xf32> -> vector<13x208xf32>
    %c1_350 = arith.constant 1 : index
    %c0_351 = arith.constant 0 : index
    %c0_352 = arith.constant 0 : index
    %317 = vector.load %arg4[%c1_350, %c0_351, %c0_352] : memref<2x13x26xf32, #tpu.memory_space<vmem>>, vector<1x13x26xf32>
    %318 = vector.shape_cast %317 : vector<1x13x26xf32> to vector<13x26xf32>
    %cst_353 = arith.constant dense<0.000000e+00> : vector<13x208xf32>
    %319 = tpu.matmul %318, %313, %cst_353 {dimension_numbers = #tpu.dot_dimension_numbers<[1], [0], [0], [1], [0, 0, 1, 1], [], []>} : vector<13x26xf32>, vector<26x208xf32>, vector<13x208xf32> -> vector<13x208xf32>
    %320 = arith.maximumf %316, %319 : vector<13x208xf32>
    %c0_354 = arith.constant 0 : index
    %c0_355 = arith.constant 0 : index
    %c0_356 = arith.constant 0 : index
    %321 = vector.load %arg5[%c0_354, %c0_355, %c0_356] : memref<2x208x104xf32, #tpu.memory_space<vmem>>, vector<1x208x104xf32>
    %322 = vector.shape_cast %321 : vector<1x208x104xf32> to vector<208x104xf32>
    %cst_357 = arith.constant dense<0.000000e+00> : vector<13x104xf32>
    %323 = tpu.matmul %320, %322, %cst_357 {dimension_numbers = #tpu.dot_dimension_numbers<[1], [0], [0], [1], [0, 0, 1, 1], [], []>} : vector<13x208xf32>, vector<208x104xf32>, vector<13x104xf32> -> vector<13x104xf32>
    %c1_358 = arith.constant 1 : index
    %c0_359 = arith.constant 0 : index
    %c0_360 = arith.constant 0 : index
    %324 = vector.load %arg5[%c1_358, %c0_359, %c0_360] : memref<2x208x104xf32, #tpu.memory_space<vmem>>, vector<1x208x104xf32>
    %325 = vector.shape_cast %324 : vector<1x208x104xf32> to vector<208x104xf32>
    %cst_361 = arith.constant dense<0.000000e+00> : vector<13x104xf32>
    %326 = tpu.matmul %320, %325, %cst_361 {dimension_numbers = #tpu.dot_dimension_numbers<[1], [0], [0], [1], [0, 0, 1, 1], [], []>} : vector<13x208xf32>, vector<208x104xf32>, vector<13x104xf32> -> vector<13x104xf32>
    %327 = arith.maximumf %323, %326 : vector<13x104xf32>
    %c0_362 = arith.constant 0 : index
    %c0_363 = arith.constant 0 : index
    %328 = vector.load %arg15[%c0_362, %c0_363] : memref<13x104xf32, #tpu.memory_space<vmem>>, vector<13x104xf32>
    tpu.vector_store %arg15[%c0_362, %c0_363], %327 {strides = array<i32>} : memref<13x104xf32, #tpu.memory_space<vmem>>, vector<13x104xf32>,
    %c0_364 = arith.constant 0 : index
    %c0_365 = arith.constant 0 : index
    %329 = vector.load %arg15[%c0_364, %c0_365] : memref<13x104xf32, #tpu.memory_space<vmem>>, vector<11x104xf32>
    %c0_366 = arith.constant 0 : index
    %c0_367 = arith.constant 0 : index
    %c0_368 = arith.constant 0 : index
    %330 = vector.load %arg6[%c0_366, %c0_367, %c0_368] : memref<3x104x88xf32, #tpu.memory_space<vmem>>, vector<1x104x88xf32>
    %331 = vector.shape_cast %330 : vector<1x104x88xf32> to vector<104x88xf32>
    %cst_369 = arith.constant dense<0.000000e+00> : vector<11x88xf32>
    %332 = tpu.matmul %329, %331, %cst_369 {dimension_numbers = #tpu.dot_dimension_numbers<[1], [0], [0], [1], [0, 0, 1, 1], [], []>} : vector<11x104xf32>, vector<104x88xf32>, vector<11x88xf32> -> vector<11x88xf32>
    %c1_370 = arith.constant 1 : index
    %c0_371 = arith.constant 0 : index
    %333 = vector.load %arg15[%c1_370, %c0_371] : memref<13x104xf32, #tpu.memory_space<vmem>>, vector<11x104xf32>
    %c1_372 = arith.constant 1 : index
    %c0_373 = arith.constant 0 : index
    %c0_374 = arith.constant 0 : index
    %334 = vector.load %arg6[%c1_372, %c0_373, %c0_374] : memref<3x104x88xf32, #tpu.memory_space<vmem>>, vector<1x104x88xf32>
    %335 = vector.shape_cast %334 : vector<1x104x88xf32> to vector<104x88xf32>
    %cst_375 = arith.constant dense<0.000000e+00> : vector<11x88xf32>
    %336 = tpu.matmul %333, %335, %cst_375 {dimension_numbers = #tpu.dot_dimension_numbers<[1], [0], [0], [1], [0, 0, 1, 1], [], []>} : vector<11x104xf32>, vector<104x88xf32>, vector<11x88xf32> -> vector<11x88xf32>
    %337 = arith.addf %332, %336 : vector<11x88xf32>
    %c2_376 = arith.constant 2 : index
    %c0_377 = arith.constant 0 : index
    %338 = vector.load %arg15[%c2_376, %c0_377] : memref<13x104xf32, #tpu.memory_space<vmem>>, vector<11x104xf32>
    %c2_378 = arith.constant 2 : index
    %c0_379 = arith.constant 0 : index
    %c0_380 = arith.constant 0 : index
    %339 = vector.load %arg6[%c2_378, %c0_379, %c0_380] : memref<3x104x88xf32, #tpu.memory_space<vmem>>, vector<1x104x88xf32>
    %340 = vector.shape_cast %339 : vector<1x104x88xf32> to vector<104x88xf32>
    %cst_381 = arith.constant dense<0.000000e+00> : vector<11x88xf32>
    %341 = tpu.matmul %338, %340, %cst_381 {dimension_numbers = #tpu.dot_dimension_numbers<[1], [0], [0], [1], [0, 0, 1, 1], [], []>} : vector<11x104xf32>, vector<104x88xf32>, vector<11x88xf32> -> vector<11x88xf32>
    %342 = arith.addf %337, %341 : vector<11x88xf32>
    %c0_382 = arith.constant 0 : index
    %c0_383 = arith.constant 0 : index
    %343 = vector.load %arg7[%c0_382, %c0_383] : memref<1x88xf32, #tpu.memory_space<vmem>>, vector<1x88xf32>
    %344 = vector.broadcast %343 : vector<1x88xf32> to vector<11x88xf32>
    %345 = arith.addf %342, %344 : vector<11x88xf32>
    %cst_384 = arith.constant 0.000000e+00 : f32
    %346 = vector.broadcast %cst_384 : f32 to vector<11x88xf32>
    %347 = arith.maximumf %345, %346 : vector<11x88xf32>
    %c0_385 = arith.constant 0 : index
    %c0_386 = arith.constant 0 : index
    %c0_387 = arith.constant 0 : index
    %348 = vector.load %arg8[%c0_385, %c0_386, %c0_387] : memref<2x5x11xf32, #tpu.memory_space<vmem>>, vector<1x5x11xf32>
    %349 = vector.shape_cast %348 : vector<1x5x11xf32> to vector<5x11xf32>
    %cst_388 = arith.constant dense<0.000000e+00> : vector<5x88xf32>
    %350 = tpu.matmul %349, %347, %cst_388 {dimension_numbers = #tpu.dot_dimension_numbers<[1], [0], [0], [1], [0, 0, 1, 1], [], []>} : vector<5x11xf32>, vector<11x88xf32>, vector<5x88xf32> -> vector<5x88xf32>
    %c1_389 = arith.constant 1 : index
    %c0_390 = arith.constant 0 : index
    %c0_391 = arith.constant 0 : index
    %351 = vector.load %arg8[%c1_389, %c0_390, %c0_391] : memref<2x5x11xf32, #tpu.memory_space<vmem>>, vector<1x5x11xf32>
    %352 = vector.shape_cast %351 : vector<1x5x11xf32> to vector<5x11xf32>
    %cst_392 = arith.constant dense<0.000000e+00> : vector<5x88xf32>
    %353 = tpu.matmul %352, %347, %cst_392 {dimension_numbers = #tpu.dot_dimension_numbers<[1], [0], [0], [1], [0, 0, 1, 1], [], []>} : vector<5x11xf32>, vector<11x88xf32>, vector<5x88xf32> -> vector<5x88xf32>
    %354 = arith.maximumf %350, %353 : vector<5x88xf32>
    %c0_393 = arith.constant 0 : index
    %c0_394 = arith.constant 0 : index
    %c0_395 = arith.constant 0 : index
    %355 = vector.load %arg9[%c0_393, %c0_394, %c0_395] : memref<2x88x40xf32, #tpu.memory_space<vmem>>, vector<1x88x40xf32>
    %356 = vector.shape_cast %355 : vector<1x88x40xf32> to vector<88x40xf32>
    %cst_396 = arith.constant dense<0.000000e+00> : vector<5x40xf32>
    %357 = tpu.matmul %354, %356, %cst_396 {dimension_numbers = #tpu.dot_dimension_numbers<[1], [0], [0], [1], [0, 0, 1, 1], [], []>} : vector<5x88xf32>, vector<88x40xf32>, vector<5x40xf32> -> vector<5x40xf32>
    %c1_397 = arith.constant 1 : index
    %c0_398 = arith.constant 0 : index
    %c0_399 = arith.constant 0 : index
    %358 = vector.load %arg9[%c1_397, %c0_398, %c0_399] : memref<2x88x40xf32, #tpu.memory_space<vmem>>, vector<1x88x40xf32>
    %359 = vector.shape_cast %358 : vector<1x88x40xf32> to vector<88x40xf32>
    %cst_400 = arith.constant dense<0.000000e+00> : vector<5x40xf32>
    %360 = tpu.matmul %354, %359, %cst_400 {dimension_numbers = #tpu.dot_dimension_numbers<[1], [0], [0], [1], [0, 0, 1, 1], [], []>} : vector<5x88xf32>, vector<88x40xf32>, vector<5x40xf32> -> vector<5x40xf32>
    %361 = arith.maximumf %357, %360 : vector<5x40xf32>
    %c4_401 = arith.constant 4 : index
    %c0_402 = arith.constant 0 : index
    %c0_403 = arith.constant 0 : index
    %362 = vector.load %arg16[%c4_401, %c0_402, %c0_403] : memref<8x5x40xf32, #tpu.memory_space<vmem>>, vector<1x5x40xf32>
    %363 = vector.shape_cast %362 : vector<1x5x40xf32> to vector<5x40xf32>
    %364 = vector.shape_cast %361 : vector<5x40xf32> to vector<1x5x40xf32>
    tpu.vector_store %arg16[%c4_401, %c0_402, %c0_403], %364 {strides = array<i32>} : memref<8x5x40xf32, #tpu.memory_space<vmem>>, vector<1x5x40xf32>,
    %c5 = arith.constant 5 : index
    %c0_404 = arith.constant 0 : index
    %c0_405 = arith.constant 0 : index
    %365 = vector.load %arg1[%c5, %c0_404, %c0_405] : memref<8x28x28xf32, #tpu.memory_space<vmem>>, vector<1x26x28xf32>
    %366 = vector.shape_cast %365 : vector<1x26x28xf32> to vector<26x28xf32>
    %c0_406 = arith.constant 0 : index
    %c0_407 = arith.constant 0 : index
    %c0_408 = arith.constant 0 : index
    %367 = vector.load %arg2[%c0_406, %c0_407, %c0_408] : memref<3x28x208xf32, #tpu.memory_space<vmem>>, vector<1x28x208xf32>
    %368 = vector.shape_cast %367 : vector<1x28x208xf32> to vector<28x208xf32>
    %cst_409 = arith.constant dense<0.000000e+00> : vector<26x208xf32>
    %369 = tpu.matmul %366, %368, %cst_409 {dimension_numbers = #tpu.dot_dimension_numbers<[1], [0], [0], [1], [0, 0, 1, 1], [], []>} : vector<26x28xf32>, vector<28x208xf32>, vector<26x208xf32> -> vector<26x208xf32>
    %c5_410 = arith.constant 5 : index
    %c1_411 = arith.constant 1 : index
    %c0_412 = arith.constant 0 : index
    %370 = vector.load %arg1[%c5_410, %c1_411, %c0_412] : memref<8x28x28xf32, #tpu.memory_space<vmem>>, vector<1x26x28xf32>
    %371 = vector.shape_cast %370 : vector<1x26x28xf32> to vector<26x28xf32>
    %c1_413 = arith.constant 1 : index
    %c0_414 = arith.constant 0 : index
    %c0_415 = arith.constant 0 : index
    %372 = vector.load %arg2[%c1_413, %c0_414, %c0_415] : memref<3x28x208xf32, #tpu.memory_space<vmem>>, vector<1x28x208xf32>
    %373 = vector.shape_cast %372 : vector<1x28x208xf32> to vector<28x208xf32>
    %cst_416 = arith.constant dense<0.000000e+00> : vector<26x208xf32>
    %374 = tpu.matmul %371, %373, %cst_416 {dimension_numbers = #tpu.dot_dimension_numbers<[1], [0], [0], [1], [0, 0, 1, 1], [], []>} : vector<26x28xf32>, vector<28x208xf32>, vector<26x208xf32> -> vector<26x208xf32>
    %375 = arith.addf %369, %374 : vector<26x208xf32>
    %c5_417 = arith.constant 5 : index
    %c2_418 = arith.constant 2 : index
    %c0_419 = arith.constant 0 : index
    %376 = vector.load %arg1[%c5_417, %c2_418, %c0_419] : memref<8x28x28xf32, #tpu.memory_space<vmem>>, vector<1x26x28xf32>
    %377 = vector.shape_cast %376 : vector<1x26x28xf32> to vector<26x28xf32>
    %c2_420 = arith.constant 2 : index
    %c0_421 = arith.constant 0 : index
    %c0_422 = arith.constant 0 : index
    %378 = vector.load %arg2[%c2_420, %c0_421, %c0_422] : memref<3x28x208xf32, #tpu.memory_space<vmem>>, vector<1x28x208xf32>
    %379 = vector.shape_cast %378 : vector<1x28x208xf32> to vector<28x208xf32>
    %cst_423 = arith.constant dense<0.000000e+00> : vector<26x208xf32>
    %380 = tpu.matmul %377, %379, %cst_423 {dimension_numbers = #tpu.dot_dimension_numbers<[1], [0], [0], [1], [0, 0, 1, 1], [], []>} : vector<26x28xf32>, vector<28x208xf32>, vector<26x208xf32> -> vector<26x208xf32>
    %381 = arith.addf %375, %380 : vector<26x208xf32>
    %c0_424 = arith.constant 0 : index
    %c0_425 = arith.constant 0 : index
    %382 = vector.load %arg3[%c0_424, %c0_425] : memref<1x208xf32, #tpu.memory_space<vmem>>, vector<1x208xf32>
    %383 = vector.broadcast %382 : vector<1x208xf32> to vector<26x208xf32>
    %384 = arith.addf %381, %383 : vector<26x208xf32>
    %cst_426 = arith.constant 0.000000e+00 : f32
    %385 = vector.broadcast %cst_426 : f32 to vector<26x208xf32>
    %386 = arith.maximumf %384, %385 : vector<26x208xf32>
    %c0_427 = arith.constant 0 : index
    %c0_428 = arith.constant 0 : index
    %c0_429 = arith.constant 0 : index
    %387 = vector.load %arg4[%c0_427, %c0_428, %c0_429] : memref<2x13x26xf32, #tpu.memory_space<vmem>>, vector<1x13x26xf32>
    %388 = vector.shape_cast %387 : vector<1x13x26xf32> to vector<13x26xf32>
    %cst_430 = arith.constant dense<0.000000e+00> : vector<13x208xf32>
    %389 = tpu.matmul %388, %386, %cst_430 {dimension_numbers = #tpu.dot_dimension_numbers<[1], [0], [0], [1], [0, 0, 1, 1], [], []>} : vector<13x26xf32>, vector<26x208xf32>, vector<13x208xf32> -> vector<13x208xf32>
    %c1_431 = arith.constant 1 : index
    %c0_432 = arith.constant 0 : index
    %c0_433 = arith.constant 0 : index
    %390 = vector.load %arg4[%c1_431, %c0_432, %c0_433] : memref<2x13x26xf32, #tpu.memory_space<vmem>>, vector<1x13x26xf32>
    %391 = vector.shape_cast %390 : vector<1x13x26xf32> to vector<13x26xf32>
    %cst_434 = arith.constant dense<0.000000e+00> : vector<13x208xf32>
    %392 = tpu.matmul %391, %386, %cst_434 {dimension_numbers = #tpu.dot_dimension_numbers<[1], [0], [0], [1], [0, 0, 1, 1], [], []>} : vector<13x26xf32>, vector<26x208xf32>, vector<13x208xf32> -> vector<13x208xf32>
    %393 = arith.maximumf %389, %392 : vector<13x208xf32>
    %c0_435 = arith.constant 0 : index
    %c0_436 = arith.constant 0 : index
    %c0_437 = arith.constant 0 : index
    %394 = vector.load %arg5[%c0_435, %c0_436, %c0_437] : memref<2x208x104xf32, #tpu.memory_space<vmem>>, vector<1x208x104xf32>
    %395 = vector.shape_cast %394 : vector<1x208x104xf32> to vector<208x104xf32>
    %cst_438 = arith.constant dense<0.000000e+00> : vector<13x104xf32>
    %396 = tpu.matmul %393, %395, %cst_438 {dimension_numbers = #tpu.dot_dimension_numbers<[1], [0], [0], [1], [0, 0, 1, 1], [], []>} : vector<13x208xf32>, vector<208x104xf32>, vector<13x104xf32> -> vector<13x104xf32>
    %c1_439 = arith.constant 1 : index
    %c0_440 = arith.constant 0 : index
    %c0_441 = arith.constant 0 : index
    %397 = vector.load %arg5[%c1_439, %c0_440, %c0_441] : memref<2x208x104xf32, #tpu.memory_space<vmem>>, vector<1x208x104xf32>
    %398 = vector.shape_cast %397 : vector<1x208x104xf32> to vector<208x104xf32>
    %cst_442 = arith.constant dense<0.000000e+00> : vector<13x104xf32>
    %399 = tpu.matmul %393, %398, %cst_442 {dimension_numbers = #tpu.dot_dimension_numbers<[1], [0], [0], [1], [0, 0, 1, 1], [], []>} : vector<13x208xf32>, vector<208x104xf32>, vector<13x104xf32> -> vector<13x104xf32>
    %400 = arith.maximumf %396, %399 : vector<13x104xf32>
    %c0_443 = arith.constant 0 : index
    %c0_444 = arith.constant 0 : index
    %401 = vector.load %arg15[%c0_443, %c0_444] : memref<13x104xf32, #tpu.memory_space<vmem>>, vector<13x104xf32>
    tpu.vector_store %arg15[%c0_443, %c0_444], %400 {strides = array<i32>} : memref<13x104xf32, #tpu.memory_space<vmem>>, vector<13x104xf32>,
    %c0_445 = arith.constant 0 : index
    %c0_446 = arith.constant 0 : index
    %402 = vector.load %arg15[%c0_445, %c0_446] : memref<13x104xf32, #tpu.memory_space<vmem>>, vector<11x104xf32>
    %c0_447 = arith.constant 0 : index
    %c0_448 = arith.constant 0 : index
    %c0_449 = arith.constant 0 : index
    %403 = vector.load %arg6[%c0_447, %c0_448, %c0_449] : memref<3x104x88xf32, #tpu.memory_space<vmem>>, vector<1x104x88xf32>
    %404 = vector.shape_cast %403 : vector<1x104x88xf32> to vector<104x88xf32>
    %cst_450 = arith.constant dense<0.000000e+00> : vector<11x88xf32>
    %405 = tpu.matmul %402, %404, %cst_450 {dimension_numbers = #tpu.dot_dimension_numbers<[1], [0], [0], [1], [0, 0, 1, 1], [], []>} : vector<11x104xf32>, vector<104x88xf32>, vector<11x88xf32> -> vector<11x88xf32>
    %c1_451 = arith.constant 1 : index
    %c0_452 = arith.constant 0 : index
    %406 = vector.load %arg15[%c1_451, %c0_452] : memref<13x104xf32, #tpu.memory_space<vmem>>, vector<11x104xf32>
    %c1_453 = arith.constant 1 : index
    %c0_454 = arith.constant 0 : index
    %c0_455 = arith.constant 0 : index
    %407 = vector.load %arg6[%c1_453, %c0_454, %c0_455] : memref<3x104x88xf32, #tpu.memory_space<vmem>>, vector<1x104x88xf32>
    %408 = vector.shape_cast %407 : vector<1x104x88xf32> to vector<104x88xf32>
    %cst_456 = arith.constant dense<0.000000e+00> : vector<11x88xf32>
    %409 = tpu.matmul %406, %408, %cst_456 {dimension_numbers = #tpu.dot_dimension_numbers<[1], [0], [0], [1], [0, 0, 1, 1], [], []>} : vector<11x104xf32>, vector<104x88xf32>, vector<11x88xf32> -> vector<11x88xf32>
    %410 = arith.addf %405, %409 : vector<11x88xf32>
    %c2_457 = arith.constant 2 : index
    %c0_458 = arith.constant 0 : index
    %411 = vector.load %arg15[%c2_457, %c0_458] : memref<13x104xf32, #tpu.memory_space<vmem>>, vector<11x104xf32>
    %c2_459 = arith.constant 2 : index
    %c0_460 = arith.constant 0 : index
    %c0_461 = arith.constant 0 : index
    %412 = vector.load %arg6[%c2_459, %c0_460, %c0_461] : memref<3x104x88xf32, #tpu.memory_space<vmem>>, vector<1x104x88xf32>
    %413 = vector.shape_cast %412 : vector<1x104x88xf32> to vector<104x88xf32>
    %cst_462 = arith.constant dense<0.000000e+00> : vector<11x88xf32>
    %414 = tpu.matmul %411, %413, %cst_462 {dimension_numbers = #tpu.dot_dimension_numbers<[1], [0], [0], [1], [0, 0, 1, 1], [], []>} : vector<11x104xf32>, vector<104x88xf32>, vector<11x88xf32> -> vector<11x88xf32>
    %415 = arith.addf %410, %414 : vector<11x88xf32>
    %c0_463 = arith.constant 0 : index
    %c0_464 = arith.constant 0 : index
    %416 = vector.load %arg7[%c0_463, %c0_464] : memref<1x88xf32, #tpu.memory_space<vmem>>, vector<1x88xf32>
    %417 = vector.broadcast %416 : vector<1x88xf32> to vector<11x88xf32>
    %418 = arith.addf %415, %417 : vector<11x88xf32>
    %cst_465 = arith.constant 0.000000e+00 : f32
    %419 = vector.broadcast %cst_465 : f32 to vector<11x88xf32>
    %420 = arith.maximumf %418, %419 : vector<11x88xf32>
    %c0_466 = arith.constant 0 : index
    %c0_467 = arith.constant 0 : index
    %c0_468 = arith.constant 0 : index
    %421 = vector.load %arg8[%c0_466, %c0_467, %c0_468] : memref<2x5x11xf32, #tpu.memory_space<vmem>>, vector<1x5x11xf32>
    %422 = vector.shape_cast %421 : vector<1x5x11xf32> to vector<5x11xf32>
    %cst_469 = arith.constant dense<0.000000e+00> : vector<5x88xf32>
    %423 = tpu.matmul %422, %420, %cst_469 {dimension_numbers = #tpu.dot_dimension_numbers<[1], [0], [0], [1], [0, 0, 1, 1], [], []>} : vector<5x11xf32>, vector<11x88xf32>, vector<5x88xf32> -> vector<5x88xf32>
    %c1_470 = arith.constant 1 : index
    %c0_471 = arith.constant 0 : index
    %c0_472 = arith.constant 0 : index
    %424 = vector.load %arg8[%c1_470, %c0_471, %c0_472] : memref<2x5x11xf32, #tpu.memory_space<vmem>>, vector<1x5x11xf32>
    %425 = vector.shape_cast %424 : vector<1x5x11xf32> to vector<5x11xf32>
    %cst_473 = arith.constant dense<0.000000e+00> : vector<5x88xf32>
    %426 = tpu.matmul %425, %420, %cst_473 {dimension_numbers = #tpu.dot_dimension_numbers<[1], [0], [0], [1], [0, 0, 1, 1], [], []>} : vector<5x11xf32>, vector<11x88xf32>, vector<5x88xf32> -> vector<5x88xf32>
    %427 = arith.maximumf %423, %426 : vector<5x88xf32>
    %c0_474 = arith.constant 0 : index
    %c0_475 = arith.constant 0 : index
    %c0_476 = arith.constant 0 : index
    %428 = vector.load %arg9[%c0_474, %c0_475, %c0_476] : memref<2x88x40xf32, #tpu.memory_space<vmem>>, vector<1x88x40xf32>
    %429 = vector.shape_cast %428 : vector<1x88x40xf32> to vector<88x40xf32>
    %cst_477 = arith.constant dense<0.000000e+00> : vector<5x40xf32>
    %430 = tpu.matmul %427, %429, %cst_477 {dimension_numbers = #tpu.dot_dimension_numbers<[1], [0], [0], [1], [0, 0, 1, 1], [], []>} : vector<5x88xf32>, vector<88x40xf32>, vector<5x40xf32> -> vector<5x40xf32>
    %c1_478 = arith.constant 1 : index
    %c0_479 = arith.constant 0 : index
    %c0_480 = arith.constant 0 : index
    %431 = vector.load %arg9[%c1_478, %c0_479, %c0_480] : memref<2x88x40xf32, #tpu.memory_space<vmem>>, vector<1x88x40xf32>
    %432 = vector.shape_cast %431 : vector<1x88x40xf32> to vector<88x40xf32>
    %cst_481 = arith.constant dense<0.000000e+00> : vector<5x40xf32>
    %433 = tpu.matmul %427, %432, %cst_481 {dimension_numbers = #tpu.dot_dimension_numbers<[1], [0], [0], [1], [0, 0, 1, 1], [], []>} : vector<5x88xf32>, vector<88x40xf32>, vector<5x40xf32> -> vector<5x40xf32>
    %434 = arith.maximumf %430, %433 : vector<5x40xf32>
    %c5_482 = arith.constant 5 : index
    %c0_483 = arith.constant 0 : index
    %c0_484 = arith.constant 0 : index
    %435 = vector.load %arg16[%c5_482, %c0_483, %c0_484] : memref<8x5x40xf32, #tpu.memory_space<vmem>>, vector<1x5x40xf32>
    %436 = vector.shape_cast %435 : vector<1x5x40xf32> to vector<5x40xf32>
    %437 = vector.shape_cast %434 : vector<5x40xf32> to vector<1x5x40xf32>
    tpu.vector_store %arg16[%c5_482, %c0_483, %c0_484], %437 {strides = array<i32>} : memref<8x5x40xf32, #tpu.memory_space<vmem>>, vector<1x5x40xf32>,
    %c6 = arith.constant 6 : index
    %c0_485 = arith.constant 0 : index
    %c0_486 = arith.constant 0 : index
    %438 = vector.load %arg1[%c6, %c0_485, %c0_486] : memref<8x28x28xf32, #tpu.memory_space<vmem>>, vector<1x26x28xf32>
    %439 = vector.shape_cast %438 : vector<1x26x28xf32> to vector<26x28xf32>
    %c0_487 = arith.constant 0 : index
    %c0_488 = arith.constant 0 : index
    %c0_489 = arith.constant 0 : index
    %440 = vector.load %arg2[%c0_487, %c0_488, %c0_489] : memref<3x28x208xf32, #tpu.memory_space<vmem>>, vector<1x28x208xf32>
    %441 = vector.shape_cast %440 : vector<1x28x208xf32> to vector<28x208xf32>
    %cst_490 = arith.constant dense<0.000000e+00> : vector<26x208xf32>
    %442 = tpu.matmul %439, %441, %cst_490 {dimension_numbers = #tpu.dot_dimension_numbers<[1], [0], [0], [1], [0, 0, 1, 1], [], []>} : vector<26x28xf32>, vector<28x208xf32>, vector<26x208xf32> -> vector<26x208xf32>
    %c6_491 = arith.constant 6 : index
    %c1_492 = arith.constant 1 : index
    %c0_493 = arith.constant 0 : index
    %443 = vector.load %arg1[%c6_491, %c1_492, %c0_493] : memref<8x28x28xf32, #tpu.memory_space<vmem>>, vector<1x26x28xf32>
    %444 = vector.shape_cast %443 : vector<1x26x28xf32> to vector<26x28xf32>
    %c1_494 = arith.constant 1 : index
    %c0_495 = arith.constant 0 : index
    %c0_496 = arith.constant 0 : index
    %445 = vector.load %arg2[%c1_494, %c0_495, %c0_496] : memref<3x28x208xf32, #tpu.memory_space<vmem>>, vector<1x28x208xf32>
    %446 = vector.shape_cast %445 : vector<1x28x208xf32> to vector<28x208xf32>
    %cst_497 = arith.constant dense<0.000000e+00> : vector<26x208xf32>
    %447 = tpu.matmul %444, %446, %cst_497 {dimension_numbers = #tpu.dot_dimension_numbers<[1], [0], [0], [1], [0, 0, 1, 1], [], []>} : vector<26x28xf32>, vector<28x208xf32>, vector<26x208xf32> -> vector<26x208xf32>
    %448 = arith.addf %442, %447 : vector<26x208xf32>
    %c6_498 = arith.constant 6 : index
    %c2_499 = arith.constant 2 : index
    %c0_500 = arith.constant 0 : index
    %449 = vector.load %arg1[%c6_498, %c2_499, %c0_500] : memref<8x28x28xf32, #tpu.memory_space<vmem>>, vector<1x26x28xf32>
    %450 = vector.shape_cast %449 : vector<1x26x28xf32> to vector<26x28xf32>
    %c2_501 = arith.constant 2 : index
    %c0_502 = arith.constant 0 : index
    %c0_503 = arith.constant 0 : index
    %451 = vector.load %arg2[%c2_501, %c0_502, %c0_503] : memref<3x28x208xf32, #tpu.memory_space<vmem>>, vector<1x28x208xf32>
    %452 = vector.shape_cast %451 : vector<1x28x208xf32> to vector<28x208xf32>
    %cst_504 = arith.constant dense<0.000000e+00> : vector<26x208xf32>
    %453 = tpu.matmul %450, %452, %cst_504 {dimension_numbers = #tpu.dot_dimension_numbers<[1], [0], [0], [1], [0, 0, 1, 1], [], []>} : vector<26x28xf32>, vector<28x208xf32>, vector<26x208xf32> -> vector<26x208xf32>
    %454 = arith.addf %448, %453 : vector<26x208xf32>
    %c0_505 = arith.constant 0 : index
    %c0_506 = arith.constant 0 : index
    %455 = vector.load %arg3[%c0_505, %c0_506] : memref<1x208xf32, #tpu.memory_space<vmem>>, vector<1x208xf32>
    %456 = vector.broadcast %455 : vector<1x208xf32> to vector<26x208xf32>
    %457 = arith.addf %454, %456 : vector<26x208xf32>
    %cst_507 = arith.constant 0.000000e+00 : f32
    %458 = vector.broadcast %cst_507 : f32 to vector<26x208xf32>
    %459 = arith.maximumf %457, %458 : vector<26x208xf32>
    %c0_508 = arith.constant 0 : index
    %c0_509 = arith.constant 0 : index
    %c0_510 = arith.constant 0 : index
    %460 = vector.load %arg4[%c0_508, %c0_509, %c0_510] : memref<2x13x26xf32, #tpu.memory_space<vmem>>, vector<1x13x26xf32>
    %461 = vector.shape_cast %460 : vector<1x13x26xf32> to vector<13x26xf32>
    %cst_511 = arith.constant dense<0.000000e+00> : vector<13x208xf32>
    %462 = tpu.matmul %461, %459, %cst_511 {dimension_numbers = #tpu.dot_dimension_numbers<[1], [0], [0], [1], [0, 0, 1, 1], [], []>} : vector<13x26xf32>, vector<26x208xf32>, vector<13x208xf32> -> vector<13x208xf32>
    %c1_512 = arith.constant 1 : index
    %c0_513 = arith.constant 0 : index
    %c0_514 = arith.constant 0 : index
    %463 = vector.load %arg4[%c1_512, %c0_513, %c0_514] : memref<2x13x26xf32, #tpu.memory_space<vmem>>, vector<1x13x26xf32>
    %464 = vector.shape_cast %463 : vector<1x13x26xf32> to vector<13x26xf32>
    %cst_515 = arith.constant dense<0.000000e+00> : vector<13x208xf32>
    %465 = tpu.matmul %464, %459, %cst_515 {dimension_numbers = #tpu.dot_dimension_numbers<[1], [0], [0], [1], [0, 0, 1, 1], [], []>} : vector<13x26xf32>, vector<26x208xf32>, vector<13x208xf32> -> vector<13x208xf32>
    %466 = arith.maximumf %462, %465 : vector<13x208xf32>
    %c0_516 = arith.constant 0 : index
    %c0_517 = arith.constant 0 : index
    %c0_518 = arith.constant 0 : index
    %467 = vector.load %arg5[%c0_516, %c0_517, %c0_518] : memref<2x208x104xf32, #tpu.memory_space<vmem>>, vector<1x208x104xf32>
    %468 = vector.shape_cast %467 : vector<1x208x104xf32> to vector<208x104xf32>
    %cst_519 = arith.constant dense<0.000000e+00> : vector<13x104xf32>
    %469 = tpu.matmul %466, %468, %cst_519 {dimension_numbers = #tpu.dot_dimension_numbers<[1], [0], [0], [1], [0, 0, 1, 1], [], []>} : vector<13x208xf32>, vector<208x104xf32>, vector<13x104xf32> -> vector<13x104xf32>
    %c1_520 = arith.constant 1 : index
    %c0_521 = arith.constant 0 : index
    %c0_522 = arith.constant 0 : index
    %470 = vector.load %arg5[%c1_520, %c0_521, %c0_522] : memref<2x208x104xf32, #tpu.memory_space<vmem>>, vector<1x208x104xf32>
    %471 = vector.shape_cast %470 : vector<1x208x104xf32> to vector<208x104xf32>
    %cst_523 = arith.constant dense<0.000000e+00> : vector<13x104xf32>
    %472 = tpu.matmul %466, %471, %cst_523 {dimension_numbers = #tpu.dot_dimension_numbers<[1], [0], [0], [1], [0, 0, 1, 1], [], []>} : vector<13x208xf32>, vector<208x104xf32>, vector<13x104xf32> -> vector<13x104xf32>
    %473 = arith.maximumf %469, %472 : vector<13x104xf32>
    %c0_524 = arith.constant 0 : index
    %c0_525 = arith.constant 0 : index
    %474 = vector.load %arg15[%c0_524, %c0_525] : memref<13x104xf32, #tpu.memory_space<vmem>>, vector<13x104xf32>
    tpu.vector_store %arg15[%c0_524, %c0_525], %473 {strides = array<i32>} : memref<13x104xf32, #tpu.memory_space<vmem>>, vector<13x104xf32>,
    %c0_526 = arith.constant 0 : index
    %c0_527 = arith.constant 0 : index
    %475 = vector.load %arg15[%c0_526, %c0_527] : memref<13x104xf32, #tpu.memory_space<vmem>>, vector<11x104xf32>
    %c0_528 = arith.constant 0 : index
    %c0_529 = arith.constant 0 : index
    %c0_530 = arith.constant 0 : index
    %476 = vector.load %arg6[%c0_528, %c0_529, %c0_530] : memref<3x104x88xf32, #tpu.memory_space<vmem>>, vector<1x104x88xf32>
    %477 = vector.shape_cast %476 : vector<1x104x88xf32> to vector<104x88xf32>
    %cst_531 = arith.constant dense<0.000000e+00> : vector<11x88xf32>
    %478 = tpu.matmul %475, %477, %cst_531 {dimension_numbers = #tpu.dot_dimension_numbers<[1], [0], [0], [1], [0, 0, 1, 1], [], []>} : vector<11x104xf32>, vector<104x88xf32>, vector<11x88xf32> -> vector<11x88xf32>
    %c1_532 = arith.constant 1 : index
    %c0_533 = arith.constant 0 : index
    %479 = vector.load %arg15[%c1_532, %c0_533] : memref<13x104xf32, #tpu.memory_space<vmem>>, vector<11x104xf32>
    %c1_534 = arith.constant 1 : index
    %c0_535 = arith.constant 0 : index
    %c0_536 = arith.constant 0 : index
    %480 = vector.load %arg6[%c1_534, %c0_535, %c0_536] : memref<3x104x88xf32, #tpu.memory_space<vmem>>, vector<1x104x88xf32>
    %481 = vector.shape_cast %480 : vector<1x104x88xf32> to vector<104x88xf32>
    %cst_537 = arith.constant dense<0.000000e+00> : vector<11x88xf32>
    %482 = tpu.matmul %479, %481, %cst_537 {dimension_numbers = #tpu.dot_dimension_numbers<[1], [0], [0], [1], [0, 0, 1, 1], [], []>} : vector<11x104xf32>, vector<104x88xf32>, vector<11x88xf32> -> vector<11x88xf32>
    %483 = arith.addf %478, %482 : vector<11x88xf32>
    %c2_538 = arith.constant 2 : index
    %c0_539 = arith.constant 0 : index
    %484 = vector.load %arg15[%c2_538, %c0_539] : memref<13x104xf32, #tpu.memory_space<vmem>>, vector<11x104xf32>
    %c2_540 = arith.constant 2 : index
    %c0_541 = arith.constant 0 : index
    %c0_542 = arith.constant 0 : index
    %485 = vector.load %arg6[%c2_540, %c0_541, %c0_542] : memref<3x104x88xf32, #tpu.memory_space<vmem>>, vector<1x104x88xf32>
    %486 = vector.shape_cast %485 : vector<1x104x88xf32> to vector<104x88xf32>
    %cst_543 = arith.constant dense<0.000000e+00> : vector<11x88xf32>
    %487 = tpu.matmul %484, %486, %cst_543 {dimension_numbers = #tpu.dot_dimension_numbers<[1], [0], [0], [1], [0, 0, 1, 1], [], []>} : vector<11x104xf32>, vector<104x88xf32>, vector<11x88xf32> -> vector<11x88xf32>
    %488 = arith.addf %483, %487 : vector<11x88xf32>
    %c0_544 = arith.constant 0 : index
    %c0_545 = arith.constant 0 : index
    %489 = vector.load %arg7[%c0_544, %c0_545] : memref<1x88xf32, #tpu.memory_space<vmem>>, vector<1x88xf32>
    %490 = vector.broadcast %489 : vector<1x88xf32> to vector<11x88xf32>
    %491 = arith.addf %488, %490 : vector<11x88xf32>
    %cst_546 = arith.constant 0.000000e+00 : f32
    %492 = vector.broadcast %cst_546 : f32 to vector<11x88xf32>
    %493 = arith.maximumf %491, %492 : vector<11x88xf32>
    %c0_547 = arith.constant 0 : index
    %c0_548 = arith.constant 0 : index
    %c0_549 = arith.constant 0 : index
    %494 = vector.load %arg8[%c0_547, %c0_548, %c0_549] : memref<2x5x11xf32, #tpu.memory_space<vmem>>, vector<1x5x11xf32>
    %495 = vector.shape_cast %494 : vector<1x5x11xf32> to vector<5x11xf32>
    %cst_550 = arith.constant dense<0.000000e+00> : vector<5x88xf32>
    %496 = tpu.matmul %495, %493, %cst_550 {dimension_numbers = #tpu.dot_dimension_numbers<[1], [0], [0], [1], [0, 0, 1, 1], [], []>} : vector<5x11xf32>, vector<11x88xf32>, vector<5x88xf32> -> vector<5x88xf32>
    %c1_551 = arith.constant 1 : index
    %c0_552 = arith.constant 0 : index
    %c0_553 = arith.constant 0 : index
    %497 = vector.load %arg8[%c1_551, %c0_552, %c0_553] : memref<2x5x11xf32, #tpu.memory_space<vmem>>, vector<1x5x11xf32>
    %498 = vector.shape_cast %497 : vector<1x5x11xf32> to vector<5x11xf32>
    %cst_554 = arith.constant dense<0.000000e+00> : vector<5x88xf32>
    %499 = tpu.matmul %498, %493, %cst_554 {dimension_numbers = #tpu.dot_dimension_numbers<[1], [0], [0], [1], [0, 0, 1, 1], [], []>} : vector<5x11xf32>, vector<11x88xf32>, vector<5x88xf32> -> vector<5x88xf32>
    %500 = arith.maximumf %496, %499 : vector<5x88xf32>
    %c0_555 = arith.constant 0 : index
    %c0_556 = arith.constant 0 : index
    %c0_557 = arith.constant 0 : index
    %501 = vector.load %arg9[%c0_555, %c0_556, %c0_557] : memref<2x88x40xf32, #tpu.memory_space<vmem>>, vector<1x88x40xf32>
    %502 = vector.shape_cast %501 : vector<1x88x40xf32> to vector<88x40xf32>
    %cst_558 = arith.constant dense<0.000000e+00> : vector<5x40xf32>
    %503 = tpu.matmul %500, %502, %cst_558 {dimension_numbers = #tpu.dot_dimension_numbers<[1], [0], [0], [1], [0, 0, 1, 1], [], []>} : vector<5x88xf32>, vector<88x40xf32>, vector<5x40xf32> -> vector<5x40xf32>
    %c1_559 = arith.constant 1 : index
    %c0_560 = arith.constant 0 : index
    %c0_561 = arith.constant 0 : index
    %504 = vector.load %arg9[%c1_559, %c0_560, %c0_561] : memref<2x88x40xf32, #tpu.memory_space<vmem>>, vector<1x88x40xf32>
    %505 = vector.shape_cast %504 : vector<1x88x40xf32> to vector<88x40xf32>
    %cst_562 = arith.constant dense<0.000000e+00> : vector<5x40xf32>
    %506 = tpu.matmul %500, %505, %cst_562 {dimension_numbers = #tpu.dot_dimension_numbers<[1], [0], [0], [1], [0, 0, 1, 1], [], []>} : vector<5x88xf32>, vector<88x40xf32>, vector<5x40xf32> -> vector<5x40xf32>
    %507 = arith.maximumf %503, %506 : vector<5x40xf32>
    %c6_563 = arith.constant 6 : index
    %c0_564 = arith.constant 0 : index
    %c0_565 = arith.constant 0 : index
    %508 = vector.load %arg16[%c6_563, %c0_564, %c0_565] : memref<8x5x40xf32, #tpu.memory_space<vmem>>, vector<1x5x40xf32>
    %509 = vector.shape_cast %508 : vector<1x5x40xf32> to vector<5x40xf32>
    %510 = vector.shape_cast %507 : vector<5x40xf32> to vector<1x5x40xf32>
    tpu.vector_store %arg16[%c6_563, %c0_564, %c0_565], %510 {strides = array<i32>} : memref<8x5x40xf32, #tpu.memory_space<vmem>>, vector<1x5x40xf32>,
    %c7 = arith.constant 7 : index
    %c0_566 = arith.constant 0 : index
    %c0_567 = arith.constant 0 : index
    %511 = vector.load %arg1[%c7, %c0_566, %c0_567] : memref<8x28x28xf32, #tpu.memory_space<vmem>>, vector<1x26x28xf32>
    %512 = vector.shape_cast %511 : vector<1x26x28xf32> to vector<26x28xf32>
    %c0_568 = arith.constant 0 : index
    %c0_569 = arith.constant 0 : index
    %c0_570 = arith.constant 0 : index
    %513 = vector.load %arg2[%c0_568, %c0_569, %c0_570] : memref<3x28x208xf32, #tpu.memory_space<vmem>>, vector<1x28x208xf32>
    %514 = vector.shape_cast %513 : vector<1x28x208xf32> to vector<28x208xf32>
    %cst_571 = arith.constant dense<0.000000e+00> : vector<26x208xf32>
    %515 = tpu.matmul %512, %514, %cst_571 {dimension_numbers = #tpu.dot_dimension_numbers<[1], [0], [0], [1], [0, 0, 1, 1], [], []>} : vector<26x28xf32>, vector<28x208xf32>, vector<26x208xf32> -> vector<26x208xf32>
    %c7_572 = arith.constant 7 : index
    %c1_573 = arith.constant 1 : index
    %c0_574 = arith.constant 0 : index
    %516 = vector.load %arg1[%c7_572, %c1_573, %c0_574] : memref<8x28x28xf32, #tpu.memory_space<vmem>>, vector<1x26x28xf32>
    %517 = vector.shape_cast %516 : vector<1x26x28xf32> to vector<26x28xf32>
    %c1_575 = arith.constant 1 : index
    %c0_576 = arith.constant 0 : index
    %c0_577 = arith.constant 0 : index
    %518 = vector.load %arg2[%c1_575, %c0_576, %c0_577] : memref<3x28x208xf32, #tpu.memory_space<vmem>>, vector<1x28x208xf32>
    %519 = vector.shape_cast %518 : vector<1x28x208xf32> to vector<28x208xf32>
    %cst_578 = arith.constant dense<0.000000e+00> : vector<26x208xf32>
    %520 = tpu.matmul %517, %519, %cst_578 {dimension_numbers = #tpu.dot_dimension_numbers<[1], [0], [0], [1], [0, 0, 1, 1], [], []>} : vector<26x28xf32>, vector<28x208xf32>, vector<26x208xf32> -> vector<26x208xf32>
    %521 = arith.addf %515, %520 : vector<26x208xf32>
    %c7_579 = arith.constant 7 : index
    %c2_580 = arith.constant 2 : index
    %c0_581 = arith.constant 0 : index
    %522 = vector.load %arg1[%c7_579, %c2_580, %c0_581] : memref<8x28x28xf32, #tpu.memory_space<vmem>>, vector<1x26x28xf32>
    %523 = vector.shape_cast %522 : vector<1x26x28xf32> to vector<26x28xf32>
    %c2_582 = arith.constant 2 : index
    %c0_583 = arith.constant 0 : index
    %c0_584 = arith.constant 0 : index
    %524 = vector.load %arg2[%c2_582, %c0_583, %c0_584] : memref<3x28x208xf32, #tpu.memory_space<vmem>>, vector<1x28x208xf32>
    %525 = vector.shape_cast %524 : vector<1x28x208xf32> to vector<28x208xf32>
    %cst_585 = arith.constant dense<0.000000e+00> : vector<26x208xf32>
    %526 = tpu.matmul %523, %525, %cst_585 {dimension_numbers = #tpu.dot_dimension_numbers<[1], [0], [0], [1], [0, 0, 1, 1], [], []>} : vector<26x28xf32>, vector<28x208xf32>, vector<26x208xf32> -> vector<26x208xf32>
    %527 = arith.addf %521, %526 : vector<26x208xf32>
    %c0_586 = arith.constant 0 : index
    %c0_587 = arith.constant 0 : index
    %528 = vector.load %arg3[%c0_586, %c0_587] : memref<1x208xf32, #tpu.memory_space<vmem>>, vector<1x208xf32>
    %529 = vector.broadcast %528 : vector<1x208xf32> to vector<26x208xf32>
    %530 = arith.addf %527, %529 : vector<26x208xf32>
    %cst_588 = arith.constant 0.000000e+00 : f32
    %531 = vector.broadcast %cst_588 : f32 to vector<26x208xf32>
    %532 = arith.maximumf %530, %531 : vector<26x208xf32>
    %c0_589 = arith.constant 0 : index
    %c0_590 = arith.constant 0 : index
    %c0_591 = arith.constant 0 : index
    %533 = vector.load %arg4[%c0_589, %c0_590, %c0_591] : memref<2x13x26xf32, #tpu.memory_space<vmem>>, vector<1x13x26xf32>
    %534 = vector.shape_cast %533 : vector<1x13x26xf32> to vector<13x26xf32>
    %cst_592 = arith.constant dense<0.000000e+00> : vector<13x208xf32>
    %535 = tpu.matmul %534, %532, %cst_592 {dimension_numbers = #tpu.dot_dimension_numbers<[1], [0], [0], [1], [0, 0, 1, 1], [], []>} : vector<13x26xf32>, vector<26x208xf32>, vector<13x208xf32> -> vector<13x208xf32>
    %c1_593 = arith.constant 1 : index
    %c0_594 = arith.constant 0 : index
    %c0_595 = arith.constant 0 : index
    %536 = vector.load %arg4[%c1_593, %c0_594, %c0_595] : memref<2x13x26xf32, #tpu.memory_space<vmem>>, vector<1x13x26xf32>
    %537 = vector.shape_cast %536 : vector<1x13x26xf32> to vector<13x26xf32>
    %cst_596 = arith.constant dense<0.000000e+00> : vector<13x208xf32>
    %538 = tpu.matmul %537, %532, %cst_596 {dimension_numbers = #tpu.dot_dimension_numbers<[1], [0], [0], [1], [0, 0, 1, 1], [], []>} : vector<13x26xf32>, vector<26x208xf32>, vector<13x208xf32> -> vector<13x208xf32>
    %539 = arith.maximumf %535, %538 : vector<13x208xf32>
    %c0_597 = arith.constant 0 : index
    %c0_598 = arith.constant 0 : index
    %c0_599 = arith.constant 0 : index
    %540 = vector.load %arg5[%c0_597, %c0_598, %c0_599] : memref<2x208x104xf32, #tpu.memory_space<vmem>>, vector<1x208x104xf32>
    %541 = vector.shape_cast %540 : vector<1x208x104xf32> to vector<208x104xf32>
    %cst_600 = arith.constant dense<0.000000e+00> : vector<13x104xf32>
    %542 = tpu.matmul %539, %541, %cst_600 {dimension_numbers = #tpu.dot_dimension_numbers<[1], [0], [0], [1], [0, 0, 1, 1], [], []>} : vector<13x208xf32>, vector<208x104xf32>, vector<13x104xf32> -> vector<13x104xf32>
    %c1_601 = arith.constant 1 : index
    %c0_602 = arith.constant 0 : index
    %c0_603 = arith.constant 0 : index
    %543 = vector.load %arg5[%c1_601, %c0_602, %c0_603] : memref<2x208x104xf32, #tpu.memory_space<vmem>>, vector<1x208x104xf32>
    %544 = vector.shape_cast %543 : vector<1x208x104xf32> to vector<208x104xf32>
    %cst_604 = arith.constant dense<0.000000e+00> : vector<13x104xf32>
    %545 = tpu.matmul %539, %544, %cst_604 {dimension_numbers = #tpu.dot_dimension_numbers<[1], [0], [0], [1], [0, 0, 1, 1], [], []>} : vector<13x208xf32>, vector<208x104xf32>, vector<13x104xf32> -> vector<13x104xf32>
    %546 = arith.maximumf %542, %545 : vector<13x104xf32>
    %c0_605 = arith.constant 0 : index
    %c0_606 = arith.constant 0 : index
    %547 = vector.load %arg15[%c0_605, %c0_606] : memref<13x104xf32, #tpu.memory_space<vmem>>, vector<13x104xf32>
    tpu.vector_store %arg15[%c0_605, %c0_606], %546 {strides = array<i32>} : memref<13x104xf32, #tpu.memory_space<vmem>>, vector<13x104xf32>,
    %c0_607 = arith.constant 0 : index
    %c0_608 = arith.constant 0 : index
    %548 = vector.load %arg15[%c0_607, %c0_608] : memref<13x104xf32, #tpu.memory_space<vmem>>, vector<11x104xf32>
    %c0_609 = arith.constant 0 : index
    %c0_610 = arith.constant 0 : index
    %c0_611 = arith.constant 0 : index
    %549 = vector.load %arg6[%c0_609, %c0_610, %c0_611] : memref<3x104x88xf32, #tpu.memory_space<vmem>>, vector<1x104x88xf32>
    %550 = vector.shape_cast %549 : vector<1x104x88xf32> to vector<104x88xf32>
    %cst_612 = arith.constant dense<0.000000e+00> : vector<11x88xf32>
    %551 = tpu.matmul %548, %550, %cst_612 {dimension_numbers = #tpu.dot_dimension_numbers<[1], [0], [0], [1], [0, 0, 1, 1], [], []>} : vector<11x104xf32>, vector<104x88xf32>, vector<11x88xf32> -> vector<11x88xf32>
    %c1_613 = arith.constant 1 : index
    %c0_614 = arith.constant 0 : index
    %552 = vector.load %arg15[%c1_613, %c0_614] : memref<13x104xf32, #tpu.memory_space<vmem>>, vector<11x104xf32>
    %c1_615 = arith.constant 1 : index
    %c0_616 = arith.constant 0 : index
    %c0_617 = arith.constant 0 : index
    %553 = vector.load %arg6[%c1_615, %c0_616, %c0_617] : memref<3x104x88xf32, #tpu.memory_space<vmem>>, vector<1x104x88xf32>
    %554 = vector.shape_cast %553 : vector<1x104x88xf32> to vector<104x88xf32>
    %cst_618 = arith.constant dense<0.000000e+00> : vector<11x88xf32>
    %555 = tpu.matmul %552, %554, %cst_618 {dimension_numbers = #tpu.dot_dimension_numbers<[1], [0], [0], [1], [0, 0, 1, 1], [], []>} : vector<11x104xf32>, vector<104x88xf32>, vector<11x88xf32> -> vector<11x88xf32>
    %556 = arith.addf %551, %555 : vector<11x88xf32>
    %c2_619 = arith.constant 2 : index
    %c0_620 = arith.constant 0 : index
    %557 = vector.load %arg15[%c2_619, %c0_620] : memref<13x104xf32, #tpu.memory_space<vmem>>, vector<11x104xf32>
    %c2_621 = arith.constant 2 : index
    %c0_622 = arith.constant 0 : index
    %c0_623 = arith.constant 0 : index
    %558 = vector.load %arg6[%c2_621, %c0_622, %c0_623] : memref<3x104x88xf32, #tpu.memory_space<vmem>>, vector<1x104x88xf32>
    %559 = vector.shape_cast %558 : vector<1x104x88xf32> to vector<104x88xf32>
    %cst_624 = arith.constant dense<0.000000e+00> : vector<11x88xf32>
    %560 = tpu.matmul %557, %559, %cst_624 {dimension_numbers = #tpu.dot_dimension_numbers<[1], [0], [0], [1], [0, 0, 1, 1], [], []>} : vector<11x104xf32>, vector<104x88xf32>, vector<11x88xf32> -> vector<11x88xf32>
    %561 = arith.addf %556, %560 : vector<11x88xf32>
    %c0_625 = arith.constant 0 : index
    %c0_626 = arith.constant 0 : index
    %562 = vector.load %arg7[%c0_625, %c0_626] : memref<1x88xf32, #tpu.memory_space<vmem>>, vector<1x88xf32>
    %563 = vector.broadcast %562 : vector<1x88xf32> to vector<11x88xf32>
    %564 = arith.addf %561, %563 : vector<11x88xf32>
    %cst_627 = arith.constant 0.000000e+00 : f32
    %565 = vector.broadcast %cst_627 : f32 to vector<11x88xf32>
    %566 = arith.maximumf %564, %565 : vector<11x88xf32>
    %c0_628 = arith.constant 0 : index
    %c0_629 = arith.constant 0 : index
    %c0_630 = arith.constant 0 : index
    %567 = vector.load %arg8[%c0_628, %c0_629, %c0_630] : memref<2x5x11xf32, #tpu.memory_space<vmem>>, vector<1x5x11xf32>
    %568 = vector.shape_cast %567 : vector<1x5x11xf32> to vector<5x11xf32>
    %cst_631 = arith.constant dense<0.000000e+00> : vector<5x88xf32>
    %569 = tpu.matmul %568, %566, %cst_631 {dimension_numbers = #tpu.dot_dimension_numbers<[1], [0], [0], [1], [0, 0, 1, 1], [], []>} : vector<5x11xf32>, vector<11x88xf32>, vector<5x88xf32> -> vector<5x88xf32>
    %c1_632 = arith.constant 1 : index
    %c0_633 = arith.constant 0 : index
    %c0_634 = arith.constant 0 : index
    %570 = vector.load %arg8[%c1_632, %c0_633, %c0_634] : memref<2x5x11xf32, #tpu.memory_space<vmem>>, vector<1x5x11xf32>
    %571 = vector.shape_cast %570 : vector<1x5x11xf32> to vector<5x11xf32>
    %cst_635 = arith.constant dense<0.000000e+00> : vector<5x88xf32>
    %572 = tpu.matmul %571, %566, %cst_635 {dimension_numbers = #tpu.dot_dimension_numbers<[1], [0], [0], [1], [0, 0, 1, 1], [], []>} : vector<5x11xf32>, vector<11x88xf32>, vector<5x88xf32> -> vector<5x88xf32>
    %573 = arith.maximumf %569, %572 : vector<5x88xf32>
    %c0_636 = arith.constant 0 : index
    %c0_637 = arith.constant 0 : index
    %c0_638 = arith.constant 0 : index
    %574 = vector.load %arg9[%c0_636, %c0_637, %c0_638] : memref<2x88x40xf32, #tpu.memory_space<vmem>>, vector<1x88x40xf32>
    %575 = vector.shape_cast %574 : vector<1x88x40xf32> to vector<88x40xf32>
    %cst_639 = arith.constant dense<0.000000e+00> : vector<5x40xf32>
    %576 = tpu.matmul %573, %575, %cst_639 {dimension_numbers = #tpu.dot_dimension_numbers<[1], [0], [0], [1], [0, 0, 1, 1], [], []>} : vector<5x88xf32>, vector<88x40xf32>, vector<5x40xf32> -> vector<5x40xf32>
    %c1_640 = arith.constant 1 : index
    %c0_641 = arith.constant 0 : index
    %c0_642 = arith.constant 0 : index
    %577 = vector.load %arg9[%c1_640, %c0_641, %c0_642] : memref<2x88x40xf32, #tpu.memory_space<vmem>>, vector<1x88x40xf32>
    %578 = vector.shape_cast %577 : vector<1x88x40xf32> to vector<88x40xf32>
    %cst_643 = arith.constant dense<0.000000e+00> : vector<5x40xf32>
    %579 = tpu.matmul %573, %578, %cst_643 {dimension_numbers = #tpu.dot_dimension_numbers<[1], [0], [0], [1], [0, 0, 1, 1], [], []>} : vector<5x88xf32>, vector<88x40xf32>, vector<5x40xf32> -> vector<5x40xf32>
    %580 = arith.maximumf %576, %579 : vector<5x40xf32>
    %c7_644 = arith.constant 7 : index
    %c0_645 = arith.constant 0 : index
    %c0_646 = arith.constant 0 : index
    %581 = vector.load %arg16[%c7_644, %c0_645, %c0_646] : memref<8x5x40xf32, #tpu.memory_space<vmem>>, vector<1x5x40xf32>
    %582 = vector.shape_cast %581 : vector<1x5x40xf32> to vector<5x40xf32>
    %583 = vector.shape_cast %580 : vector<5x40xf32> to vector<1x5x40xf32>
    tpu.vector_store %arg16[%c7_644, %c0_645, %c0_646], %583 {strides = array<i32>} : memref<8x5x40xf32, #tpu.memory_space<vmem>>, vector<1x5x40xf32>,
    %c0_647 = arith.constant 0 : index
    %c0_648 = arith.constant 0 : index
    %c0_649 = arith.constant 0 : index
    %584 = vector.load %arg16[%c0_647, %c0_648, %c0_649] : memref<8x5x40xf32, #tpu.memory_space<vmem>>, vector<8x1x40xf32>
    %585 = vector.shape_cast %584 : vector<8x1x40xf32> to vector<8x40xf32>
    %c0_650 = arith.constant 0 : index
    %c0_651 = arith.constant 0 : index
    %c0_652 = arith.constant 0 : index
    %586 = vector.load %arg10[%c0_650, %c0_651, %c0_652] : memref<5x40x64xf32, #tpu.memory_space<vmem>>, vector<1x40x64xf32>
    %587 = vector.shape_cast %586 : vector<1x40x64xf32> to vector<40x64xf32>
    %cst_653 = arith.constant dense<0.000000e+00> : vector<8x64xf32>
    %588 = tpu.matmul %585, %587, %cst_653 {dimension_numbers = #tpu.dot_dimension_numbers<[1], [0], [0], [1], [0, 0, 1, 1], [], []>} : vector<8x40xf32>, vector<40x64xf32>, vector<8x64xf32> -> vector<8x64xf32>
    %c0_654 = arith.constant 0 : index
    %c1_655 = arith.constant 1 : index
    %c0_656 = arith.constant 0 : index
    %589 = vector.load %arg16[%c0_654, %c1_655, %c0_656] : memref<8x5x40xf32, #tpu.memory_space<vmem>>, vector<8x1x40xf32>
    %590 = vector.shape_cast %589 : vector<8x1x40xf32> to vector<8x40xf32>
    %c1_657 = arith.constant 1 : index
    %c0_658 = arith.constant 0 : index
    %c0_659 = arith.constant 0 : index
    %591 = vector.load %arg10[%c1_657, %c0_658, %c0_659] : memref<5x40x64xf32, #tpu.memory_space<vmem>>, vector<1x40x64xf32>
    %592 = vector.shape_cast %591 : vector<1x40x64xf32> to vector<40x64xf32>
    %cst_660 = arith.constant dense<0.000000e+00> : vector<8x64xf32>
    %593 = tpu.matmul %590, %592, %cst_660 {dimension_numbers = #tpu.dot_dimension_numbers<[1], [0], [0], [1], [0, 0, 1, 1], [], []>} : vector<8x40xf32>, vector<40x64xf32>, vector<8x64xf32> -> vector<8x64xf32>
    %594 = arith.addf %588, %593 : vector<8x64xf32>
    %c0_661 = arith.constant 0 : index
    %c2_662 = arith.constant 2 : index
    %c0_663 = arith.constant 0 : index
    %595 = vector.load %arg16[%c0_661, %c2_662, %c0_663] : memref<8x5x40xf32, #tpu.memory_space<vmem>>, vector<8x1x40xf32>
    %596 = vector.shape_cast %595 : vector<8x1x40xf32> to vector<8x40xf32>
    %c2_664 = arith.constant 2 : index
    %c0_665 = arith.constant 0 : index
    %c0_666 = arith.constant 0 : index
    %597 = vector.load %arg10[%c2_664, %c0_665, %c0_666] : memref<5x40x64xf32, #tpu.memory_space<vmem>>, vector<1x40x64xf32>
    %598 = vector.shape_cast %597 : vector<1x40x64xf32> to vector<40x64xf32>
    %cst_667 = arith.constant dense<0.000000e+00> : vector<8x64xf32>
    %599 = tpu.matmul %596, %598, %cst_667 {dimension_numbers = #tpu.dot_dimension_numbers<[1], [0], [0], [1], [0, 0, 1, 1], [], []>} : vector<8x40xf32>, vector<40x64xf32>, vector<8x64xf32> -> vector<8x64xf32>
    %600 = arith.addf %594, %599 : vector<8x64xf32>
    %c0_668 = arith.constant 0 : index
    %c3_669 = arith.constant 3 : index
    %c0_670 = arith.constant 0 : index
    %601 = vector.load %arg16[%c0_668, %c3_669, %c0_670] : memref<8x5x40xf32, #tpu.memory_space<vmem>>, vector<8x1x40xf32>
    %602 = vector.shape_cast %601 : vector<8x1x40xf32> to vector<8x40xf32>
    %c3_671 = arith.constant 3 : index
    %c0_672 = arith.constant 0 : index
    %c0_673 = arith.constant 0 : index
    %603 = vector.load %arg10[%c3_671, %c0_672, %c0_673] : memref<5x40x64xf32, #tpu.memory_space<vmem>>, vector<1x40x64xf32>
    %604 = vector.shape_cast %603 : vector<1x40x64xf32> to vector<40x64xf32>
    %cst_674 = arith.constant dense<0.000000e+00> : vector<8x64xf32>
    %605 = tpu.matmul %602, %604, %cst_674 {dimension_numbers = #tpu.dot_dimension_numbers<[1], [0], [0], [1], [0, 0, 1, 1], [], []>} : vector<8x40xf32>, vector<40x64xf32>, vector<8x64xf32> -> vector<8x64xf32>
    %606 = arith.addf %600, %605 : vector<8x64xf32>
    %c0_675 = arith.constant 0 : index
    %c4_676 = arith.constant 4 : index
    %c0_677 = arith.constant 0 : index
    %607 = vector.load %arg16[%c0_675, %c4_676, %c0_677] : memref<8x5x40xf32, #tpu.memory_space<vmem>>, vector<8x1x40xf32>
    %608 = vector.shape_cast %607 : vector<8x1x40xf32> to vector<8x40xf32>
    %c4_678 = arith.constant 4 : index
    %c0_679 = arith.constant 0 : index
    %c0_680 = arith.constant 0 : index
    %609 = vector.load %arg10[%c4_678, %c0_679, %c0_680] : memref<5x40x64xf32, #tpu.memory_space<vmem>>, vector<1x40x64xf32>
    %610 = vector.shape_cast %609 : vector<1x40x64xf32> to vector<40x64xf32>
    %cst_681 = arith.constant dense<0.000000e+00> : vector<8x64xf32>
    %611 = tpu.matmul %608, %610, %cst_681 {dimension_numbers = #tpu.dot_dimension_numbers<[1], [0], [0], [1], [0, 0, 1, 1], [], []>} : vector<8x40xf32>, vector<40x64xf32>, vector<8x64xf32> -> vector<8x64xf32>
    %612 = arith.addf %606, %611 : vector<8x64xf32>
    %c0_682 = arith.constant 0 : index
    %c0_683 = arith.constant 0 : index
    %613 = vector.load %arg11[%c0_682, %c0_683] : memref<1x64xf32, #tpu.memory_space<vmem>>, vector<1x64xf32>
    %614 = vector.broadcast %613 : vector<1x64xf32> to vector<8x64xf32>
    %615 = arith.addf %612, %614 : vector<8x64xf32>
    %cst_684 = arith.constant 0.000000e+00 : f32
    %616 = vector.broadcast %cst_684 : f32 to vector<8x64xf32>
    %617 = arith.maximumf %615, %616 : vector<8x64xf32>
    %c0_685 = arith.constant 0 : index
    %c0_686 = arith.constant 0 : index
    %618 = vector.load %arg12[%c0_685, %c0_686] : memref<64x10xf32, #tpu.memory_space<vmem>>, vector<64x10xf32>
    %cst_687 = arith.constant dense<0.000000e+00> : vector<8x10xf32>
    %619 = tpu.matmul %617, %618, %cst_687 {dimension_numbers = #tpu.dot_dimension_numbers<[1], [0], [0], [1], [0, 0, 1, 1], [], []>} : vector<8x64xf32>, vector<64x10xf32>, vector<8x10xf32> -> vector<8x10xf32>
    %c0_688 = arith.constant 0 : index
    %c0_689 = arith.constant 0 : index
    %620 = vector.load %arg13[%c0_688, %c0_689] : memref<1x10xf32, #tpu.memory_space<vmem>>, vector<1x10xf32>
    %621 = vector.broadcast %620 : vector<1x10xf32> to vector<8x10xf32>
    %622 = arith.addf %619, %621 : vector<8x10xf32>
    %cst_690 = arith.constant dense<0xFF800000> : vector<8xf32>
    %623 = vector.multi_reduction <maximumf>, %622, %cst_690 [1] : vector<8x10xf32> to vector<8xf32>
    %624 = vector.shape_cast %623 : vector<8xf32> to vector<8x1xf32>
    %625 = vector.broadcast %624 : vector<8x1xf32> to vector<8x10xf32>
    %626 = arith.subf %622, %625 : vector<8x10xf32>
    %627 = math.exp %626 : vector<8x10xf32>
    %cst_691 = arith.constant dense<0.000000e+00> : vector<8xf32>
    %628 = vector.multi_reduction <add>, %627, %cst_691 [1] : vector<8x10xf32> to vector<8xf32>
    %629 = vector.shape_cast %628 : vector<8xf32> to vector<8x1xf32>
    %630 = math.log %629 : vector<8x1xf32>
    %631 = arith.addf %624, %630 : vector<8x1xf32>
    %632 = vector.broadcast %631 : vector<8x1xf32> to vector<8x10xf32>
    %633 = arith.subf %622, %632 : vector<8x10xf32>
    %c0_692 = arith.constant 0 : index
    %c0_693 = arith.constant 0 : index
    %634 = vector.load %arg14[%c0_692, %c0_693] : memref<8x10xf32, #tpu.memory_space<vmem>>, vector<8x10xf32>
    tpu.vector_store %arg14[%c0_692, %c0_693], %633 {strides = array<i32>} : memref<8x10xf32, #tpu.memory_space<vmem>>, vector<8x10xf32>,
    return
  }
  func.func @transform_0(%arg0: i32) -> (i32, i32, i32) {
    %c0_i32 = arith.constant 0 : i32
    %c0_i32_0 = arith.constant 0 : i32
    %c0_i32_1 = arith.constant 0 : i32
    return %arg0, %c0_i32, %c0_i32_0 : i32, i32, i32
  }
  func.func @transform_1(%arg0: i32) -> (i32, i32, i32) {
    %c0_i32 = arith.constant 0 : i32
    %c0_i32_0 = arith.constant 0 : i32
    %c0_i32_1 = arith.constant 0 : i32
    %c0_i32_2 = arith.constant 0 : i32
    return %c0_i32, %c0_i32_0, %c0_i32_1 : i32, i32, i32
  }
  func.func @transform_2(%arg0: i32) -> (i32, i32) {
    %c0_i32 = arith.constant 0 : i32
    %c0_i32_0 = arith.constant 0 : i32
    %c0_i32_1 = arith.constant 0 : i32
    return %c0_i32, %c0_i32_0 : i32, i32
  }
  func.func @transform_3(%arg0: i32) -> (i32, i32, i32) {
    %c0_i32 = arith.constant 0 : i32
    %c0_i32_0 = arith.constant 0 : i32
    %c0_i32_1 = arith.constant 0 : i32
    %c0_i32_2 = arith.constant 0 : i32
    return %c0_i32, %c0_i32_0, %c0_i32_1 : i32, i32, i32
  }
  func.func @transform_4(%arg0: i32) -> (i32, i32, i32) {
    %c0_i32 = arith.constant 0 : i32
    %c0_i32_0 = arith.constant 0 : i32
    %c0_i32_1 = arith.constant 0 : i32
    %c0_i32_2 = arith.constant 0 : i32
    return %c0_i32, %c0_i32_0, %c0_i32_1 : i32, i32, i32
  }
  func.func @transform_5(%arg0: i32) -> (i32, i32, i32) {
    %c0_i32 = arith.constant 0 : i32
    %c0_i32_0 = arith.constant 0 : i32
    %c0_i32_1 = arith.constant 0 : i32
    %c0_i32_2 = arith.constant 0 : i32
    return %c0_i32, %c0_i32_0, %c0_i32_1 : i32, i32, i32
  }
  func.func @transform_6(%arg0: i32) -> (i32, i32) {
    %c0_i32 = arith.constant 0 : i32
    %c0_i32_0 = arith.constant 0 : i32
    %c0_i32_1 = arith.constant 0 : i32
    return %c0_i32, %c0_i32_0 : i32, i32
  }
  func.func @transform_7(%arg0: i32) -> (i32, i32, i32) {
    %c0_i32 = arith.constant 0 : i32
    %c0_i32_0 = arith.constant 0 : i32
    %c0_i32_1 = arith.constant 0 : i32
    %c0_i32_2 = arith.constant 0 : i32
    return %c0_i32, %c0_i32_0, %c0_i32_1 : i32, i32, i32
  }
  func.func @transform_8(%arg0: i32) -> (i32, i32, i32) {
    %c0_i32 = arith.constant 0 : i32
    %c0_i32_0 = arith.constant 0 : i32
    %c0_i32_1 = arith.constant 0 : i32
    %c0_i32_2 = arith.constant 0 : i32
    return %c0_i32, %c0_i32_0, %c0_i32_1 : i32, i32, i32
  }
  func.func @transform_9(%arg0: i32) -> (i32, i32, i32) {
    %c0_i32 = arith.constant 0 : i32
    %c0_i32_0 = arith.constant 0 : i32
    %c0_i32_1 = arith.constant 0 : i32
    %c0_i32_2 = arith.constant 0 : i32
    return %c0_i32, %c0_i32_0, %c0_i32_1 : i32, i32, i32
  }
  func.func @transform_10(%arg0: i32) -> (i32, i32) {
    %c0_i32 = arith.constant 0 : i32
    %c0_i32_0 = arith.constant 0 : i32
    %c0_i32_1 = arith.constant 0 : i32
    return %c0_i32, %c0_i32_0 : i32, i32
  }
  func.func @transform_11(%arg0: i32) -> (i32, i32) {
    %c0_i32 = arith.constant 0 : i32
    %c0_i32_0 = arith.constant 0 : i32
    %c0_i32_1 = arith.constant 0 : i32
    return %c0_i32, %c0_i32_0 : i32, i32
  }
  func.func @transform_12(%arg0: i32) -> (i32, i32) {
    %c0_i32 = arith.constant 0 : i32
    %c0_i32_0 = arith.constant 0 : i32
    %c0_i32_1 = arith.constant 0 : i32
    return %c0_i32, %c0_i32_0 : i32, i32
  }
  func.func @transform_13(%arg0: i32) -> (i32, i32) {
    %c0_i32 = arith.constant 0 : i32
    %c0_i32_0 = arith.constant 0 : i32
    return %arg0, %c0_i32 : i32, i32
  }
}

</mosaic_0001>

<bundles_post_ra>
// kernel: tile.14
= control target key start
LH: loop header
LB: loop body
LE: loop exit
PB: predicated region body
PF: predicated region fallthrough
CT: control target
= control target key end

     0   :  { %s150_s10 = smov 120   ;;  %s151_s11 = smov 104   ;;  %vm4_vm0 = vcmask 64512   ;;  %vm10_vm1 = vcmask 1048512   ;;  %vm16_vm2 = vcmask 982912   ;;  %vm22_vm3 = vcmask 917312   ;;  %s229_s0 = inlined_call_operand.vmem [shape: f32[26,8], index: 0, kind: input, shape index: {}]   ;;  %s230_s1 = inlined_call_operand.vmem [shape: f32[1,208], index: 1, kind: output, shape index: {}]  }
   0x1   :  { %v119_v0 = vld [vmem:[%s229_s0 + $0xf] sm:$0x1]   ;;  %v121_v1 = vld [vmem:[%s229_s0 + $0xd] sm:$0x1]   ;;  %v120_v2 = vld [vmem:[%s229_s0 + $0xe] sm:$0x1]  }
   0x2   :  { %8 = vrot.lane.b32.xlu0 %v119_v0, %s150_s10  ;;  %20 = vrot.lane.b32.xlu1 %v121_v1, %s151_s11  ;;  %v122_v3 = vld [vmem:[%s229_s0 + $0xc] sm:$0x1]   ;;  %s152_s16 = smov 112   ;;  %s153_s17 = smov 96   ;;  %v123_v4 = vld [vmem:[%s229_s0 + $0xb] sm:$0x1]  }
   0x3   :  { %v124_v5 = vld [vmem:[%s229_s0 + $0xa] sm:$0x1]   ;;  %s43_s22 = smov 3  ;;  %s50_s23 = smov 3  ;;  %vm28_vm4 = vcmask 851712   ;;  %vm34_vm5 = vcmask 786112  }
   0x4   :  { %s154_s24 = smov 88   ;;  %s155_s25 = smov 80   ;;  %v125_v6 = vld [vmem:[%s229_s0 + $0x9] ss:$16 sm:%s43_s22]   ;;  %v126_v7 = vld [vmem:[%s229_s0 + $0x8] ss:$16 sm:%s50_s23]  }
   0x5   :  { %s57_s30 = smov 3  ;;  %s64_s2 = smov 3  ;;  %vm40_vm6 = vcmask 720512   ;;  %vm47_vm7 = vcmask 654912   ;;  %vm54_vm8 = vcmask 589312   ;;  %vm61_vm9 = vcmask 523712  }
   0x6   :  { %14 = vrot.lane.b32.xlu0 %v120_v2, %s152_s16  ;;  %26 = vrot.lane.b32.xlu1 %v122_v3, %s153_s17  ;;  %s2_s3 = smov 3  ;;  %s156_s4 = smov 72   ;;  %v127_v9 = vld [vmem:[%s229_s0 + $0x7] ss:$16 sm:%s57_s30]   ;;  %vm68_vm10 = vcmask 458112   ;;  %vm75_vm11 = vcmask 392512  }
   0x7   :  { %s157_s5 = smov 64   ;;  %v3_v8 = vld [vmem:[%s229_s0] ss:$16 sm:%s2_s3]   ;;  %v128_v10 = vld [vmem:[%s229_s0 + $0x6] ss:$16 sm:%s64_s2]   ;;  %s71_s12 = smov 3 }
   0x8   :  { %5 = vst.msk [vmem:[#allocation0] ss:$8 sm:$0x3] %vm4_vm0, %v3_v8   ;;  %s78_s13 = smov 3  ;;  %s158_s14 = smov 56   ;;  %vm82_vm12 = vcmask 326912  }
   0x9   :  { %s159_s15 = smov 48   ;;  %v129_v11 = vld [vmem:[%s229_s0 + $0x5] ss:$16 sm:%s71_s12]   ;;  %v130_v12 = vld [vmem:[%s229_s0 + $0x4] ss:$16 sm:%s78_s13]   ;;  %s85_s20 = smov 3 }
   0xa   :  { %32 = vrot.lane.b32.xlu0 %v123_v4, %s154_s24  ;;  %38 = vrot.lane.b32.xlu1 %v124_v5, %s155_s25  ;;  %s92_s21 = smov 3  ;;  %s160_s22 = smov 40   ;;  %v131_v13 = vld [vmem:[%s229_s0 + $0x3] ss:$16 sm:%s85_s20]   ;;  %vm89_vm13 = vcmask 261312   ;;  %vm96_vm14 = vcmask 195712  }
   0xb   :  { %s161_s23 = smov 32   ;;  %v132_v14 = vld [vmem:[%s229_s0 + $0x2] ss:$16 sm:%s92_s21]   ;;  %s99_s28 = smov 3  ;;  %vm103_vm15 = vcmask 130112  }
   0xc   :  { %s162_s29 = smov 24   ;;  %s163_s30 = smov 16   ;;  %v133_v15 = vld [vmem:[%s229_s0 + $0x1] ss:$16 sm:%s99_s28]  }
   0xd   :  { %s164_s0 = smov 8  }
   0xe   :  { %45 = vrot.lane.b32.xlu0 %v125_v6, %s156_s4  ;;  %52 = vrot.lane.b32.xlu1 %v126_v7, %s157_s5 }
  0x12   :  { %59 = vrot.lane.b32.xlu0 %v127_v9, %s158_s14  ;;  %66 = vrot.lane.b32.xlu1 %v128_v10, %s159_s15 }
  0x16   :  { %73 = vrot.lane.b32.xlu0 %v129_v11, %s160_s22  ;;  %80 = vrot.lane.b32.xlu1 %v130_v12, %s161_s23 }
  0x1a   :  { %87 = vrot.lane.b32.xlu0 %v131_v13, %s162_s29  ;;  %94 = vrot.lane.b32.xlu1 %v132_v14, %s163_s30 }
  0x1e   :  { %101 = vrot.lane.b32.xlu0 %v133_v15, %s164_s0 }
  0x74   :  { %v9_v16 = vpop.permute.xlu0 %8   ;;  %v21_v17 = vpop.permute.xlu1 %20  }
  0x75   :  { %11 = vst.msk [vmem:[#allocation0] sm:$0x1] %vm10_vm1, %v9_v16  }
  0x78   :  { %v15_v18 = vpop.permute.xlu0 %14   ;;  %v27_v19 = vpop.permute.xlu1 %26  }
  0x79   :  { %17 = vst.msk [vmem:[#allocation0] sm:$0x1] %vm16_vm2, %v15_v18  }
  0x7a   :  { %23 = vst.msk [vmem:[#allocation0] sm:$0x1] %vm22_vm3, %v21_v17  }
  0x7b   :  { %29 = vst.msk [vmem:[#allocation0] sm:$0x1] %vm28_vm4, %v27_v19  }
  0x7c   :  { %v33_v20 = vpop.permute.xlu0 %32   ;;  %v39_v21 = vpop.permute.xlu1 %38  }
  0x7d   :  { %35 = vst.msk [vmem:[#allocation0] sm:$0x1] %vm34_vm5, %v33_v20  }
  0x7e   :  { %41 = vst.msk [vmem:[#allocation0] sm:$0x1] %vm40_vm6, %v39_v21  }
  0x80   :  { %v46_v22 = vpop.permute.xlu0 %45   ;;  %v53_v23 = vpop.permute.xlu1 %52  }
  0x81   :  { %48 = vst.msk [vmem:[#allocation0] ss:$8 sm:$0x3] %vm47_vm7, %v46_v22  }
  0x82   :  { %55 = vst.msk [vmem:[#allocation0] ss:$8 sm:$0x3] %vm54_vm8, %v53_v23  }
  0x84   :  { %v60_v24 = vpop.permute.xlu0 %59   ;;  %v67_v25 = vpop.permute.xlu1 %66  }
  0x85   :  { %62 = vst.msk [vmem:[#allocation0] ss:$8 sm:$0x3] %vm61_vm9, %v60_v24  }
  0x86   :  { %69 = vst.msk [vmem:[#allocation0] ss:$8 sm:$0x3] %vm68_vm10, %v67_v25  }
  0x88   :  { %v74_v26 = vpop.permute.xlu0 %73   ;;  %v81_v27 = vpop.permute.xlu1 %80  }
  0x89   :  { %76 = vst.msk [vmem:[#allocation0] ss:$8 sm:$0x3] %vm75_vm11, %v74_v26  }
  0x8a   :  { %83 = vst.msk [vmem:[#allocation0] ss:$8 sm:$0x3] %vm82_vm12, %v81_v27  }
  0x8c   :  { %v88_v28 = vpop.permute.xlu0 %87   ;;  %v95_v29 = vpop.permute.xlu1 %94  }
  0x8d   :  { %90 = vst.msk [vmem:[#allocation0] ss:$8 sm:$0x3] %vm89_vm13, %v88_v28  }
  0x8e   :  { %97 = vst.msk [vmem:[#allocation0] ss:$8 sm:$0x3] %vm96_vm14, %v95_v29  }
  0x90   :  { %v102_v30 = vpop.permute.xlu0 %101  }
  0x91   :  { %104 = vst.msk [vmem:[#allocation0] ss:$8 sm:$0x3] %vm103_vm15, %v102_v30  }
  0x98   :  { %v109_v31 = vld [vmem:[#allocation0] sm:$0x1]  ;;  %v114_v32 = vld [vmem:[#allocation0 + $0x8] sm:$0x1] }
  0x99   :  { %112 = vst [vmem:[%s230_s1] sm:$0x1] %v109_v31  ;;  %134 = vst [vmem:[%s230_s1 + $0x1] sm:$0x1] %v114_v32 }

// kernel: tile.18
= control target key start
LH: loop header
LB: loop body
LE: loop exit
PB: predicated region body
PF: predicated region fallthrough
CT: control target
= control target key end

     0   :  { %s28_s0 = inlined_call_operand.vmem [shape: f32[8], index: 0, kind: input, shape index: {}]   ;;  %s29_s1 = inlined_call_operand.vmem [shape: f32[11,8], index: 1, kind: output, shape index: {}]  }
   0x1   :  { %v4_v0 = vld [vmem:[%s28_s0] ss:$0 sm:$0xff] }
   0x2   :  { %5 = vst [vmem:[%s29_s1] sm:$0xff] %v4_v0  ;;  %8 = vst [vmem:[%s29_s1 + $0x8] sm:$0xff] %v4_v0 }

// kernel: tile.19
= control target key start
LH: loop header
LB: loop body
LE: loop exit
PB: predicated region body
PF: predicated region fallthrough
CT: control target
= control target key end

     0   :  { %s93_s10 = smov 80   ;;  %s94_s11 = smov 64   ;;  %vm3_vm0 = vcmask 64512   ;;  %vm9_vm1 = vcmask 720512   ;;  %vm15_vm2 = vcmask 654912   ;;  %vm21_vm3 = vcmask 589312   ;;  %s149_s0 = inlined_call_operand.vmem [shape: f32[11,8], index: 0, kind: input, shape index: {}]   ;;  %s150_s1 = inlined_call_operand.vmem [shape: f32[1,88], index: 1, kind: output, shape index: {}]  }
   0x1   :  { %v73_v0 = vld [vmem:[%s149_s0 + $0xa] sm:$0x1]   ;;  %v75_v1 = vld [vmem:[%s149_s0 + $0x8] sm:$0x1]   ;;  %v74_v2 = vld [vmem:[%s149_s0 + $0x9] sm:$0x1]  }
   0x2   :  { %7 = vrot.lane.b32.xlu0 %v73_v0, %s93_s10  ;;  %19 = vrot.lane.b32.xlu1 %v75_v1, %s94_s11  ;;  %v76_v3 = vld [vmem:[%s149_s0 + $0x7] sm:$0x1]   ;;  %s95_s16 = smov 72   ;;  %s96_s17 = smov 56   ;;  %v2_v4 = vld [vmem:[%s149_s0] sm:$0x1]  }
   0x3   :  { %v77_v5 = vld [vmem:[%s149_s0 + $0x6] sm:$0x1]   ;;  %v78_v6 = vld [vmem:[%s149_s0 + $0x5] sm:$0x1]   ;;  %4 = vst.msk [vmem:[#allocation0] sm:$0x1] %vm3_vm0, %v2_v4  }
   0x4   :  { %s97_s24 = smov 48   ;;  %s98_s25 = smov 40   ;;  %v79_v7 = vld [vmem:[%s149_s0 + $0x4] sm:$0x1]   ;;  %v80_v8 = vld [vmem:[%s149_s0 + $0x3] sm:$0x1]  }
   0x5   :  { %s99_s30 = smov 32   ;;  %s100_s2 = smov 24   ;;  %v81_v9 = vld [vmem:[%s149_s0 + $0x2] sm:$0x1]   ;;  %v82_v10 = vld [vmem:[%s149_s0 + $0x1] sm:$0x1]  }
   0x6   :  { %13 = vrot.lane.b32.xlu0 %v74_v2, %s95_s16  ;;  %25 = vrot.lane.b32.xlu1 %v76_v3, %s96_s17  ;;  %s101_s0 = smov 16   ;;  %s102_s7 = smov 8   ;;  %vm27_vm4 = vcmask 523712   ;;  %vm33_vm5 = vcmask 458112   ;;  %vm39_vm6 = vcmask 392512   ;;  %vm45_vm7 = vcmask 326912  }
   0x7   :  { %vm51_vm8 = vcmask 261312   ;;  %vm57_vm9 = vcmask 195712   ;;  %vm63_vm10 = vcmask 130112  }
   0xa   :  { %31 = vrot.lane.b32.xlu0 %v77_v5, %s97_s24  ;;  %37 = vrot.lane.b32.xlu1 %v78_v6, %s98_s25 }
   0xe   :  { %43 = vrot.lane.b32.xlu0 %v79_v7, %s99_s30  ;;  %49 = vrot.lane.b32.xlu1 %v80_v8, %s100_s2 }
  0x12   :  { %55 = vrot.lane.b32.xlu0 %v81_v9, %s101_s0  ;;  %61 = vrot.lane.b32.xlu1 %v82_v10, %s102_s7 }
  0x74   :  { %v8_v11 = vpop.permute.xlu0 %7   ;;  %v20_v12 = vpop.permute.xlu1 %19  }
  0x75   :  { %10 = vst.msk [vmem:[#allocation0] sm:$0x1] %vm9_vm1, %v8_v11  }
  0x78   :  { %v14_v13 = vpop.permute.xlu0 %13   ;;  %v26_v14 = vpop.permute.xlu1 %25  }
  0x79   :  { %16 = vst.msk [vmem:[#allocation0] sm:$0x1] %vm15_vm2, %v14_v13  }
  0x7a   :  { %22 = vst.msk [vmem:[#allocation0] sm:$0x1] %vm21_vm3, %v20_v12  }
  0x7b   :  { %28 = vst.msk [vmem:[#allocation0] sm:$0x1] %vm27_vm4, %v26_v14  }
  0x7c   :  { %v32_v15 = vpop.permute.xlu0 %31   ;;  %v38_v16 = vpop.permute.xlu1 %37  }
  0x7d   :  { %34 = vst.msk [vmem:[#allocation0] sm:$0x1] %vm33_vm5, %v32_v15  }
  0x7e   :  { %40 = vst.msk [vmem:[#allocation0] sm:$0x1] %vm39_vm6, %v38_v16  }
  0x80   :  { %v44_v17 = vpop.permute.xlu0 %43   ;;  %v50_v18 = vpop.permute.xlu1 %49  }
  0x81   :  { %46 = vst.msk [vmem:[#allocation0] sm:$0x1] %vm45_vm7, %v44_v17  }
  0x82   :  { %52 = vst.msk [vmem:[#allocation0] sm:$0x1] %vm51_vm8, %v50_v18  }
  0x84   :  { %v56_v19 = vpop.permute.xlu0 %55   ;;  %v62_v20 = vpop.permute.xlu1 %61  }
  0x85   :  { %58 = vst.msk [vmem:[#allocation0] sm:$0x1] %vm57_vm9, %v56_v19  }
  0x86   :  { %64 = vst.msk [vmem:[#allocation0] sm:$0x1] %vm63_vm10, %v62_v20  }
  0x8d   :  { %v69_v21 = vld [vmem:[#allocation0] sm:$0x1] }
  0x8e   :  { %72 = vst [vmem:[%s150_s1] sm:$0x1] %v69_v21 }

// kernel: convnet_forward.1
= control target key start
LH: loop header
LB: loop body
LE: loop exit
PB: predicated region body
PF: predicated region fallthrough
CT: control target
= control target key end

     0   :  { %vm82_vm0 = vcmask 1043456   ;;  %v15033_v3 = vmov 0.0   ;;  %vm69_vm1 = vcmask 228352   ;;  %vm450_vm2 = vcmask 1041408   ;;  %s20265_s1 = inlined_call_operand.vmem [shape: f32[3,28,208], index: 1, kind: input, shape index: {}]   ;;  %s20266_s0 = inlined_call_operand.vmem [shape: f32[8,28,28], index: 0, kind: input, shape index: {}]   ;;  %s20267_s4 = inlined_call_operand.vmem [shape: f32[2,208,104], index: 4, kind: input, shape index: {}]   ;;  %s20268_s2 = inlined_call_operand.vmem [shape: f32[1,208], index: 2, kind: input, shape index: {}]   ;;  %s20269_s3 = inlined_call_operand.vmem [shape: f32[2,13,26], index: 3, kind: input, shape index: {}]   ;;  %s20270_s5 = inlined_call_operand.vmem [shape: f32[3,104,88], index: 5, kind: input, shape index: {}]   ;;  %s20271_s8 = inlined_call_operand.vmem [shape: f32[2,88,40], index: 8, kind: input, shape index: {}]   ;;  %s20272_s6 = inlined_call_operand.vmem [shape: f32[1,88], index: 6, kind: input, shape index: {}]   ;;  %s20273_s7 = inlined_call_operand.vmem [shape: f32[2,5,11], index: 7, kind: input, shape index: {}]   ;;  %s20274_s9 = inlined_call_operand.vmem [shape: f32[5,40,64], index: 9, kind: input, shape index: {}]   ;;  %s20275_s11 = inlined_call_operand.vmem [shape: f32[64,10], index: 11, kind: input, shape index: {}]   ;;  %s20276_s10 = inlined_call_operand.vmem [shape: f32[1,64], index: 10, kind: input, shape index: {}]   ;;  %s20277_s12 = inlined_call_operand.vmem [shape: f32[1,10], index: 12, kind: input, shape index: {}]   ;;  %s20278_s13 = inlined_call_operand.vmem [shape: f32[8,10], index: 13, kind: output, shape index: {}]  }
   0x1   :  { %v11991_v0 = vld [vmem:[%s20265_s1 + $0x78] sm:$0xf]  ;;  %v11990_v2 = vld [vmem:[%s20265_s1 + $0x70] sm:$0xf]  ;;  %153 = vmatprep.mubr.f32.mxu0 %v15033_v3  ;;  %260 = vmatprep.mubr.f32.mxu1 %v15033_v3  ;;  %v11989_v5 = vld [vmem:[%s20265_s1 + $0x68] sm:$0xff]  ;;  %vm443_vm3 = vcmask 211968  }
   0x2   :  { %v55_v1 = vld [vmem:[%s20265_s1 + $0x38] sm:$0xf]  ;;  %11992 = vmatprep.subr.msk.mxu0 %vm82_vm0, %v11991_v0  ;;  %v54_v4 = vld [vmem:[%s20265_s1 + $0x30] sm:$0xf]  ;;  %v53_v6 = vld [vmem:[%s20265_s1 + $0x28] sm:$0xff]  ;;  %vm650_vm4 = vcmask 654336  }
   0x3   :  { %11998 = vmatprep.subr.msk.mxu1 %vm82_vm0, %v55_v1  ;;  %11993 = vmatpush1.msk.msra.mxu0 %vm82_vm0, %v11990_v2  ;;  %v11988_v7 = vld [vmem:[%s20265_s1 + $0x60] sm:$0xff]  ;;  %v11987_v9 = vld [vmem:[%s20265_s1 + $0x58] sm:$0xff]  ;;  %v11986_v11 = vld [vmem:[%s20265_s1 + $0x50] sm:$0xff]  ;;  %vm836_vm5 = vcmask 850944   ;;  %vm838_vm6 = vcmask 847872   ;;  %vm15034_vm7 = vmmov 0  }
   0x4   :  { %11999 = vmatpush1.msk.msra.mxu1 %vm82_vm0, %v54_v4  ;;  %v52_v8 = vld [vmem:[%s20265_s1 + $0x20] sm:$0xff]  ;;  %115 = vmatprep.subr.mxu0 %v11989_v5  ;;  %v51_v10 = vld [vmem:[%s20265_s1 + $0x18] sm:$0xff]  ;;  %v50_v12 = vld [vmem:[%s20265_s1 + $0x10] sm:$0xff]  ;;  %vm1148_vm8 = vcmask 1042432   ;;  %vm1144_vm9 = vcmask 89088   ;;  %vm1309_vm10 = vcmask 719872  }
   0x5   :  { %222 = vmatprep.subr.mxu1 %v53_v6  ;;  %116 = vmatpush1.msra.mxu0 %v11988_v7  ;;  %v11985_v13 = vld [vmem:[%s20265_s1 + $0x48] sm:$0xff]  ;;  %v11984_v15 = vld [vmem:[%s20265_s1 + $0x40] sm:$0xff]  ;;  %v12011_v19 = vld [vmem:[%s20265_s1 + $0xb8] sm:$0xf]  ;;  %vm1466_vm11 = vcmask 323584   ;;  %vm11353_vm12 = vcmask 1041409  }
   0x6   :  { %223 = vmatpush1.msra.mxu1 %v52_v8  ;;  %v49_v14 = vld [vmem:[%s20265_s1 + $0x8] sm:$0xff]  ;;  %117 = vmatprep.subr.mxu0 %v11987_v9  ;;  %v48_v16 = vld [vmem:[%s20265_s1] sm:$0xff]  ;;  %v12010_v20 = vld [vmem:[%s20265_s1 + $0xb0] sm:$0xf]  ;;  %v415_v8 = vlaneseq  ;;  %vm11356_vm13 = vcmask 1042434   ;;  %vm11359_vm14 = vcmask 1043459  }
   0x7   :  { %224 = vmatprep.subr.mxu1 %v51_v10  ;;  %118 = vmatpush1.msra.mxu0 %v11986_v11  ;;  %v56_v17 = vld [vmem:[%s20266_s0 + $0x1] sm:$0xff]  ;;  %v57_v21 = vld [vmem:[%s20266_s0 + $0x9] sm:$0xff]  ;;  %v58_v25 = vld [vmem:[%s20266_s0 + $0x11] sm:$0xff]  ;;  %vm11362_vm15 = vcmask 1044484  }
   0x8   :  { %225 = vmatpush1.msra.mxu1 %v50_v12  ;;  %v44_v18 = vld [vmem:[%s20266_s0] sm:$0xff]  ;;  %119 = vmatprep.subr.mxu0 %v11985_v13  ;;  %v45_v22 = vld [vmem:[%s20266_s0 + $0x8] sm:$0xff]  ;;  %v46_v26 = vld [vmem:[%s20266_s0 + $0x10] sm:$0xff]  ;;  %v416_v12 = vshrl.u32 %v415_v8, 7 }
   0x9   :  { %226 = vmatprep.subr.mxu1 %v49_v14  ;;  %120 = vmatpush1.msra.mxu0 %v11984_v15  ;;  %v12009_v23 = vld [vmem:[%s20265_s1 + $0xa8] sm:$0xff]  ;;  %v12008_v24 = vld [vmem:[%s20265_s1 + $0xa0] sm:$0xff]  ;;  %v12007_v27 = vld [vmem:[%s20265_s1 + $0x98] sm:$0xff] }
   0xa   :  { %227 = vmatpush1.msra.mxu1 %v48_v16  ;;  %11994 = vmatmul.mubr.msk.f32.vlgmr.msra.gmra.mxu0 %vm69_vm1, %v56_v17  ;;  %v12006_v28 = vld [vmem:[%s20265_s1 + $0x90] sm:$0xff]  ;;  %v59_v29 = vld [vmem:[%s20266_s0 + $0x19] sm:$0x3]  ;;  %v12005_v31 = vld [vmem:[%s20265_s1 + $0x88] sm:$0xff]  ;;  %v15321_v16 = vsub.s32 0, %v416_v12 }
   0xb   :  { %12000 = vmatmul.mubr.msk.f32.vlgmr.msra.gmra.mxu1 %vm69_vm1, %v44_v18  ;;  %159 = vmatprep.mubr.f32.mxu0 %v15033_v3  ;;  %v47_v30 = vld [vmem:[%s20266_s0 + $0x18] sm:$0x3]  ;;  %v12004_v32 = vld [vmem:[%s20265_s1 + $0x80] sm:$0xff]  ;;  %v286_v34 = vld [vmem:[%s20266_s0 + $0xa] sm:$0xff] }
   0xc   :  { %266 = vmatprep.mubr.f32.mxu1 %v15033_v3  ;;  %12012 = vmatprep.subr.msk.mxu0 %vm82_vm0, %v12011_v19  ;;  %v285_v33 = vld [vmem:[%s20266_s0 + $0x2] sm:$0xff]  ;;  %v287_v35 = vld [vmem:[%s20266_s0 + $0x12] sm:$0xff]  ;;  %v288_v36 = vld [vmem:[%s20266_s0 + $0x1a] sm:$0x3] }
   0xd   :  { %12013 = vmatpush1.msk.msra.mxu0 %vm82_vm0, %v12010_v20  ;;  %v639_v37 = vld [vmem:[%s20267_s4 + $0x78] sm:$0xff]  ;;  %v638_v38 = vld [vmem:[%s20267_s4 + $0x70] sm:$0xff]  ;;  %v637_v39 = vld [vmem:[%s20267_s4 + $0x68] sm:$0xff] }
   0xe   :  { %11995 = vmatmul.mubr.msk.f32.gmra.mxu0 %vm69_vm1, %v57_v21  ;;  %342 = vmatprep.subr.mxu0 %v12009_v23  ;;  %v636_v40 = vld [vmem:[%s20267_s4 + $0x60] sm:$0xff]  ;;  %v635_v41 = vld [vmem:[%s20267_s4 + $0x58] sm:$0xff]  ;;  %v634_v42 = vld [vmem:[%s20267_s4 + $0x50] sm:$0xff]  ;;  %v15326_v21 = vsub.s32 1, %v416_v12 }
   0xf   :  { %12001 = vmatmul.mubr.msk.f32.gmra.mxu1 %vm69_vm1, %v45_v22  ;;  %165 = vmatprep.mubr.f32.mxu0 %v15033_v3  ;;  %v633_v43 = vld [vmem:[%s20267_s4 + $0x48] sm:$0xff]  ;;  %v632_v44 = vld [vmem:[%s20267_s4 + $0x40] sm:$0xff]  ;;  %v631_v45 = vld [vmem:[%s20267_s4 + $0x38] sm:$0xff] }
  0x10   :  { %272 = vmatprep.mubr.f32.mxu1 %v15033_v3  ;;  %343 = vmatpush1.msra.mxu0 %v12008_v24  ;;  %v630_v46 = vld [vmem:[%s20267_s4 + $0x30] sm:$0xff]  ;;  %v629_v47 = vld [vmem:[%s20267_s4 + $0x28] sm:$0xff]  ;;  %v628_v48 = vld [vmem:[%s20267_s4 + $0x20] sm:$0xff] }
  0x11   :  { %344 = vmatprep.subr.mxu0 %v12007_v27  ;;  %v627_v49 = vld [vmem:[%s20267_s4 + $0x18] sm:$0xff]  ;;  %v626_v50 = vld [vmem:[%s20267_s4 + $0x10] sm:$0xff]  ;;  %v625_v51 = vld [vmem:[%s20267_s4 + $0x8] sm:$0xff] }
  0x12   :  { %11996 = vmatmul.mubr.msk.f32.gmra.mxu0 %vm69_vm1, %v58_v25  ;;  %v624_v52 = vld [vmem:[%s20267_s4] sm:$0xff]  ;;  %v649_v53 = vld [vmem:[%s20267_s4 + $0xc8] sm:$0xff]  ;;  %v647_v55 = vld [vmem:[%s20267_s4 + $0xb8] sm:$0xff] }
  0x13   :  { %12002 = vmatmul.mubr.msk.f32.gmra.mxu1 %vm69_vm1, %v46_v26  ;;  %171 = vmatprep.mubr.f32.mxu0 %v15033_v3  ;;  %v648_v54 = vld [vmem:[%s20267_s4 + $0xc0] sm:$0xff]  ;;  %v12034_v8 = vld [vmem:[%s20267_s4 + $0xf0] sm:$0xff] }
  0x14   :  { %278 = vmatprep.mubr.f32.mxu1 %v15033_v3  ;;  %345 = vmatpush1.msra.mxu0 %v12006_v28  ;;  %v413_v20 = vld [vmem:[%s20268_s2] sm:$0x3]  ;;  %v12030_v12 = vld [vmem:[%s20267_s4 + $0xd0] sm:$0xff] }
  0x15   :  { %346 = vmatprep.subr.mxu0 %v12005_v31 }
  0x16   :  { %11997 = vmatmul.mubr.msk.f32.gmra.mxu0 %vm69_vm1, %v59_v29  ;;  %v418_v29 = vrot.slane %v413_v20, %v15321_v16 }
  0x17   :  { %12003 = vmatmul.mubr.msk.f32.gmra.mxu1 %vm69_vm1, %v47_v30  ;;  %380 = vmatprep.mubr.f32.mxu0 %v15033_v3 }
  0x18   :  { %347 = vmatpush1.msra.mxu0 %v12004_v32  ;;  %521 = vmatprep.mubr.f32.mxu1 %v15033_v3 }
  0x19   :  { %657 = vmatprep.subr.mxu0 %v15033_v3 }
  0x1a   :  { %12014 = vmatmul.mubr.msk.f32.vlgmr.msra.gmra.mxu0 %vm69_vm1, %v285_v33  ;;  %v422_v33 = vrot.slane %v413_v20, %v15326_v21  ;;  %v12051_v20 = vld [vmem:[%s20267_s4 + $0x178] sm:$0xff] }
  0x1b   :  { %386 = vmatprep.mubr.f32.mxu0 %v15033_v3  ;;  %658 = vmatpush1.msra.mxu0 %v639_v37 }
  0x1c   :  { %659 = vmatprep.subr.mxu0 %v15033_v3 }
  0x1d   :  { %660 = vmatpush1.msra.mxu0 %v638_v38 }
  0x1e   :  { %12015 = vmatmul.mubr.msk.f32.gmra.mxu0 %vm69_vm1, %v286_v34  ;;  %661 = vmatprep.subr.mxu0 %v15033_v3 }
  0x1f   :  { %392 = vmatprep.mubr.f32.mxu0 %v15033_v3  ;;  %662 = vmatpush1.msra.mxu0 %v637_v39 }
  0x20   :  { %663 = vmatprep.subr.mxu0 %v15033_v3 }
  0x21   :  { %664 = vmatpush1.msra.mxu0 %v636_v40 }
  0x22   :  { %12016 = vmatmul.mubr.msk.f32.gmra.mxu0 %vm69_vm1, %v287_v35  ;;  %665 = vmatprep.subr.mxu0 %v15033_v3 }
  0x23   :  { %398 = vmatprep.mubr.f32.mxu0 %v15033_v3  ;;  %666 = vmatpush1.msra.mxu0 %v635_v41 }
  0x24   :  { %667 = vmatprep.subr.mxu0 %v15033_v3 }
  0x25   :  { %668 = vmatpush1.msra.mxu0 %v634_v42 }
  0x26   :  { %12017 = vmatmul.mubr.msk.f32.gmra.mxu0 %vm69_vm1, %v288_v36  ;;  %669 = vmatprep.subr.mxu0 %v15033_v3 }
  0x27   :  { %670 = vmatpush1.msra.mxu0 %v633_v43 }
  0x28   :  { %671 = vmatprep.subr.mxu0 %v15033_v3 }
  0x29   :  { %672 = vmatpush1.msra.mxu0 %v632_v44 }
  0x2a   :  { %673 = vmatprep.subr.mxu0 %v15033_v3 }
  0x2b   :  { %674 = vmatpush1.msra.mxu0 %v631_v45 }
  0x2c   :  { %675 = vmatprep.subr.mxu0 %v15033_v3 }
  0x2d   :  { %676 = vmatpush1.msra.mxu0 %v630_v46 }
  0x2e   :  { %677 = vmatprep.subr.mxu0 %v15033_v3 }
  0x2f   :  { %678 = vmatpush1.msra.mxu0 %v629_v47 }
  0x30   :  { %679 = vmatprep.subr.mxu0 %v15033_v3 }
  0x31   :  { %680 = vmatpush1.msra.mxu0 %v628_v48 }
  0x32   :  { %681 = vmatprep.subr.mxu0 %v15033_v3 }
  0x33   :  { %682 = vmatpush1.msra.mxu0 %v627_v49 }
  0x34   :  { %683 = vmatprep.subr.mxu0 %v15033_v3 }
  0x35   :  { %684 = vmatpush1.msra.mxu0 %v626_v50 }
  0x36   :  { %685 = vmatprep.subr.mxu0 %v15033_v3 }
  0x37   :  { %686 = vmatpush1.msra.mxu0 %v625_v51 }
  0x38   :  { %687 = vmatprep.subr.mxu0 %v15033_v3 }
  0x39   :  { %688 = vmatpush1.msra.mxu0 %v624_v52 }
  0x3a   :  { %701 = vmatprep.subr.mxu0 %v15033_v3 }
  0x3b   :  { %702 = vmatpush2.msra.mxu0 %v649_v53 }
  0x3c   :  { %703 = vmatprep.subr.mxu0 %v15033_v3 }
  0x3d   :  { %704 = vmatpush2.msra.mxu0 %v648_v54 }
  0x3e   :  { %705 = vmatprep.subr.mxu0 %v15033_v3 }
  0x3f   :  { %706 = vmatpush2.msra.mxu0 %v647_v55 }
  0x40   :  { %707 = vmatprep.subr.mxu0 %v15033_v3 }
  0xca   :  { %v155_v56 = vpop.f32.mrf.mxu0 }
  0xcb   :  { %v262_v57 = vpop.f32.mrf.mxu1 }
  0xcc   :  { %v157_v58 = vpop.f32.mrf.mxu0  ;;  %v263_v36 = vadd.f32 %v262_v57, %v155_v56  ;;  %v441_v56 = vld [vmem:[%s20269_s3] sm:$0xff]  ;;  %v442_v57 = vld [vmem:[%s20269_s3 + $0x8] sm:$0x1f] }
  0xcd   :  { %v264_v59 = vpop.f32.mrf.mxu1 }
  0xce   :  { %v161_v60 = vpop.f32.mrf.mxu0  ;;  %v265_v32 = vadd.f32 %v264_v59, %v157_v58  ;;  %v12022_v58 = vld [vmem:[%s20269_s3 + $0x10] sm:$0xff]  ;;  %v12045_v59 = vld [vmem:[%s20267_s4 + $0x148] sm:$0xff] }
  0xcf   :  { %v268_v61 = vpop.f32.mrf.mxu1 }
  0xd0   :  { %v163_v62 = vpop.f32.mrf.mxu0  ;;  %v269_v28 = vadd.f32 %v268_v61, %v161_v60  ;;  %v12044_v60 = vld [vmem:[%s20267_s4 + $0x140] sm:$0xff]  ;;  %v12023_v61 = vld [vmem:[%s20269_s3 + $0x18] sm:$0x1f] }
  0xd1   :  { %v270_v0 = vpop.f32.mrf.mxu1 }
  0xd2   :  { %v167_v63 = vpop.f32.mrf.mxu0  ;;  %v271_v24 = vadd.f32 %v270_v0, %v163_v62  ;;  %v12043_v62 = vld [vmem:[%s20267_s4 + $0x138] sm:$0xff]  ;;  %v12041_v0 = vld [vmem:[%s20267_s4 + $0x128] sm:$0xff] }
  0xd3   :  { %v274_v4 = vpop.f32.mrf.mxu1 }
  0xd4   :  { %v169_v1 = vpop.f32.mrf.mxu0  ;;  %v275_v22 = vadd.f32 %v274_v4, %v167_v63  ;;  %v12042_v63 = vld [vmem:[%s20267_s4 + $0x130] sm:$0xff] }
  0xd5   :  { %v276_v7 = vpop.f32.mrf.mxu1  ;;  %v12038_v4 = vld [vmem:[%s20267_s4 + $0x110] sm:$0xff] }
  0xd6   :  { %v173_v2 = vpop.f32.mrf.mxu0  ;;  %v277_v18 = vadd.f32 %v276_v7, %v169_v1  ;;  %v12040_v1 = vld [vmem:[%s20267_s4 + $0x120] sm:$0xff]  ;;  %v12035_v7 = vld [vmem:[%s20267_s4 + $0xf8] sm:$0xff] }
  0xd7   :  { %v280_v11 = vpop.f32.mrf.mxu1 }
  0xd8   :  { %v175_v5 = vpop.f32.mrf.mxu0  ;;  %v281_v19 = vadd.f32 %v280_v11, %v173_v2  ;;  %v12039_v2 = vld [vmem:[%s20267_s4 + $0x118] sm:$0xff] }
  0xd9   :  { %v282_v15 = vpop.f32.mrf.mxu1  ;;  %v12031_v11 = vld [vmem:[%s20267_s4 + $0xd8] sm:$0xff] }
  0xda   :  { %v382_v6 = vpop.f32.mrf.mxu0  ;;  %v283_v25 = vadd.f32 %v282_v15, %v175_v5  ;;  %v12037_v5 = vld [vmem:[%s20267_s4 + $0x108] sm:$0xff] }
  0xdb   :  { %v405_v42 = vadd.f32 %v382_v6, %v263_v36  ;;  %v12036_v6 = vld [vmem:[%s20267_s4 + $0x100] sm:$0xff]  ;;  %v12053_v15 = vld [vmem:[%s20267_s4 + $0x188] sm:$0xff] }
  0xdc   :  { %v384_v9 = vpop.f32.mrf.mxu0 }
  0xdd   :  { %v406_v39 = vadd.f32 %v384_v9, %v265_v32  ;;  %v425_v50 = vadd.f32 %v418_v29, %v405_v42  ;;  %v12033_v9 = vld [vmem:[%s20267_s4 + $0xe8] sm:$0xff] }
  0xde   :  { %v388_v10 = vpop.f32.mrf.mxu0  ;;  %v12070_v32 = vld [vmem:[%s20270_s5 + $0xc8] sm:$0xff] }
  0xdf   :  { %v407_v37 = vadd.f32 %v388_v10, %v269_v28  ;;  %v426_v48 = vadd.f32 %v422_v33, %v406_v39  ;;  %v433_v55 = vmax.f32 %v425_v50, 0.0  ;;  %v12032_v10 = vld [vmem:[%s20267_s4 + $0xe0] sm:$0xff]  ;;  %v641_v28 = vld [vmem:[%s20267_s4 + $0x88] sm:$0xff]  ;;  %v12067_v50 = vld [vmem:[%s20270_s5 + $0xb0] sm:$0xff] }
  0xe0   :  { %v390_v13 = vpop.f32.mrf.mxu0 }
  0xe1   :  { %v408_v34 = vadd.f32 %v390_v13, %v271_v24  ;;  %v427_v46 = vadd.f32 %v418_v29, %v407_v37  ;;  %v434_v54 = vmax.f32 %v426_v48, 0.0  ;;  %v12055_v13 = vld [vmem:[%s20267_s4 + $0x198] sm:$0xff] }
  0xe2   :  { %v394_v14 = vpop.f32.mrf.mxu0  ;;  %v643_v24 = vld [vmem:[%s20267_s4 + $0x98] sm:$0xff] }
  0xe3   :  { %v409_v30 = vadd.f32 %v394_v14, %v275_v22  ;;  %v428_v44 = vadd.f32 %v422_v33, %v408_v34  ;;  %v435_v53 = vmax.f32 %v427_v46, 0.0  ;;  %v12054_v14 = vld [vmem:[%s20267_s4 + $0x190] sm:$0xff]  ;;  %v644_v22 = vld [vmem:[%s20267_s4 + $0xa0] sm:$0xff]  ;;  %v12068_v48 = vld [vmem:[%s20270_s5 + $0xb8] sm:$0xff] }
  0xe4   :  { %v396_v17 = vpop.f32.mrf.mxu0 }
  0xe5   :  { %v410_v26 = vadd.f32 %v396_v17, %v277_v18  ;;  %v429_v43 = vadd.f32 %v418_v29, %v409_v30  ;;  %v436_v52 = vmax.f32 %v428_v44, 0.0  ;;  %v646_v17 = vld [vmem:[%s20267_s4 + $0xb0] sm:$0xff]  ;;  %v12052_v18 = vld [vmem:[%s20267_s4 + $0x180] sm:$0xff]  ;;  %v853_v44 = vld [vmem:[%s20270_s5 + $0x58] sm:$0xff] }
  0xe6   :  { %v400_v23 = vpop.f32.mrf.mxu0  ;;  %708 = vmatpush2.msra.mxu0 %v646_v17  ;;  %v640_v30 = vld [vmem:[%s20267_s4 + $0x80] sm:$0xff] }
  0xe7   :  { %v411_v27 = vadd.f32 %v400_v23, %v281_v19  ;;  %v430_v40 = vadd.f32 %v422_v33, %v410_v26  ;;  %v437_v51 = vmax.f32 %v429_v43, 0.0  ;;  %709 = vmatprep.subr.mxu0 %v15033_v3  ;;  %v645_v19 = vld [vmem:[%s20267_s4 + $0xa8] sm:$0xff]  ;;  %v12050_v23 = vld [vmem:[%s20267_s4 + $0x170] sm:$0xff]  ;;  %v12069_v43 = vld [vmem:[%s20270_s5 + $0xc0] sm:$0xff] }
  0xe8   :  { %v402_v31 = vpop.f32.mrf.mxu0  ;;  %710 = vmatpush2.msra.mxu0 %v645_v19  ;;  %v642_v26 = vld [vmem:[%s20267_s4 + $0x90] sm:$0xff] }
  0xe9   :  { %v412_v35 = vadd.f32 %v402_v31, %v283_v25  ;;  %v431_v38 = vadd.f32 %v418_v29, %v411_v27  ;;  %v438_v49 = vmax.f32 %v430_v40, 0.0  ;;  %711 = vmatprep.subr.mxu0 %v15033_v3  ;;  %v12049_v25 = vld [vmem:[%s20267_s4 + $0x168] sm:$0xff]  ;;  %v12048_v27 = vld [vmem:[%s20267_s4 + $0x160] sm:$0xff]  ;;  %v12047_v29 = vld [vmem:[%s20267_s4 + $0x158] sm:$0xff] }
  0xea   :  { %712 = vmatpush2.msra.mxu0 %v644_v22  ;;  %v12046_v31 = vld [vmem:[%s20267_s4 + $0x150] sm:$0xff] }
  0xeb   :  { %v432_v41 = vadd.f32 %v422_v33, %v412_v35  ;;  %v439_v47 = vmax.f32 %v431_v38, 0.0  ;;  %713 = vmatprep.subr.mxu0 %v15033_v3  ;;  %v854_v33 = vld [vmem:[%s20270_s5 + $0x60] sm:$0xff] }
  0xec   :  { %714 = vmatpush2.msra.mxu0 %v643_v24  ;;  %v12086_v24 = vld [vmem:[%s20270_s5 + $0x128] sm:$0xff] }
  0xed   :  { %v440_v45 = vmax.f32 %v432_v41, 0.0  ;;  %715 = vmatprep.subr.mxu0 %v15033_v3 }
  0xee   :  { %716 = vmatpush2.msra.mxu0 %v642_v26  ;;  %v12085_v26 = vld [vmem:[%s20270_s5 + $0x120] sm:$0xff] }
  0xef   :  { %12018 = vmatprep.subr.msk.mxu1 %vm450_vm2, %v440_v45  ;;  %717 = vmatprep.subr.mxu0 %v15033_v3 }
  0xf0   :  { %12019 = vmatpush1.msk.msra.mxu1 %vm450_vm2, %v439_v47  ;;  %718 = vmatpush2.msra.mxu0 %v641_v28  ;;  %v12083_v28 = vld [vmem:[%s20270_s5 + $0x110] sm:$0xff] }
  0xf1   :  { %483 = vmatprep.subr.mxu1 %v438_v49  ;;  %719 = vmatprep.subr.mxu0 %v15033_v3 }
  0xf2   :  { %484 = vmatpush1.msra.mxu1 %v437_v51  ;;  %720 = vmatpush2.msra.mxu0 %v640_v30  ;;  %v12081_v30 = vld [vmem:[%s20270_s5 + $0x100] sm:$0xff] }
  0xf3   :  { %485 = vmatprep.subr.mxu1 %v436_v52  ;;  %13735 = vmatprep.subr.mxu0 %v12070_v32 }
  0xf4   :  { %486 = vmatpush1.msra.mxu1 %v435_v53 }
  0xf5   :  { %487 = vmatprep.subr.mxu1 %v434_v54 }
  0xf6   :  { %488 = vmatpush1.msra.mxu1 %v433_v55 }
  0xf7   :  { %12020 = vmatmul.mubr.msk.f32.vlgmr.msra.gmra.mxu1 %vm443_vm3, %v441_v56  ;;  %12024 = vmatprep.subr.msk.mxu1 %vm450_vm2, %v440_v45  ;;  %v12064_v56 = vld [vmem:[%s20270_s5 + $0x98] sm:$0xff] }
  0xf8   :  { %12025 = vmatpush1.msk.msra.mxu1 %vm450_vm2, %v439_v47  ;;  %527 = vmatprep.mubr.f32.mxu1 %v15033_v3 }
  0xf9   :  { %569 = vmatprep.subr.mxu1 %v438_v49  ;;  %v852_v49 = vld [vmem:[%s20270_s5 + $0x50] sm:$0xff] }
  0xfa   :  { %570 = vmatpush1.msra.mxu1 %v437_v51  ;;  %v851_v51 = vld [vmem:[%s20270_s5 + $0x48] sm:$0xff] }
  0xfb   :  { %12021 = vmatmul.mubr.msk.f32.gmra.mxu1 %vm443_vm3, %v442_v57  ;;  %571 = vmatprep.subr.mxu1 %v436_v52  ;;  %v12066_v52 = vld [vmem:[%s20270_s5 + $0xa8] sm:$0xff]  ;;  %v848_v57 = vld [vmem:[%s20270_s5 + $0x30] sm:$0xff] }
  0xfc   :  { %572 = vmatpush1.msra.mxu1 %v435_v53  ;;  %607 = vmatprep.mubr.f32.mxu1 %v15033_v3  ;;  %v850_v53 = vld [vmem:[%s20270_s5 + $0x40] sm:$0xff] }
  0xfd   :  { %573 = vmatprep.subr.mxu1 %v434_v54  ;;  %v12065_v54 = vld [vmem:[%s20270_s5 + $0xa0] sm:$0xff] }
  0xfe   :  { %574 = vmatpush1.msra.mxu1 %v433_v55  ;;  %v849_v55 = vld [vmem:[%s20270_s5 + $0x38] sm:$0xff] }
  0xff   :  { %12026 = vmatmul.mubr.msk.f32.vlgmr.msra.gmra.mxu1 %vm443_vm3, %v12022_v58  ;;  %759 = vmatprep.subr.mxu1 %v15033_v3  ;;  %v12063_v58 = vld [vmem:[%s20270_s5 + $0x90] sm:$0xff] }
 0x100   :  { %613 = vmatprep.mubr.f32.mxu1 %v15033_v3  ;;  %760 = vmatpush1.msra.mxu1 %v12045_v59  ;;  %v847_v59 = vld [vmem:[%s20270_s5 + $0x28] sm:$0xff] }
 0x101   :  { %761 = vmatprep.subr.mxu1 %v15033_v3 }
 0x102   :  { %762 = vmatpush1.msra.mxu1 %v12044_v60  ;;  %v12062_v60 = vld [vmem:[%s20270_s5 + $0x88] sm:$0xff] }
 0x103   :  { %12027 = vmatmul.mubr.msk.f32.gmra.mxu1 %vm443_vm3, %v12023_v61  ;;  %763 = vmatprep.subr.mxu1 %v15033_v3  ;;  %v846_v61 = vld [vmem:[%s20270_s5 + $0x20] sm:$0xff] }
 0x104   :  { %764 = vmatpush1.msra.mxu1 %v12043_v62  ;;  %v12061_v62 = vld [vmem:[%s20270_s5 + $0x80] sm:$0xff] }
 0x105   :  { %765 = vmatprep.subr.mxu1 %v15033_v3 }
 0x106   :  { %766 = vmatpush1.msra.mxu1 %v12042_v63  ;;  %v845_v63 = vld [vmem:[%s20270_s5 + $0x18] sm:$0xff] }
 0x107   :  { %767 = vmatprep.subr.mxu1 %v15033_v3 }
 0x108   :  { %768 = vmatpush1.msra.mxu1 %v12041_v0  ;;  %v12060_v0 = vld [vmem:[%s20270_s5 + $0x78] sm:$0xff] }
 0x109   :  { %769 = vmatprep.subr.mxu1 %v15033_v3 }
 0x10a   :  { %770 = vmatpush1.msra.mxu1 %v12040_v1  ;;  %v844_v1 = vld [vmem:[%s20270_s5 + $0x10] sm:$0xff] }
 0x10b   :  { %771 = vmatprep.subr.mxu1 %v15033_v3 }
 0x10c   :  { %772 = vmatpush1.msra.mxu1 %v12039_v2  ;;  %v12059_v2 = vld [vmem:[%s20270_s5 + $0x70] sm:$0xff] }
 0x10d   :  { %773 = vmatprep.subr.mxu1 %v15033_v3 }
 0x10e   :  { %774 = vmatpush1.msra.mxu1 %v12038_v4  ;;  %v843_v4 = vld [vmem:[%s20270_s5 + $0x8] sm:$0xff] }
 0x10f   :  { %775 = vmatprep.subr.mxu1 %v15033_v3 }
 0x110   :  { %776 = vmatpush1.msra.mxu1 %v12037_v5  ;;  %v12058_v5 = vld [vmem:[%s20270_s5 + $0x68] sm:$0xff] }
 0x111   :  { %777 = vmatprep.subr.mxu1 %v15033_v3 }
 0x112   :  { %778 = vmatpush1.msra.mxu1 %v12036_v6  ;;  %v842_v6 = vld [vmem:[%s20270_s5] sm:$0xff] }
 0x113   :  { %779 = vmatprep.subr.mxu1 %v15033_v3 }
 0x114   :  { %780 = vmatpush1.msra.mxu1 %v12035_v7  ;;  %v12087_v7 = vld [vmem:[%s20270_s5 + $0x130] sm:$0xff] }
 0x115   :  { %781 = vmatprep.subr.mxu1 %v15033_v3 }
 0x116   :  { %782 = vmatpush1.msra.mxu1 %v12034_v8 }
 0x117   :  { %783 = vmatprep.subr.mxu1 %v15033_v3 }
 0x118   :  { %784 = vmatpush1.msra.mxu1 %v12033_v9 }
 0x119   :  { %785 = vmatprep.subr.mxu1 %v15033_v3 }
 0x11a   :  { %786 = vmatpush1.msra.mxu1 %v12032_v10 }
 0x11b   :  { %787 = vmatprep.subr.mxu1 %v15033_v3 }
 0x11c   :  { %788 = vmatpush1.msra.mxu1 %v12031_v11 }
 0x11d   :  { %789 = vmatprep.subr.mxu1 %v15033_v3 }
 0x11e   :  { %790 = vmatpush1.msra.mxu1 %v12030_v12 }
 0x11f   :  { %803 = vmatprep.subr.mxu1 %v15033_v3 }
 0x120   :  { %804 = vmatpush2.msra.mxu1 %v12055_v13 }
 0x121   :  { %805 = vmatprep.subr.mxu1 %v15033_v3 }
 0x122   :  { %806 = vmatpush2.msra.mxu1 %v12054_v14 }
 0x123   :  { %807 = vmatprep.subr.mxu1 %v15033_v3 }
 0x124   :  { %808 = vmatpush2.msra.mxu1 %v12053_v15 }
 0x125   :  { %809 = vmatprep.subr.mxu1 %v15033_v3 }
 0x126   :  { %810 = vmatpush2.msra.mxu1 %v12052_v18 }
 0x127   :  { %811 = vmatprep.subr.mxu1 %v15033_v3 }
 0x128   :  { %812 = vmatpush2.msra.mxu1 %v12051_v20 }
 0x129   :  { %813 = vmatprep.subr.mxu1 %v15033_v3 }
 0x12a   :  { %814 = vmatpush2.msra.mxu1 %v12050_v23 }
 0x12b   :  { %815 = vmatprep.subr.mxu1 %v15033_v3 }
 0x12c   :  { %816 = vmatpush2.msra.mxu1 %v12049_v25 }
 0x12d   :  { %817 = vmatprep.subr.mxu1 %v15033_v3 }
 0x12e   :  { %818 = vmatpush2.msra.mxu1 %v12048_v27  ;;  %v12084_v27 = vld [vmem:[%s20270_s5 + $0x118] sm:$0xff] }
 0x12f   :  { %819 = vmatprep.subr.mxu1 %v15033_v3 }
 0x130   :  { %820 = vmatpush2.msra.mxu1 %v12047_v29  ;;  %v12082_v29 = vld [vmem:[%s20270_s5 + $0x108] sm:$0xff] }
 0x131   :  { %821 = vmatprep.subr.mxu1 %v15033_v3 }
 0x132   :  { %822 = vmatpush2.msra.mxu1 %v12046_v31  ;;  %v12080_v31 = vld [vmem:[%s20270_s5 + $0xf8] sm:$0xff] }
 0x133   :  { %13764 = vmatprep.subr.mxu1 %v854_v33 }
 0x1b7   :  { %v523_v34 = vpop.f32.mrf.mxu1 }
 0x1b9   :  { %v525_v35 = vpop.f32.mrf.mxu1 }
 0x1bb   :  { %v529_v36 = vpop.f32.mrf.mxu1 }
 0x1bd   :  { %v531_v37 = vpop.f32.mrf.mxu1 }
 0x1bf   :  { %v609_v38 = vpop.f32.mrf.mxu1 }
 0x1c0   :  { %v620_v41 = vmax.f32 %v523_v34, %v609_v38  ;;  %v12077_v34 = vld [vmem:[%s20270_s5 + $0xe0] sm:$0xff]  ;;  %v12107_v38 = vld [vmem:[%s20271_s8 + $0xa8] sm:$0xff] }
 0x1c1   :  { %v611_v39 = vpop.f32.mrf.mxu1 }
 0x1c2   :  { %v621_v40 = vmax.f32 %v525_v35, %v611_v39  ;;  %v12076_v35 = vld [vmem:[%s20270_s5 + $0xd8] sm:$0xff]  ;;  %v12106_v39 = vld [vmem:[%s20271_s8 + $0xa0] sm:$0xff] }
 0x1c3   :  { %v615_v42 = vpop.f32.mrf.mxu1 }
 0x1c4   :  { %12028 = vmatprep.mubr.msk.f32.mxu0 %vm650_vm4, %v621_v40  ;;  %12056 = vmatprep.mubr.msk.f32.mxu1 %vm650_vm4, %v621_v40  ;;  %v622_v47 = vmax.f32 %v529_v36, %v615_v42  ;;  %v12075_v36 = vld [vmem:[%s20270_s5 + $0xd0] sm:$0xff]  ;;  %v12105_v40 = vld [vmem:[%s20271_s8 + $0x98] sm:$0xff]  ;;  %v12103_v42 = vld [vmem:[%s20271_s8 + $0x88] sm:$0xff] }
 0x1c5   :  { %v617_v45 = vpop.f32.mrf.mxu1  ;;  %722 = vmatmul.mubr.f32.vlgmr.msra.gmra.mxu0 %v620_v41  ;;  %824 = vmatmul.mubr.f32.vlgmr.msra.gmra.mxu1 %v620_v41  ;;  %v12104_v41 = vld [vmem:[%s20271_s8 + $0x90] sm:$0xff] }
 0x1c6   :  { %v623_v46 = vmax.f32 %v531_v37, %v617_v45  ;;  %13736 = vmatpush3.msra.mxu0 %v12070_v32  ;;  %13765 = vmatpush3.msra.mxu1 %v854_v33  ;;  %v12079_v32 = vld [vmem:[%s20270_s5 + $0xf0] sm:$0xff]  ;;  %v12078_v33 = vld [vmem:[%s20270_s5 + $0xe8] sm:$0xff] }
 0x1c7   :  { %13737 = vmatprep.subr.mxu0 %v12069_v43  ;;  %13766 = vmatprep.subr.mxu1 %v853_v44  ;;  %v12100_v45 = vld [vmem:[%s20271_s8 + $0x70] sm:$0xff] }
 0x1c8   :  { %12029 = vmatprep.mubr.msk.f32.mxu0 %vm650_vm4, %v623_v46  ;;  %12057 = vmatprep.mubr.msk.f32.mxu1 %vm650_vm4, %v623_v46 }
 0x1c9   :  { %727 = vmatmul.mubr.f32.gmra.mxu0 %v622_v47  ;;  %829 = vmatmul.mubr.f32.gmra.mxu1 %v622_v47 }
 0x1ca   :  { %13738 = vmatpush3.msra.mxu0 %v12069_v43  ;;  %13767 = vmatpush3.msra.mxu1 %v853_v44  ;;  %v12102_v43 = vld [vmem:[%s20271_s8 + $0x80] sm:$0xff]  ;;  %v12101_v44 = vld [vmem:[%s20271_s8 + $0x78] sm:$0xff] }
 0x1cb   :  { %13739 = vmatprep.subr.mxu0 %v12068_v48  ;;  %13768 = vmatprep.subr.mxu1 %v852_v49 }
 0x1cc   :  { %13740 = vmatpush3.msra.mxu0 %v12068_v48  ;;  %13769 = vmatpush3.msra.mxu1 %v852_v49 }
 0x1cd   :  { %13741 = vmatprep.subr.mxu0 %v12067_v50  ;;  %13770 = vmatprep.subr.mxu1 %v851_v51 }
 0x1ce   :  { %13742 = vmatpush3.msra.mxu0 %v12067_v50  ;;  %13771 = vmatpush3.msra.mxu1 %v851_v51 }
 0x1cf   :  { %13743 = vmatprep.subr.mxu0 %v12066_v52  ;;  %13772 = vmatprep.subr.mxu1 %v850_v53 }
 0x1d0   :  { %13744 = vmatpush3.msra.mxu0 %v12066_v52  ;;  %13773 = vmatpush3.msra.mxu1 %v850_v53  ;;  %v12090_v52 = vld [vmem:[%s20272_s6] ss:$0 sm:$0xff] }
 0x1d1   :  { %13745 = vmatprep.subr.mxu0 %v12065_v54  ;;  %13774 = vmatprep.subr.mxu1 %v849_v55 }
 0x1d2   :  { %13746 = vmatpush3.msra.mxu0 %v12065_v54  ;;  %13775 = vmatpush3.msra.mxu1 %v849_v55 }
 0x1d3   :  { %13747 = vmatprep.subr.mxu0 %v12064_v56  ;;  %13776 = vmatprep.subr.mxu1 %v848_v57 }
 0x1d4   :  { %13748 = vmatpush3.msra.mxu0 %v12064_v56  ;;  %13777 = vmatpush3.msra.mxu1 %v848_v57 }
 0x1d5   :  { %13749 = vmatprep.subr.mxu0 %v12063_v58  ;;  %13778 = vmatprep.subr.mxu1 %v847_v59 }
 0x1d6   :  { %13750 = vmatpush3.msra.mxu0 %v12063_v58  ;;  %13779 = vmatpush3.msra.mxu1 %v847_v59 }
 0x1d7   :  { %13751 = vmatprep.subr.mxu0 %v12062_v60  ;;  %13780 = vmatprep.subr.mxu1 %v846_v61 }
 0x1d8   :  { %13752 = vmatpush3.msra.mxu0 %v12062_v60  ;;  %13781 = vmatpush3.msra.mxu1 %v846_v61  ;;  %v1143_v61 = vld [vmem:[%s20273_s7] sm:$0x1f] }
 0x1d9   :  { %13753 = vmatprep.subr.mxu0 %v12061_v62  ;;  %13782 = vmatprep.subr.mxu1 %v845_v63 }
 0x1da   :  { %13754 = vmatpush3.msra.mxu0 %v12061_v62  ;;  %13783 = vmatpush3.msra.mxu1 %v845_v63  ;;  %v12093_v62 = vld [vmem:[%s20273_s7 + $0x8] sm:$0x1f]  ;;  %v1308_v63 = vld [vmem:[%s20271_s8 + $0x50] sm:$0xff] }
 0x1db   :  { %13755 = vmatprep.subr.mxu0 %v12060_v0  ;;  %13784 = vmatprep.subr.mxu1 %v844_v1 }
 0x1dc   :  { %13756 = vmatpush3.msra.mxu0 %v12060_v0  ;;  %13785 = vmatpush3.msra.mxu1 %v844_v1  ;;  %v1307_v0 = vld [vmem:[%s20271_s8 + $0x48] sm:$0xff]  ;;  %v1306_v1 = vld [vmem:[%s20271_s8 + $0x40] sm:$0xff] }
 0x1dd   :  { %13757 = vmatprep.subr.mxu0 %v12059_v2  ;;  %13786 = vmatprep.subr.mxu1 %v843_v4 }
 0x1de   :  { %13758 = vmatpush3.msra.mxu0 %v12059_v2  ;;  %13787 = vmatpush3.msra.mxu1 %v843_v4  ;;  %v1305_v2 = vld [vmem:[%s20271_s8 + $0x38] sm:$0xff]  ;;  %v1304_v4 = vld [vmem:[%s20271_s8 + $0x30] sm:$0xff] }
 0x1df   :  { %13759 = vmatprep.subr.mxu0 %v12058_v5  ;;  %13788 = vmatprep.subr.mxu1 %v842_v6 }
 0x1e0   :  { %13760 = vmatpush3.msra.mxu0 %v12058_v5  ;;  %13789 = vmatpush3.msra.mxu1 %v842_v6  ;;  %v1303_v5 = vld [vmem:[%s20271_s8 + $0x28] sm:$0xff]  ;;  %v1302_v6 = vld [vmem:[%s20271_s8 + $0x20] sm:$0xff] }
 0x1e1   :  { %13793 = vmatprep.subr.mxu0 %v12087_v7  ;;  %13822 = vmatprep.subr.mxu1 %v15033_v3 }
 0x285   :  { %v723_v8 = vpop.f32.mrf.mxu0  ;;  %v825_v9 = vpop.f32.mrf.mxu1 }
 0x286   :  { %v834_v10 = vmax.f32 %v723_v8, %v825_v9  ;;  %v1300_v8 = vld [vmem:[%s20271_s8 + $0x10] sm:$0xff]  ;;  %v12099_v9 = vld [vmem:[%s20271_s8 + $0x68] sm:$0xff] }
 0x287   :  { %v725_v11 = vpop.f32.mrf.mxu0  ;;  %v827_v12 = vpop.f32.mrf.mxu1 }
 0x288   :  { %837 = vst.msk [vmem:[#allocation2] sm:$0xff] %vm836_vm5, %v834_v10  ;;  %v1299_v10 = vld [vmem:[%s20271_s8 + $0x8] sm:$0xff]  ;;  %v12098_v11 = vld [vmem:[%s20271_s8 + $0x60] sm:$0xff] }
 0x289   :  { %v728_v13 = vpop.f32.mrf.mxu0  ;;  %v830_v14 = vpop.f32.mrf.mxu1  ;;  %v1298_v12 = vld [vmem:[%s20271_s8] sm:$0xff] }
 0x28a   :  { %v835_v15 = vmax.f32 %v728_v13, %v830_v14  ;;  %v12097_v13 = vld [vmem:[%s20271_s8 + $0x58] sm:$0xff] }
 0x28b   :  { %v730_v17 = vpop.f32.mrf.mxu0  ;;  %v832_v18 = vpop.f32.mrf.mxu1  ;;  %v12124_v14 = vld [vmem:[%s20265_s1 + $0x78] sm:$0xf] }
 0x28c   :  { %839 = vst.msk [vmem:[#allocation2 + $0x8] sm:$0x1f] %vm838_vm6, %v835_v15  ;;  %v1480_v15 = vld [vmem:[%s20265_s1 + $0x38] sm:$0xf] }
 0x28f   :  { %v840_v19 = vld [vmem:[#allocation2] sm:$0xff] }
 0x290   :  { %13790 = vmatprep.mubr.msk.f32.mxu1 %vm836_vm5, %v840_v19 }
 0x293   :  { %v855_v20 = vld [vmem:[#allocation2 + $0x1] sm:$0xff]  ;;  %v856_v23 = vld [vmem:[#allocation2 + $0x9] sm:$0x7] }
 0x294   :  { %v841_v22 = vld [vmem:[#allocation2 + $0x8] sm:$0x7]  ;;  %13761 = vmatprep.mubr.msk.f32.mxu0 %vm836_vm5, %v855_v20 }
 0x295   :  { %13791 = vmatmul.mubr.msk.f32.vlgmr.msra.gmra.mxu1 %vm836_vm5, %v841_v22  ;;  %v1033_v25 = vld [vmem:[#allocation2 + $0x2] sm:$0xff]  ;;  %13762 = vmatmul.mubr.msk.f32.vlgmr.msra.gmra.mxu0 %vm836_vm5, %v856_v23  ;;  %v1034_v37 = vld [vmem:[#allocation2 + $0xa] sm:$0x7]  ;;  %v12123_v22 = vld [vmem:[%s20265_s1 + $0x70] sm:$0xf] }
 0x296   :  { %13794 = vmatpush3.msra.mxu0 %v12087_v7  ;;  %13819 = vmatprep.mubr.msk.f32.mxu0 %vm836_vm5, %v1033_v25  ;;  %v1301_v7 = vld [vmem:[%s20271_s8 + $0x18] sm:$0xff]  ;;  %v1479_v23 = vld [vmem:[%s20265_s1 + $0x30] sm:$0xf]  ;;  %v12122_v25 = vld [vmem:[%s20265_s1 + $0x68] sm:$0xff] }
 0x297   :  { %13795 = vmatprep.subr.mxu0 %v12086_v24  ;;  %13826 = vmatprep.mubr.msk.f32.mxu1 %vm15034_vm7, %v15033_v3 }
 0x298   :  { %13796 = vmatpush3.msra.mxu0 %v12086_v24 }
 0x299   :  { %13797 = vmatprep.subr.mxu0 %v12085_v26 }
 0x29a   :  { %13798 = vmatpush3.msra.mxu0 %v12085_v26  ;;  %v1478_v26 = vld [vmem:[%s20265_s1 + $0x28] sm:$0xff] }
 0x29b   :  { %13799 = vmatprep.subr.mxu0 %v12084_v27 }
 0x29c   :  { %13800 = vmatpush3.msra.mxu0 %v12084_v27  ;;  %v12121_v27 = vld [vmem:[%s20265_s1 + $0x60] sm:$0xff] }
 0x29d   :  { %13801 = vmatprep.subr.mxu0 %v12083_v28 }
 0x29e   :  { %13802 = vmatpush3.msra.mxu0 %v12083_v28  ;;  %v1477_v28 = vld [vmem:[%s20265_s1 + $0x20] sm:$0xff] }
 0x29f   :  { %13803 = vmatprep.subr.mxu0 %v12082_v29 }
 0x2a0   :  { %13804 = vmatpush3.msra.mxu0 %v12082_v29  ;;  %v12120_v29 = vld [vmem:[%s20265_s1 + $0x58] sm:$0xff] }
 0x2a1   :  { %13805 = vmatprep.subr.mxu0 %v12081_v30 }
 0x2a2   :  { %13806 = vmatpush3.msra.mxu0 %v12081_v30  ;;  %v1476_v30 = vld [vmem:[%s20265_s1 + $0x18] sm:$0xff] }
 0x2a3   :  { %13807 = vmatprep.subr.mxu0 %v12080_v31 }
 0x2a4   :  { %13808 = vmatpush3.msra.mxu0 %v12080_v31  ;;  %v12119_v31 = vld [vmem:[%s20265_s1 + $0x50] sm:$0xff] }
 0x2a5   :  { %13809 = vmatprep.subr.mxu0 %v12079_v32 }
 0x2a6   :  { %13810 = vmatpush3.msra.mxu0 %v12079_v32  ;;  %v1475_v32 = vld [vmem:[%s20265_s1 + $0x10] sm:$0xff] }
 0x2a7   :  { %13811 = vmatprep.subr.mxu0 %v12078_v33 }
 0x2a8   :  { %13812 = vmatpush3.msra.mxu0 %v12078_v33  ;;  %v12118_v33 = vld [vmem:[%s20265_s1 + $0x48] sm:$0xff] }
 0x2a9   :  { %13813 = vmatprep.subr.mxu0 %v12077_v34 }
 0x2aa   :  { %13814 = vmatpush3.msra.mxu0 %v12077_v34  ;;  %v1474_v34 = vld [vmem:[%s20265_s1 + $0x8] sm:$0xff] }
 0x2ab   :  { %13815 = vmatprep.subr.mxu0 %v12076_v35 }
 0x2ac   :  { %13816 = vmatpush3.msra.mxu0 %v12076_v35  ;;  %v12117_v35 = vld [vmem:[%s20265_s1 + $0x40] sm:$0xff] }
 0x2ad   :  { %13817 = vmatprep.subr.mxu0 %v12075_v36 }
 0x2ae   :  { %13818 = vmatpush3.msra.mxu0 %v12075_v36  ;;  %v1473_v36 = vld [vmem:[%s20265_s1] sm:$0xff] }
 0x2af   :  { %13820 = vmatmul.mubr.msk.f32.vlgmr.msra.gmra.mxu0 %vm836_vm5, %v1034_v37  ;;  %13861 = vmatprep.subr.mxu0 %v15033_v3  ;;  %v12113_v37 = vld [vmem:[%s20266_s0 + $0x21] sm:$0xff] }
 0x2b0   :  { %13883 = vmatprep.mubr.msk.f32.mxu0 %vm15034_vm7, %v15033_v3  ;;  %13862 = vmatpush3.msra.mxu0 %v12107_v38  ;;  %v12109_v38 = vld [vmem:[%s20266_s0 + $0x20] sm:$0xff] }
 0x2b1   :  { %13863 = vmatprep.subr.mxu0 %v15033_v3 }
 0x2b2   :  { %13864 = vmatpush3.msra.mxu0 %v12106_v39  ;;  %v12148_v39 = vld [vmem:[%s20265_s1 + $0xb8] sm:$0xf] }
 0x2b3   :  { %13865 = vmatprep.subr.mxu0 %v15033_v3 }
 0x2b4   :  { %13866 = vmatpush3.msra.mxu0 %v12105_v40  ;;  %v12147_v40 = vld [vmem:[%s20265_s1 + $0xb0] sm:$0xf] }
 0x2b5   :  { %13867 = vmatprep.subr.mxu0 %v15033_v3 }
 0x2b6   :  { %13868 = vmatpush3.msra.mxu0 %v12104_v41  ;;  %v12114_v41 = vld [vmem:[%s20266_s0 + $0x29] sm:$0xff] }
 0x2b7   :  { %13869 = vmatprep.subr.mxu0 %v15033_v3 }
 0x2b8   :  { %13870 = vmatpush3.msra.mxu0 %v12103_v42  ;;  %v12110_v42 = vld [vmem:[%s20266_s0 + $0x28] sm:$0xff] }
 0x2b9   :  { %13871 = vmatprep.subr.mxu0 %v15033_v3 }
 0x2ba   :  { %13872 = vmatpush3.msra.mxu0 %v12102_v43  ;;  %v12146_v43 = vld [vmem:[%s20265_s1 + $0xa8] sm:$0xff] }
 0x2bb   :  { %13873 = vmatprep.subr.mxu0 %v15033_v3 }
 0x2bc   :  { %13874 = vmatpush3.msra.mxu0 %v12101_v44  ;;  %v12145_v44 = vld [vmem:[%s20265_s1 + $0xa0] sm:$0xff] }
 0x2bd   :  { %13875 = vmatprep.subr.mxu0 %v15033_v3 }
 0x2be   :  { %13876 = vmatpush3.msra.mxu0 %v12100_v45  ;;  %v12115_v45 = vld [vmem:[%s20266_s0 + $0x31] sm:$0xff] }
 0x2bf   :  { %13877 = vmatprep.subr.mxu0 %v15033_v3 }
 0x2c0   :  { %13878 = vmatpush3.msra.mxu0 %v12099_v9 }
 0x2c1   :  { %13879 = vmatprep.subr.mxu0 %v15033_v3 }
 0x2c2   :  { %13880 = vmatpush3.msra.mxu0 %v12098_v11 }
 0x2c3   :  { %13881 = vmatprep.subr.mxu0 %v15033_v3 }
 0x2c4   :  { %13882 = vmatpush3.msra.mxu0 %v12097_v13 }
 0x2c5   :  { %12131 = vmatprep.subr.msk.mxu0 %vm82_vm0, %v1480_v15 }
 0x355   :  { %v13792_v46 = vpop.f32.mrf.mxu1  ;;  %v13763_v47 = vpop.f32.mrf.mxu0 }
 0x356   :  { %v1030_v50 = vadd.f32 %v13792_v46, %v13763_v47  ;;  %v12111_v46 = vld [vmem:[%s20266_s0 + $0x30] sm:$0xff]  ;;  %v12144_v47 = vld [vmem:[%s20265_s1 + $0x98] sm:$0xff] }
 0x357   :  { %v1024_v48 = vpop.f32.mrf.mxu1  ;;  %v943_v49 = vpop.f32.mrf.mxu0 }
 0x358   :  { %v1025_v53 = vadd.f32 %v1024_v48, %v943_v49  ;;  %v12143_v48 = vld [vmem:[%s20265_s1 + $0x90] sm:$0xff]  ;;  %v12116_v49 = vld [vmem:[%s20266_s0 + $0x39] sm:$0x3] }
 0x36f   :  { %v13821_v51 = vpop.f32.mrf.mxu0 }
 0x370   :  { %v1131_v54 = vadd.f32 %v13821_v51, %v1030_v50  ;;  %v12112_v50 = vld [vmem:[%s20266_s0 + $0x38] sm:$0x3]  ;;  %v12142_v51 = vld [vmem:[%s20265_s1 + $0x88] sm:$0xff] }
 0x371   :  { %v1121_v55 = vpop.f32.mrf.mxu0 }
 0x372   :  { %v1140_v56 = vadd.f32 %v12090_v52, %v1131_v54  ;;  %v1130_v57 = vadd.f32 %v1121_v55, %v1025_v53  ;;  %v12137_v53 = vld [vmem:[%s20266_s0 + $0x22] sm:$0xff]  ;;  %v12138_v54 = vld [vmem:[%s20266_s0 + $0x2a] sm:$0xff]  ;;  %v12139_v55 = vld [vmem:[%s20266_s0 + $0x32] sm:$0xff] }
 0x374   :  { %v1142_v58 = vmax.f32 %v1140_v56, 0.0  ;;  %v1139_v59 = vadd.f32 %v12090_v52, %v1130_v57  ;;  %v12141_v52 = vld [vmem:[%s20265_s1 + $0x80] sm:$0xff]  ;;  %v12140_v56 = vld [vmem:[%s20266_s0 + $0x3a] sm:$0x3] }
 0x376   :  { %v1141_v60 = vmax.f32 %v1139_v59, 0.0  ;;  %13823 = vmatpush3.msk.msra.mxu1 %vm1148_vm8, %v1142_v58 }
 0x377   :  { %13824 = vmatprep.subr.mxu1 %v15033_v3 }
 0x378   :  { %13825 = vmatpush3.msra.mxu1 %v1141_v60 }
 0x379   :  { %13827 = vmatmul.mubr.msk.f32.vlgmr.msra.gmra.mxu1 %vm1144_vm9, %v1143_v61  ;;  %13829 = vmatprep.subr.mxu1 %v15033_v3 }
 0x37a   :  { %13830 = vmatpush3.msk.msra.mxu1 %vm1148_vm8, %v1142_v58  ;;  %13833 = vmatprep.mubr.msk.f32.mxu1 %vm15034_vm7, %v15033_v3 }
 0x37b   :  { %13831 = vmatprep.subr.mxu1 %v15033_v3 }
 0x37c   :  { %13832 = vmatpush3.msra.mxu1 %v1141_v60 }
 0x37d   :  { %13834 = vmatmul.mubr.msk.f32.vlgmr.msra.gmra.mxu1 %vm1144_vm9, %v12093_v62  ;;  %13836 = vmatprep.subr.mxu1 %v15033_v3 }
 0x37e   :  { %13837 = vmatpush3.msra.mxu1 %v1308_v63  ;;  %13858 = vmatprep.mubr.msk.f32.mxu1 %vm15034_vm7, %v15033_v3 }
 0x37f   :  { %13838 = vmatprep.subr.mxu1 %v15033_v3 }
 0x380   :  { %13839 = vmatpush3.msra.mxu1 %v1307_v0 }
 0x381   :  { %13840 = vmatprep.subr.mxu1 %v15033_v3 }
 0x382   :  { %13841 = vmatpush3.msra.mxu1 %v1306_v1 }
 0x383   :  { %13842 = vmatprep.subr.mxu1 %v15033_v3 }
 0x384   :  { %13843 = vmatpush3.msra.mxu1 %v1305_v2 }
 0x385   :  { %13844 = vmatprep.subr.mxu1 %v15033_v3 }
 0x386   :  { %13845 = vmatpush3.msra.mxu1 %v1304_v4 }
 0x387   :  { %13846 = vmatprep.subr.mxu1 %v15033_v3 }
 0x388   :  { %13847 = vmatpush3.msra.mxu1 %v1303_v5 }
 0x389   :  { %13848 = vmatprep.subr.mxu1 %v15033_v3 }
 0x38a   :  { %13849 = vmatpush3.msra.mxu1 %v1302_v6 }
 0x38b   :  { %13850 = vmatprep.subr.mxu1 %v15033_v3 }
 0x38c   :  { %13851 = vmatpush3.msra.mxu1 %v1301_v7 }
 0x38d   :  { %13852 = vmatprep.subr.mxu1 %v15033_v3 }
 0x38e   :  { %13853 = vmatpush3.msra.mxu1 %v1300_v8 }
 0x38f   :  { %13854 = vmatprep.subr.mxu1 %v15033_v3 }
 0x390   :  { %13855 = vmatpush3.msra.mxu1 %v1299_v10 }
 0x391   :  { %13856 = vmatprep.subr.mxu1 %v15033_v3 }
 0x392   :  { %13857 = vmatpush3.msra.mxu1 %v1298_v12 }
 0x393   :  { %12125 = vmatprep.subr.msk.mxu1 %vm82_vm0, %v12124_v14 }
 0x439   :  { %v1218_v17 = vpop.f32.mrf.mxu1 }
 0x43b   :  { %v13828_v18 = vpop.f32.mrf.mxu1 }
 0x43d   :  { %v1293_v19 = vpop.f32.mrf.mxu1 }
 0x43e   :  { %v1297_v20 = vmax.f32 %v1218_v17, %v1293_v19 }
 0x43f   :  { %v13835_v24 = vpop.f32.mrf.mxu1 }
 0x440   :  { %13859 = vmatmul.mubr.msk.f32.vlgmr.msra.gmra.mxu1 %vm1309_vm10, %v1297_v20  ;;  %13884 = vmatmul.mubr.msk.f32.vlgmr.msra.gmra.mxu0 %vm1309_vm10, %v1297_v20 }
 0x441   :  { %12126 = vmatpush1.msk.msra.mxu1 %vm82_vm0, %v12123_v22  ;;  %12132 = vmatpush1.msk.msra.mxu0 %vm82_vm0, %v1479_v23 }
 0x442   :  { %1537 = vmatprep.subr.mxu1 %v12122_v25  ;;  %1644 = vmatprep.subr.mxu0 %v1478_v26  ;;  %v1834_v25 = vld [vmem:[%s20268_s2] sm:$0x3] }
 0x443   :  { %1538 = vmatpush1.msra.mxu1 %v12121_v27  ;;  %1645 = vmatpush1.msra.mxu0 %v1477_v28 }
 0x444   :  { %1539 = vmatprep.subr.mxu1 %v12120_v29  ;;  %1646 = vmatprep.subr.mxu0 %v1476_v30 }
 0x445   :  { %1540 = vmatpush1.msra.mxu1 %v12119_v31  ;;  %1647 = vmatpush1.msra.mxu0 %v1475_v32 }
 0x446   :  { %1541 = vmatprep.subr.mxu1 %v12118_v33  ;;  %1648 = vmatprep.subr.mxu0 %v1474_v34  ;;  %v1839_v33 = vrot.slane %v1834_v25, %v15321_v16 }
 0x447   :  { %1542 = vmatpush1.msra.mxu1 %v12117_v35  ;;  %1575 = vmatprep.mubr.f32.mxu1 %v15033_v3 }
 0x448   :  { %1649 = vmatpush1.msra.mxu0 %v1473_v36  ;;  %1682 = vmatprep.mubr.f32.mxu0 %v15033_v3 }
 0x449   :  { %12127 = vmatmul.mubr.msk.f32.vlgmr.msra.gmra.mxu1 %vm69_vm1, %v12113_v37  ;;  %12133 = vmatmul.mubr.msk.f32.vlgmr.msra.gmra.mxu0 %vm69_vm1, %v12109_v38  ;;  %v1843_v37 = vrot.slane %v1834_v25, %v15326_v21  ;;  %v2046_v25 = vld [vmem:[%s20267_s4 + $0x20] sm:$0xff] }
 0x44a   :  { %1581 = vmatprep.mubr.f32.mxu1 %v15033_v3  ;;  %1688 = vmatprep.mubr.f32.mxu0 %v15033_v3 }
 0x44b   :  { %12149 = vmatprep.subr.msk.mxu1 %vm82_vm0, %v12148_v39 }
 0x44c   :  { %12150 = vmatpush1.msk.msra.mxu1 %vm82_vm0, %v12147_v40 }
 0x44d   :  { %12128 = vmatmul.mubr.msk.f32.gmra.mxu1 %vm69_vm1, %v12114_v41  ;;  %12134 = vmatmul.mubr.msk.f32.gmra.mxu0 %vm69_vm1, %v12110_v42 }
 0x44e   :  { %1587 = vmatprep.mubr.f32.mxu1 %v15033_v3  ;;  %1694 = vmatprep.mubr.f32.mxu0 %v15033_v3 }
 0x44f   :  { %1763 = vmatprep.subr.mxu1 %v12146_v43 }
 0x450   :  { %1764 = vmatpush1.msra.mxu1 %v12145_v44 }
 0x451   :  { %12129 = vmatmul.mubr.msk.f32.gmra.mxu1 %vm69_vm1, %v12115_v45  ;;  %12135 = vmatmul.mubr.msk.f32.gmra.mxu0 %vm69_vm1, %v12111_v46 }
 0x452   :  { %1593 = vmatprep.mubr.f32.mxu1 %v15033_v3  ;;  %1700 = vmatprep.mubr.f32.mxu0 %v15033_v3 }
 0x453   :  { %1765 = vmatprep.subr.mxu1 %v12144_v47 }
 0x454   :  { %1766 = vmatpush1.msra.mxu1 %v12143_v48 }
 0x455   :  { %12130 = vmatmul.mubr.msk.f32.gmra.mxu1 %vm69_vm1, %v12116_v49  ;;  %12136 = vmatmul.mubr.msk.f32.gmra.mxu0 %vm69_vm1, %v12112_v50 }
 0x456   :  { %1767 = vmatprep.subr.mxu1 %v12142_v51  ;;  %1801 = vmatprep.mubr.f32.mxu1 %v15033_v3 }
 0x457   :  { %1768 = vmatpush1.msra.mxu1 %v12141_v52  ;;  %1940 = vmatprep.mubr.f32.mxu0 %v15033_v3 }
 0x459   :  { %12151 = vmatmul.mubr.msk.f32.vlgmr.msra.gmra.mxu1 %vm69_vm1, %v12137_v53 }
 0x45a   :  { %1807 = vmatprep.mubr.f32.mxu1 %v15033_v3 }
 0x45d   :  { %12152 = vmatmul.mubr.msk.f32.gmra.mxu1 %vm69_vm1, %v12138_v54 }
 0x45e   :  { %1813 = vmatprep.mubr.f32.mxu1 %v15033_v3 }
 0x461   :  { %12153 = vmatmul.mubr.msk.f32.gmra.mxu1 %vm69_vm1, %v12139_v55 }
 0x462   :  { %1819 = vmatprep.mubr.f32.mxu1 %v15033_v3 }
 0x465   :  { %12154 = vmatmul.mubr.msk.f32.gmra.mxu1 %vm69_vm1, %v12140_v56 }
 0x466   :  { %2025 = vmatprep.mubr.f32.mxu1 %v15033_v3 }
 0x500   :  { %v1379_v57 = vpop.f32.mrf.mxu1  ;;  %v1461_v58 = vpop.f32.mrf.mxu0 }
 0x501   :  { %v1465_v59 = vmax.f32 %v1379_v57, %v1461_v58 }
 0x502   :  { %v13860_v60 = vpop.f32.mrf.mxu1  ;;  %v13885_v61 = vpop.f32.mrf.mxu0 }
 0x503   :  { %1467 = vst.msk [vmem:[#allocation3] sm:$0x1f] %vm1466_vm11, %v1465_v59  ;;  %v1862_v60 = vld [vmem:[%s20269_s3] sm:$0xff]  ;;  %v12159_v61 = vld [vmem:[%s20269_s3 + $0x10] sm:$0xff] }
 0x509   :  { %v1577_v62 = vpop.f32.mrf.mxu1  ;;  %v1684_v63 = vpop.f32.mrf.mxu0 }
 0x50a   :  { %v1685_v40 = vadd.f32 %v1684_v63, %v1577_v62  ;;  %v2057_v62 = vld [vmem:[%s20267_s4 + $0x78] sm:$0xff]  ;;  %v12182_v63 = vld [vmem:[%s20267_s4 + $0x148] sm:$0xff] }
 0x50b   :  { %v1579_v0 = vpop.f32.mrf.mxu1  ;;  %v1686_v1 = vpop.f32.mrf.mxu0 }
 0x50c   :  { %v1687_v36 = vadd.f32 %v1686_v1, %v1579_v0  ;;  %v1863_v0 = vld [vmem:[%s20269_s3 + $0x8] sm:$0x1f]  ;;  %v12160_v1 = vld [vmem:[%s20269_s3 + $0x18] sm:$0x1f] }
 0x50d   :  { %v1583_v2 = vpop.f32.mrf.mxu1  ;;  %v1690_v4 = vpop.f32.mrf.mxu0 }
 0x50e   :  { %v1691_v32 = vadd.f32 %v1690_v4, %v1583_v2  ;;  %v2056_v2 = vld [vmem:[%s20267_s4 + $0x70] sm:$0xff]  ;;  %v12181_v4 = vld [vmem:[%s20267_s4 + $0x140] sm:$0xff] }
 0x50f   :  { %v1585_v5 = vpop.f32.mrf.mxu1  ;;  %v1692_v7 = vpop.f32.mrf.mxu0 }
 0x510   :  { %v1693_v28 = vadd.f32 %v1692_v7, %v1585_v5  ;;  %v2055_v5 = vld [vmem:[%s20267_s4 + $0x68] sm:$0xff]  ;;  %v2054_v7 = vld [vmem:[%s20267_s4 + $0x60] sm:$0xff] }
 0x511   :  { %v1589_v6 = vpop.f32.mrf.mxu1  ;;  %v1696_v10 = vpop.f32.mrf.mxu0 }
 0x512   :  { %v1697_v26 = vadd.f32 %v1696_v10, %v1589_v6  ;;  %v12180_v6 = vld [vmem:[%s20267_s4 + $0x138] sm:$0xff]  ;;  %v12178_v10 = vld [vmem:[%s20267_s4 + $0x128] sm:$0xff] }
 0x513   :  { %v1591_v8 = vpop.f32.mrf.mxu1  ;;  %v1698_v13 = vpop.f32.mrf.mxu0 }
 0x514   :  { %v1699_v23 = vadd.f32 %v1698_v13, %v1591_v8  ;;  %v12179_v8 = vld [vmem:[%s20267_s4 + $0x130] sm:$0xff]  ;;  %v2051_v13 = vld [vmem:[%s20267_s4 + $0x48] sm:$0xff] }
 0x515   :  { %v1595_v9 = vpop.f32.mrf.mxu1  ;;  %v1702_v17 = vpop.f32.mrf.mxu0 }
 0x516   :  { %v1703_v24 = vadd.f32 %v1702_v17, %v1595_v9  ;;  %v2053_v9 = vld [vmem:[%s20267_s4 + $0x58] sm:$0xff]  ;;  %v12175_v17 = vld [vmem:[%s20267_s4 + $0x110] sm:$0xff] }
 0x517   :  { %v1597_v11 = vpop.f32.mrf.mxu1  ;;  %v1704_v20 = vpop.f32.mrf.mxu0 }
 0x518   :  { %v1705_v29 = vadd.f32 %v1704_v20, %v1597_v11  ;;  %v2052_v11 = vld [vmem:[%s20267_s4 + $0x50] sm:$0xff] }
 0x519   :  { %v1803_v12 = vpop.f32.mrf.mxu1  ;;  %v2048_v20 = vld [vmem:[%s20267_s4 + $0x30] sm:$0xff] }
 0x51a   :  { %v1826_v46 = vadd.f32 %v1803_v12, %v1685_v40  ;;  %v12177_v12 = vld [vmem:[%s20267_s4 + $0x120] sm:$0xff]  ;;  %v12190_v40 = vld [vmem:[%s20267_s4 + $0x188] sm:$0xff] }
 0x51b   :  { %v1805_v14 = vpop.f32.mrf.mxu1 }
 0x51c   :  { %v1827_v43 = vadd.f32 %v1805_v14, %v1687_v36  ;;  %v1846_v54 = vadd.f32 %v1839_v33, %v1826_v46  ;;  %v12176_v14 = vld [vmem:[%s20267_s4 + $0x118] sm:$0xff]  ;;  %v12187_v46 = vld [vmem:[%s20267_s4 + $0x170] sm:$0xff] }
 0x51d   :  { %v1809_v15 = vpop.f32.mrf.mxu1  ;;  %v12192_v36 = vld [vmem:[%s20267_s4 + $0x198] sm:$0xff] }
 0x51e   :  { %v1828_v41 = vadd.f32 %v1809_v15, %v1691_v32  ;;  %v1847_v52 = vadd.f32 %v1843_v37, %v1827_v43  ;;  %v1854_v59 = vmax.f32 %v1846_v54, 0.0  ;;  %v2050_v15 = vld [vmem:[%s20267_s4 + $0x40] sm:$0xff]  ;;  %v12168_v32 = vld [vmem:[%s20267_s4 + $0xd8] sm:$0xff]  ;;  %v2063_v43 = vld [vmem:[%s20267_s4 + $0xa8] sm:$0xff] }
 0x51f   :  { %v1811_v18 = vpop.f32.mrf.mxu1  ;;  %v12183_v54 = vld [vmem:[%s20267_s4 + $0x150] sm:$0xff] }
 0x520   :  { %v1829_v38 = vadd.f32 %v1811_v18, %v1693_v28  ;;  %v1848_v50 = vadd.f32 %v1839_v33, %v1828_v41  ;;  %v1855_v58 = vmax.f32 %v1847_v52, 0.0  ;;  %v2049_v18 = vld [vmem:[%s20267_s4 + $0x38] sm:$0xff]  ;;  %v12170_v28 = vld [vmem:[%s20267_s4 + $0xe8] sm:$0xff]  ;;  %v2064_v41 = vld [vmem:[%s20267_s4 + $0xb0] sm:$0xff] }
 0x521   :  { %v1815_v19 = vpop.f32.mrf.mxu1  ;;  %v12184_v52 = vld [vmem:[%s20267_s4 + $0x158] sm:$0xff] }
 0x522   :  { %v1830_v34 = vadd.f32 %v1815_v19, %v1697_v26  ;;  %v1849_v48 = vadd.f32 %v1843_v37, %v1829_v38  ;;  %v1856_v57 = vmax.f32 %v1848_v50, 0.0  ;;  %v12174_v19 = vld [vmem:[%s20267_s4 + $0x108] sm:$0xff]  ;;  %v12171_v26 = vld [vmem:[%s20267_s4 + $0xf0] sm:$0xff]  ;;  %v12185_v50 = vld [vmem:[%s20267_s4 + $0x160] sm:$0xff] }
 0x523   :  { %v1817_v22 = vpop.f32.mrf.mxu1  ;;  %v12191_v38 = vld [vmem:[%s20267_s4 + $0x190] sm:$0xff] }
 0x524   :  { %v1831_v30 = vadd.f32 %v1817_v22, %v1699_v23  ;;  %v1850_v47 = vadd.f32 %v1839_v33, %v1830_v34  ;;  %v1857_v56 = vmax.f32 %v1849_v48, 0.0  ;;  %v12173_v22 = vld [vmem:[%s20267_s4 + $0x100] sm:$0xff]  ;;  %v2047_v23 = vld [vmem:[%s20267_s4 + $0x28] sm:$0xff]  ;;  %v12167_v34 = vld [vmem:[%s20267_s4 + $0xd0] sm:$0xff] }
 0x525   :  { %v1821_v27 = vpop.f32.mrf.mxu1  ;;  %v12186_v48 = vld [vmem:[%s20267_s4 + $0x168] sm:$0xff] }
 0x526   :  { %v1832_v31 = vadd.f32 %v1821_v27, %v1703_v24  ;;  %v1851_v44 = vadd.f32 %v1843_v37, %v1831_v30  ;;  %v1858_v55 = vmax.f32 %v1850_v47, 0.0  ;;  %v12172_v24 = vld [vmem:[%s20267_s4 + $0xf8] sm:$0xff]  ;;  %v12169_v30 = vld [vmem:[%s20267_s4 + $0xe0] sm:$0xff] }
 0x527   :  { %v1823_v35 = vpop.f32.mrf.mxu1  ;;  %v2045_v27 = vld [vmem:[%s20267_s4 + $0x18] sm:$0xff] }
 0x528   :  { %v1833_v39 = vadd.f32 %v1823_v35, %v1705_v29  ;;  %v1852_v42 = vadd.f32 %v1839_v33, %v1832_v31  ;;  %v1859_v53 = vmax.f32 %v1851_v44, 0.0  ;;  %v2044_v29 = vld [vmem:[%s20267_s4 + $0x10] sm:$0xff]  ;;  %v2043_v31 = vld [vmem:[%s20267_s4 + $0x8] sm:$0xff]  ;;  %v2042_v33 = vld [vmem:[%s20267_s4] sm:$0xff] }
 0x529   :  { %v2067_v35 = vld [vmem:[%s20267_s4 + $0xc8] sm:$0xff]  ;;  %v12188_v44 = vld [vmem:[%s20267_s4 + $0x178] sm:$0xff] }
 0x52a   :  { %v1853_v45 = vadd.f32 %v1843_v37, %v1833_v39  ;;  %v1860_v51 = vmax.f32 %v1852_v42, 0.0  ;;  %v2066_v37 = vld [vmem:[%s20267_s4 + $0xc0] sm:$0xff]  ;;  %v2065_v39 = vld [vmem:[%s20267_s4 + $0xb8] sm:$0xff] }
 0x52b   :  { %v12189_v42 = vld [vmem:[%s20267_s4 + $0x180] sm:$0xff]  ;;  %v2061_v47 = vld [vmem:[%s20267_s4 + $0x98] sm:$0xff] }
 0x52c   :  { %v1861_v49 = vmax.f32 %v1853_v45, 0.0  ;;  %v2062_v45 = vld [vmem:[%s20267_s4 + $0xa0] sm:$0xff] }
 0x52e   :  { %12155 = vmatprep.subr.msk.mxu0 %vm450_vm2, %v1861_v49  ;;  %12161 = vmatprep.subr.msk.mxu1 %vm450_vm2, %v1861_v49  ;;  %v2060_v49 = vld [vmem:[%s20267_s4 + $0x90] sm:$0xff] }
 0x52f   :  { %12156 = vmatpush1.msk.msra.mxu0 %vm450_vm2, %v1860_v51  ;;  %12162 = vmatpush1.msk.msra.mxu1 %vm450_vm2, %v1860_v51  ;;  %v2059_v51 = vld [vmem:[%s20267_s4 + $0x88] sm:$0xff] }
 0x530   :  { %1902 = vmatprep.subr.mxu0 %v1859_v53  ;;  %1987 = vmatprep.subr.mxu1 %v1859_v53  ;;  %v2058_v53 = vld [vmem:[%s20267_s4 + $0x80] sm:$0xff] }
 0x531   :  { %1903 = vmatpush1.msra.mxu0 %v1858_v55  ;;  %1988 = vmatpush1.msra.mxu1 %v1858_v55  ;;  %v12207_v55 = vld [vmem:[%s20270_s5 + $0xc8] sm:$0xff] }
 0x532   :  { %1904 = vmatprep.subr.mxu0 %v1857_v56  ;;  %1989 = vmatprep.subr.mxu1 %v1857_v56  ;;  %v2268_v56 = vld [vmem:[%s20270_s5 + $0x60] sm:$0xff] }
 0x533   :  { %1905 = vmatpush1.msra.mxu0 %v1856_v57  ;;  %1990 = vmatpush1.msra.mxu1 %v1856_v57 }
 0x534   :  { %1906 = vmatprep.subr.mxu0 %v1855_v58  ;;  %1991 = vmatprep.subr.mxu1 %v1855_v58 }
 0x535   :  { %1907 = vmatpush1.msra.mxu0 %v1854_v59  ;;  %1992 = vmatpush1.msra.mxu1 %v1854_v59 }
 0x536   :  { %12157 = vmatmul.mubr.msk.f32.vlgmr.msra.gmra.mxu0 %vm443_vm3, %v1862_v60  ;;  %12163 = vmatmul.mubr.msk.f32.vlgmr.msra.gmra.mxu1 %vm443_vm3, %v12159_v61 }
 0x537   :  { %1946 = vmatprep.mubr.f32.mxu0 %v15033_v3  ;;  %2031 = vmatprep.mubr.f32.mxu1 %v15033_v3 }
 0x538   :  { %2074 = vmatprep.subr.mxu0 %v15033_v3  ;;  %2175 = vmatprep.subr.mxu1 %v15033_v3 }
 0x539   :  { %2075 = vmatpush1.msra.mxu0 %v2057_v62  ;;  %2176 = vmatpush1.msra.mxu1 %v12182_v63 }
 0x53a   :  { %12158 = vmatmul.mubr.msk.f32.gmra.mxu0 %vm443_vm3, %v1863_v0  ;;  %12164 = vmatmul.mubr.msk.f32.gmra.mxu1 %vm443_vm3, %v12160_v1  ;;  %v12206_v1 = vld [vmem:[%s20270_s5 + $0xc0] sm:$0xff] }
 0x53b   :  { %2076 = vmatprep.subr.mxu0 %v15033_v3  ;;  %2177 = vmatprep.subr.mxu1 %v15033_v3 }
 0x53c   :  { %2077 = vmatpush1.msra.mxu0 %v2056_v2  ;;  %2178 = vmatpush1.msra.mxu1 %v12181_v4  ;;  %v2267_v2 = vld [vmem:[%s20270_s5 + $0x58] sm:$0xff] }
 0x53d   :  { %2078 = vmatprep.subr.mxu0 %v15033_v3  ;;  %2179 = vmatprep.subr.mxu1 %v15033_v3 }
 0x53e   :  { %2079 = vmatpush1.msra.mxu0 %v2055_v5  ;;  %2180 = vmatpush1.msra.mxu1 %v12180_v6 }
 0x53f   :  { %2080 = vmatprep.subr.mxu0 %v15033_v3  ;;  %2181 = vmatprep.subr.mxu1 %v15033_v3 }
 0x540   :  { %2081 = vmatpush1.msra.mxu0 %v2054_v7  ;;  %2182 = vmatpush1.msra.mxu1 %v12179_v8  ;;  %v12205_v8 = vld [vmem:[%s20270_s5 + $0xb8] sm:$0xff] }
 0x541   :  { %2082 = vmatprep.subr.mxu0 %v15033_v3  ;;  %2183 = vmatprep.subr.mxu1 %v15033_v3 }
 0x542   :  { %2083 = vmatpush1.msra.mxu0 %v2053_v9  ;;  %2184 = vmatpush1.msra.mxu1 %v12178_v10  ;;  %v2266_v9 = vld [vmem:[%s20270_s5 + $0x50] sm:$0xff] }
 0x543   :  { %2084 = vmatprep.subr.mxu0 %v15033_v3  ;;  %2185 = vmatprep.subr.mxu1 %v15033_v3  ;;  %v12204_v10 = vld [vmem:[%s20270_s5 + $0xb0] sm:$0xff] }
 0x544   :  { %2085 = vmatpush1.msra.mxu0 %v2052_v11  ;;  %2186 = vmatpush1.msra.mxu1 %v12177_v12  ;;  %v2265_v11 = vld [vmem:[%s20270_s5 + $0x48] sm:$0xff] }
 0x545   :  { %2086 = vmatprep.subr.mxu0 %v15033_v3  ;;  %2187 = vmatprep.subr.mxu1 %v15033_v3  ;;  %v12203_v12 = vld [vmem:[%s20270_s5 + $0xa8] sm:$0xff] }
 0x546   :  { %2087 = vmatpush1.msra.mxu0 %v2051_v13  ;;  %2188 = vmatpush1.msra.mxu1 %v12176_v14  ;;  %v2264_v13 = vld [vmem:[%s20270_s5 + $0x40] sm:$0xff] }
 0x547   :  { %2088 = vmatprep.subr.mxu0 %v15033_v3  ;;  %2189 = vmatprep.subr.mxu1 %v15033_v3  ;;  %v12202_v14 = vld [vmem:[%s20270_s5 + $0xa0] sm:$0xff] }
 0x548   :  { %2089 = vmatpush1.msra.mxu0 %v2050_v15  ;;  %2190 = vmatpush1.msra.mxu1 %v12175_v17  ;;  %v2263_v15 = vld [vmem:[%s20270_s5 + $0x38] sm:$0xff] }
 0x549   :  { %2090 = vmatprep.subr.mxu0 %v15033_v3  ;;  %2191 = vmatprep.subr.mxu1 %v15033_v3  ;;  %v12201_v17 = vld [vmem:[%s20270_s5 + $0x98] sm:$0xff] }
 0x54a   :  { %2091 = vmatpush1.msra.mxu0 %v2049_v18  ;;  %2192 = vmatpush1.msra.mxu1 %v12174_v19  ;;  %v2262_v18 = vld [vmem:[%s20270_s5 + $0x30] sm:$0xff] }
 0x54b   :  { %2092 = vmatprep.subr.mxu0 %v15033_v3  ;;  %2193 = vmatprep.subr.mxu1 %v15033_v3  ;;  %v12200_v19 = vld [vmem:[%s20270_s5 + $0x90] sm:$0xff] }
 0x54c   :  { %2093 = vmatpush1.msra.mxu0 %v2048_v20  ;;  %2194 = vmatpush1.msra.mxu1 %v12173_v22  ;;  %v2261_v20 = vld [vmem:[%s20270_s5 + $0x28] sm:$0xff] }
 0x54d   :  { %2094 = vmatprep.subr.mxu0 %v15033_v3  ;;  %2195 = vmatprep.subr.mxu1 %v15033_v3  ;;  %v12199_v22 = vld [vmem:[%s20270_s5 + $0x88] sm:$0xff] }
 0x54e   :  { %2095 = vmatpush1.msra.mxu0 %v2047_v23  ;;  %2196 = vmatpush1.msra.mxu1 %v12172_v24  ;;  %v2260_v23 = vld [vmem:[%s20270_s5 + $0x20] sm:$0xff] }
 0x54f   :  { %2096 = vmatprep.subr.mxu0 %v15033_v3  ;;  %2197 = vmatprep.subr.mxu1 %v15033_v3  ;;  %v12198_v24 = vld [vmem:[%s20270_s5 + $0x80] sm:$0xff] }
 0x550   :  { %2097 = vmatpush1.msra.mxu0 %v2046_v25  ;;  %2198 = vmatpush1.msra.mxu1 %v12171_v26  ;;  %v2259_v25 = vld [vmem:[%s20270_s5 + $0x18] sm:$0xff] }
 0x551   :  { %2098 = vmatprep.subr.mxu0 %v15033_v3  ;;  %2199 = vmatprep.subr.mxu1 %v15033_v3  ;;  %v12197_v26 = vld [vmem:[%s20270_s5 + $0x78] sm:$0xff] }
 0x552   :  { %2099 = vmatpush1.msra.mxu0 %v2045_v27  ;;  %2200 = vmatpush1.msra.mxu1 %v12170_v28  ;;  %v2258_v27 = vld [vmem:[%s20270_s5 + $0x10] sm:$0xff] }
 0x553   :  { %2100 = vmatprep.subr.mxu0 %v15033_v3  ;;  %2201 = vmatprep.subr.mxu1 %v15033_v3  ;;  %v12196_v28 = vld [vmem:[%s20270_s5 + $0x70] sm:$0xff] }
 0x554   :  { %2101 = vmatpush1.msra.mxu0 %v2044_v29  ;;  %2202 = vmatpush1.msra.mxu1 %v12169_v30  ;;  %v2257_v29 = vld [vmem:[%s20270_s5 + $0x8] sm:$0xff] }
 0x555   :  { %2102 = vmatprep.subr.mxu0 %v15033_v3  ;;  %2203 = vmatprep.subr.mxu1 %v15033_v3  ;;  %v12195_v30 = vld [vmem:[%s20270_s5 + $0x68] sm:$0xff] }
 0x556   :  { %2103 = vmatpush1.msra.mxu0 %v2043_v31  ;;  %2204 = vmatpush1.msra.mxu1 %v12168_v32  ;;  %v2256_v31 = vld [vmem:[%s20270_s5] sm:$0xff]  ;;  %v12224_v32 = vld [vmem:[%s20270_s5 + $0x130] sm:$0xff] }
 0x557   :  { %2104 = vmatprep.subr.mxu0 %v15033_v3  ;;  %2205 = vmatprep.subr.mxu1 %v15033_v3 }
 0x558   :  { %2105 = vmatpush1.msra.mxu0 %v2042_v33  ;;  %2206 = vmatpush1.msra.mxu1 %v12167_v34 }
 0x559   :  { %2118 = vmatprep.subr.mxu0 %v15033_v3  ;;  %2219 = vmatprep.subr.mxu1 %v15033_v3 }
 0x55a   :  { %2119 = vmatpush2.msra.mxu0 %v2067_v35  ;;  %2220 = vmatpush2.msra.mxu1 %v12192_v36 }
 0x55b   :  { %2120 = vmatprep.subr.mxu0 %v15033_v3  ;;  %2221 = vmatprep.subr.mxu1 %v15033_v3 }
 0x55c   :  { %2121 = vmatpush2.msra.mxu0 %v2066_v37  ;;  %2222 = vmatpush2.msra.mxu1 %v12191_v38 }
 0x55d   :  { %2122 = vmatprep.subr.mxu0 %v15033_v3  ;;  %2223 = vmatprep.subr.mxu1 %v15033_v3 }
 0x55e   :  { %2123 = vmatpush2.msra.mxu0 %v2065_v39  ;;  %2224 = vmatpush2.msra.mxu1 %v12190_v40 }
 0x55f   :  { %2124 = vmatprep.subr.mxu0 %v15033_v3  ;;  %2225 = vmatprep.subr.mxu1 %v15033_v3 }
 0x560   :  { %2125 = vmatpush2.msra.mxu0 %v2064_v41  ;;  %2226 = vmatpush2.msra.mxu1 %v12189_v42 }
 0x561   :  { %2126 = vmatprep.subr.mxu0 %v15033_v3  ;;  %2227 = vmatprep.subr.mxu1 %v15033_v3 }
 0x562   :  { %2127 = vmatpush2.msra.mxu0 %v2063_v43  ;;  %2228 = vmatpush2.msra.mxu1 %v12188_v44 }
 0x563   :  { %2128 = vmatprep.subr.mxu0 %v15033_v3  ;;  %2229 = vmatprep.subr.mxu1 %v15033_v3 }
 0x564   :  { %2129 = vmatpush2.msra.mxu0 %v2062_v45  ;;  %2230 = vmatpush2.msra.mxu1 %v12187_v46 }
 0x565   :  { %2130 = vmatprep.subr.mxu0 %v15033_v3  ;;  %2231 = vmatprep.subr.mxu1 %v15033_v3 }
 0x566   :  { %2131 = vmatpush2.msra.mxu0 %v2061_v47  ;;  %2232 = vmatpush2.msra.mxu1 %v12186_v48  ;;  %v12223_v47 = vld [vmem:[%s20270_s5 + $0x128] sm:$0xff] }
 0x567   :  { %2132 = vmatprep.subr.mxu0 %v15033_v3  ;;  %2233 = vmatprep.subr.mxu1 %v15033_v3 }
 0x568   :  { %2133 = vmatpush2.msra.mxu0 %v2060_v49  ;;  %2234 = vmatpush2.msra.mxu1 %v12185_v50  ;;  %v12222_v49 = vld [vmem:[%s20270_s5 + $0x120] sm:$0xff]  ;;  %v12221_v50 = vld [vmem:[%s20270_s5 + $0x118] sm:$0xff] }
 0x569   :  { %2134 = vmatprep.subr.mxu0 %v15033_v3  ;;  %2235 = vmatprep.subr.mxu1 %v15033_v3 }
 0x56a   :  { %2135 = vmatpush2.msra.mxu0 %v2059_v51  ;;  %2236 = vmatpush2.msra.mxu1 %v12184_v52  ;;  %v12220_v51 = vld [vmem:[%s20270_s5 + $0x110] sm:$0xff]  ;;  %v12219_v52 = vld [vmem:[%s20270_s5 + $0x108] sm:$0xff] }
 0x56b   :  { %2136 = vmatprep.subr.mxu0 %v15033_v3  ;;  %2237 = vmatprep.subr.mxu1 %v15033_v3 }
 0x56c   :  { %2137 = vmatpush2.msra.mxu0 %v2058_v53  ;;  %2238 = vmatpush2.msra.mxu1 %v12183_v54  ;;  %v12218_v53 = vld [vmem:[%s20270_s5 + $0x100] sm:$0xff]  ;;  %v12217_v54 = vld [vmem:[%s20270_s5 + $0xf8] sm:$0xff] }
 0x56d   :  { %13886 = vmatprep.subr.mxu0 %v12207_v55  ;;  %13915 = vmatprep.subr.mxu1 %v2268_v56 }
 0x5f6   :  { %v1942_v57 = vpop.f32.mrf.mxu0  ;;  %v2027_v58 = vpop.f32.mrf.mxu1 }
 0x5f7   :  { %v2038_v62 = vmax.f32 %v1942_v57, %v2027_v58  ;;  %v12214_v57 = vld [vmem:[%s20270_s5 + $0xe0] sm:$0xff]  ;;  %v12213_v58 = vld [vmem:[%s20270_s5 + $0xd8] sm:$0xff] }
 0x5f8   :  { %v1944_v59 = vpop.f32.mrf.mxu0  ;;  %v2029_v60 = vpop.f32.mrf.mxu1 }
 0x5f9   :  { %v2039_v61 = vmax.f32 %v1944_v59, %v2029_v60  ;;  %v12212_v59 = vld [vmem:[%s20270_s5 + $0xd0] sm:$0xff] }
 0x5fa   :  { %v1948_v63 = vpop.f32.mrf.mxu0  ;;  %v2033_v0 = vpop.f32.mrf.mxu1 }
 0x5fb   :  { %12165 = vmatprep.mubr.msk.f32.mxu0 %vm650_vm4, %v2039_v61  ;;  %12193 = vmatprep.mubr.msk.f32.mxu1 %vm650_vm4, %v2039_v61  ;;  %v2040_v7 = vmax.f32 %v1948_v63, %v2033_v0  ;;  %v12244_v61 = vld [vmem:[%s20271_s8 + $0xa8] sm:$0xff]  ;;  %v12242_v63 = vld [vmem:[%s20271_s8 + $0x98] sm:$0xff]  ;;  %v12241_v0 = vld [vmem:[%s20271_s8 + $0x90] sm:$0xff] }
 0x5fc   :  { %v1950_v4 = vpop.f32.mrf.mxu0  ;;  %v2035_v5 = vpop.f32.mrf.mxu1  ;;  %2139 = vmatmul.mubr.f32.vlgmr.msra.gmra.mxu0 %v2038_v62  ;;  %2240 = vmatmul.mubr.f32.vlgmr.msra.gmra.mxu1 %v2038_v62  ;;  %v12243_v62 = vld [vmem:[%s20271_s8 + $0xa0] sm:$0xff] }
 0x5fd   :  { %v2041_v6 = vmax.f32 %v1950_v4, %v2035_v5  ;;  %13887 = vmatpush3.msra.mxu0 %v12207_v55  ;;  %13916 = vmatpush3.msra.mxu1 %v2268_v56  ;;  %v12216_v55 = vld [vmem:[%s20270_s5 + $0xf0] sm:$0xff]  ;;  %v12215_v56 = vld [vmem:[%s20270_s5 + $0xe8] sm:$0xff]  ;;  %v12238_v4 = vld [vmem:[%s20271_s8 + $0x78] sm:$0xff] }
 0x5fe   :  { %13888 = vmatprep.subr.mxu0 %v12206_v1  ;;  %13917 = vmatprep.subr.mxu1 %v2267_v2  ;;  %v12237_v5 = vld [vmem:[%s20271_s8 + $0x70] sm:$0xff] }
 0x5ff   :  { %12166 = vmatprep.mubr.msk.f32.mxu0 %vm650_vm4, %v2041_v6  ;;  %12194 = vmatprep.mubr.msk.f32.mxu1 %vm650_vm4, %v2041_v6 }
 0x600   :  { %2144 = vmatmul.mubr.f32.gmra.mxu0 %v2040_v7  ;;  %2245 = vmatmul.mubr.f32.gmra.mxu1 %v2040_v7 }
 0x601   :  { %13889 = vmatpush3.msra.mxu0 %v12206_v1  ;;  %13918 = vmatpush3.msra.mxu1 %v2267_v2  ;;  %v12240_v1 = vld [vmem:[%s20271_s8 + $0x88] sm:$0xff]  ;;  %v12239_v2 = vld [vmem:[%s20271_s8 + $0x80] sm:$0xff] }
 0x602   :  { %13890 = vmatprep.subr.mxu0 %v12205_v8  ;;  %13919 = vmatprep.subr.mxu1 %v2266_v9 }
 0x603   :  { %13891 = vmatpush3.msra.mxu0 %v12205_v8  ;;  %13920 = vmatpush3.msra.mxu1 %v2266_v9 }
 0x604   :  { %13892 = vmatprep.subr.mxu0 %v12204_v10  ;;  %13921 = vmatprep.subr.mxu1 %v2265_v11 }
 0x605   :  { %13893 = vmatpush3.msra.mxu0 %v12204_v10  ;;  %13922 = vmatpush3.msra.mxu1 %v2265_v11 }
 0x606   :  { %13894 = vmatprep.subr.mxu0 %v12203_v12  ;;  %13923 = vmatprep.subr.mxu1 %v2264_v13 }
 0x607   :  { %13895 = vmatpush3.msra.mxu0 %v12203_v12  ;;  %13924 = vmatpush3.msra.mxu1 %v2264_v13  ;;  %v12227_v12 = vld [vmem:[%s20272_s6] ss:$0 sm:$0xff] }
 0x608   :  { %13896 = vmatprep.subr.mxu0 %v12202_v14  ;;  %13925 = vmatprep.subr.mxu1 %v2263_v15 }
 0x609   :  { %13897 = vmatpush3.msra.mxu0 %v12202_v14  ;;  %13926 = vmatpush3.msra.mxu1 %v2263_v15 }
 0x60a   :  { %13898 = vmatprep.subr.mxu0 %v12201_v17  ;;  %13927 = vmatprep.subr.mxu1 %v2262_v18 }
 0x60b   :  { %13899 = vmatpush3.msra.mxu0 %v12201_v17  ;;  %13928 = vmatpush3.msra.mxu1 %v2262_v18 }
 0x60c   :  { %13900 = vmatprep.subr.mxu0 %v12200_v19  ;;  %13929 = vmatprep.subr.mxu1 %v2261_v20 }
 0x60d   :  { %13901 = vmatpush3.msra.mxu0 %v12200_v19  ;;  %13930 = vmatpush3.msra.mxu1 %v2261_v20 }
 0x60e   :  { %13902 = vmatprep.subr.mxu0 %v12199_v22  ;;  %13931 = vmatprep.subr.mxu1 %v2260_v23 }
 0x60f   :  { %13903 = vmatpush3.msra.mxu0 %v12199_v22  ;;  %13932 = vmatpush3.msra.mxu1 %v2260_v23  ;;  %v2555_v23 = vld [vmem:[%s20273_s7] sm:$0x1f] }
 0x610   :  { %13904 = vmatprep.subr.mxu0 %v12198_v24  ;;  %13933 = vmatprep.subr.mxu1 %v2259_v25 }
 0x611   :  { %13905 = vmatpush3.msra.mxu0 %v12198_v24  ;;  %13934 = vmatpush3.msra.mxu1 %v2259_v25  ;;  %v12230_v24 = vld [vmem:[%s20273_s7 + $0x8] sm:$0x1f]  ;;  %v2717_v25 = vld [vmem:[%s20271_s8 + $0x50] sm:$0xff] }
 0x612   :  { %13906 = vmatprep.subr.mxu0 %v12197_v26  ;;  %13935 = vmatprep.subr.mxu1 %v2258_v27 }
 0x613   :  { %13907 = vmatpush3.msra.mxu0 %v12197_v26  ;;  %13936 = vmatpush3.msra.mxu1 %v2258_v27  ;;  %v2716_v26 = vld [vmem:[%s20271_s8 + $0x48] sm:$0xff]  ;;  %v2715_v27 = vld [vmem:[%s20271_s8 + $0x40] sm:$0xff] }
 0x614   :  { %13908 = vmatprep.subr.mxu0 %v12196_v28  ;;  %13937 = vmatprep.subr.mxu1 %v2257_v29 }
 0x615   :  { %13909 = vmatpush3.msra.mxu0 %v12196_v28  ;;  %13938 = vmatpush3.msra.mxu1 %v2257_v29  ;;  %v2714_v28 = vld [vmem:[%s20271_s8 + $0x38] sm:$0xff]  ;;  %v2713_v29 = vld [vmem:[%s20271_s8 + $0x30] sm:$0xff] }
 0x616   :  { %13910 = vmatprep.subr.mxu0 %v12195_v30  ;;  %13939 = vmatprep.subr.mxu1 %v2256_v31 }
 0x617   :  { %13911 = vmatpush3.msra.mxu0 %v12195_v30  ;;  %13940 = vmatpush3.msra.mxu1 %v2256_v31  ;;  %v2712_v30 = vld [vmem:[%s20271_s8 + $0x28] sm:$0xff]  ;;  %v2711_v31 = vld [vmem:[%s20271_s8 + $0x20] sm:$0xff] }
 0x618   :  { %13944 = vmatprep.subr.mxu0 %v12224_v32  ;;  %13973 = vmatprep.subr.mxu1 %v15033_v3 }
 0x6bc   :  { %v2140_v33 = vpop.f32.mrf.mxu0  ;;  %v2241_v34 = vpop.f32.mrf.mxu1 }
 0x6bd   :  { %v2250_v35 = vmax.f32 %v2140_v33, %v2241_v34  ;;  %v2709_v33 = vld [vmem:[%s20271_s8 + $0x10] sm:$0xff]  ;;  %v12236_v34 = vld [vmem:[%s20271_s8 + $0x68] sm:$0xff] }
 0x6be   :  { %v2142_v36 = vpop.f32.mrf.mxu0  ;;  %v2243_v37 = vpop.f32.mrf.mxu1 }
 0x6bf   :  { %2252 = vst.msk [vmem:[#allocation2] sm:$0xff] %vm836_vm5, %v2250_v35  ;;  %v2708_v35 = vld [vmem:[%s20271_s8 + $0x8] sm:$0xff]  ;;  %v12235_v36 = vld [vmem:[%s20271_s8 + $0x60] sm:$0xff] }
 0x6c0   :  { %v2145_v38 = vpop.f32.mrf.mxu0  ;;  %v2246_v39 = vpop.f32.mrf.mxu1  ;;  %v2707_v37 = vld [vmem:[%s20271_s8] sm:$0xff] }
 0x6c1   :  { %v2251_v40 = vmax.f32 %v2145_v38, %v2246_v39  ;;  %v12234_v38 = vld [vmem:[%s20271_s8 + $0x58] sm:$0xff] }
 0x6c2   :  { %v2147_v41 = vpop.f32.mrf.mxu0  ;;  %v2248_v42 = vpop.f32.mrf.mxu1  ;;  %v12261_v39 = vld [vmem:[%s20265_s1 + $0x78] sm:$0xf] }
 0x6c3   :  { %2253 = vst.msk [vmem:[#allocation2 + $0x8] sm:$0x1f] %vm838_vm6, %v2251_v40  ;;  %v2887_v40 = vld [vmem:[%s20265_s1 + $0x38] sm:$0xf] }
 0x6c6   :  { %v2254_v43 = vld [vmem:[#allocation2] sm:$0xff] }
 0x6c7   :  { %13941 = vmatprep.mubr.msk.f32.mxu1 %vm836_vm5, %v2254_v43 }
 0x6ca   :  { %v2269_v44 = vld [vmem:[#allocation2 + $0x1] sm:$0xff]  ;;  %v2270_v46 = vld [vmem:[#allocation2 + $0x9] sm:$0x7] }
 0x6cb   :  { %v2255_v45 = vld [vmem:[#allocation2 + $0x8] sm:$0x7]  ;;  %13912 = vmatprep.mubr.msk.f32.mxu0 %vm836_vm5, %v2269_v44 }
 0x6cc   :  { %13942 = vmatmul.mubr.msk.f32.vlgmr.msra.gmra.mxu1 %vm836_vm5, %v2255_v45  ;;  %13913 = vmatmul.mubr.msk.f32.vlgmr.msra.gmra.mxu0 %vm836_vm5, %v2270_v46  ;;  %v2446_v48 = vld [vmem:[#allocation2 + $0x2] sm:$0xff]  ;;  %v2447_v60 = vld [vmem:[#allocation2 + $0xa] sm:$0x7]  ;;  %v12260_v45 = vld [vmem:[%s20265_s1 + $0x70] sm:$0xf] }
 0x6cd   :  { %13977 = vmatprep.mubr.msk.f32.mxu1 %vm15034_vm7, %v15033_v3  ;;  %13945 = vmatpush3.msra.mxu0 %v12224_v32  ;;  %v2710_v32 = vld [vmem:[%s20271_s8 + $0x18] sm:$0xff]  ;;  %v2886_v46 = vld [vmem:[%s20265_s1 + $0x30] sm:$0xf] }
 0x6ce   :  { %13970 = vmatprep.mubr.msk.f32.mxu0 %vm836_vm5, %v2446_v48  ;;  %13946 = vmatprep.subr.mxu0 %v12223_v47  ;;  %v12259_v48 = vld [vmem:[%s20265_s1 + $0x68] sm:$0xff] }
 0x6cf   :  { %13947 = vmatpush3.msra.mxu0 %v12223_v47 }
 0x6d0   :  { %13948 = vmatprep.subr.mxu0 %v12222_v49 }
 0x6d1   :  { %13949 = vmatpush3.msra.mxu0 %v12222_v49  ;;  %v2885_v49 = vld [vmem:[%s20265_s1 + $0x28] sm:$0xff] }
 0x6d2   :  { %13950 = vmatprep.subr.mxu0 %v12221_v50 }
 0x6d3   :  { %13951 = vmatpush3.msra.mxu0 %v12221_v50  ;;  %v12258_v50 = vld [vmem:[%s20265_s1 + $0x60] sm:$0xff] }
 0x6d4   :  { %13952 = vmatprep.subr.mxu0 %v12220_v51 }
 0x6d5   :  { %13953 = vmatpush3.msra.mxu0 %v12220_v51  ;;  %v2884_v51 = vld [vmem:[%s20265_s1 + $0x20] sm:$0xff] }
 0x6d6   :  { %13954 = vmatprep.subr.mxu0 %v12219_v52 }
 0x6d7   :  { %13955 = vmatpush3.msra.mxu0 %v12219_v52  ;;  %v12257_v52 = vld [vmem:[%s20265_s1 + $0x58] sm:$0xff] }
 0x6d8   :  { %13956 = vmatprep.subr.mxu0 %v12218_v53 }
 0x6d9   :  { %13957 = vmatpush3.msra.mxu0 %v12218_v53  ;;  %v2883_v53 = vld [vmem:[%s20265_s1 + $0x18] sm:$0xff] }
 0x6da   :  { %13958 = vmatprep.subr.mxu0 %v12217_v54 }
 0x6db   :  { %13959 = vmatpush3.msra.mxu0 %v12217_v54  ;;  %v12256_v54 = vld [vmem:[%s20265_s1 + $0x50] sm:$0xff] }
 0x6dc   :  { %13960 = vmatprep.subr.mxu0 %v12216_v55 }
 0x6dd   :  { %13961 = vmatpush3.msra.mxu0 %v12216_v55  ;;  %v2882_v55 = vld [vmem:[%s20265_s1 + $0x10] sm:$0xff] }
 0x6de   :  { %13962 = vmatprep.subr.mxu0 %v12215_v56 }
 0x6df   :  { %13963 = vmatpush3.msra.mxu0 %v12215_v56  ;;  %v12255_v56 = vld [vmem:[%s20265_s1 + $0x48] sm:$0xff] }
 0x6e0   :  { %13964 = vmatprep.subr.mxu0 %v12214_v57 }
 0x6e1   :  { %13965 = vmatpush3.msra.mxu0 %v12214_v57  ;;  %v2881_v57 = vld [vmem:[%s20265_s1 + $0x8] sm:$0xff] }
 0x6e2   :  { %13966 = vmatprep.subr.mxu0 %v12213_v58 }
 0x6e3   :  { %13967 = vmatpush3.msra.mxu0 %v12213_v58  ;;  %v12254_v58 = vld [vmem:[%s20265_s1 + $0x40] sm:$0xff] }
 0x6e4   :  { %13968 = vmatprep.subr.mxu0 %v12212_v59 }
 0x6e5   :  { %13969 = vmatpush3.msra.mxu0 %v12212_v59  ;;  %v2880_v59 = vld [vmem:[%s20265_s1] sm:$0xff] }
 0x6e6   :  { %13971 = vmatmul.mubr.msk.f32.vlgmr.msra.gmra.mxu0 %vm836_vm5, %v2447_v60  ;;  %14012 = vmatprep.subr.mxu0 %v15033_v3  ;;  %v12250_v60 = vld [vmem:[%s20266_s0 + $0x41] sm:$0xff] }
 0x6e7   :  { %14034 = vmatprep.mubr.msk.f32.mxu0 %vm15034_vm7, %v15033_v3  ;;  %14013 = vmatpush3.msra.mxu0 %v12244_v61  ;;  %v12246_v61 = vld [vmem:[%s20266_s0 + $0x40] sm:$0xff] }
 0x6e8   :  { %14014 = vmatprep.subr.mxu0 %v15033_v3 }
 0x6e9   :  { %14015 = vmatpush3.msra.mxu0 %v12243_v62  ;;  %v12285_v62 = vld [vmem:[%s20265_s1 + $0xb8] sm:$0xf] }
 0x6ea   :  { %14016 = vmatprep.subr.mxu0 %v15033_v3 }
 0x6eb   :  { %14017 = vmatpush3.msra.mxu0 %v12242_v63  ;;  %v12284_v63 = vld [vmem:[%s20265_s1 + $0xb0] sm:$0xf] }
 0x6ec   :  { %14018 = vmatprep.subr.mxu0 %v15033_v3 }
 0x6ed   :  { %14019 = vmatpush3.msra.mxu0 %v12241_v0  ;;  %v12251_v0 = vld [vmem:[%s20266_s0 + $0x49] sm:$0xff] }
 0x6ee   :  { %14020 = vmatprep.subr.mxu0 %v15033_v3 }
 0x6ef   :  { %14021 = vmatpush3.msra.mxu0 %v12240_v1  ;;  %v12247_v1 = vld [vmem:[%s20266_s0 + $0x48] sm:$0xff] }
 0x6f0   :  { %14022 = vmatprep.subr.mxu0 %v15033_v3 }
 0x6f1   :  { %14023 = vmatpush3.msra.mxu0 %v12239_v2  ;;  %v12283_v2 = vld [vmem:[%s20265_s1 + $0xa8] sm:$0xff] }
 0x6f2   :  { %14024 = vmatprep.subr.mxu0 %v15033_v3 }
 0x6f3   :  { %14025 = vmatpush3.msra.mxu0 %v12238_v4  ;;  %v12282_v4 = vld [vmem:[%s20265_s1 + $0xa0] sm:$0xff] }
 0x6f4   :  { %14026 = vmatprep.subr.mxu0 %v15033_v3 }
 0x6f5   :  { %14027 = vmatpush3.msra.mxu0 %v12237_v5  ;;  %v12252_v5 = vld [vmem:[%s20266_s0 + $0x51] sm:$0xff] }
 0x6f6   :  { %14028 = vmatprep.subr.mxu0 %v15033_v3 }
 0x6f7   :  { %14029 = vmatpush3.msra.mxu0 %v12236_v34 }
 0x6f8   :  { %14030 = vmatprep.subr.mxu0 %v15033_v3 }
 0x6f9   :  { %14031 = vmatpush3.msra.mxu0 %v12235_v36 }
 0x6fa   :  { %14032 = vmatprep.subr.mxu0 %v15033_v3 }
 0x6fb   :  { %14033 = vmatpush3.msra.mxu0 %v12234_v38 }
 0x6fc   :  { %12268 = vmatprep.subr.msk.mxu0 %vm82_vm0, %v2887_v40 }
 0x78c   :  { %v13943_v6 = vpop.f32.mrf.mxu1  ;;  %v13914_v7 = vpop.f32.mrf.mxu0 }
 0x78d   :  { %v2443_v10 = vadd.f32 %v13943_v6, %v13914_v7  ;;  %v12248_v6 = vld [vmem:[%s20266_s0 + $0x50] sm:$0xff]  ;;  %v12281_v7 = vld [vmem:[%s20265_s1 + $0x98] sm:$0xff] }
 0x78e   :  { %v2437_v8 = vpop.f32.mrf.mxu1  ;;  %v2356_v9 = vpop.f32.mrf.mxu0 }
 0x78f   :  { %v2438_v13 = vadd.f32 %v2437_v8, %v2356_v9  ;;  %v12280_v8 = vld [vmem:[%s20265_s1 + $0x90] sm:$0xff]  ;;  %v12253_v9 = vld [vmem:[%s20266_s0 + $0x59] sm:$0x3] }
 0x7a6   :  { %v13972_v11 = vpop.f32.mrf.mxu0 }
 0x7a7   :  { %v2543_v14 = vadd.f32 %v13972_v11, %v2443_v10  ;;  %v12249_v10 = vld [vmem:[%s20266_s0 + $0x58] sm:$0x3]  ;;  %v12279_v11 = vld [vmem:[%s20265_s1 + $0x88] sm:$0xff] }
 0x7a8   :  { %v2533_v15 = vpop.f32.mrf.mxu0 }
 0x7a9   :  { %v2552_v17 = vadd.f32 %v12227_v12, %v2543_v14  ;;  %v2542_v18 = vadd.f32 %v2533_v15, %v2438_v13  ;;  %v12274_v13 = vld [vmem:[%s20266_s0 + $0x42] sm:$0xff]  ;;  %v12275_v14 = vld [vmem:[%s20266_s0 + $0x4a] sm:$0xff]  ;;  %v12276_v15 = vld [vmem:[%s20266_s0 + $0x52] sm:$0xff] }
 0x7ab   :  { %v2554_v19 = vmax.f32 %v2552_v17, 0.0  ;;  %v2551_v20 = vadd.f32 %v12227_v12, %v2542_v18  ;;  %v12278_v12 = vld [vmem:[%s20265_s1 + $0x80] sm:$0xff]  ;;  %v12277_v17 = vld [vmem:[%s20266_s0 + $0x5a] sm:$0x3] }
 0x7ad   :  { %v2553_v22 = vmax.f32 %v2551_v20, 0.0  ;;  %13974 = vmatpush3.msk.msra.mxu1 %vm1148_vm8, %v2554_v19 }
 0x7ae   :  { %13975 = vmatprep.subr.mxu1 %v15033_v3 }
 0x7af   :  { %13976 = vmatpush3.msra.mxu1 %v2553_v22 }
 0x7b0   :  { %13978 = vmatmul.mubr.msk.f32.vlgmr.msra.gmra.mxu1 %vm1144_vm9, %v2555_v23  ;;  %13980 = vmatprep.subr.mxu1 %v15033_v3 }
 0x7b1   :  { %13981 = vmatpush3.msk.msra.mxu1 %vm1148_vm8, %v2554_v19  ;;  %13984 = vmatprep.mubr.msk.f32.mxu1 %vm15034_vm7, %v15033_v3 }
 0x7b2   :  { %13982 = vmatprep.subr.mxu1 %v15033_v3 }
 0x7b3   :  { %13983 = vmatpush3.msra.mxu1 %v2553_v22 }
 0x7b4   :  { %13985 = vmatmul.mubr.msk.f32.vlgmr.msra.gmra.mxu1 %vm1144_vm9, %v12230_v24  ;;  %13987 = vmatprep.subr.mxu1 %v15033_v3 }
 0x7b5   :  { %13988 = vmatpush3.msra.mxu1 %v2717_v25  ;;  %14009 = vmatprep.mubr.msk.f32.mxu1 %vm15034_vm7, %v15033_v3 }
 0x7b6   :  { %13989 = vmatprep.subr.mxu1 %v15033_v3 }
 0x7b7   :  { %13990 = vmatpush3.msra.mxu1 %v2716_v26 }
 0x7b8   :  { %13991 = vmatprep.subr.mxu1 %v15033_v3 }
 0x7b9   :  { %13992 = vmatpush3.msra.mxu1 %v2715_v27 }
 0x7ba   :  { %13993 = vmatprep.subr.mxu1 %v15033_v3 }
 0x7bb   :  { %13994 = vmatpush3.msra.mxu1 %v2714_v28 }
 0x7bc   :  { %13995 = vmatprep.subr.mxu1 %v15033_v3 }
 0x7bd   :  { %13996 = vmatpush3.msra.mxu1 %v2713_v29 }
 0x7be   :  { %13997 = vmatprep.subr.mxu1 %v15033_v3 }
 0x7bf   :  { %13998 = vmatpush3.msra.mxu1 %v2712_v30 }
 0x7c0   :  { %13999 = vmatprep.subr.mxu1 %v15033_v3 }
 0x7c1   :  { %14000 = vmatpush3.msra.mxu1 %v2711_v31 }
 0x7c2   :  { %14001 = vmatprep.subr.mxu1 %v15033_v3 }
 0x7c3   :  { %14002 = vmatpush3.msra.mxu1 %v2710_v32 }
 0x7c4   :  { %14003 = vmatprep.subr.mxu1 %v15033_v3 }
 0x7c5   :  { %14004 = vmatpush3.msra.mxu1 %v2709_v33 }
 0x7c6   :  { %14005 = vmatprep.subr.mxu1 %v15033_v3 }
 0x7c7   :  { %14006 = vmatpush3.msra.mxu1 %v2708_v35 }
 0x7c8   :  { %14007 = vmatprep.subr.mxu1 %v15033_v3 }
 0x7c9   :  { %14008 = vmatpush3.msra.mxu1 %v2707_v37 }
 0x7ca   :  { %12262 = vmatprep.subr.msk.mxu1 %vm82_vm0, %v12261_v39 }
 0x870   :  { %v2628_v41 = vpop.f32.mrf.mxu1 }
 0x872   :  { %v13979_v42 = vpop.f32.mrf.mxu1 }
 0x874   :  { %v2702_v43 = vpop.f32.mrf.mxu1 }
 0x875   :  { %v2706_v44 = vmax.f32 %v2628_v41, %v2702_v43 }
 0x876   :  { %v13986_v47 = vpop.f32.mrf.mxu1 }
 0x877   :  { %14010 = vmatmul.mubr.msk.f32.vlgmr.msra.gmra.mxu1 %vm1309_vm10, %v2706_v44  ;;  %14035 = vmatmul.mubr.msk.f32.vlgmr.msra.gmra.mxu0 %vm1309_vm10, %v2706_v44 }
 0x878   :  { %12263 = vmatpush1.msk.msra.mxu1 %vm82_vm0, %v12260_v45  ;;  %12269 = vmatpush1.msk.msra.mxu0 %vm82_vm0, %v2886_v46 }
 0x879   :  { %2944 = vmatprep.subr.mxu1 %v12259_v48  ;;  %3051 = vmatprep.subr.mxu0 %v2885_v49  ;;  %v3241_v48 = vld [vmem:[%s20268_s2] sm:$0x3] }
 0x87a   :  { %2945 = vmatpush1.msra.mxu1 %v12258_v50  ;;  %3052 = vmatpush1.msra.mxu0 %v2884_v51 }
 0x87b   :  { %2946 = vmatprep.subr.mxu1 %v12257_v52  ;;  %3053 = vmatprep.subr.mxu0 %v2883_v53 }
 0x87c   :  { %2947 = vmatpush1.msra.mxu1 %v12256_v54  ;;  %3054 = vmatpush1.msra.mxu0 %v2882_v55 }
 0x87d   :  { %2948 = vmatprep.subr.mxu1 %v12255_v56  ;;  %3055 = vmatprep.subr.mxu0 %v2881_v57  ;;  %v3246_v56 = vrot.slane %v3241_v48, %v15321_v16 }
 0x87e   :  { %2949 = vmatpush1.msra.mxu1 %v12254_v58  ;;  %2982 = vmatprep.mubr.f32.mxu1 %v15033_v3 }
 0x87f   :  { %3056 = vmatpush1.msra.mxu0 %v2880_v59  ;;  %3089 = vmatprep.mubr.f32.mxu0 %v15033_v3 }
 0x880   :  { %12264 = vmatmul.mubr.msk.f32.vlgmr.msra.gmra.mxu1 %vm69_vm1, %v12250_v60  ;;  %12270 = vmatmul.mubr.msk.f32.vlgmr.msra.gmra.mxu0 %vm69_vm1, %v12246_v61  ;;  %v3250_v60 = vrot.slane %v3241_v48, %v15326_v21  ;;  %v3453_v48 = vld [vmem:[%s20267_s4 + $0x20] sm:$0xff] }
 0x881   :  { %2988 = vmatprep.mubr.f32.mxu1 %v15033_v3  ;;  %3095 = vmatprep.mubr.f32.mxu0 %v15033_v3 }
 0x882   :  { %12286 = vmatprep.subr.msk.mxu1 %vm82_vm0, %v12285_v62 }
 0x883   :  { %12287 = vmatpush1.msk.msra.mxu1 %vm82_vm0, %v12284_v63 }
 0x884   :  { %12265 = vmatmul.mubr.msk.f32.gmra.mxu1 %vm69_vm1, %v12251_v0  ;;  %12271 = vmatmul.mubr.msk.f32.gmra.mxu0 %vm69_vm1, %v12247_v1 }
 0x885   :  { %2994 = vmatprep.mubr.f32.mxu1 %v15033_v3  ;;  %3101 = vmatprep.mubr.f32.mxu0 %v15033_v3 }
 0x886   :  { %3170 = vmatprep.subr.mxu1 %v12283_v2 }
 0x887   :  { %3171 = vmatpush1.msra.mxu1 %v12282_v4 }
 0x888   :  { %12266 = vmatmul.mubr.msk.f32.gmra.mxu1 %vm69_vm1, %v12252_v5  ;;  %12272 = vmatmul.mubr.msk.f32.gmra.mxu0 %vm69_vm1, %v12248_v6 }
 0x889   :  { %3000 = vmatprep.mubr.f32.mxu1 %v15033_v3  ;;  %3107 = vmatprep.mubr.f32.mxu0 %v15033_v3 }
 0x88a   :  { %3172 = vmatprep.subr.mxu1 %v12281_v7 }
 0x88b   :  { %3173 = vmatpush1.msra.mxu1 %v12280_v8 }
 0x88c   :  { %12267 = vmatmul.mubr.msk.f32.gmra.mxu1 %vm69_vm1, %v12253_v9  ;;  %12273 = vmatmul.mubr.msk.f32.gmra.mxu0 %vm69_vm1, %v12249_v10 }
 0x88d   :  { %3174 = vmatprep.subr.mxu1 %v12279_v11  ;;  %3208 = vmatprep.mubr.f32.mxu1 %v15033_v3 }
 0x88e   :  { %3175 = vmatpush1.msra.mxu1 %v12278_v12  ;;  %3347 = vmatprep.mubr.f32.mxu0 %v15033_v3 }
 0x890   :  { %12288 = vmatmul.mubr.msk.f32.vlgmr.msra.gmra.mxu1 %vm69_vm1, %v12274_v13 }
 0x891   :  { %3214 = vmatprep.mubr.f32.mxu1 %v15033_v3 }
 0x894   :  { %12289 = vmatmul.mubr.msk.f32.gmra.mxu1 %vm69_vm1, %v12275_v14 }
 0x895   :  { %3220 = vmatprep.mubr.f32.mxu1 %v15033_v3 }
 0x898   :  { %12290 = vmatmul.mubr.msk.f32.gmra.mxu1 %vm69_vm1, %v12276_v15 }
 0x899   :  { %3226 = vmatprep.mubr.f32.mxu1 %v15033_v3 }
 0x89c   :  { %12291 = vmatmul.mubr.msk.f32.gmra.mxu1 %vm69_vm1, %v12277_v17 }
 0x89d   :  { %3432 = vmatprep.mubr.f32.mxu1 %v15033_v3 }
 0x937   :  { %v2787_v18 = vpop.f32.mrf.mxu1  ;;  %v2868_v19 = vpop.f32.mrf.mxu0 }
 0x938   :  { %v2872_v20 = vmax.f32 %v2787_v18, %v2868_v19 }
 0x939   :  { %v14011_v22 = vpop.f32.mrf.mxu1  ;;  %v14036_v23 = vpop.f32.mrf.mxu0 }
 0x93a   :  { %2874 = vst.msk [vmem:[#allocation3 + $0x8] sm:$0x1f] %vm1466_vm11, %v2872_v20  ;;  %v3269_v22 = vld [vmem:[%s20269_s3] sm:$0xff]  ;;  %v12296_v23 = vld [vmem:[%s20269_s3 + $0x10] sm:$0xff] }
 0x940   :  { %v2984_v24 = vpop.f32.mrf.mxu1  ;;  %v3091_v25 = vpop.f32.mrf.mxu0 }
 0x941   :  { %v3092_v63 = vadd.f32 %v3091_v25, %v2984_v24  ;;  %v3464_v24 = vld [vmem:[%s20267_s4 + $0x78] sm:$0xff]  ;;  %v12319_v25 = vld [vmem:[%s20267_s4 + $0x148] sm:$0xff] }
 0x942   :  { %v2986_v26 = vpop.f32.mrf.mxu1  ;;  %v3093_v27 = vpop.f32.mrf.mxu0 }
 0x943   :  { %v3094_v59 = vadd.f32 %v3093_v27, %v2986_v26  ;;  %v3270_v26 = vld [vmem:[%s20269_s3 + $0x8] sm:$0x1f]  ;;  %v12297_v27 = vld [vmem:[%s20269_s3 + $0x18] sm:$0x1f] }
 0x944   :  { %v2990_v28 = vpop.f32.mrf.mxu1  ;;  %v3097_v29 = vpop.f32.mrf.mxu0 }
 0x945   :  { %v3098_v55 = vadd.f32 %v3097_v29, %v2990_v28  ;;  %v3463_v28 = vld [vmem:[%s20267_s4 + $0x70] sm:$0xff]  ;;  %v12318_v29 = vld [vmem:[%s20267_s4 + $0x140] sm:$0xff] }
 0x946   :  { %v2992_v30 = vpop.f32.mrf.mxu1  ;;  %v3099_v32 = vpop.f32.mrf.mxu0 }
 0x947   :  { %v3100_v51 = vadd.f32 %v3099_v32, %v2992_v30  ;;  %v3462_v30 = vld [vmem:[%s20267_s4 + $0x68] sm:$0xff]  ;;  %v3461_v32 = vld [vmem:[%s20267_s4 + $0x60] sm:$0xff] }
 0x948   :  { %v2996_v31 = vpop.f32.mrf.mxu1  ;;  %v3103_v35 = vpop.f32.mrf.mxu0 }
 0x949   :  { %v3104_v49 = vadd.f32 %v3103_v35, %v2996_v31  ;;  %v12317_v31 = vld [vmem:[%s20267_s4 + $0x138] sm:$0xff]  ;;  %v12315_v35 = vld [vmem:[%s20267_s4 + $0x128] sm:$0xff] }
 0x94a   :  { %v2998_v33 = vpop.f32.mrf.mxu1  ;;  %v3105_v38 = vpop.f32.mrf.mxu0 }
 0x94b   :  { %v3106_v46 = vadd.f32 %v3105_v38, %v2998_v33  ;;  %v12316_v33 = vld [vmem:[%s20267_s4 + $0x130] sm:$0xff]  ;;  %v3458_v38 = vld [vmem:[%s20267_s4 + $0x48] sm:$0xff] }
 0x94c   :  { %v3002_v34 = vpop.f32.mrf.mxu1  ;;  %v3109_v41 = vpop.f32.mrf.mxu0 }
 0x94d   :  { %v3110_v47 = vadd.f32 %v3109_v41, %v3002_v34  ;;  %v3460_v34 = vld [vmem:[%s20267_s4 + $0x58] sm:$0xff]  ;;  %v12312_v41 = vld [vmem:[%s20267_s4 + $0x110] sm:$0xff] }
 0x94e   :  { %v3004_v36 = vpop.f32.mrf.mxu1  ;;  %v3111_v44 = vpop.f32.mrf.mxu0 }
 0x94f   :  { %v3112_v52 = vadd.f32 %v3111_v44, %v3004_v36  ;;  %v3459_v36 = vld [vmem:[%s20267_s4 + $0x50] sm:$0xff] }
 0x950   :  { %v3210_v37 = vpop.f32.mrf.mxu1  ;;  %v3455_v44 = vld [vmem:[%s20267_s4 + $0x30] sm:$0xff] }
 0x951   :  { %v3233_v6 = vadd.f32 %v3210_v37, %v3092_v63  ;;  %v12314_v37 = vld [vmem:[%s20267_s4 + $0x120] sm:$0xff]  ;;  %v12327_v63 = vld [vmem:[%s20267_s4 + $0x188] sm:$0xff] }
 0x952   :  { %v3212_v39 = vpop.f32.mrf.mxu1 }
 0x953   :  { %v3234_v2 = vadd.f32 %v3212_v39, %v3094_v59  ;;  %v3253_v14 = vadd.f32 %v3246_v56, %v3233_v6  ;;  %v12313_v39 = vld [vmem:[%s20267_s4 + $0x118] sm:$0xff]  ;;  %v12324_v6 = vld [vmem:[%s20267_s4 + $0x170] sm:$0xff] }
 0x954   :  { %v3216_v40 = vpop.f32.mrf.mxu1  ;;  %v12329_v59 = vld [vmem:[%s20267_s4 + $0x198] sm:$0xff] }
 0x955   :  { %v3235_v0 = vadd.f32 %v3216_v40, %v3098_v55  ;;  %v3254_v12 = vadd.f32 %v3250_v60, %v3234_v2  ;;  %v3261_v20 = vmax.f32 %v3253_v14, 0.0  ;;  %v3457_v40 = vld [vmem:[%s20267_s4 + $0x40] sm:$0xff]  ;;  %v12305_v55 = vld [vmem:[%s20267_s4 + $0xd8] sm:$0xff]  ;;  %v3470_v2 = vld [vmem:[%s20267_s4 + $0xa8] sm:$0xff] }
 0x956   :  { %v3218_v42 = vpop.f32.mrf.mxu1  ;;  %v12320_v14 = vld [vmem:[%s20267_s4 + $0x150] sm:$0xff] }
 0x957   :  { %v3236_v61 = vadd.f32 %v3218_v42, %v3100_v51  ;;  %v3255_v10 = vadd.f32 %v3246_v56, %v3235_v0  ;;  %v3262_v19 = vmax.f32 %v3254_v12, 0.0  ;;  %v3456_v42 = vld [vmem:[%s20267_s4 + $0x38] sm:$0xff]  ;;  %v12307_v51 = vld [vmem:[%s20267_s4 + $0xe8] sm:$0xff]  ;;  %v3471_v0 = vld [vmem:[%s20267_s4 + $0xb0] sm:$0xff] }
 0x958   :  { %v3222_v43 = vpop.f32.mrf.mxu1  ;;  %v12321_v12 = vld [vmem:[%s20267_s4 + $0x158] sm:$0xff] }
 0x959   :  { %v3237_v57 = vadd.f32 %v3222_v43, %v3104_v49  ;;  %v3256_v8 = vadd.f32 %v3250_v60, %v3236_v61  ;;  %v3263_v18 = vmax.f32 %v3255_v10, 0.0  ;;  %v12311_v43 = vld [vmem:[%s20267_s4 + $0x108] sm:$0xff]  ;;  %v12308_v49 = vld [vmem:[%s20267_s4 + $0xf0] sm:$0xff]  ;;  %v12322_v10 = vld [vmem:[%s20267_s4 + $0x160] sm:$0xff] }
 0x95a   :  { %v3224_v45 = vpop.f32.mrf.mxu1  ;;  %v12328_v61 = vld [vmem:[%s20267_s4 + $0x190] sm:$0xff] }
 0x95b   :  { %v3238_v53 = vadd.f32 %v3224_v45, %v3106_v46  ;;  %v3257_v7 = vadd.f32 %v3246_v56, %v3237_v57  ;;  %v3264_v17 = vmax.f32 %v3256_v8, 0.0  ;;  %v12310_v45 = vld [vmem:[%s20267_s4 + $0x100] sm:$0xff]  ;;  %v3454_v46 = vld [vmem:[%s20267_s4 + $0x28] sm:$0xff]  ;;  %v12304_v57 = vld [vmem:[%s20267_s4 + $0xd0] sm:$0xff] }
 0x95c   :  { %v3228_v50 = vpop.f32.mrf.mxu1  ;;  %v12323_v8 = vld [vmem:[%s20267_s4 + $0x168] sm:$0xff] }
 0x95d   :  { %v3239_v54 = vadd.f32 %v3228_v50, %v3110_v47  ;;  %v3258_v4 = vadd.f32 %v3250_v60, %v3238_v53  ;;  %v3265_v15 = vmax.f32 %v3257_v7, 0.0  ;;  %v12309_v47 = vld [vmem:[%s20267_s4 + $0xf8] sm:$0xff]  ;;  %v12306_v53 = vld [vmem:[%s20267_s4 + $0xe0] sm:$0xff] }
 0x95e   :  { %v3230_v58 = vpop.f32.mrf.mxu1  ;;  %v3452_v50 = vld [vmem:[%s20267_s4 + $0x18] sm:$0xff] }
 0x95f   :  { %v3240_v62 = vadd.f32 %v3230_v58, %v3112_v52  ;;  %v3259_v1 = vadd.f32 %v3246_v56, %v3239_v54  ;;  %v3266_v13 = vmax.f32 %v3258_v4, 0.0  ;;  %v3451_v52 = vld [vmem:[%s20267_s4 + $0x10] sm:$0xff]  ;;  %v3450_v54 = vld [vmem:[%s20267_s4 + $0x8] sm:$0xff]  ;;  %v3449_v56 = vld [vmem:[%s20267_s4] sm:$0xff] }
 0x960   :  { %v3474_v58 = vld [vmem:[%s20267_s4 + $0xc8] sm:$0xff]  ;;  %v12325_v4 = vld [vmem:[%s20267_s4 + $0x178] sm:$0xff] }
 0x961   :  { %v3260_v5 = vadd.f32 %v3250_v60, %v3240_v62  ;;  %v3267_v11 = vmax.f32 %v3259_v1, 0.0  ;;  %v3473_v60 = vld [vmem:[%s20267_s4 + $0xc0] sm:$0xff]  ;;  %v3472_v62 = vld [vmem:[%s20267_s4 + $0xb8] sm:$0xff] }
 0x962   :  { %v12326_v1 = vld [vmem:[%s20267_s4 + $0x180] sm:$0xff]  ;;  %v3468_v7 = vld [vmem:[%s20267_s4 + $0x98] sm:$0xff] }
 0x963   :  { %v3268_v9 = vmax.f32 %v3260_v5, 0.0  ;;  %v3469_v5 = vld [vmem:[%s20267_s4 + $0xa0] sm:$0xff] }
 0x965   :  { %12292 = vmatprep.subr.msk.mxu0 %vm450_vm2, %v3268_v9  ;;  %12298 = vmatprep.subr.msk.mxu1 %vm450_vm2, %v3268_v9  ;;  %v3467_v9 = vld [vmem:[%s20267_s4 + $0x90] sm:$0xff] }
 0x966   :  { %12293 = vmatpush1.msk.msra.mxu0 %vm450_vm2, %v3267_v11  ;;  %12299 = vmatpush1.msk.msra.mxu1 %vm450_vm2, %v3267_v11  ;;  %v3466_v11 = vld [vmem:[%s20267_s4 + $0x88] sm:$0xff] }
 0x967   :  { %3309 = vmatprep.subr.mxu0 %v3266_v13  ;;  %3394 = vmatprep.subr.mxu1 %v3266_v13  ;;  %v3465_v13 = vld [vmem:[%s20267_s4 + $0x80] sm:$0xff] }
 0x968   :  { %3310 = vmatpush1.msra.mxu0 %v3265_v15  ;;  %3395 = vmatpush1.msra.mxu1 %v3265_v15  ;;  %v12344_v15 = vld [vmem:[%s20270_s5 + $0xc8] sm:$0xff] }
 0x969   :  { %3311 = vmatprep.subr.mxu0 %v3264_v17  ;;  %3396 = vmatprep.subr.mxu1 %v3264_v17  ;;  %v3675_v17 = vld [vmem:[%s20270_s5 + $0x60] sm:$0xff] }
 0x96a   :  { %3312 = vmatpush1.msra.mxu0 %v3263_v18  ;;  %3397 = vmatpush1.msra.mxu1 %v3263_v18 }
 0x96b   :  { %3313 = vmatprep.subr.mxu0 %v3262_v19  ;;  %3398 = vmatprep.subr.mxu1 %v3262_v19 }
 0x96c   :  { %3314 = vmatpush1.msra.mxu0 %v3261_v20  ;;  %3399 = vmatpush1.msra.mxu1 %v3261_v20 }
 0x96d   :  { %12294 = vmatmul.mubr.msk.f32.vlgmr.msra.gmra.mxu0 %vm443_vm3, %v3269_v22  ;;  %12300 = vmatmul.mubr.msk.f32.vlgmr.msra.gmra.mxu1 %vm443_vm3, %v12296_v23 }
 0x96e   :  { %3353 = vmatprep.mubr.f32.mxu0 %v15033_v3  ;;  %3438 = vmatprep.mubr.f32.mxu1 %v15033_v3 }
 0x96f   :  { %3481 = vmatprep.subr.mxu0 %v15033_v3  ;;  %3582 = vmatprep.subr.mxu1 %v15033_v3 }
 0x970   :  { %3482 = vmatpush1.msra.mxu0 %v3464_v24  ;;  %3583 = vmatpush1.msra.mxu1 %v12319_v25 }
 0x971   :  { %12295 = vmatmul.mubr.msk.f32.gmra.mxu0 %vm443_vm3, %v3270_v26  ;;  %12301 = vmatmul.mubr.msk.f32.gmra.mxu1 %vm443_vm3, %v12297_v27  ;;  %v12343_v27 = vld [vmem:[%s20270_s5 + $0xc0] sm:$0xff] }
 0x972   :  { %3483 = vmatprep.subr.mxu0 %v15033_v3  ;;  %3584 = vmatprep.subr.mxu1 %v15033_v3 }
 0x973   :  { %3484 = vmatpush1.msra.mxu0 %v3463_v28  ;;  %3585 = vmatpush1.msra.mxu1 %v12318_v29  ;;  %v3674_v28 = vld [vmem:[%s20270_s5 + $0x58] sm:$0xff] }
 0x974   :  { %3485 = vmatprep.subr.mxu0 %v15033_v3  ;;  %3586 = vmatprep.subr.mxu1 %v15033_v3 }
 0x975   :  { %3486 = vmatpush1.msra.mxu0 %v3462_v30  ;;  %3587 = vmatpush1.msra.mxu1 %v12317_v31 }
 0x976   :  { %3487 = vmatprep.subr.mxu0 %v15033_v3  ;;  %3588 = vmatprep.subr.mxu1 %v15033_v3 }
 0x977   :  { %3488 = vmatpush1.msra.mxu0 %v3461_v32  ;;  %3589 = vmatpush1.msra.mxu1 %v12316_v33  ;;  %v12342_v33 = vld [vmem:[%s20270_s5 + $0xb8] sm:$0xff] }
 0x978   :  { %3489 = vmatprep.subr.mxu0 %v15033_v3  ;;  %3590 = vmatprep.subr.mxu1 %v15033_v3 }
 0x979   :  { %3490 = vmatpush1.msra.mxu0 %v3460_v34  ;;  %3591 = vmatpush1.msra.mxu1 %v12315_v35  ;;  %v3673_v34 = vld [vmem:[%s20270_s5 + $0x50] sm:$0xff] }
 0x97a   :  { %3491 = vmatprep.subr.mxu0 %v15033_v3  ;;  %3592 = vmatprep.subr.mxu1 %v15033_v3  ;;  %v12341_v35 = vld [vmem:[%s20270_s5 + $0xb0] sm:$0xff] }
 0x97b   :  { %3492 = vmatpush1.msra.mxu0 %v3459_v36  ;;  %3593 = vmatpush1.msra.mxu1 %v12314_v37  ;;  %v3672_v36 = vld [vmem:[%s20270_s5 + $0x48] sm:$0xff] }
 0x97c   :  { %3493 = vmatprep.subr.mxu0 %v15033_v3  ;;  %3594 = vmatprep.subr.mxu1 %v15033_v3  ;;  %v12340_v37 = vld [vmem:[%s20270_s5 + $0xa8] sm:$0xff] }
 0x97d   :  { %3494 = vmatpush1.msra.mxu0 %v3458_v38  ;;  %3595 = vmatpush1.msra.mxu1 %v12313_v39  ;;  %v3671_v38 = vld [vmem:[%s20270_s5 + $0x40] sm:$0xff] }
 0x97e   :  { %3495 = vmatprep.subr.mxu0 %v15033_v3  ;;  %3596 = vmatprep.subr.mxu1 %v15033_v3  ;;  %v12339_v39 = vld [vmem:[%s20270_s5 + $0xa0] sm:$0xff] }
 0x97f   :  { %3496 = vmatpush1.msra.mxu0 %v3457_v40  ;;  %3597 = vmatpush1.msra.mxu1 %v12312_v41  ;;  %v3670_v40 = vld [vmem:[%s20270_s5 + $0x38] sm:$0xff] }
 0x980   :  { %3497 = vmatprep.subr.mxu0 %v15033_v3  ;;  %3598 = vmatprep.subr.mxu1 %v15033_v3  ;;  %v12338_v41 = vld [vmem:[%s20270_s5 + $0x98] sm:$0xff] }
 0x981   :  { %3498 = vmatpush1.msra.mxu0 %v3456_v42  ;;  %3599 = vmatpush1.msra.mxu1 %v12311_v43  ;;  %v3669_v42 = vld [vmem:[%s20270_s5 + $0x30] sm:$0xff] }
 0x982   :  { %3499 = vmatprep.subr.mxu0 %v15033_v3  ;;  %3600 = vmatprep.subr.mxu1 %v15033_v3  ;;  %v12337_v43 = vld [vmem:[%s20270_s5 + $0x90] sm:$0xff] }
 0x983   :  { %3500 = vmatpush1.msra.mxu0 %v3455_v44  ;;  %3601 = vmatpush1.msra.mxu1 %v12310_v45  ;;  %v3668_v44 = vld [vmem:[%s20270_s5 + $0x28] sm:$0xff] }
 0x984   :  { %3501 = vmatprep.subr.mxu0 %v15033_v3  ;;  %3602 = vmatprep.subr.mxu1 %v15033_v3  ;;  %v12336_v45 = vld [vmem:[%s20270_s5 + $0x88] sm:$0xff] }
 0x985   :  { %3502 = vmatpush1.msra.mxu0 %v3454_v46  ;;  %3603 = vmatpush1.msra.mxu1 %v12309_v47  ;;  %v3667_v46 = vld [vmem:[%s20270_s5 + $0x20] sm:$0xff] }
 0x986   :  { %3503 = vmatprep.subr.mxu0 %v15033_v3  ;;  %3604 = vmatprep.subr.mxu1 %v15033_v3  ;;  %v12335_v47 = vld [vmem:[%s20270_s5 + $0x80] sm:$0xff] }
 0x987   :  { %3504 = vmatpush1.msra.mxu0 %v3453_v48  ;;  %3605 = vmatpush1.msra.mxu1 %v12308_v49  ;;  %v3666_v48 = vld [vmem:[%s20270_s5 + $0x18] sm:$0xff] }
 0x988   :  { %3505 = vmatprep.subr.mxu0 %v15033_v3  ;;  %3606 = vmatprep.subr.mxu1 %v15033_v3  ;;  %v12334_v49 = vld [vmem:[%s20270_s5 + $0x78] sm:$0xff] }
 0x989   :  { %3506 = vmatpush1.msra.mxu0 %v3452_v50  ;;  %3607 = vmatpush1.msra.mxu1 %v12307_v51  ;;  %v3665_v50 = vld [vmem:[%s20270_s5 + $0x10] sm:$0xff] }
 0x98a   :  { %3507 = vmatprep.subr.mxu0 %v15033_v3  ;;  %3608 = vmatprep.subr.mxu1 %v15033_v3  ;;  %v12333_v51 = vld [vmem:[%s20270_s5 + $0x70] sm:$0xff] }
 0x98b   :  { %3508 = vmatpush1.msra.mxu0 %v3451_v52  ;;  %3609 = vmatpush1.msra.mxu1 %v12306_v53  ;;  %v3664_v52 = vld [vmem:[%s20270_s5 + $0x8] sm:$0xff] }
 0x98c   :  { %3509 = vmatprep.subr.mxu0 %v15033_v3  ;;  %3610 = vmatprep.subr.mxu1 %v15033_v3  ;;  %v12332_v53 = vld [vmem:[%s20270_s5 + $0x68] sm:$0xff] }
 0x98d   :  { %3510 = vmatpush1.msra.mxu0 %v3450_v54  ;;  %3611 = vmatpush1.msra.mxu1 %v12305_v55  ;;  %v3663_v54 = vld [vmem:[%s20270_s5] sm:$0xff]  ;;  %v12361_v55 = vld [vmem:[%s20270_s5 + $0x130] sm:$0xff] }
 0x98e   :  { %3511 = vmatprep.subr.mxu0 %v15033_v3  ;;  %3612 = vmatprep.subr.mxu1 %v15033_v3 }
 0x98f   :  { %3512 = vmatpush1.msra.mxu0 %v3449_v56  ;;  %3613 = vmatpush1.msra.mxu1 %v12304_v57 }
 0x990   :  { %3525 = vmatprep.subr.mxu0 %v15033_v3  ;;  %3626 = vmatprep.subr.mxu1 %v15033_v3 }
 0x991   :  { %3526 = vmatpush2.msra.mxu0 %v3474_v58  ;;  %3627 = vmatpush2.msra.mxu1 %v12329_v59 }
 0x992   :  { %3527 = vmatprep.subr.mxu0 %v15033_v3  ;;  %3628 = vmatprep.subr.mxu1 %v15033_v3 }
 0x993   :  { %3528 = vmatpush2.msra.mxu0 %v3473_v60  ;;  %3629 = vmatpush2.msra.mxu1 %v12328_v61 }
 0x994   :  { %3529 = vmatprep.subr.mxu0 %v15033_v3  ;;  %3630 = vmatprep.subr.mxu1 %v15033_v3 }
 0x995   :  { %3530 = vmatpush2.msra.mxu0 %v3472_v62  ;;  %3631 = vmatpush2.msra.mxu1 %v12327_v63 }
 0x996   :  { %3531 = vmatprep.subr.mxu0 %v15033_v3  ;;  %3632 = vmatprep.subr.mxu1 %v15033_v3 }
 0x997   :  { %3532 = vmatpush2.msra.mxu0 %v3471_v0  ;;  %3633 = vmatpush2.msra.mxu1 %v12326_v1 }
 0x998   :  { %3533 = vmatprep.subr.mxu0 %v15033_v3  ;;  %3634 = vmatprep.subr.mxu1 %v15033_v3 }
 0x999   :  { %3534 = vmatpush2.msra.mxu0 %v3470_v2  ;;  %3635 = vmatpush2.msra.mxu1 %v12325_v4 }
 0x99a   :  { %3535 = vmatprep.subr.mxu0 %v15033_v3  ;;  %3636 = vmatprep.subr.mxu1 %v15033_v3 }
 0x99b   :  { %3536 = vmatpush2.msra.mxu0 %v3469_v5  ;;  %3637 = vmatpush2.msra.mxu1 %v12324_v6 }
 0x99c   :  { %3537 = vmatprep.subr.mxu0 %v15033_v3  ;;  %3638 = vmatprep.subr.mxu1 %v15033_v3 }
 0x99d   :  { %3538 = vmatpush2.msra.mxu0 %v3468_v7  ;;  %3639 = vmatpush2.msra.mxu1 %v12323_v8  ;;  %v12360_v7 = vld [vmem:[%s20270_s5 + $0x128] sm:$0xff] }
 0x99e   :  { %3539 = vmatprep.subr.mxu0 %v15033_v3  ;;  %3640 = vmatprep.subr.mxu1 %v15033_v3 }
 0x99f   :  { %3540 = vmatpush2.msra.mxu0 %v3467_v9  ;;  %3641 = vmatpush2.msra.mxu1 %v12322_v10  ;;  %v12359_v9 = vld [vmem:[%s20270_s5 + $0x120] sm:$0xff]  ;;  %v12358_v10 = vld [vmem:[%s20270_s5 + $0x118] sm:$0xff] }
 0x9a0   :  { %3541 = vmatprep.subr.mxu0 %v15033_v3  ;;  %3642 = vmatprep.subr.mxu1 %v15033_v3 }
 0x9a1   :  { %3542 = vmatpush2.msra.mxu0 %v3466_v11  ;;  %3643 = vmatpush2.msra.mxu1 %v12321_v12  ;;  %v12357_v11 = vld [vmem:[%s20270_s5 + $0x110] sm:$0xff]  ;;  %v12356_v12 = vld [vmem:[%s20270_s5 + $0x108] sm:$0xff] }
 0x9a2   :  { %3543 = vmatprep.subr.mxu0 %v15033_v3  ;;  %3644 = vmatprep.subr.mxu1 %v15033_v3 }
 0x9a3   :  { %3544 = vmatpush2.msra.mxu0 %v3465_v13  ;;  %3645 = vmatpush2.msra.mxu1 %v12320_v14  ;;  %v12355_v13 = vld [vmem:[%s20270_s5 + $0x100] sm:$0xff]  ;;  %v12354_v14 = vld [vmem:[%s20270_s5 + $0xf8] sm:$0xff] }
 0x9a4   :  { %14037 = vmatprep.subr.mxu0 %v12344_v15  ;;  %14066 = vmatprep.subr.mxu1 %v3675_v17 }
 0xa2d   :  { %v3349_v18 = vpop.f32.mrf.mxu0  ;;  %v3434_v19 = vpop.f32.mrf.mxu1 }
 0xa2e   :  { %v3445_v24 = vmax.f32 %v3349_v18, %v3434_v19  ;;  %v12351_v18 = vld [vmem:[%s20270_s5 + $0xe0] sm:$0xff]  ;;  %v12350_v19 = vld [vmem:[%s20270_s5 + $0xd8] sm:$0xff] }
 0xa2f   :  { %v3351_v20 = vpop.f32.mrf.mxu0  ;;  %v3436_v22 = vpop.f32.mrf.mxu1 }
 0xa30   :  { %v3446_v23 = vmax.f32 %v3351_v20, %v3436_v22  ;;  %v12349_v20 = vld [vmem:[%s20270_s5 + $0xd0] sm:$0xff] }
 0xa31   :  { %v3355_v25 = vpop.f32.mrf.mxu0  ;;  %v3440_v26 = vpop.f32.mrf.mxu1 }
 0xa32   :  { %12302 = vmatprep.mubr.msk.f32.mxu0 %vm650_vm4, %v3446_v23  ;;  %12330 = vmatprep.mubr.msk.f32.mxu1 %vm650_vm4, %v3446_v23  ;;  %v3447_v32 = vmax.f32 %v3355_v25, %v3440_v26  ;;  %v12381_v23 = vld [vmem:[%s20271_s8 + $0xa8] sm:$0xff]  ;;  %v12379_v25 = vld [vmem:[%s20271_s8 + $0x98] sm:$0xff]  ;;  %v12378_v26 = vld [vmem:[%s20271_s8 + $0x90] sm:$0xff] }
 0xa33   :  { %v3357_v29 = vpop.f32.mrf.mxu0  ;;  %v3442_v30 = vpop.f32.mrf.mxu1  ;;  %3546 = vmatmul.mubr.f32.vlgmr.msra.gmra.mxu0 %v3445_v24  ;;  %3647 = vmatmul.mubr.f32.vlgmr.msra.gmra.mxu1 %v3445_v24  ;;  %v12380_v24 = vld [vmem:[%s20271_s8 + $0xa0] sm:$0xff] }
 0xa34   :  { %v3448_v31 = vmax.f32 %v3357_v29, %v3442_v30  ;;  %14038 = vmatpush3.msra.mxu0 %v12344_v15  ;;  %14067 = vmatpush3.msra.mxu1 %v3675_v17  ;;  %v12353_v15 = vld [vmem:[%s20270_s5 + $0xf0] sm:$0xff]  ;;  %v12352_v17 = vld [vmem:[%s20270_s5 + $0xe8] sm:$0xff]  ;;  %v12375_v29 = vld [vmem:[%s20271_s8 + $0x78] sm:$0xff] }
 0xa35   :  { %14039 = vmatprep.subr.mxu0 %v12343_v27  ;;  %14068 = vmatprep.subr.mxu1 %v3674_v28  ;;  %v12374_v30 = vld [vmem:[%s20271_s8 + $0x70] sm:$0xff] }
 0xa36   :  { %12303 = vmatprep.mubr.msk.f32.mxu0 %vm650_vm4, %v3448_v31  ;;  %12331 = vmatprep.mubr.msk.f32.mxu1 %vm650_vm4, %v3448_v31 }
 0xa37   :  { %3551 = vmatmul.mubr.f32.gmra.mxu0 %v3447_v32  ;;  %3652 = vmatmul.mubr.f32.gmra.mxu1 %v3447_v32 }
 0xa38   :  { %14040 = vmatpush3.msra.mxu0 %v12343_v27  ;;  %14069 = vmatpush3.msra.mxu1 %v3674_v28  ;;  %v12377_v27 = vld [vmem:[%s20271_s8 + $0x88] sm:$0xff]  ;;  %v12376_v28 = vld [vmem:[%s20271_s8 + $0x80] sm:$0xff] }
 0xa39   :  { %14041 = vmatprep.subr.mxu0 %v12342_v33  ;;  %14070 = vmatprep.subr.mxu1 %v3673_v34 }
 0xa3a   :  { %14042 = vmatpush3.msra.mxu0 %v12342_v33  ;;  %14071 = vmatpush3.msra.mxu1 %v3673_v34 }
 0xa3b   :  { %14043 = vmatprep.subr.mxu0 %v12341_v35  ;;  %14072 = vmatprep.subr.mxu1 %v3672_v36 }
 0xa3c   :  { %14044 = vmatpush3.msra.mxu0 %v12341_v35  ;;  %14073 = vmatpush3.msra.mxu1 %v3672_v36 }
 0xa3d   :  { %14045 = vmatprep.subr.mxu0 %v12340_v37  ;;  %14074 = vmatprep.subr.mxu1 %v3671_v38 }
 0xa3e   :  { %14046 = vmatpush3.msra.mxu0 %v12340_v37  ;;  %14075 = vmatpush3.msra.mxu1 %v3671_v38  ;;  %v12364_v37 = vld [vmem:[%s20272_s6] ss:$0 sm:$0xff] }
 0xa3f   :  { %14047 = vmatprep.subr.mxu0 %v12339_v39  ;;  %14076 = vmatprep.subr.mxu1 %v3670_v40 }
 0xa40   :  { %14048 = vmatpush3.msra.mxu0 %v12339_v39  ;;  %14077 = vmatpush3.msra.mxu1 %v3670_v40 }
 0xa41   :  { %14049 = vmatprep.subr.mxu0 %v12338_v41  ;;  %14078 = vmatprep.subr.mxu1 %v3669_v42 }
 0xa42   :  { %14050 = vmatpush3.msra.mxu0 %v12338_v41  ;;  %14079 = vmatpush3.msra.mxu1 %v3669_v42 }
 0xa43   :  { %14051 = vmatprep.subr.mxu0 %v12337_v43  ;;  %14080 = vmatprep.subr.mxu1 %v3668_v44 }
 0xa44   :  { %14052 = vmatpush3.msra.mxu0 %v12337_v43  ;;  %14081 = vmatpush3.msra.mxu1 %v3668_v44 }
 0xa45   :  { %14053 = vmatprep.subr.mxu0 %v12336_v45  ;;  %14082 = vmatprep.subr.mxu1 %v3667_v46 }
 0xa46   :  { %14054 = vmatpush3.msra.mxu0 %v12336_v45  ;;  %14083 = vmatpush3.msra.mxu1 %v3667_v46  ;;  %v3962_v46 = vld [vmem:[%s20273_s7] sm:$0x1f] }
 0xa47   :  { %14055 = vmatprep.subr.mxu0 %v12335_v47  ;;  %14084 = vmatprep.subr.mxu1 %v3666_v48 }
 0xa48   :  { %14056 = vmatpush3.msra.mxu0 %v12335_v47  ;;  %14085 = vmatpush3.msra.mxu1 %v3666_v48  ;;  %v12367_v47 = vld [vmem:[%s20273_s7 + $0x8] sm:$0x1f]  ;;  %v4124_v48 = vld [vmem:[%s20271_s8 + $0x50] sm:$0xff] }
 0xa49   :  { %14057 = vmatprep.subr.mxu0 %v12334_v49  ;;  %14086 = vmatprep.subr.mxu1 %v3665_v50 }
 0xa4a   :  { %14058 = vmatpush3.msra.mxu0 %v12334_v49  ;;  %14087 = vmatpush3.msra.mxu1 %v3665_v50  ;;  %v4123_v49 = vld [vmem:[%s20271_s8 + $0x48] sm:$0xff]  ;;  %v4122_v50 = vld [vmem:[%s20271_s8 + $0x40] sm:$0xff] }
 0xa4b   :  { %14059 = vmatprep.subr.mxu0 %v12333_v51  ;;  %14088 = vmatprep.subr.mxu1 %v3664_v52 }
 0xa4c   :  { %14060 = vmatpush3.msra.mxu0 %v12333_v51  ;;  %14089 = vmatpush3.msra.mxu1 %v3664_v52  ;;  %v4121_v51 = vld [vmem:[%s20271_s8 + $0x38] sm:$0xff]  ;;  %v4120_v52 = vld [vmem:[%s20271_s8 + $0x30] sm:$0xff] }
 0xa4d   :  { %14061 = vmatprep.subr.mxu0 %v12332_v53  ;;  %14090 = vmatprep.subr.mxu1 %v3663_v54 }
 0xa4e   :  { %14062 = vmatpush3.msra.mxu0 %v12332_v53  ;;  %14091 = vmatpush3.msra.mxu1 %v3663_v54  ;;  %v4119_v53 = vld [vmem:[%s20271_s8 + $0x28] sm:$0xff]  ;;  %v4118_v54 = vld [vmem:[%s20271_s8 + $0x20] sm:$0xff] }
 0xa4f   :  { %14095 = vmatprep.subr.mxu0 %v12361_v55  ;;  %14124 = vmatprep.subr.mxu1 %v15033_v3 }
 0xaf3   :  { %v3547_v56 = vpop.f32.mrf.mxu0  ;;  %v3648_v57 = vpop.f32.mrf.mxu1 }
 0xaf4   :  { %v3657_v58 = vmax.f32 %v3547_v56, %v3648_v57  ;;  %v4116_v56 = vld [vmem:[%s20271_s8 + $0x10] sm:$0xff]  ;;  %v12373_v57 = vld [vmem:[%s20271_s8 + $0x68] sm:$0xff] }
 0xaf5   :  { %v3549_v59 = vpop.f32.mrf.mxu0  ;;  %v3650_v60 = vpop.f32.mrf.mxu1 }
 0xaf6   :  { %3659 = vst.msk [vmem:[#allocation2] sm:$0xff] %vm836_vm5, %v3657_v58  ;;  %v4115_v58 = vld [vmem:[%s20271_s8 + $0x8] sm:$0xff]  ;;  %v12372_v59 = vld [vmem:[%s20271_s8 + $0x60] sm:$0xff] }
 0xaf7   :  { %v3552_v61 = vpop.f32.mrf.mxu0  ;;  %v3653_v62 = vpop.f32.mrf.mxu1  ;;  %v4114_v60 = vld [vmem:[%s20271_s8] sm:$0xff] }
 0xaf8   :  { %v3658_v63 = vmax.f32 %v3552_v61, %v3653_v62  ;;  %v12371_v61 = vld [vmem:[%s20271_s8 + $0x58] sm:$0xff] }
 0xaf9   :  { %v3554_v0 = vpop.f32.mrf.mxu0  ;;  %v3655_v1 = vpop.f32.mrf.mxu1  ;;  %v12398_v62 = vld [vmem:[%s20265_s1 + $0x78] sm:$0xf] }
 0xafa   :  { %3660 = vst.msk [vmem:[#allocation2 + $0x8] sm:$0x1f] %vm838_vm6, %v3658_v63  ;;  %v4294_v63 = vld [vmem:[%s20265_s1 + $0x38] sm:$0xf] }
 0xafd   :  { %v3661_v2 = vld [vmem:[#allocation2] sm:$0xff] }
 0xafe   :  { %14092 = vmatprep.mubr.msk.f32.mxu1 %vm836_vm5, %v3661_v2 }
 0xb01   :  { %v3676_v4 = vld [vmem:[#allocation2 + $0x1] sm:$0xff]  ;;  %v3677_v6 = vld [vmem:[#allocation2 + $0x9] sm:$0x7] }
 0xb02   :  { %v3662_v5 = vld [vmem:[#allocation2 + $0x8] sm:$0x7]  ;;  %14063 = vmatprep.mubr.msk.f32.mxu0 %vm836_vm5, %v3676_v4 }
 0xb03   :  { %14093 = vmatmul.mubr.msk.f32.vlgmr.msra.gmra.mxu1 %vm836_vm5, %v3662_v5  ;;  %14064 = vmatmul.mubr.msk.f32.vlgmr.msra.gmra.mxu0 %vm836_vm5, %v3677_v6  ;;  %v3853_v8 = vld [vmem:[#allocation2 + $0x2] sm:$0xff]  ;;  %v3854_v22 = vld [vmem:[#allocation2 + $0xa] sm:$0x7]  ;;  %v12397_v5 = vld [vmem:[%s20265_s1 + $0x70] sm:$0xf] }
 0xb04   :  { %14128 = vmatprep.mubr.msk.f32.mxu1 %vm15034_vm7, %v15033_v3  ;;  %14096 = vmatpush3.msra.mxu0 %v12361_v55  ;;  %v4117_v55 = vld [vmem:[%s20271_s8 + $0x18] sm:$0xff]  ;;  %v4293_v6 = vld [vmem:[%s20265_s1 + $0x30] sm:$0xf] }
 0xb05   :  { %14121 = vmatprep.mubr.msk.f32.mxu0 %vm836_vm5, %v3853_v8  ;;  %14097 = vmatprep.subr.mxu0 %v12360_v7  ;;  %v12396_v8 = vld [vmem:[%s20265_s1 + $0x68] sm:$0xff] }
 0xb06   :  { %14098 = vmatpush3.msra.mxu0 %v12360_v7 }
 0xb07   :  { %14099 = vmatprep.subr.mxu0 %v12359_v9 }
 0xb08   :  { %14100 = vmatpush3.msra.mxu0 %v12359_v9  ;;  %v4292_v9 = vld [vmem:[%s20265_s1 + $0x28] sm:$0xff] }
 0xb09   :  { %14101 = vmatprep.subr.mxu0 %v12358_v10 }
 0xb0a   :  { %14102 = vmatpush3.msra.mxu0 %v12358_v10  ;;  %v12395_v10 = vld [vmem:[%s20265_s1 + $0x60] sm:$0xff] }
 0xb0b   :  { %14103 = vmatprep.subr.mxu0 %v12357_v11 }
 0xb0c   :  { %14104 = vmatpush3.msra.mxu0 %v12357_v11  ;;  %v4291_v11 = vld [vmem:[%s20265_s1 + $0x20] sm:$0xff] }
 0xb0d   :  { %14105 = vmatprep.subr.mxu0 %v12356_v12 }
 0xb0e   :  { %14106 = vmatpush3.msra.mxu0 %v12356_v12  ;;  %v12394_v12 = vld [vmem:[%s20265_s1 + $0x58] sm:$0xff] }
 0xb0f   :  { %14107 = vmatprep.subr.mxu0 %v12355_v13 }
 0xb10   :  { %14108 = vmatpush3.msra.mxu0 %v12355_v13  ;;  %v4290_v13 = vld [vmem:[%s20265_s1 + $0x18] sm:$0xff] }
 0xb11   :  { %14109 = vmatprep.subr.mxu0 %v12354_v14 }
 0xb12   :  { %14110 = vmatpush3.msra.mxu0 %v12354_v14  ;;  %v12393_v14 = vld [vmem:[%s20265_s1 + $0x50] sm:$0xff] }
 0xb13   :  { %14111 = vmatprep.subr.mxu0 %v12353_v15 }
 0xb14   :  { %14112 = vmatpush3.msra.mxu0 %v12353_v15  ;;  %v4289_v15 = vld [vmem:[%s20265_s1 + $0x10] sm:$0xff] }
 0xb15   :  { %14113 = vmatprep.subr.mxu0 %v12352_v17 }
 0xb16   :  { %14114 = vmatpush3.msra.mxu0 %v12352_v17  ;;  %v12392_v17 = vld [vmem:[%s20265_s1 + $0x48] sm:$0xff] }
 0xb17   :  { %14115 = vmatprep.subr.mxu0 %v12351_v18 }
 0xb18   :  { %14116 = vmatpush3.msra.mxu0 %v12351_v18  ;;  %v4288_v18 = vld [vmem:[%s20265_s1 + $0x8] sm:$0xff] }
 0xb19   :  { %14117 = vmatprep.subr.mxu0 %v12350_v19 }
 0xb1a   :  { %14118 = vmatpush3.msra.mxu0 %v12350_v19  ;;  %v12391_v19 = vld [vmem:[%s20265_s1 + $0x40] sm:$0xff] }
 0xb1b   :  { %14119 = vmatprep.subr.mxu0 %v12349_v20 }
 0xb1c   :  { %14120 = vmatpush3.msra.mxu0 %v12349_v20  ;;  %v4287_v20 = vld [vmem:[%s20265_s1] sm:$0xff] }
 0xb1d   :  { %14122 = vmatmul.mubr.msk.f32.vlgmr.msra.gmra.mxu0 %vm836_vm5, %v3854_v22  ;;  %14163 = vmatprep.subr.mxu0 %v15033_v3  ;;  %v12387_v22 = vld [vmem:[%s20266_s0 + $0x61] sm:$0xff] }
 0xb1e   :  { %14185 = vmatprep.mubr.msk.f32.mxu0 %vm15034_vm7, %v15033_v3  ;;  %14164 = vmatpush3.msra.mxu0 %v12381_v23  ;;  %v12383_v23 = vld [vmem:[%s20266_s0 + $0x60] sm:$0xff] }
 0xb1f   :  { %14165 = vmatprep.subr.mxu0 %v15033_v3 }
 0xb20   :  { %14166 = vmatpush3.msra.mxu0 %v12380_v24  ;;  %v12422_v24 = vld [vmem:[%s20265_s1 + $0xb8] sm:$0xf] }
 0xb21   :  { %14167 = vmatprep.subr.mxu0 %v15033_v3 }
 0xb22   :  { %14168 = vmatpush3.msra.mxu0 %v12379_v25  ;;  %v12421_v25 = vld [vmem:[%s20265_s1 + $0xb0] sm:$0xf] }
 0xb23   :  { %14169 = vmatprep.subr.mxu0 %v15033_v3 }
 0xb24   :  { %14170 = vmatpush3.msra.mxu0 %v12378_v26  ;;  %v12388_v26 = vld [vmem:[%s20266_s0 + $0x69] sm:$0xff] }
 0xb25   :  { %14171 = vmatprep.subr.mxu0 %v15033_v3 }
 0xb26   :  { %14172 = vmatpush3.msra.mxu0 %v12377_v27  ;;  %v12384_v27 = vld [vmem:[%s20266_s0 + $0x68] sm:$0xff] }
 0xb27   :  { %14173 = vmatprep.subr.mxu0 %v15033_v3 }
 0xb28   :  { %14174 = vmatpush3.msra.mxu0 %v12376_v28  ;;  %v12420_v28 = vld [vmem:[%s20265_s1 + $0xa8] sm:$0xff] }
 0xb29   :  { %14175 = vmatprep.subr.mxu0 %v15033_v3 }
 0xb2a   :  { %14176 = vmatpush3.msra.mxu0 %v12375_v29  ;;  %v12419_v29 = vld [vmem:[%s20265_s1 + $0xa0] sm:$0xff] }
 0xb2b   :  { %14177 = vmatprep.subr.mxu0 %v15033_v3 }
 0xb2c   :  { %14178 = vmatpush3.msra.mxu0 %v12374_v30  ;;  %v12389_v30 = vld [vmem:[%s20266_s0 + $0x71] sm:$0xff] }
 0xb2d   :  { %14179 = vmatprep.subr.mxu0 %v15033_v3 }
 0xb2e   :  { %14180 = vmatpush3.msra.mxu0 %v12373_v57 }
 0xb2f   :  { %14181 = vmatprep.subr.mxu0 %v15033_v3 }
 0xb30   :  { %14182 = vmatpush3.msra.mxu0 %v12372_v59 }
 0xb31   :  { %14183 = vmatprep.subr.mxu0 %v15033_v3 }
 0xb32   :  { %14184 = vmatpush3.msra.mxu0 %v12371_v61 }
 0xb33   :  { %12405 = vmatprep.subr.msk.mxu0 %vm82_vm0, %v4294_v63 }
 0xbc3   :  { %v14094_v31 = vpop.f32.mrf.mxu1  ;;  %v14065_v32 = vpop.f32.mrf.mxu0 }
 0xbc4   :  { %v3850_v35 = vadd.f32 %v14094_v31, %v14065_v32  ;;  %v12385_v31 = vld [vmem:[%s20266_s0 + $0x70] sm:$0xff]  ;;  %v12418_v32 = vld [vmem:[%s20265_s1 + $0x98] sm:$0xff] }
 0xbc5   :  { %v3844_v33 = vpop.f32.mrf.mxu1  ;;  %v3763_v34 = vpop.f32.mrf.mxu0 }
 0xbc6   :  { %v3845_v38 = vadd.f32 %v3844_v33, %v3763_v34  ;;  %v12417_v33 = vld [vmem:[%s20265_s1 + $0x90] sm:$0xff]  ;;  %v12390_v34 = vld [vmem:[%s20266_s0 + $0x79] sm:$0x3] }
 0xbdd   :  { %v14123_v36 = vpop.f32.mrf.mxu0 }
 0xbde   :  { %v3950_v39 = vadd.f32 %v14123_v36, %v3850_v35  ;;  %v12386_v35 = vld [vmem:[%s20266_s0 + $0x78] sm:$0x3]  ;;  %v12416_v36 = vld [vmem:[%s20265_s1 + $0x88] sm:$0xff] }
 0xbdf   :  { %v3940_v40 = vpop.f32.mrf.mxu0 }
 0xbe0   :  { %v3959_v41 = vadd.f32 %v12364_v37, %v3950_v39  ;;  %v3949_v42 = vadd.f32 %v3940_v40, %v3845_v38  ;;  %v12411_v38 = vld [vmem:[%s20266_s0 + $0x62] sm:$0xff]  ;;  %v12412_v39 = vld [vmem:[%s20266_s0 + $0x6a] sm:$0xff]  ;;  %v12413_v40 = vld [vmem:[%s20266_s0 + $0x72] sm:$0xff] }
 0xbe2   :  { %v3961_v43 = vmax.f32 %v3959_v41, 0.0  ;;  %v3958_v44 = vadd.f32 %v12364_v37, %v3949_v42  ;;  %v12415_v37 = vld [vmem:[%s20265_s1 + $0x80] sm:$0xff]  ;;  %v12414_v41 = vld [vmem:[%s20266_s0 + $0x7a] sm:$0x3] }
 0xbe4   :  { %v3960_v45 = vmax.f32 %v3958_v44, 0.0  ;;  %14125 = vmatpush3.msk.msra.mxu1 %vm1148_vm8, %v3961_v43 }
 0xbe5   :  { %14126 = vmatprep.subr.mxu1 %v15033_v3 }
 0xbe6   :  { %14127 = vmatpush3.msra.mxu1 %v3960_v45 }
 0xbe7   :  { %14129 = vmatmul.mubr.msk.f32.vlgmr.msra.gmra.mxu1 %vm1144_vm9, %v3962_v46  ;;  %14131 = vmatprep.subr.mxu1 %v15033_v3 }
 0xbe8   :  { %14132 = vmatpush3.msk.msra.mxu1 %vm1148_vm8, %v3961_v43  ;;  %14135 = vmatprep.mubr.msk.f32.mxu1 %vm15034_vm7, %v15033_v3 }
 0xbe9   :  { %14133 = vmatprep.subr.mxu1 %v15033_v3 }
 0xbea   :  { %14134 = vmatpush3.msra.mxu1 %v3960_v45 }
 0xbeb   :  { %14136 = vmatmul.mubr.msk.f32.vlgmr.msra.gmra.mxu1 %vm1144_vm9, %v12367_v47  ;;  %14138 = vmatprep.subr.mxu1 %v15033_v3 }
 0xbec   :  { %14139 = vmatpush3.msra.mxu1 %v4124_v48  ;;  %14160 = vmatprep.mubr.msk.f32.mxu1 %vm15034_vm7, %v15033_v3 }
 0xbed   :  { %14140 = vmatprep.subr.mxu1 %v15033_v3 }
 0xbee   :  { %14141 = vmatpush3.msra.mxu1 %v4123_v49 }
 0xbef   :  { %14142 = vmatprep.subr.mxu1 %v15033_v3 }
 0xbf0   :  { %14143 = vmatpush3.msra.mxu1 %v4122_v50 }
 0xbf1   :  { %14144 = vmatprep.subr.mxu1 %v15033_v3 }
 0xbf2   :  { %14145 = vmatpush3.msra.mxu1 %v4121_v51 }
 0xbf3   :  { %14146 = vmatprep.subr.mxu1 %v15033_v3 }
 0xbf4   :  { %14147 = vmatpush3.msra.mxu1 %v4120_v52 }
 0xbf5   :  { %14148 = vmatprep.subr.mxu1 %v15033_v3 }
 0xbf6   :  { %14149 = vmatpush3.msra.mxu1 %v4119_v53 }
 0xbf7   :  { %14150 = vmatprep.subr.mxu1 %v15033_v3 }
 0xbf8   :  { %14151 = vmatpush3.msra.mxu1 %v4118_v54 }
 0xbf9   :  { %14152 = vmatprep.subr.mxu1 %v15033_v3 }
 0xbfa   :  { %14153 = vmatpush3.msra.mxu1 %v4117_v55 }
 0xbfb   :  { %14154 = vmatprep.subr.mxu1 %v15033_v3 }
 0xbfc   :  { %14155 = vmatpush3.msra.mxu1 %v4116_v56 }
 0xbfd   :  { %14156 = vmatprep.subr.mxu1 %v15033_v3 }
 0xbfe   :  { %14157 = vmatpush3.msra.mxu1 %v4115_v58 }
 0xbff   :  { %14158 = vmatprep.subr.mxu1 %v15033_v3 }
 0xc00   :  { %14159 = vmatpush3.msra.mxu1 %v4114_v60 }
 0xc01   :  { %12399 = vmatprep.subr.msk.mxu1 %vm82_vm0, %v12398_v62 }
 0xca7   :  { %v4035_v0 = vpop.f32.mrf.mxu1 }
 0xca9   :  { %v14130_v1 = vpop.f32.mrf.mxu1 }
 0xcab   :  { %v4109_v2 = vpop.f32.mrf.mxu1 }
 0xcac   :  { %v4113_v4 = vmax.f32 %v4035_v0, %v4109_v2 }
 0xcad   :  { %v14137_v7 = vpop.f32.mrf.mxu1 }
 0xcae   :  { %14161 = vmatmul.mubr.msk.f32.vlgmr.msra.gmra.mxu1 %vm1309_vm10, %v4113_v4  ;;  %14186 = vmatmul.mubr.msk.f32.vlgmr.msra.gmra.mxu0 %vm1309_vm10, %v4113_v4 }
 0xcaf   :  { %12400 = vmatpush1.msk.msra.mxu1 %vm82_vm0, %v12397_v5  ;;  %12406 = vmatpush1.msk.msra.mxu0 %vm82_vm0, %v4293_v6 }
 0xcb0   :  { %4351 = vmatprep.subr.mxu1 %v12396_v8  ;;  %4458 = vmatprep.subr.mxu0 %v4292_v9  ;;  %v4648_v8 = vld [vmem:[%s20268_s2] sm:$0x3] }
 0xcb1   :  { %4352 = vmatpush1.msra.mxu1 %v12395_v10  ;;  %4459 = vmatpush1.msra.mxu0 %v4291_v11 }
 0xcb2   :  { %4353 = vmatprep.subr.mxu1 %v12394_v12  ;;  %4460 = vmatprep.subr.mxu0 %v4290_v13 }
 0xcb3   :  { %4354 = vmatpush1.msra.mxu1 %v12393_v14  ;;  %4461 = vmatpush1.msra.mxu0 %v4289_v15 }
 0xcb4   :  { %4355 = vmatprep.subr.mxu1 %v12392_v17  ;;  %4462 = vmatprep.subr.mxu0 %v4288_v18  ;;  %v4653_v17 = vrot.slane %v4648_v8, %v15321_v16 }
 0xcb5   :  { %4356 = vmatpush1.msra.mxu1 %v12391_v19  ;;  %4389 = vmatprep.mubr.f32.mxu1 %v15033_v3 }
 0xcb6   :  { %4463 = vmatpush1.msra.mxu0 %v4287_v20  ;;  %4496 = vmatprep.mubr.f32.mxu0 %v15033_v3 }
 0xcb7   :  { %12401 = vmatmul.mubr.msk.f32.vlgmr.msra.gmra.mxu1 %vm69_vm1, %v12387_v22  ;;  %12407 = vmatmul.mubr.msk.f32.vlgmr.msra.gmra.mxu0 %vm69_vm1, %v12383_v23  ;;  %v4657_v22 = vrot.slane %v4648_v8, %v15326_v21  ;;  %v4860_v8 = vld [vmem:[%s20267_s4 + $0x20] sm:$0xff] }
 0xcb8   :  { %4395 = vmatprep.mubr.f32.mxu1 %v15033_v3  ;;  %4502 = vmatprep.mubr.f32.mxu0 %v15033_v3 }
 0xcb9   :  { %12423 = vmatprep.subr.msk.mxu1 %vm82_vm0, %v12422_v24 }
 0xcba   :  { %12424 = vmatpush1.msk.msra.mxu1 %vm82_vm0, %v12421_v25 }
 0xcbb   :  { %12402 = vmatmul.mubr.msk.f32.gmra.mxu1 %vm69_vm1, %v12388_v26  ;;  %12408 = vmatmul.mubr.msk.f32.gmra.mxu0 %vm69_vm1, %v12384_v27 }
 0xcbc   :  { %4401 = vmatprep.mubr.f32.mxu1 %v15033_v3  ;;  %4508 = vmatprep.mubr.f32.mxu0 %v15033_v3 }
 0xcbd   :  { %4577 = vmatprep.subr.mxu1 %v12420_v28 }
 0xcbe   :  { %4578 = vmatpush1.msra.mxu1 %v12419_v29 }
 0xcbf   :  { %12403 = vmatmul.mubr.msk.f32.gmra.mxu1 %vm69_vm1, %v12389_v30  ;;  %12409 = vmatmul.mubr.msk.f32.gmra.mxu0 %vm69_vm1, %v12385_v31 }
 0xcc0   :  { %4407 = vmatprep.mubr.f32.mxu1 %v15033_v3  ;;  %4514 = vmatprep.mubr.f32.mxu0 %v15033_v3 }
 0xcc1   :  { %4579 = vmatprep.subr.mxu1 %v12418_v32 }
 0xcc2   :  { %4580 = vmatpush1.msra.mxu1 %v12417_v33 }
 0xcc3   :  { %12404 = vmatmul.mubr.msk.f32.gmra.mxu1 %vm69_vm1, %v12390_v34  ;;  %12410 = vmatmul.mubr.msk.f32.gmra.mxu0 %vm69_vm1, %v12386_v35 }
 0xcc4   :  { %4581 = vmatprep.subr.mxu1 %v12416_v36  ;;  %4615 = vmatprep.mubr.f32.mxu1 %v15033_v3 }
 0xcc5   :  { %4582 = vmatpush1.msra.mxu1 %v12415_v37  ;;  %4754 = vmatprep.mubr.f32.mxu0 %v15033_v3 }
 0xcc7   :  { %12425 = vmatmul.mubr.msk.f32.vlgmr.msra.gmra.mxu1 %vm69_vm1, %v12411_v38 }
 0xcc8   :  { %4621 = vmatprep.mubr.f32.mxu1 %v15033_v3 }
 0xccb   :  { %12426 = vmatmul.mubr.msk.f32.gmra.mxu1 %vm69_vm1, %v12412_v39 }
 0xccc   :  { %4627 = vmatprep.mubr.f32.mxu1 %v15033_v3 }
 0xccf   :  { %12427 = vmatmul.mubr.msk.f32.gmra.mxu1 %vm69_vm1, %v12413_v40 }
 0xcd0   :  { %4633 = vmatprep.mubr.f32.mxu1 %v15033_v3 }
 0xcd3   :  { %12428 = vmatmul.mubr.msk.f32.gmra.mxu1 %vm69_vm1, %v12414_v41 }
 0xcd4   :  { %4839 = vmatprep.mubr.f32.mxu1 %v15033_v3 }
 0xd6e   :  { %v4194_v42 = vpop.f32.mrf.mxu1  ;;  %v4275_v43 = vpop.f32.mrf.mxu0 }
 0xd6f   :  { %v4279_v44 = vmax.f32 %v4194_v42, %v4275_v43 }
 0xd70   :  { %v14162_v45 = vpop.f32.mrf.mxu1  ;;  %v14187_v46 = vpop.f32.mrf.mxu0 }
 0xd71   :  { %4281 = vst.msk [vmem:[#allocation3 + $0x10] sm:$0x1f] %vm1466_vm11, %v4279_v44  ;;  %v4676_v45 = vld [vmem:[%s20269_s3] sm:$0xff]  ;;  %v12433_v46 = vld [vmem:[%s20269_s3 + $0x10] sm:$0xff] }
 0xd77   :  { %v4391_v47 = vpop.f32.mrf.mxu1  ;;  %v4498_v48 = vpop.f32.mrf.mxu0 }
 0xd78   :  { %v4499_v25 = vadd.f32 %v4498_v48, %v4391_v47  ;;  %v4871_v47 = vld [vmem:[%s20267_s4 + $0x78] sm:$0xff]  ;;  %v12456_v48 = vld [vmem:[%s20267_s4 + $0x148] sm:$0xff] }
 0xd79   :  { %v4393_v49 = vpop.f32.mrf.mxu1  ;;  %v4500_v50 = vpop.f32.mrf.mxu0 }
 0xd7a   :  { %v4501_v20 = vadd.f32 %v4500_v50, %v4393_v49  ;;  %v4677_v49 = vld [vmem:[%s20269_s3 + $0x8] sm:$0x1f]  ;;  %v12434_v50 = vld [vmem:[%s20269_s3 + $0x18] sm:$0x1f] }
 0xd7b   :  { %v4397_v51 = vpop.f32.mrf.mxu1  ;;  %v4504_v52 = vpop.f32.mrf.mxu0 }
 0xd7c   :  { %v4505_v15 = vadd.f32 %v4504_v52, %v4397_v51  ;;  %v4870_v51 = vld [vmem:[%s20267_s4 + $0x70] sm:$0xff]  ;;  %v12455_v52 = vld [vmem:[%s20267_s4 + $0x140] sm:$0xff] }
 0xd7d   :  { %v4399_v53 = vpop.f32.mrf.mxu1  ;;  %v4506_v55 = vpop.f32.mrf.mxu0 }
 0xd7e   :  { %v4507_v11 = vadd.f32 %v4506_v55, %v4399_v53  ;;  %v4869_v53 = vld [vmem:[%s20267_s4 + $0x68] sm:$0xff]  ;;  %v4868_v55 = vld [vmem:[%s20267_s4 + $0x60] sm:$0xff] }
 0xd7f   :  { %v4403_v54 = vpop.f32.mrf.mxu1  ;;  %v4510_v58 = vpop.f32.mrf.mxu0 }
 0xd80   :  { %v4511_v9 = vadd.f32 %v4510_v58, %v4403_v54  ;;  %v12454_v54 = vld [vmem:[%s20267_s4 + $0x138] sm:$0xff]  ;;  %v12452_v58 = vld [vmem:[%s20267_s4 + $0x128] sm:$0xff] }
 0xd81   :  { %v4405_v56 = vpop.f32.mrf.mxu1  ;;  %v4512_v61 = vpop.f32.mrf.mxu0 }
 0xd82   :  { %v4513_v6 = vadd.f32 %v4512_v61, %v4405_v56  ;;  %v12453_v56 = vld [vmem:[%s20267_s4 + $0x130] sm:$0xff]  ;;  %v4865_v61 = vld [vmem:[%s20267_s4 + $0x48] sm:$0xff] }
 0xd83   :  { %v4409_v57 = vpop.f32.mrf.mxu1  ;;  %v4516_v0 = vpop.f32.mrf.mxu0 }
 0xd84   :  { %v4517_v7 = vadd.f32 %v4516_v0, %v4409_v57  ;;  %v4867_v57 = vld [vmem:[%s20267_s4 + $0x58] sm:$0xff]  ;;  %v12449_v0 = vld [vmem:[%s20267_s4 + $0x110] sm:$0xff] }
 0xd85   :  { %v4411_v59 = vpop.f32.mrf.mxu1  ;;  %v4518_v4 = vpop.f32.mrf.mxu0 }
 0xd86   :  { %v4519_v12 = vadd.f32 %v4518_v4, %v4411_v59  ;;  %v4866_v59 = vld [vmem:[%s20267_s4 + $0x50] sm:$0xff] }
 0xd87   :  { %v4617_v60 = vpop.f32.mrf.mxu1  ;;  %v4862_v4 = vld [vmem:[%s20267_s4 + $0x30] sm:$0xff] }
 0xd88   :  { %v4640_v31 = vadd.f32 %v4617_v60, %v4499_v25  ;;  %v12451_v60 = vld [vmem:[%s20267_s4 + $0x120] sm:$0xff]  ;;  %v12464_v25 = vld [vmem:[%s20267_s4 + $0x188] sm:$0xff] }
 0xd89   :  { %v4619_v62 = vpop.f32.mrf.mxu1 }
 0xd8a   :  { %v4641_v28 = vadd.f32 %v4619_v62, %v4501_v20  ;;  %v4660_v39 = vadd.f32 %v4653_v17, %v4640_v31  ;;  %v12450_v62 = vld [vmem:[%s20267_s4 + $0x118] sm:$0xff]  ;;  %v12461_v31 = vld [vmem:[%s20267_s4 + $0x170] sm:$0xff] }
 0xd8b   :  { %v4623_v63 = vpop.f32.mrf.mxu1  ;;  %v12466_v20 = vld [vmem:[%s20267_s4 + $0x198] sm:$0xff] }
 0xd8c   :  { %v4642_v26 = vadd.f32 %v4623_v63, %v4505_v15  ;;  %v4661_v37 = vadd.f32 %v4657_v22, %v4641_v28  ;;  %v4668_v44 = vmax.f32 %v4660_v39, 0.0  ;;  %v4864_v63 = vld [vmem:[%s20267_s4 + $0x40] sm:$0xff]  ;;  %v12442_v15 = vld [vmem:[%s20267_s4 + $0xd8] sm:$0xff]  ;;  %v4877_v28 = vld [vmem:[%s20267_s4 + $0xa8] sm:$0xff] }
 0xd8d   :  { %v4625_v1 = vpop.f32.mrf.mxu1  ;;  %v12457_v39 = vld [vmem:[%s20267_s4 + $0x150] sm:$0xff] }
 0xd8e   :  { %v4643_v23 = vadd.f32 %v4625_v1, %v4507_v11  ;;  %v4662_v35 = vadd.f32 %v4653_v17, %v4642_v26  ;;  %v4669_v43 = vmax.f32 %v4661_v37, 0.0  ;;  %v4863_v1 = vld [vmem:[%s20267_s4 + $0x38] sm:$0xff]  ;;  %v12444_v11 = vld [vmem:[%s20267_s4 + $0xe8] sm:$0xff]  ;;  %v4878_v26 = vld [vmem:[%s20267_s4 + $0xb0] sm:$0xff] }
 0xd8f   :  { %v4629_v2 = vpop.f32.mrf.mxu1  ;;  %v12458_v37 = vld [vmem:[%s20267_s4 + $0x158] sm:$0xff] }
 0xd90   :  { %v4644_v18 = vadd.f32 %v4629_v2, %v4511_v9  ;;  %v4663_v33 = vadd.f32 %v4657_v22, %v4643_v23  ;;  %v4670_v42 = vmax.f32 %v4662_v35, 0.0  ;;  %v12448_v2 = vld [vmem:[%s20267_s4 + $0x108] sm:$0xff]  ;;  %v12445_v9 = vld [vmem:[%s20267_s4 + $0xf0] sm:$0xff]  ;;  %v12459_v35 = vld [vmem:[%s20267_s4 + $0x160] sm:$0xff] }
 0xd91   :  { %v4631_v5 = vpop.f32.mrf.mxu1  ;;  %v12465_v23 = vld [vmem:[%s20267_s4 + $0x190] sm:$0xff] }
 0xd92   :  { %v4645_v13 = vadd.f32 %v4631_v5, %v4513_v6  ;;  %v4664_v32 = vadd.f32 %v4653_v17, %v4644_v18  ;;  %v4671_v41 = vmax.f32 %v4663_v33, 0.0  ;;  %v12447_v5 = vld [vmem:[%s20267_s4 + $0x100] sm:$0xff]  ;;  %v4861_v6 = vld [vmem:[%s20267_s4 + $0x28] sm:$0xff]  ;;  %v12441_v18 = vld [vmem:[%s20267_s4 + $0xd0] sm:$0xff] }
 0xd93   :  { %v4635_v10 = vpop.f32.mrf.mxu1  ;;  %v12460_v33 = vld [vmem:[%s20267_s4 + $0x168] sm:$0xff] }
 0xd94   :  { %v4646_v14 = vadd.f32 %v4635_v10, %v4517_v7  ;;  %v4665_v29 = vadd.f32 %v4657_v22, %v4645_v13  ;;  %v4672_v40 = vmax.f32 %v4664_v32, 0.0  ;;  %v12446_v7 = vld [vmem:[%s20267_s4 + $0xf8] sm:$0xff]  ;;  %v12443_v13 = vld [vmem:[%s20267_s4 + $0xe0] sm:$0xff] }
 0xd95   :  { %v4637_v19 = vpop.f32.mrf.mxu1  ;;  %v4859_v10 = vld [vmem:[%s20267_s4 + $0x18] sm:$0xff] }
 0xd96   :  { %v4647_v24 = vadd.f32 %v4637_v19, %v4519_v12  ;;  %v4666_v27 = vadd.f32 %v4653_v17, %v4646_v14  ;;  %v4673_v38 = vmax.f32 %v4665_v29, 0.0  ;;  %v4858_v12 = vld [vmem:[%s20267_s4 + $0x10] sm:$0xff]  ;;  %v4857_v14 = vld [vmem:[%s20267_s4 + $0x8] sm:$0xff]  ;;  %v4856_v17 = vld [vmem:[%s20267_s4] sm:$0xff] }
 0xd97   :  { %v4881_v19 = vld [vmem:[%s20267_s4 + $0xc8] sm:$0xff]  ;;  %v12462_v29 = vld [vmem:[%s20267_s4 + $0x178] sm:$0xff] }
 0xd98   :  { %v4667_v30 = vadd.f32 %v4657_v22, %v4647_v24  ;;  %v4674_v36 = vmax.f32 %v4666_v27, 0.0  ;;  %v4880_v22 = vld [vmem:[%s20267_s4 + $0xc0] sm:$0xff]  ;;  %v4879_v24 = vld [vmem:[%s20267_s4 + $0xb8] sm:$0xff] }
 0xd99   :  { %v12463_v27 = vld [vmem:[%s20267_s4 + $0x180] sm:$0xff]  ;;  %v4875_v32 = vld [vmem:[%s20267_s4 + $0x98] sm:$0xff] }
 0xd9a   :  { %v4675_v34 = vmax.f32 %v4667_v30, 0.0  ;;  %v4876_v30 = vld [vmem:[%s20267_s4 + $0xa0] sm:$0xff] }
 0xd9c   :  { %12429 = vmatprep.subr.msk.mxu0 %vm450_vm2, %v4675_v34  ;;  %12435 = vmatprep.subr.msk.mxu1 %vm450_vm2, %v4675_v34  ;;  %v4874_v34 = vld [vmem:[%s20267_s4 + $0x90] sm:$0xff] }
 0xd9d   :  { %12430 = vmatpush1.msk.msra.mxu0 %vm450_vm2, %v4674_v36  ;;  %12436 = vmatpush1.msk.msra.mxu1 %vm450_vm2, %v4674_v36  ;;  %v4873_v36 = vld [vmem:[%s20267_s4 + $0x88] sm:$0xff] }
 0xd9e   :  { %4716 = vmatprep.subr.mxu0 %v4673_v38  ;;  %4801 = vmatprep.subr.mxu1 %v4673_v38  ;;  %v4872_v38 = vld [vmem:[%s20267_s4 + $0x80] sm:$0xff] }
 0xd9f   :  { %4717 = vmatpush1.msra.mxu0 %v4672_v40  ;;  %4802 = vmatpush1.msra.mxu1 %v4672_v40  ;;  %v12481_v40 = vld [vmem:[%s20270_s5 + $0xc8] sm:$0xff] }
 0xda0   :  { %4718 = vmatprep.subr.mxu0 %v4671_v41  ;;  %4803 = vmatprep.subr.mxu1 %v4671_v41  ;;  %v5082_v41 = vld [vmem:[%s20270_s5 + $0x60] sm:$0xff] }
 0xda1   :  { %4719 = vmatpush1.msra.mxu0 %v4670_v42  ;;  %4804 = vmatpush1.msra.mxu1 %v4670_v42 }
 0xda2   :  { %4720 = vmatprep.subr.mxu0 %v4669_v43  ;;  %4805 = vmatprep.subr.mxu1 %v4669_v43 }
 0xda3   :  { %4721 = vmatpush1.msra.mxu0 %v4668_v44  ;;  %4806 = vmatpush1.msra.mxu1 %v4668_v44 }
 0xda4   :  { %12431 = vmatmul.mubr.msk.f32.vlgmr.msra.gmra.mxu0 %vm443_vm3, %v4676_v45  ;;  %12437 = vmatmul.mubr.msk.f32.vlgmr.msra.gmra.mxu1 %vm443_vm3, %v12433_v46 }
 0xda5   :  { %4760 = vmatprep.mubr.f32.mxu0 %v15033_v3  ;;  %4845 = vmatprep.mubr.f32.mxu1 %v15033_v3 }
 0xda6   :  { %4888 = vmatprep.subr.mxu0 %v15033_v3  ;;  %4989 = vmatprep.subr.mxu1 %v15033_v3 }
 0xda7   :  { %4889 = vmatpush1.msra.mxu0 %v4871_v47  ;;  %4990 = vmatpush1.msra.mxu1 %v12456_v48 }
 0xda8   :  { %12432 = vmatmul.mubr.msk.f32.gmra.mxu0 %vm443_vm3, %v4677_v49  ;;  %12438 = vmatmul.mubr.msk.f32.gmra.mxu1 %vm443_vm3, %v12434_v50  ;;  %v12480_v50 = vld [vmem:[%s20270_s5 + $0xc0] sm:$0xff] }
 0xda9   :  { %4890 = vmatprep.subr.mxu0 %v15033_v3  ;;  %4991 = vmatprep.subr.mxu1 %v15033_v3 }
 0xdaa   :  { %4891 = vmatpush1.msra.mxu0 %v4870_v51  ;;  %4992 = vmatpush1.msra.mxu1 %v12455_v52  ;;  %v5081_v51 = vld [vmem:[%s20270_s5 + $0x58] sm:$0xff] }
 0xdab   :  { %4892 = vmatprep.subr.mxu0 %v15033_v3  ;;  %4993 = vmatprep.subr.mxu1 %v15033_v3 }
 0xdac   :  { %4893 = vmatpush1.msra.mxu0 %v4869_v53  ;;  %4994 = vmatpush1.msra.mxu1 %v12454_v54 }
 0xdad   :  { %4894 = vmatprep.subr.mxu0 %v15033_v3  ;;  %4995 = vmatprep.subr.mxu1 %v15033_v3 }
 0xdae   :  { %4895 = vmatpush1.msra.mxu0 %v4868_v55  ;;  %4996 = vmatpush1.msra.mxu1 %v12453_v56  ;;  %v12479_v56 = vld [vmem:[%s20270_s5 + $0xb8] sm:$0xff] }
 0xdaf   :  { %4896 = vmatprep.subr.mxu0 %v15033_v3  ;;  %4997 = vmatprep.subr.mxu1 %v15033_v3 }
 0xdb0   :  { %4897 = vmatpush1.msra.mxu0 %v4867_v57  ;;  %4998 = vmatpush1.msra.mxu1 %v12452_v58  ;;  %v5080_v57 = vld [vmem:[%s20270_s5 + $0x50] sm:$0xff] }
 0xdb1   :  { %4898 = vmatprep.subr.mxu0 %v15033_v3  ;;  %4999 = vmatprep.subr.mxu1 %v15033_v3  ;;  %v12478_v58 = vld [vmem:[%s20270_s5 + $0xb0] sm:$0xff] }
 0xdb2   :  { %4899 = vmatpush1.msra.mxu0 %v4866_v59  ;;  %5000 = vmatpush1.msra.mxu1 %v12451_v60  ;;  %v5079_v59 = vld [vmem:[%s20270_s5 + $0x48] sm:$0xff] }
 0xdb3   :  { %4900 = vmatprep.subr.mxu0 %v15033_v3  ;;  %5001 = vmatprep.subr.mxu1 %v15033_v3  ;;  %v12477_v60 = vld [vmem:[%s20270_s5 + $0xa8] sm:$0xff] }
 0xdb4   :  { %4901 = vmatpush1.msra.mxu0 %v4865_v61  ;;  %5002 = vmatpush1.msra.mxu1 %v12450_v62  ;;  %v5078_v61 = vld [vmem:[%s20270_s5 + $0x40] sm:$0xff] }
 0xdb5   :  { %4902 = vmatprep.subr.mxu0 %v15033_v3  ;;  %5003 = vmatprep.subr.mxu1 %v15033_v3  ;;  %v12476_v62 = vld [vmem:[%s20270_s5 + $0xa0] sm:$0xff] }
 0xdb6   :  { %4903 = vmatpush1.msra.mxu0 %v4864_v63  ;;  %5004 = vmatpush1.msra.mxu1 %v12449_v0  ;;  %v5077_v63 = vld [vmem:[%s20270_s5 + $0x38] sm:$0xff] }
 0xdb7   :  { %4904 = vmatprep.subr.mxu0 %v15033_v3  ;;  %5005 = vmatprep.subr.mxu1 %v15033_v3  ;;  %v12475_v0 = vld [vmem:[%s20270_s5 + $0x98] sm:$0xff] }
 0xdb8   :  { %4905 = vmatpush1.msra.mxu0 %v4863_v1  ;;  %5006 = vmatpush1.msra.mxu1 %v12448_v2  ;;  %v5076_v1 = vld [vmem:[%s20270_s5 + $0x30] sm:$0xff] }
 0xdb9   :  { %4906 = vmatprep.subr.mxu0 %v15033_v3  ;;  %5007 = vmatprep.subr.mxu1 %v15033_v3  ;;  %v12474_v2 = vld [vmem:[%s20270_s5 + $0x90] sm:$0xff] }
 0xdba   :  { %4907 = vmatpush1.msra.mxu0 %v4862_v4  ;;  %5008 = vmatpush1.msra.mxu1 %v12447_v5  ;;  %v5075_v4 = vld [vmem:[%s20270_s5 + $0x28] sm:$0xff] }
 0xdbb   :  { %4908 = vmatprep.subr.mxu0 %v15033_v3  ;;  %5009 = vmatprep.subr.mxu1 %v15033_v3  ;;  %v12473_v5 = vld [vmem:[%s20270_s5 + $0x88] sm:$0xff] }
 0xdbc   :  { %4909 = vmatpush1.msra.mxu0 %v4861_v6  ;;  %5010 = vmatpush1.msra.mxu1 %v12446_v7  ;;  %v5074_v6 = vld [vmem:[%s20270_s5 + $0x20] sm:$0xff] }
 0xdbd   :  { %4910 = vmatprep.subr.mxu0 %v15033_v3  ;;  %5011 = vmatprep.subr.mxu1 %v15033_v3  ;;  %v12472_v7 = vld [vmem:[%s20270_s5 + $0x80] sm:$0xff] }
 0xdbe   :  { %4911 = vmatpush1.msra.mxu0 %v4860_v8  ;;  %5012 = vmatpush1.msra.mxu1 %v12445_v9  ;;  %v5073_v8 = vld [vmem:[%s20270_s5 + $0x18] sm:$0xff] }
 0xdbf   :  { %4912 = vmatprep.subr.mxu0 %v15033_v3  ;;  %5013 = vmatprep.subr.mxu1 %v15033_v3  ;;  %v12471_v9 = vld [vmem:[%s20270_s5 + $0x78] sm:$0xff] }
 0xdc0   :  { %4913 = vmatpush1.msra.mxu0 %v4859_v10  ;;  %5014 = vmatpush1.msra.mxu1 %v12444_v11  ;;  %v5072_v10 = vld [vmem:[%s20270_s5 + $0x10] sm:$0xff] }
 0xdc1   :  { %4914 = vmatprep.subr.mxu0 %v15033_v3  ;;  %5015 = vmatprep.subr.mxu1 %v15033_v3  ;;  %v12470_v11 = vld [vmem:[%s20270_s5 + $0x70] sm:$0xff] }
 0xdc2   :  { %4915 = vmatpush1.msra.mxu0 %v4858_v12  ;;  %5016 = vmatpush1.msra.mxu1 %v12443_v13  ;;  %v5071_v12 = vld [vmem:[%s20270_s5 + $0x8] sm:$0xff] }
 0xdc3   :  { %4916 = vmatprep.subr.mxu0 %v15033_v3  ;;  %5017 = vmatprep.subr.mxu1 %v15033_v3  ;;  %v12469_v13 = vld [vmem:[%s20270_s5 + $0x68] sm:$0xff] }
 0xdc4   :  { %4917 = vmatpush1.msra.mxu0 %v4857_v14  ;;  %5018 = vmatpush1.msra.mxu1 %v12442_v15  ;;  %v5070_v14 = vld [vmem:[%s20270_s5] sm:$0xff]  ;;  %v12498_v15 = vld [vmem:[%s20270_s5 + $0x130] sm:$0xff] }
 0xdc5   :  { %4918 = vmatprep.subr.mxu0 %v15033_v3  ;;  %5019 = vmatprep.subr.mxu1 %v15033_v3 }
 0xdc6   :  { %4919 = vmatpush1.msra.mxu0 %v4856_v17  ;;  %5020 = vmatpush1.msra.mxu1 %v12441_v18 }
 0xdc7   :  { %4932 = vmatprep.subr.mxu0 %v15033_v3  ;;  %5033 = vmatprep.subr.mxu1 %v15033_v3 }
 0xdc8   :  { %4933 = vmatpush2.msra.mxu0 %v4881_v19  ;;  %5034 = vmatpush2.msra.mxu1 %v12466_v20 }
 0xdc9   :  { %4934 = vmatprep.subr.mxu0 %v15033_v3  ;;  %5035 = vmatprep.subr.mxu1 %v15033_v3 }
 0xdca   :  { %4935 = vmatpush2.msra.mxu0 %v4880_v22  ;;  %5036 = vmatpush2.msra.mxu1 %v12465_v23 }
 0xdcb   :  { %4936 = vmatprep.subr.mxu0 %v15033_v3  ;;  %5037 = vmatprep.subr.mxu1 %v15033_v3 }
 0xdcc   :  { %4937 = vmatpush2.msra.mxu0 %v4879_v24  ;;  %5038 = vmatpush2.msra.mxu1 %v12464_v25 }
 0xdcd   :  { %4938 = vmatprep.subr.mxu0 %v15033_v3  ;;  %5039 = vmatprep.subr.mxu1 %v15033_v3 }
 0xdce   :  { %4939 = vmatpush2.msra.mxu0 %v4878_v26  ;;  %5040 = vmatpush2.msra.mxu1 %v12463_v27 }
 0xdcf   :  { %4940 = vmatprep.subr.mxu0 %v15033_v3  ;;  %5041 = vmatprep.subr.mxu1 %v15033_v3 }
 0xdd0   :  { %4941 = vmatpush2.msra.mxu0 %v4877_v28  ;;  %5042 = vmatpush2.msra.mxu1 %v12462_v29 }
 0xdd1   :  { %4942 = vmatprep.subr.mxu0 %v15033_v3  ;;  %5043 = vmatprep.subr.mxu1 %v15033_v3 }
 0xdd2   :  { %4943 = vmatpush2.msra.mxu0 %v4876_v30  ;;  %5044 = vmatpush2.msra.mxu1 %v12461_v31 }
 0xdd3   :  { %4944 = vmatprep.subr.mxu0 %v15033_v3  ;;  %5045 = vmatprep.subr.mxu1 %v15033_v3 }
 0xdd4   :  { %4945 = vmatpush2.msra.mxu0 %v4875_v32  ;;  %5046 = vmatpush2.msra.mxu1 %v12460_v33  ;;  %v12497_v32 = vld [vmem:[%s20270_s5 + $0x128] sm:$0xff] }
 0xdd5   :  { %4946 = vmatprep.subr.mxu0 %v15033_v3  ;;  %5047 = vmatprep.subr.mxu1 %v15033_v3 }
 0xdd6   :  { %4947 = vmatpush2.msra.mxu0 %v4874_v34  ;;  %5048 = vmatpush2.msra.mxu1 %v12459_v35  ;;  %v12496_v34 = vld [vmem:[%s20270_s5 + $0x120] sm:$0xff]  ;;  %v12495_v35 = vld [vmem:[%s20270_s5 + $0x118] sm:$0xff] }
 0xdd7   :  { %4948 = vmatprep.subr.mxu0 %v15033_v3  ;;  %5049 = vmatprep.subr.mxu1 %v15033_v3 }
 0xdd8   :  { %4949 = vmatpush2.msra.mxu0 %v4873_v36  ;;  %5050 = vmatpush2.msra.mxu1 %v12458_v37  ;;  %v12494_v36 = vld [vmem:[%s20270_s5 + $0x110] sm:$0xff]  ;;  %v12493_v37 = vld [vmem:[%s20270_s5 + $0x108] sm:$0xff] }
 0xdd9   :  { %4950 = vmatprep.subr.mxu0 %v15033_v3  ;;  %5051 = vmatprep.subr.mxu1 %v15033_v3 }
 0xdda   :  { %4951 = vmatpush2.msra.mxu0 %v4872_v38  ;;  %5052 = vmatpush2.msra.mxu1 %v12457_v39  ;;  %v12492_v38 = vld [vmem:[%s20270_s5 + $0x100] sm:$0xff]  ;;  %v12491_v39 = vld [vmem:[%s20270_s5 + $0xf8] sm:$0xff] }
 0xddb   :  { %14188 = vmatprep.subr.mxu0 %v12481_v40  ;;  %14217 = vmatprep.subr.mxu1 %v5082_v41 }
 0xe64   :  { %v4756_v42 = vpop.f32.mrf.mxu0  ;;  %v4841_v43 = vpop.f32.mrf.mxu1 }
 0xe65   :  { %v4852_v47 = vmax.f32 %v4756_v42, %v4841_v43  ;;  %v12488_v42 = vld [vmem:[%s20270_s5 + $0xe0] sm:$0xff]  ;;  %v12487_v43 = vld [vmem:[%s20270_s5 + $0xd8] sm:$0xff] }
 0xe66   :  { %v4758_v44 = vpop.f32.mrf.mxu0  ;;  %v4843_v45 = vpop.f32.mrf.mxu1 }
 0xe67   :  { %v4853_v46 = vmax.f32 %v4758_v44, %v4843_v45  ;;  %v12486_v44 = vld [vmem:[%s20270_s5 + $0xd0] sm:$0xff] }
 0xe68   :  { %v4762_v48 = vpop.f32.mrf.mxu0  ;;  %v4847_v49 = vpop.f32.mrf.mxu1 }
 0xe69   :  { %12439 = vmatprep.mubr.msk.f32.mxu0 %vm650_vm4, %v4853_v46  ;;  %12467 = vmatprep.mubr.msk.f32.mxu1 %vm650_vm4, %v4853_v46  ;;  %v4854_v55 = vmax.f32 %v4762_v48, %v4847_v49  ;;  %v12518_v46 = vld [vmem:[%s20271_s8 + $0xa8] sm:$0xff]  ;;  %v12516_v48 = vld [vmem:[%s20271_s8 + $0x98] sm:$0xff]  ;;  %v12515_v49 = vld [vmem:[%s20271_s8 + $0x90] sm:$0xff] }
 0xe6a   :  { %v4764_v52 = vpop.f32.mrf.mxu0  ;;  %v4849_v53 = vpop.f32.mrf.mxu1  ;;  %4953 = vmatmul.mubr.f32.vlgmr.msra.gmra.mxu0 %v4852_v47  ;;  %5054 = vmatmul.mubr.f32.vlgmr.msra.gmra.mxu1 %v4852_v47  ;;  %v12517_v47 = vld [vmem:[%s20271_s8 + $0xa0] sm:$0xff] }
 0xe6b   :  { %v4855_v54 = vmax.f32 %v4764_v52, %v4849_v53  ;;  %14189 = vmatpush3.msra.mxu0 %v12481_v40  ;;  %14218 = vmatpush3.msra.mxu1 %v5082_v41  ;;  %v12490_v40 = vld [vmem:[%s20270_s5 + $0xf0] sm:$0xff]  ;;  %v12489_v41 = vld [vmem:[%s20270_s5 + $0xe8] sm:$0xff]  ;;  %v12512_v52 = vld [vmem:[%s20271_s8 + $0x78] sm:$0xff] }
 0xe6c   :  { %14190 = vmatprep.subr.mxu0 %v12480_v50  ;;  %14219 = vmatprep.subr.mxu1 %v5081_v51  ;;  %v12511_v53 = vld [vmem:[%s20271_s8 + $0x70] sm:$0xff] }
 0xe6d   :  { %12440 = vmatprep.mubr.msk.f32.mxu0 %vm650_vm4, %v4855_v54  ;;  %12468 = vmatprep.mubr.msk.f32.mxu1 %vm650_vm4, %v4855_v54 }
 0xe6e   :  { %4958 = vmatmul.mubr.f32.gmra.mxu0 %v4854_v55  ;;  %5059 = vmatmul.mubr.f32.gmra.mxu1 %v4854_v55 }
 0xe6f   :  { %14191 = vmatpush3.msra.mxu0 %v12480_v50  ;;  %14220 = vmatpush3.msra.mxu1 %v5081_v51  ;;  %v12514_v50 = vld [vmem:[%s20271_s8 + $0x88] sm:$0xff]  ;;  %v12513_v51 = vld [vmem:[%s20271_s8 + $0x80] sm:$0xff] }
 0xe70   :  { %14192 = vmatprep.subr.mxu0 %v12479_v56  ;;  %14221 = vmatprep.subr.mxu1 %v5080_v57 }
 0xe71   :  { %14193 = vmatpush3.msra.mxu0 %v12479_v56  ;;  %14222 = vmatpush3.msra.mxu1 %v5080_v57 }
 0xe72   :  { %14194 = vmatprep.subr.mxu0 %v12478_v58  ;;  %14223 = vmatprep.subr.mxu1 %v5079_v59 }
 0xe73   :  { %14195 = vmatpush3.msra.mxu0 %v12478_v58  ;;  %14224 = vmatpush3.msra.mxu1 %v5079_v59 }
 0xe74   :  { %14196 = vmatprep.subr.mxu0 %v12477_v60  ;;  %14225 = vmatprep.subr.mxu1 %v5078_v61 }
 0xe75   :  { %14197 = vmatpush3.msra.mxu0 %v12477_v60  ;;  %14226 = vmatpush3.msra.mxu1 %v5078_v61  ;;  %v12501_v60 = vld [vmem:[%s20272_s6] ss:$0 sm:$0xff] }
 0xe76   :  { %14198 = vmatprep.subr.mxu0 %v12476_v62  ;;  %14227 = vmatprep.subr.mxu1 %v5077_v63 }
 0xe77   :  { %14199 = vmatpush3.msra.mxu0 %v12476_v62  ;;  %14228 = vmatpush3.msra.mxu1 %v5077_v63 }
 0xe78   :  { %14200 = vmatprep.subr.mxu0 %v12475_v0  ;;  %14229 = vmatprep.subr.mxu1 %v5076_v1 }
 0xe79   :  { %14201 = vmatpush3.msra.mxu0 %v12475_v0  ;;  %14230 = vmatpush3.msra.mxu1 %v5076_v1 }
 0xe7a   :  { %14202 = vmatprep.subr.mxu0 %v12474_v2  ;;  %14231 = vmatprep.subr.mxu1 %v5075_v4 }
 0xe7b   :  { %14203 = vmatpush3.msra.mxu0 %v12474_v2  ;;  %14232 = vmatpush3.msra.mxu1 %v5075_v4 }
 0xe7c   :  { %14204 = vmatprep.subr.mxu0 %v12473_v5  ;;  %14233 = vmatprep.subr.mxu1 %v5074_v6 }
 0xe7d   :  { %14205 = vmatpush3.msra.mxu0 %v12473_v5  ;;  %14234 = vmatpush3.msra.mxu1 %v5074_v6  ;;  %v5369_v6 = vld [vmem:[%s20273_s7] sm:$0x1f] }
 0xe7e   :  { %14206 = vmatprep.subr.mxu0 %v12472_v7  ;;  %14235 = vmatprep.subr.mxu1 %v5073_v8 }
 0xe7f   :  { %14207 = vmatpush3.msra.mxu0 %v12472_v7  ;;  %14236 = vmatpush3.msra.mxu1 %v5073_v8  ;;  %v12504_v7 = vld [vmem:[%s20273_s7 + $0x8] sm:$0x1f]  ;;  %v5531_v8 = vld [vmem:[%s20271_s8 + $0x50] sm:$0xff] }
 0xe80   :  { %14208 = vmatprep.subr.mxu0 %v12471_v9  ;;  %14237 = vmatprep.subr.mxu1 %v5072_v10 }
 0xe81   :  { %14209 = vmatpush3.msra.mxu0 %v12471_v9  ;;  %14238 = vmatpush3.msra.mxu1 %v5072_v10  ;;  %v5530_v9 = vld [vmem:[%s20271_s8 + $0x48] sm:$0xff]  ;;  %v5529_v10 = vld [vmem:[%s20271_s8 + $0x40] sm:$0xff] }
 0xe82   :  { %14210 = vmatprep.subr.mxu0 %v12470_v11  ;;  %14239 = vmatprep.subr.mxu1 %v5071_v12 }
 0xe83   :  { %14211 = vmatpush3.msra.mxu0 %v12470_v11  ;;  %14240 = vmatpush3.msra.mxu1 %v5071_v12  ;;  %v5528_v11 = vld [vmem:[%s20271_s8 + $0x38] sm:$0xff]  ;;  %v5527_v12 = vld [vmem:[%s20271_s8 + $0x30] sm:$0xff] }
 0xe84   :  { %14212 = vmatprep.subr.mxu0 %v12469_v13  ;;  %14241 = vmatprep.subr.mxu1 %v5070_v14 }
 0xe85   :  { %14213 = vmatpush3.msra.mxu0 %v12469_v13  ;;  %14242 = vmatpush3.msra.mxu1 %v5070_v14  ;;  %v5526_v13 = vld [vmem:[%s20271_s8 + $0x28] sm:$0xff]  ;;  %v5525_v14 = vld [vmem:[%s20271_s8 + $0x20] sm:$0xff] }
 0xe86   :  { %14246 = vmatprep.subr.mxu0 %v12498_v15  ;;  %14275 = vmatprep.subr.mxu1 %v15033_v3 }
 0xf2a   :  { %v4954_v17 = vpop.f32.mrf.mxu0  ;;  %v5055_v18 = vpop.f32.mrf.mxu1 }
 0xf2b   :  { %v5064_v19 = vmax.f32 %v4954_v17, %v5055_v18  ;;  %v5523_v17 = vld [vmem:[%s20271_s8 + $0x10] sm:$0xff]  ;;  %v12510_v18 = vld [vmem:[%s20271_s8 + $0x68] sm:$0xff] }
 0xf2c   :  { %v4956_v20 = vpop.f32.mrf.mxu0  ;;  %v5057_v22 = vpop.f32.mrf.mxu1 }
 0xf2d   :  { %5066 = vst.msk [vmem:[#allocation2] sm:$0xff] %vm836_vm5, %v5064_v19  ;;  %v5522_v19 = vld [vmem:[%s20271_s8 + $0x8] sm:$0xff]  ;;  %v12509_v20 = vld [vmem:[%s20271_s8 + $0x60] sm:$0xff] }
 0xf2e   :  { %v4959_v23 = vpop.f32.mrf.mxu0  ;;  %v5060_v24 = vpop.f32.mrf.mxu1  ;;  %v5521_v22 = vld [vmem:[%s20271_s8] sm:$0xff] }
 0xf2f   :  { %v5065_v25 = vmax.f32 %v4959_v23, %v5060_v24  ;;  %v12508_v23 = vld [vmem:[%s20271_s8 + $0x58] sm:$0xff] }
 0xf30   :  { %v4961_v26 = vpop.f32.mrf.mxu0  ;;  %v5062_v27 = vpop.f32.mrf.mxu1  ;;  %v12535_v24 = vld [vmem:[%s20265_s1 + $0x78] sm:$0xf] }
 0xf31   :  { %5067 = vst.msk [vmem:[#allocation2 + $0x8] sm:$0x1f] %vm838_vm6, %v5065_v25  ;;  %v5701_v25 = vld [vmem:[%s20265_s1 + $0x38] sm:$0xf] }
 0xf34   :  { %v5068_v28 = vld [vmem:[#allocation2] sm:$0xff] }
 0xf35   :  { %14243 = vmatprep.mubr.msk.f32.mxu1 %vm836_vm5, %v5068_v28 }
 0xf38   :  { %v5083_v29 = vld [vmem:[#allocation2 + $0x1] sm:$0xff]  ;;  %v5084_v31 = vld [vmem:[#allocation2 + $0x9] sm:$0x7] }
 0xf39   :  { %v5069_v30 = vld [vmem:[#allocation2 + $0x8] sm:$0x7]  ;;  %14214 = vmatprep.mubr.msk.f32.mxu0 %vm836_vm5, %v5083_v29 }
 0xf3a   :  { %14244 = vmatmul.mubr.msk.f32.vlgmr.msra.gmra.mxu1 %vm836_vm5, %v5069_v30  ;;  %14215 = vmatmul.mubr.msk.f32.vlgmr.msra.gmra.mxu0 %vm836_vm5, %v5084_v31  ;;  %v5260_v33 = vld [vmem:[#allocation2 + $0x2] sm:$0xff]  ;;  %v5261_v45 = vld [vmem:[#allocation2 + $0xa] sm:$0x7]  ;;  %v12534_v30 = vld [vmem:[%s20265_s1 + $0x70] sm:$0xf] }
 0xf3b   :  { %14279 = vmatprep.mubr.msk.f32.mxu1 %vm15034_vm7, %v15033_v3  ;;  %14247 = vmatpush3.msra.mxu0 %v12498_v15  ;;  %v5524_v15 = vld [vmem:[%s20271_s8 + $0x18] sm:$0xff]  ;;  %v5700_v31 = vld [vmem:[%s20265_s1 + $0x30] sm:$0xf] }
 0xf3c   :  { %14272 = vmatprep.mubr.msk.f32.mxu0 %vm836_vm5, %v5260_v33  ;;  %14248 = vmatprep.subr.mxu0 %v12497_v32  ;;  %v12533_v33 = vld [vmem:[%s20265_s1 + $0x68] sm:$0xff] }
 0xf3d   :  { %14249 = vmatpush3.msra.mxu0 %v12497_v32 }
 0xf3e   :  { %14250 = vmatprep.subr.mxu0 %v12496_v34 }
 0xf3f   :  { %14251 = vmatpush3.msra.mxu0 %v12496_v34  ;;  %v5699_v34 = vld [vmem:[%s20265_s1 + $0x28] sm:$0xff] }
 0xf40   :  { %14252 = vmatprep.subr.mxu0 %v12495_v35 }
 0xf41   :  { %14253 = vmatpush3.msra.mxu0 %v12495_v35  ;;  %v12532_v35 = vld [vmem:[%s20265_s1 + $0x60] sm:$0xff] }
 0xf42   :  { %14254 = vmatprep.subr.mxu0 %v12494_v36 }
 0xf43   :  { %14255 = vmatpush3.msra.mxu0 %v12494_v36  ;;  %v5698_v36 = vld [vmem:[%s20265_s1 + $0x20] sm:$0xff] }
 0xf44   :  { %14256 = vmatprep.subr.mxu0 %v12493_v37 }
 0xf45   :  { %14257 = vmatpush3.msra.mxu0 %v12493_v37  ;;  %v12531_v37 = vld [vmem:[%s20265_s1 + $0x58] sm:$0xff] }
 0xf46   :  { %14258 = vmatprep.subr.mxu0 %v12492_v38 }
 0xf47   :  { %14259 = vmatpush3.msra.mxu0 %v12492_v38  ;;  %v5697_v38 = vld [vmem:[%s20265_s1 + $0x18] sm:$0xff] }
 0xf48   :  { %14260 = vmatprep.subr.mxu0 %v12491_v39 }
 0xf49   :  { %14261 = vmatpush3.msra.mxu0 %v12491_v39  ;;  %v12530_v39 = vld [vmem:[%s20265_s1 + $0x50] sm:$0xff] }
 0xf4a   :  { %14262 = vmatprep.subr.mxu0 %v12490_v40 }
 0xf4b   :  { %14263 = vmatpush3.msra.mxu0 %v12490_v40  ;;  %v5696_v40 = vld [vmem:[%s20265_s1 + $0x10] sm:$0xff] }
 0xf4c   :  { %14264 = vmatprep.subr.mxu0 %v12489_v41 }
 0xf4d   :  { %14265 = vmatpush3.msra.mxu0 %v12489_v41  ;;  %v12529_v41 = vld [vmem:[%s20265_s1 + $0x48] sm:$0xff] }
 0xf4e   :  { %14266 = vmatprep.subr.mxu0 %v12488_v42 }
 0xf4f   :  { %14267 = vmatpush3.msra.mxu0 %v12488_v42  ;;  %v5695_v42 = vld [vmem:[%s20265_s1 + $0x8] sm:$0xff] }
 0xf50   :  { %14268 = vmatprep.subr.mxu0 %v12487_v43 }
 0xf51   :  { %14269 = vmatpush3.msra.mxu0 %v12487_v43  ;;  %v12528_v43 = vld [vmem:[%s20265_s1 + $0x40] sm:$0xff] }
 0xf52   :  { %14270 = vmatprep.subr.mxu0 %v12486_v44 }
 0xf53   :  { %14271 = vmatpush3.msra.mxu0 %v12486_v44  ;;  %v5694_v44 = vld [vmem:[%s20265_s1] sm:$0xff] }
 0xf54   :  { %14273 = vmatmul.mubr.msk.f32.vlgmr.msra.gmra.mxu0 %vm836_vm5, %v5261_v45  ;;  %14314 = vmatprep.subr.mxu0 %v15033_v3  ;;  %v12524_v45 = vld [vmem:[%s20266_s0 + $0x81] sm:$0xff] }
 0xf55   :  { %14336 = vmatprep.mubr.msk.f32.mxu0 %vm15034_vm7, %v15033_v3  ;;  %14315 = vmatpush3.msra.mxu0 %v12518_v46  ;;  %v12520_v46 = vld [vmem:[%s20266_s0 + $0x80] sm:$0xff] }
 0xf56   :  { %14316 = vmatprep.subr.mxu0 %v15033_v3 }
 0xf57   :  { %14317 = vmatpush3.msra.mxu0 %v12517_v47  ;;  %v12559_v47 = vld [vmem:[%s20265_s1 + $0xb8] sm:$0xf] }
 0xf58   :  { %14318 = vmatprep.subr.mxu0 %v15033_v3 }
 0xf59   :  { %14319 = vmatpush3.msra.mxu0 %v12516_v48  ;;  %v12558_v48 = vld [vmem:[%s20265_s1 + $0xb0] sm:$0xf] }
 0xf5a   :  { %14320 = vmatprep.subr.mxu0 %v15033_v3 }
 0xf5b   :  { %14321 = vmatpush3.msra.mxu0 %v12515_v49  ;;  %v12525_v49 = vld [vmem:[%s20266_s0 + $0x89] sm:$0xff] }
 0xf5c   :  { %14322 = vmatprep.subr.mxu0 %v15033_v3 }
 0xf5d   :  { %14323 = vmatpush3.msra.mxu0 %v12514_v50  ;;  %v12521_v50 = vld [vmem:[%s20266_s0 + $0x88] sm:$0xff] }
 0xf5e   :  { %14324 = vmatprep.subr.mxu0 %v15033_v3 }
 0xf5f   :  { %14325 = vmatpush3.msra.mxu0 %v12513_v51  ;;  %v12557_v51 = vld [vmem:[%s20265_s1 + $0xa8] sm:$0xff] }
 0xf60   :  { %14326 = vmatprep.subr.mxu0 %v15033_v3 }
 0xf61   :  { %14327 = vmatpush3.msra.mxu0 %v12512_v52  ;;  %v12556_v52 = vld [vmem:[%s20265_s1 + $0xa0] sm:$0xff] }
 0xf62   :  { %14328 = vmatprep.subr.mxu0 %v15033_v3 }
 0xf63   :  { %14329 = vmatpush3.msra.mxu0 %v12511_v53  ;;  %v12526_v53 = vld [vmem:[%s20266_s0 + $0x91] sm:$0xff] }
 0xf64   :  { %14330 = vmatprep.subr.mxu0 %v15033_v3 }
 0xf65   :  { %14331 = vmatpush3.msra.mxu0 %v12510_v18 }
 0xf66   :  { %14332 = vmatprep.subr.mxu0 %v15033_v3 }
 0xf67   :  { %14333 = vmatpush3.msra.mxu0 %v12509_v20 }
 0xf68   :  { %14334 = vmatprep.subr.mxu0 %v15033_v3 }
 0xf69   :  { %14335 = vmatpush3.msra.mxu0 %v12508_v23 }
 0xf6a   :  { %12542 = vmatprep.subr.msk.mxu0 %vm82_vm0, %v5701_v25 }
 0xffa   :  { %v14245_v54 = vpop.f32.mrf.mxu1  ;;  %v14216_v55 = vpop.f32.mrf.mxu0 }
 0xffb   :  { %v5257_v58 = vadd.f32 %v14245_v54, %v14216_v55  ;;  %v12522_v54 = vld [vmem:[%s20266_s0 + $0x90] sm:$0xff]  ;;  %v12555_v55 = vld [vmem:[%s20265_s1 + $0x98] sm:$0xff] }
 0xffc   :  { %v5251_v56 = vpop.f32.mrf.mxu1  ;;  %v5170_v57 = vpop.f32.mrf.mxu0 }
 0xffd   :  { %v5252_v61 = vadd.f32 %v5251_v56, %v5170_v57  ;;  %v12554_v56 = vld [vmem:[%s20265_s1 + $0x90] sm:$0xff]  ;;  %v12527_v57 = vld [vmem:[%s20266_s0 + $0x99] sm:$0x3] }
0x1014   :  { %v14274_v59 = vpop.f32.mrf.mxu0 }
0x1015   :  { %v5357_v62 = vadd.f32 %v14274_v59, %v5257_v58  ;;  %v12523_v58 = vld [vmem:[%s20266_s0 + $0x98] sm:$0x3]  ;;  %v12553_v59 = vld [vmem:[%s20265_s1 + $0x88] sm:$0xff] }
0x1016   :  { %v5347_v63 = vpop.f32.mrf.mxu0 }
0x1017   :  { %v5366_v0 = vadd.f32 %v12501_v60, %v5357_v62  ;;  %v5356_v1 = vadd.f32 %v5347_v63, %v5252_v61  ;;  %v12548_v61 = vld [vmem:[%s20266_s0 + $0x82] sm:$0xff]  ;;  %v12549_v62 = vld [vmem:[%s20266_s0 + $0x8a] sm:$0xff]  ;;  %v12550_v63 = vld [vmem:[%s20266_s0 + $0x92] sm:$0xff] }
0x1019   :  { %v5368_v2 = vmax.f32 %v5366_v0, 0.0  ;;  %v5365_v4 = vadd.f32 %v12501_v60, %v5356_v1  ;;  %v12552_v60 = vld [vmem:[%s20265_s1 + $0x80] sm:$0xff]  ;;  %v12551_v0 = vld [vmem:[%s20266_s0 + $0x9a] sm:$0x3] }
0x101b   :  { %v5367_v5 = vmax.f32 %v5365_v4, 0.0  ;;  %14276 = vmatpush3.msk.msra.mxu1 %vm1148_vm8, %v5368_v2 }
0x101c   :  { %14277 = vmatprep.subr.mxu1 %v15033_v3 }
0x101d   :  { %14278 = vmatpush3.msra.mxu1 %v5367_v5 }
0x101e   :  { %14280 = vmatmul.mubr.msk.f32.vlgmr.msra.gmra.mxu1 %vm1144_vm9, %v5369_v6  ;;  %14282 = vmatprep.subr.mxu1 %v15033_v3 }
0x101f   :  { %14283 = vmatpush3.msk.msra.mxu1 %vm1148_vm8, %v5368_v2  ;;  %14286 = vmatprep.mubr.msk.f32.mxu1 %vm15034_vm7, %v15033_v3 }
0x1020   :  { %14284 = vmatprep.subr.mxu1 %v15033_v3 }
0x1021   :  { %14285 = vmatpush3.msra.mxu1 %v5367_v5 }
0x1022   :  { %14287 = vmatmul.mubr.msk.f32.vlgmr.msra.gmra.mxu1 %vm1144_vm9, %v12504_v7  ;;  %14289 = vmatprep.subr.mxu1 %v15033_v3 }
0x1023   :  { %14290 = vmatpush3.msra.mxu1 %v5531_v8  ;;  %14311 = vmatprep.mubr.msk.f32.mxu1 %vm15034_vm7, %v15033_v3 }
0x1024   :  { %14291 = vmatprep.subr.mxu1 %v15033_v3 }
0x1025   :  { %14292 = vmatpush3.msra.mxu1 %v5530_v9 }
0x1026   :  { %14293 = vmatprep.subr.mxu1 %v15033_v3 }
0x1027   :  { %14294 = vmatpush3.msra.mxu1 %v5529_v10 }
0x1028   :  { %14295 = vmatprep.subr.mxu1 %v15033_v3 }
0x1029   :  { %14296 = vmatpush3.msra.mxu1 %v5528_v11 }
0x102a   :  { %14297 = vmatprep.subr.mxu1 %v15033_v3 }
0x102b   :  { %14298 = vmatpush3.msra.mxu1 %v5527_v12 }
0x102c   :  { %14299 = vmatprep.subr.mxu1 %v15033_v3 }
0x102d   :  { %14300 = vmatpush3.msra.mxu1 %v5526_v13 }
0x102e   :  { %14301 = vmatprep.subr.mxu1 %v15033_v3 }
0x102f   :  { %14302 = vmatpush3.msra.mxu1 %v5525_v14 }
0x1030   :  { %14303 = vmatprep.subr.mxu1 %v15033_v3 }
0x1031   :  { %14304 = vmatpush3.msra.mxu1 %v5524_v15 }
0x1032   :  { %14305 = vmatprep.subr.mxu1 %v15033_v3 }
0x1033   :  { %14306 = vmatpush3.msra.mxu1 %v5523_v17 }
0x1034   :  { %14307 = vmatprep.subr.mxu1 %v15033_v3 }
0x1035   :  { %14308 = vmatpush3.msra.mxu1 %v5522_v19 }
0x1036   :  { %14309 = vmatprep.subr.mxu1 %v15033_v3 }
0x1037   :  { %14310 = vmatpush3.msra.mxu1 %v5521_v22 }
0x1038   :  { %12536 = vmatprep.subr.msk.mxu1 %vm82_vm0, %v12535_v24 }
0x10de   :  { %v5442_v26 = vpop.f32.mrf.mxu1 }
0x10e0   :  { %v14281_v27 = vpop.f32.mrf.mxu1 }
0x10e2   :  { %v5516_v28 = vpop.f32.mrf.mxu1 }
0x10e3   :  { %v5520_v29 = vmax.f32 %v5442_v26, %v5516_v28 }
0x10e4   :  { %v14288_v32 = vpop.f32.mrf.mxu1 }
0x10e5   :  { %14312 = vmatmul.mubr.msk.f32.vlgmr.msra.gmra.mxu1 %vm1309_vm10, %v5520_v29  ;;  %14337 = vmatmul.mubr.msk.f32.vlgmr.msra.gmra.mxu0 %vm1309_vm10, %v5520_v29 }
0x10e6   :  { %12537 = vmatpush1.msk.msra.mxu1 %vm82_vm0, %v12534_v30  ;;  %12543 = vmatpush1.msk.msra.mxu0 %vm82_vm0, %v5700_v31 }
0x10e7   :  { %5758 = vmatprep.subr.mxu1 %v12533_v33  ;;  %5865 = vmatprep.subr.mxu0 %v5699_v34  ;;  %v6055_v33 = vld [vmem:[%s20268_s2] sm:$0x3] }
0x10e8   :  { %5759 = vmatpush1.msra.mxu1 %v12532_v35  ;;  %5866 = vmatpush1.msra.mxu0 %v5698_v36 }
0x10e9   :  { %5760 = vmatprep.subr.mxu1 %v12531_v37  ;;  %5867 = vmatprep.subr.mxu0 %v5697_v38 }
0x10ea   :  { %5761 = vmatpush1.msra.mxu1 %v12530_v39  ;;  %5868 = vmatpush1.msra.mxu0 %v5696_v40 }
0x10eb   :  { %5762 = vmatprep.subr.mxu1 %v12529_v41  ;;  %5869 = vmatprep.subr.mxu0 %v5695_v42  ;;  %v6060_v41 = vrot.slane %v6055_v33, %v15321_v16 }
0x10ec   :  { %5763 = vmatpush1.msra.mxu1 %v12528_v43  ;;  %5796 = vmatprep.mubr.f32.mxu1 %v15033_v3 }
0x10ed   :  { %5870 = vmatpush1.msra.mxu0 %v5694_v44  ;;  %5903 = vmatprep.mubr.f32.mxu0 %v15033_v3 }
0x10ee   :  { %12538 = vmatmul.mubr.msk.f32.vlgmr.msra.gmra.mxu1 %vm69_vm1, %v12524_v45  ;;  %12544 = vmatmul.mubr.msk.f32.vlgmr.msra.gmra.mxu0 %vm69_vm1, %v12520_v46  ;;  %v6064_v45 = vrot.slane %v6055_v33, %v15326_v21  ;;  %v6267_v33 = vld [vmem:[%s20267_s4 + $0x20] sm:$0xff] }
0x10ef   :  { %5802 = vmatprep.mubr.f32.mxu1 %v15033_v3  ;;  %5909 = vmatprep.mubr.f32.mxu0 %v15033_v3 }
0x10f0   :  { %12560 = vmatprep.subr.msk.mxu1 %vm82_vm0, %v12559_v47 }
0x10f1   :  { %12561 = vmatpush1.msk.msra.mxu1 %vm82_vm0, %v12558_v48 }
0x10f2   :  { %12539 = vmatmul.mubr.msk.f32.gmra.mxu1 %vm69_vm1, %v12525_v49  ;;  %12545 = vmatmul.mubr.msk.f32.gmra.mxu0 %vm69_vm1, %v12521_v50 }
0x10f3   :  { %5808 = vmatprep.mubr.f32.mxu1 %v15033_v3  ;;  %5915 = vmatprep.mubr.f32.mxu0 %v15033_v3 }
0x10f4   :  { %5984 = vmatprep.subr.mxu1 %v12557_v51 }
0x10f5   :  { %5985 = vmatpush1.msra.mxu1 %v12556_v52 }
0x10f6   :  { %12540 = vmatmul.mubr.msk.f32.gmra.mxu1 %vm69_vm1, %v12526_v53  ;;  %12546 = vmatmul.mubr.msk.f32.gmra.mxu0 %vm69_vm1, %v12522_v54 }
0x10f7   :  { %5814 = vmatprep.mubr.f32.mxu1 %v15033_v3  ;;  %5921 = vmatprep.mubr.f32.mxu0 %v15033_v3 }
0x10f8   :  { %5986 = vmatprep.subr.mxu1 %v12555_v55 }
0x10f9   :  { %5987 = vmatpush1.msra.mxu1 %v12554_v56 }
0x10fa   :  { %12541 = vmatmul.mubr.msk.f32.gmra.mxu1 %vm69_vm1, %v12527_v57  ;;  %12547 = vmatmul.mubr.msk.f32.gmra.mxu0 %vm69_vm1, %v12523_v58 }
0x10fb   :  { %5988 = vmatprep.subr.mxu1 %v12553_v59  ;;  %6022 = vmatprep.mubr.f32.mxu1 %v15033_v3 }
0x10fc   :  { %5989 = vmatpush1.msra.mxu1 %v12552_v60  ;;  %6161 = vmatprep.mubr.f32.mxu0 %v15033_v3 }
0x10fe   :  { %12562 = vmatmul.mubr.msk.f32.vlgmr.msra.gmra.mxu1 %vm69_vm1, %v12548_v61 }
0x10ff   :  { %6028 = vmatprep.mubr.f32.mxu1 %v15033_v3 }
0x1102   :  { %12563 = vmatmul.mubr.msk.f32.gmra.mxu1 %vm69_vm1, %v12549_v62 }
0x1103   :  { %6034 = vmatprep.mubr.f32.mxu1 %v15033_v3 }
0x1106   :  { %12564 = vmatmul.mubr.msk.f32.gmra.mxu1 %vm69_vm1, %v12550_v63 }
0x1107   :  { %6040 = vmatprep.mubr.f32.mxu1 %v15033_v3 }
0x110a   :  { %12565 = vmatmul.mubr.msk.f32.gmra.mxu1 %vm69_vm1, %v12551_v0 }
0x110b   :  { %6246 = vmatprep.mubr.f32.mxu1 %v15033_v3 }
0x11a5   :  { %v5601_v1 = vpop.f32.mrf.mxu1  ;;  %v5682_v2 = vpop.f32.mrf.mxu0 }
0x11a6   :  { %v5686_v4 = vmax.f32 %v5601_v1, %v5682_v2 }
0x11a7   :  { %v14313_v5 = vpop.f32.mrf.mxu1  ;;  %v14338_v6 = vpop.f32.mrf.mxu0 }
0x11a8   :  { %5688 = vst.msk [vmem:[#allocation3 + $0x18] sm:$0x1f] %vm1466_vm11, %v5686_v4  ;;  %v6083_v5 = vld [vmem:[%s20269_s3] sm:$0xff]  ;;  %v12570_v6 = vld [vmem:[%s20269_s3 + $0x10] sm:$0xff] }
0x11ae   :  { %v5798_v7 = vpop.f32.mrf.mxu1  ;;  %v5905_v8 = vpop.f32.mrf.mxu0 }
0x11af   :  { %v5906_v48 = vadd.f32 %v5905_v8, %v5798_v7  ;;  %v6278_v7 = vld [vmem:[%s20267_s4 + $0x78] sm:$0xff]  ;;  %v12593_v8 = vld [vmem:[%s20267_s4 + $0x148] sm:$0xff] }
0x11b0   :  { %v5800_v9 = vpop.f32.mrf.mxu1  ;;  %v5907_v10 = vpop.f32.mrf.mxu0 }
0x11b1   :  { %v5908_v44 = vadd.f32 %v5907_v10, %v5800_v9  ;;  %v6084_v9 = vld [vmem:[%s20269_s3 + $0x8] sm:$0x1f]  ;;  %v12571_v10 = vld [vmem:[%s20269_s3 + $0x18] sm:$0x1f] }
0x11b2   :  { %v5804_v11 = vpop.f32.mrf.mxu1  ;;  %v5911_v12 = vpop.f32.mrf.mxu0 }
0x11b3   :  { %v5912_v40 = vadd.f32 %v5911_v12, %v5804_v11  ;;  %v6277_v11 = vld [vmem:[%s20267_s4 + $0x70] sm:$0xff]  ;;  %v12592_v12 = vld [vmem:[%s20267_s4 + $0x140] sm:$0xff] }
0x11b4   :  { %v5806_v13 = vpop.f32.mrf.mxu1  ;;  %v5913_v15 = vpop.f32.mrf.mxu0 }
0x11b5   :  { %v5914_v36 = vadd.f32 %v5913_v15, %v5806_v13  ;;  %v6276_v13 = vld [vmem:[%s20267_s4 + $0x68] sm:$0xff]  ;;  %v6275_v15 = vld [vmem:[%s20267_s4 + $0x60] sm:$0xff] }
0x11b6   :  { %v5810_v14 = vpop.f32.mrf.mxu1  ;;  %v5917_v19 = vpop.f32.mrf.mxu0 }
0x11b7   :  { %v5918_v34 = vadd.f32 %v5917_v19, %v5810_v14  ;;  %v12591_v14 = vld [vmem:[%s20267_s4 + $0x138] sm:$0xff]  ;;  %v12589_v19 = vld [vmem:[%s20267_s4 + $0x128] sm:$0xff] }
0x11b8   :  { %v5812_v17 = vpop.f32.mrf.mxu1  ;;  %v5919_v23 = vpop.f32.mrf.mxu0 }
0x11b9   :  { %v5920_v31 = vadd.f32 %v5919_v23, %v5812_v17  ;;  %v12590_v17 = vld [vmem:[%s20267_s4 + $0x130] sm:$0xff]  ;;  %v6272_v23 = vld [vmem:[%s20267_s4 + $0x48] sm:$0xff] }
0x11ba   :  { %v5816_v18 = vpop.f32.mrf.mxu1  ;;  %v5923_v26 = vpop.f32.mrf.mxu0 }
0x11bb   :  { %v5924_v32 = vadd.f32 %v5923_v26, %v5816_v18  ;;  %v6274_v18 = vld [vmem:[%s20267_s4 + $0x58] sm:$0xff]  ;;  %v12586_v26 = vld [vmem:[%s20267_s4 + $0x110] sm:$0xff] }
0x11bc   :  { %v5818_v20 = vpop.f32.mrf.mxu1  ;;  %v5925_v29 = vpop.f32.mrf.mxu0 }
0x11bd   :  { %v5926_v37 = vadd.f32 %v5925_v29, %v5818_v20  ;;  %v6273_v20 = vld [vmem:[%s20267_s4 + $0x50] sm:$0xff] }
0x11be   :  { %v6024_v22 = vpop.f32.mrf.mxu1  ;;  %v6269_v29 = vld [vmem:[%s20267_s4 + $0x30] sm:$0xff] }
0x11bf   :  { %v6047_v54 = vadd.f32 %v6024_v22, %v5906_v48  ;;  %v12588_v22 = vld [vmem:[%s20267_s4 + $0x120] sm:$0xff]  ;;  %v12601_v48 = vld [vmem:[%s20267_s4 + $0x188] sm:$0xff] }
0x11c0   :  { %v6026_v24 = vpop.f32.mrf.mxu1 }
0x11c1   :  { %v6048_v51 = vadd.f32 %v6026_v24, %v5908_v44  ;;  %v6067_v62 = vadd.f32 %v6060_v41, %v6047_v54  ;;  %v12587_v24 = vld [vmem:[%s20267_s4 + $0x118] sm:$0xff]  ;;  %v12598_v54 = vld [vmem:[%s20267_s4 + $0x170] sm:$0xff] }
0x11c2   :  { %v6030_v25 = vpop.f32.mrf.mxu1  ;;  %v12603_v44 = vld [vmem:[%s20267_s4 + $0x198] sm:$0xff] }
0x11c3   :  { %v6049_v49 = vadd.f32 %v6030_v25, %v5912_v40  ;;  %v6068_v60 = vadd.f32 %v6064_v45, %v6048_v51  ;;  %v6075_v4 = vmax.f32 %v6067_v62, 0.0  ;;  %v6271_v25 = vld [vmem:[%s20267_s4 + $0x40] sm:$0xff]  ;;  %v12579_v40 = vld [vmem:[%s20267_s4 + $0xd8] sm:$0xff]  ;;  %v6284_v51 = vld [vmem:[%s20267_s4 + $0xa8] sm:$0xff] }
0x11c4   :  { %v6032_v27 = vpop.f32.mrf.mxu1  ;;  %v12594_v62 = vld [vmem:[%s20267_s4 + $0x150] sm:$0xff] }
0x11c5   :  { %v6050_v46 = vadd.f32 %v6032_v27, %v5914_v36  ;;  %v6069_v58 = vadd.f32 %v6060_v41, %v6049_v49  ;;  %v6076_v2 = vmax.f32 %v6068_v60, 0.0  ;;  %v6270_v27 = vld [vmem:[%s20267_s4 + $0x38] sm:$0xff]  ;;  %v12581_v36 = vld [vmem:[%s20267_s4 + $0xe8] sm:$0xff]  ;;  %v6285_v49 = vld [vmem:[%s20267_s4 + $0xb0] sm:$0xff] }
0x11c6   :  { %v6036_v28 = vpop.f32.mrf.mxu1  ;;  %v12595_v60 = vld [vmem:[%s20267_s4 + $0x158] sm:$0xff] }
0x11c7   :  { %v6051_v42 = vadd.f32 %v6036_v28, %v5918_v34  ;;  %v6070_v56 = vadd.f32 %v6064_v45, %v6050_v46  ;;  %v6077_v1 = vmax.f32 %v6069_v58, 0.0  ;;  %v12585_v28 = vld [vmem:[%s20267_s4 + $0x108] sm:$0xff]  ;;  %v12582_v34 = vld [vmem:[%s20267_s4 + $0xf0] sm:$0xff]  ;;  %v12596_v58 = vld [vmem:[%s20267_s4 + $0x160] sm:$0xff] }
0x11c8   :  { %v6038_v30 = vpop.f32.mrf.mxu1  ;;  %v12602_v46 = vld [vmem:[%s20267_s4 + $0x190] sm:$0xff] }
0x11c9   :  { %v6052_v38 = vadd.f32 %v6038_v30, %v5920_v31  ;;  %v6071_v55 = vadd.f32 %v6060_v41, %v6051_v42  ;;  %v6078_v0 = vmax.f32 %v6070_v56, 0.0  ;;  %v12584_v30 = vld [vmem:[%s20267_s4 + $0x100] sm:$0xff]  ;;  %v6268_v31 = vld [vmem:[%s20267_s4 + $0x28] sm:$0xff]  ;;  %v12578_v42 = vld [vmem:[%s20267_s4 + $0xd0] sm:$0xff] }
0x11ca   :  { %v6042_v35 = vpop.f32.mrf.mxu1  ;;  %v12597_v56 = vld [vmem:[%s20267_s4 + $0x168] sm:$0xff] }
0x11cb   :  { %v6053_v39 = vadd.f32 %v6042_v35, %v5924_v32  ;;  %v6072_v52 = vadd.f32 %v6064_v45, %v6052_v38  ;;  %v6079_v63 = vmax.f32 %v6071_v55, 0.0  ;;  %v12583_v32 = vld [vmem:[%s20267_s4 + $0xf8] sm:$0xff]  ;;  %v12580_v38 = vld [vmem:[%s20267_s4 + $0xe0] sm:$0xff] }
0x11cc   :  { %v6044_v43 = vpop.f32.mrf.mxu1  ;;  %v6266_v35 = vld [vmem:[%s20267_s4 + $0x18] sm:$0xff] }
0x11cd   :  { %v6054_v47 = vadd.f32 %v6044_v43, %v5926_v37  ;;  %v6073_v50 = vadd.f32 %v6060_v41, %v6053_v39  ;;  %v6080_v61 = vmax.f32 %v6072_v52, 0.0  ;;  %v6265_v37 = vld [vmem:[%s20267_s4 + $0x10] sm:$0xff]  ;;  %v6264_v39 = vld [vmem:[%s20267_s4 + $0x8] sm:$0xff]  ;;  %v6263_v41 = vld [vmem:[%s20267_s4] sm:$0xff] }
0x11ce   :  { %v6288_v43 = vld [vmem:[%s20267_s4 + $0xc8] sm:$0xff]  ;;  %v12599_v52 = vld [vmem:[%s20267_s4 + $0x178] sm:$0xff] }
0x11cf   :  { %v6074_v53 = vadd.f32 %v6064_v45, %v6054_v47  ;;  %v6081_v59 = vmax.f32 %v6073_v50, 0.0  ;;  %v6287_v45 = vld [vmem:[%s20267_s4 + $0xc0] sm:$0xff]  ;;  %v6286_v47 = vld [vmem:[%s20267_s4 + $0xb8] sm:$0xff] }
0x11d0   :  { %v12600_v50 = vld [vmem:[%s20267_s4 + $0x180] sm:$0xff]  ;;  %v6282_v55 = vld [vmem:[%s20267_s4 + $0x98] sm:$0xff] }
0x11d1   :  { %v6082_v57 = vmax.f32 %v6074_v53, 0.0  ;;  %v6283_v53 = vld [vmem:[%s20267_s4 + $0xa0] sm:$0xff] }
0x11d3   :  { %12566 = vmatprep.subr.msk.mxu0 %vm450_vm2, %v6082_v57  ;;  %12572 = vmatprep.subr.msk.mxu1 %vm450_vm2, %v6082_v57  ;;  %v6281_v57 = vld [vmem:[%s20267_s4 + $0x90] sm:$0xff] }
0x11d4   :  { %12567 = vmatpush1.msk.msra.mxu0 %vm450_vm2, %v6081_v59  ;;  %12573 = vmatpush1.msk.msra.mxu1 %vm450_vm2, %v6081_v59  ;;  %v6280_v59 = vld [vmem:[%s20267_s4 + $0x88] sm:$0xff] }
0x11d5   :  { %6123 = vmatprep.subr.mxu0 %v6080_v61  ;;  %6208 = vmatprep.subr.mxu1 %v6080_v61  ;;  %v6279_v61 = vld [vmem:[%s20267_s4 + $0x80] sm:$0xff] }
0x11d6   :  { %6124 = vmatpush1.msra.mxu0 %v6079_v63  ;;  %6209 = vmatpush1.msra.mxu1 %v6079_v63  ;;  %v12618_v63 = vld [vmem:[%s20270_s5 + $0xc8] sm:$0xff] }
0x11d7   :  { %6125 = vmatprep.subr.mxu0 %v6078_v0  ;;  %6210 = vmatprep.subr.mxu1 %v6078_v0  ;;  %v6489_v0 = vld [vmem:[%s20270_s5 + $0x60] sm:$0xff] }
0x11d8   :  { %6126 = vmatpush1.msra.mxu0 %v6077_v1  ;;  %6211 = vmatpush1.msra.mxu1 %v6077_v1 }
0x11d9   :  { %6127 = vmatprep.subr.mxu0 %v6076_v2  ;;  %6212 = vmatprep.subr.mxu1 %v6076_v2 }
0x11da   :  { %6128 = vmatpush1.msra.mxu0 %v6075_v4  ;;  %6213 = vmatpush1.msra.mxu1 %v6075_v4 }
0x11db   :  { %12568 = vmatmul.mubr.msk.f32.vlgmr.msra.gmra.mxu0 %vm443_vm3, %v6083_v5  ;;  %12574 = vmatmul.mubr.msk.f32.vlgmr.msra.gmra.mxu1 %vm443_vm3, %v12570_v6 }
0x11dc   :  { %6167 = vmatprep.mubr.f32.mxu0 %v15033_v3  ;;  %6252 = vmatprep.mubr.f32.mxu1 %v15033_v3 }
0x11dd   :  { %6295 = vmatprep.subr.mxu0 %v15033_v3  ;;  %6396 = vmatprep.subr.mxu1 %v15033_v3 }
0x11de   :  { %6296 = vmatpush1.msra.mxu0 %v6278_v7  ;;  %6397 = vmatpush1.msra.mxu1 %v12593_v8 }
0x11df   :  { %12569 = vmatmul.mubr.msk.f32.gmra.mxu0 %vm443_vm3, %v6084_v9  ;;  %12575 = vmatmul.mubr.msk.f32.gmra.mxu1 %vm443_vm3, %v12571_v10  ;;  %v12617_v10 = vld [vmem:[%s20270_s5 + $0xc0] sm:$0xff] }
0x11e0   :  { %6297 = vmatprep.subr.mxu0 %v15033_v3  ;;  %6398 = vmatprep.subr.mxu1 %v15033_v3 }
0x11e1   :  { %6298 = vmatpush1.msra.mxu0 %v6277_v11  ;;  %6399 = vmatpush1.msra.mxu1 %v12592_v12  ;;  %v6488_v11 = vld [vmem:[%s20270_s5 + $0x58] sm:$0xff] }
0x11e2   :  { %6299 = vmatprep.subr.mxu0 %v15033_v3  ;;  %6400 = vmatprep.subr.mxu1 %v15033_v3 }
0x11e3   :  { %6300 = vmatpush1.msra.mxu0 %v6276_v13  ;;  %6401 = vmatpush1.msra.mxu1 %v12591_v14 }
0x11e4   :  { %6301 = vmatprep.subr.mxu0 %v15033_v3  ;;  %6402 = vmatprep.subr.mxu1 %v15033_v3 }
0x11e5   :  { %6302 = vmatpush1.msra.mxu0 %v6275_v15  ;;  %6403 = vmatpush1.msra.mxu1 %v12590_v17  ;;  %v12616_v17 = vld [vmem:[%s20270_s5 + $0xb8] sm:$0xff] }
0x11e6   :  { %6303 = vmatprep.subr.mxu0 %v15033_v3  ;;  %6404 = vmatprep.subr.mxu1 %v15033_v3 }
0x11e7   :  { %6304 = vmatpush1.msra.mxu0 %v6274_v18  ;;  %6405 = vmatpush1.msra.mxu1 %v12589_v19  ;;  %v6487_v18 = vld [vmem:[%s20270_s5 + $0x50] sm:$0xff] }
0x11e8   :  { %6305 = vmatprep.subr.mxu0 %v15033_v3  ;;  %6406 = vmatprep.subr.mxu1 %v15033_v3  ;;  %v12615_v19 = vld [vmem:[%s20270_s5 + $0xb0] sm:$0xff] }
0x11e9   :  { %6306 = vmatpush1.msra.mxu0 %v6273_v20  ;;  %6407 = vmatpush1.msra.mxu1 %v12588_v22  ;;  %v6486_v20 = vld [vmem:[%s20270_s5 + $0x48] sm:$0xff] }
0x11ea   :  { %6307 = vmatprep.subr.mxu0 %v15033_v3  ;;  %6408 = vmatprep.subr.mxu1 %v15033_v3  ;;  %v12614_v22 = vld [vmem:[%s20270_s5 + $0xa8] sm:$0xff] }
0x11eb   :  { %6308 = vmatpush1.msra.mxu0 %v6272_v23  ;;  %6409 = vmatpush1.msra.mxu1 %v12587_v24  ;;  %v6485_v23 = vld [vmem:[%s20270_s5 + $0x40] sm:$0xff] }
0x11ec   :  { %6309 = vmatprep.subr.mxu0 %v15033_v3  ;;  %6410 = vmatprep.subr.mxu1 %v15033_v3  ;;  %v12613_v24 = vld [vmem:[%s20270_s5 + $0xa0] sm:$0xff] }
0x11ed   :  { %6310 = vmatpush1.msra.mxu0 %v6271_v25  ;;  %6411 = vmatpush1.msra.mxu1 %v12586_v26  ;;  %v6484_v25 = vld [vmem:[%s20270_s5 + $0x38] sm:$0xff] }
0x11ee   :  { %6311 = vmatprep.subr.mxu0 %v15033_v3  ;;  %6412 = vmatprep.subr.mxu1 %v15033_v3  ;;  %v12612_v26 = vld [vmem:[%s20270_s5 + $0x98] sm:$0xff] }
0x11ef   :  { %6312 = vmatpush1.msra.mxu0 %v6270_v27  ;;  %6413 = vmatpush1.msra.mxu1 %v12585_v28  ;;  %v6483_v27 = vld [vmem:[%s20270_s5 + $0x30] sm:$0xff] }
0x11f0   :  { %6313 = vmatprep.subr.mxu0 %v15033_v3  ;;  %6414 = vmatprep.subr.mxu1 %v15033_v3  ;;  %v12611_v28 = vld [vmem:[%s20270_s5 + $0x90] sm:$0xff] }
0x11f1   :  { %6314 = vmatpush1.msra.mxu0 %v6269_v29  ;;  %6415 = vmatpush1.msra.mxu1 %v12584_v30  ;;  %v6482_v29 = vld [vmem:[%s20270_s5 + $0x28] sm:$0xff] }
0x11f2   :  { %6315 = vmatprep.subr.mxu0 %v15033_v3  ;;  %6416 = vmatprep.subr.mxu1 %v15033_v3  ;;  %v12610_v30 = vld [vmem:[%s20270_s5 + $0x88] sm:$0xff] }
0x11f3   :  { %6316 = vmatpush1.msra.mxu0 %v6268_v31  ;;  %6417 = vmatpush1.msra.mxu1 %v12583_v32  ;;  %v6481_v31 = vld [vmem:[%s20270_s5 + $0x20] sm:$0xff] }
0x11f4   :  { %6317 = vmatprep.subr.mxu0 %v15033_v3  ;;  %6418 = vmatprep.subr.mxu1 %v15033_v3  ;;  %v12609_v32 = vld [vmem:[%s20270_s5 + $0x80] sm:$0xff] }
0x11f5   :  { %6318 = vmatpush1.msra.mxu0 %v6267_v33  ;;  %6419 = vmatpush1.msra.mxu1 %v12582_v34  ;;  %v6480_v33 = vld [vmem:[%s20270_s5 + $0x18] sm:$0xff] }
0x11f6   :  { %6319 = vmatprep.subr.mxu0 %v15033_v3  ;;  %6420 = vmatprep.subr.mxu1 %v15033_v3  ;;  %v12608_v34 = vld [vmem:[%s20270_s5 + $0x78] sm:$0xff] }
0x11f7   :  { %6320 = vmatpush1.msra.mxu0 %v6266_v35  ;;  %6421 = vmatpush1.msra.mxu1 %v12581_v36  ;;  %v6479_v35 = vld [vmem:[%s20270_s5 + $0x10] sm:$0xff] }
0x11f8   :  { %6321 = vmatprep.subr.mxu0 %v15033_v3  ;;  %6422 = vmatprep.subr.mxu1 %v15033_v3  ;;  %v12607_v36 = vld [vmem:[%s20270_s5 + $0x70] sm:$0xff] }
0x11f9   :  { %6322 = vmatpush1.msra.mxu0 %v6265_v37  ;;  %6423 = vmatpush1.msra.mxu1 %v12580_v38  ;;  %v6478_v37 = vld [vmem:[%s20270_s5 + $0x8] sm:$0xff] }
0x11fa   :  { %6323 = vmatprep.subr.mxu0 %v15033_v3  ;;  %6424 = vmatprep.subr.mxu1 %v15033_v3  ;;  %v12606_v38 = vld [vmem:[%s20270_s5 + $0x68] sm:$0xff] }
0x11fb   :  { %6324 = vmatpush1.msra.mxu0 %v6264_v39  ;;  %6425 = vmatpush1.msra.mxu1 %v12579_v40  ;;  %v6477_v39 = vld [vmem:[%s20270_s5] sm:$0xff]  ;;  %v12635_v40 = vld [vmem:[%s20270_s5 + $0x130] sm:$0xff] }
0x11fc   :  { %6325 = vmatprep.subr.mxu0 %v15033_v3  ;;  %6426 = vmatprep.subr.mxu1 %v15033_v3 }
0x11fd   :  { %6326 = vmatpush1.msra.mxu0 %v6263_v41  ;;  %6427 = vmatpush1.msra.mxu1 %v12578_v42 }
0x11fe   :  { %6339 = vmatprep.subr.mxu0 %v15033_v3  ;;  %6440 = vmatprep.subr.mxu1 %v15033_v3 }
0x11ff   :  { %6340 = vmatpush2.msra.mxu0 %v6288_v43  ;;  %6441 = vmatpush2.msra.mxu1 %v12603_v44 }
0x1200   :  { %6341 = vmatprep.subr.mxu0 %v15033_v3  ;;  %6442 = vmatprep.subr.mxu1 %v15033_v3 }
0x1201   :  { %6342 = vmatpush2.msra.mxu0 %v6287_v45  ;;  %6443 = vmatpush2.msra.mxu1 %v12602_v46 }
0x1202   :  { %6343 = vmatprep.subr.mxu0 %v15033_v3  ;;  %6444 = vmatprep.subr.mxu1 %v15033_v3 }
0x1203   :  { %6344 = vmatpush2.msra.mxu0 %v6286_v47  ;;  %6445 = vmatpush2.msra.mxu1 %v12601_v48 }
0x1204   :  { %6345 = vmatprep.subr.mxu0 %v15033_v3  ;;  %6446 = vmatprep.subr.mxu1 %v15033_v3 }
0x1205   :  { %6346 = vmatpush2.msra.mxu0 %v6285_v49  ;;  %6447 = vmatpush2.msra.mxu1 %v12600_v50 }
0x1206   :  { %6347 = vmatprep.subr.mxu0 %v15033_v3  ;;  %6448 = vmatprep.subr.mxu1 %v15033_v3 }
0x1207   :  { %6348 = vmatpush2.msra.mxu0 %v6284_v51  ;;  %6449 = vmatpush2.msra.mxu1 %v12599_v52 }
0x1208   :  { %6349 = vmatprep.subr.mxu0 %v15033_v3  ;;  %6450 = vmatprep.subr.mxu1 %v15033_v3 }
0x1209   :  { %6350 = vmatpush2.msra.mxu0 %v6283_v53  ;;  %6451 = vmatpush2.msra.mxu1 %v12598_v54 }
0x120a   :  { %6351 = vmatprep.subr.mxu0 %v15033_v3  ;;  %6452 = vmatprep.subr.mxu1 %v15033_v3 }
0x120b   :  { %6352 = vmatpush2.msra.mxu0 %v6282_v55  ;;  %6453 = vmatpush2.msra.mxu1 %v12597_v56  ;;  %v12634_v55 = vld [vmem:[%s20270_s5 + $0x128] sm:$0xff] }
0x120c   :  { %6353 = vmatprep.subr.mxu0 %v15033_v3  ;;  %6454 = vmatprep.subr.mxu1 %v15033_v3 }
0x120d   :  { %6354 = vmatpush2.msra.mxu0 %v6281_v57  ;;  %6455 = vmatpush2.msra.mxu1 %v12596_v58  ;;  %v12633_v57 = vld [vmem:[%s20270_s5 + $0x120] sm:$0xff]  ;;  %v12632_v58 = vld [vmem:[%s20270_s5 + $0x118] sm:$0xff] }
0x120e   :  { %6355 = vmatprep.subr.mxu0 %v15033_v3  ;;  %6456 = vmatprep.subr.mxu1 %v15033_v3 }
0x120f   :  { %6356 = vmatpush2.msra.mxu0 %v6280_v59  ;;  %6457 = vmatpush2.msra.mxu1 %v12595_v60  ;;  %v12631_v59 = vld [vmem:[%s20270_s5 + $0x110] sm:$0xff]  ;;  %v12630_v60 = vld [vmem:[%s20270_s5 + $0x108] sm:$0xff] }
0x1210   :  { %6357 = vmatprep.subr.mxu0 %v15033_v3  ;;  %6458 = vmatprep.subr.mxu1 %v15033_v3 }
0x1211   :  { %6358 = vmatpush2.msra.mxu0 %v6279_v61  ;;  %6459 = vmatpush2.msra.mxu1 %v12594_v62  ;;  %v12629_v61 = vld [vmem:[%s20270_s5 + $0x100] sm:$0xff]  ;;  %v12628_v62 = vld [vmem:[%s20270_s5 + $0xf8] sm:$0xff] }
0x1212   :  { %14339 = vmatprep.subr.mxu0 %v12618_v63  ;;  %14368 = vmatprep.subr.mxu1 %v6489_v0 }
0x129b   :  { %v6163_v1 = vpop.f32.mrf.mxu0  ;;  %v6248_v2 = vpop.f32.mrf.mxu1 }
0x129c   :  { %v6259_v7 = vmax.f32 %v6163_v1, %v6248_v2  ;;  %v12625_v1 = vld [vmem:[%s20270_s5 + $0xe0] sm:$0xff]  ;;  %v12624_v2 = vld [vmem:[%s20270_s5 + $0xd8] sm:$0xff] }
0x129d   :  { %v6165_v4 = vpop.f32.mrf.mxu0  ;;  %v6250_v5 = vpop.f32.mrf.mxu1 }
0x129e   :  { %v6260_v6 = vmax.f32 %v6165_v4, %v6250_v5  ;;  %v12623_v4 = vld [vmem:[%s20270_s5 + $0xd0] sm:$0xff] }
0x129f   :  { %v6169_v8 = vpop.f32.mrf.mxu0  ;;  %v6254_v9 = vpop.f32.mrf.mxu1 }
0x12a0   :  { %12576 = vmatprep.mubr.msk.f32.mxu0 %vm650_vm4, %v6260_v6  ;;  %12604 = vmatprep.mubr.msk.f32.mxu1 %vm650_vm4, %v6260_v6  ;;  %v6261_v15 = vmax.f32 %v6169_v8, %v6254_v9  ;;  %v12655_v6 = vld [vmem:[%s20271_s8 + $0xa8] sm:$0xff]  ;;  %v12653_v8 = vld [vmem:[%s20271_s8 + $0x98] sm:$0xff]  ;;  %v12652_v9 = vld [vmem:[%s20271_s8 + $0x90] sm:$0xff] }
0x12a1   :  { %v6171_v12 = vpop.f32.mrf.mxu0  ;;  %v6256_v13 = vpop.f32.mrf.mxu1  ;;  %6360 = vmatmul.mubr.f32.vlgmr.msra.gmra.mxu0 %v6259_v7  ;;  %6461 = vmatmul.mubr.f32.vlgmr.msra.gmra.mxu1 %v6259_v7  ;;  %v12654_v7 = vld [vmem:[%s20271_s8 + $0xa0] sm:$0xff] }
0x12a2   :  { %v6262_v14 = vmax.f32 %v6171_v12, %v6256_v13  ;;  %14340 = vmatpush3.msra.mxu0 %v12618_v63  ;;  %14369 = vmatpush3.msra.mxu1 %v6489_v0  ;;  %v12627_v63 = vld [vmem:[%s20270_s5 + $0xf0] sm:$0xff]  ;;  %v12626_v0 = vld [vmem:[%s20270_s5 + $0xe8] sm:$0xff]  ;;  %v12649_v12 = vld [vmem:[%s20271_s8 + $0x78] sm:$0xff] }
0x12a3   :  { %14341 = vmatprep.subr.mxu0 %v12617_v10  ;;  %14370 = vmatprep.subr.mxu1 %v6488_v11 }
0x12a4   :  { %12577 = vmatprep.mubr.msk.f32.mxu0 %vm650_vm4, %v6262_v14  ;;  %12605 = vmatprep.mubr.msk.f32.mxu1 %vm650_vm4, %v6262_v14 }
0x12a5   :  { %6365 = vmatmul.mubr.f32.gmra.mxu0 %v6261_v15  ;;  %6466 = vmatmul.mubr.f32.gmra.mxu1 %v6261_v15 }
0x12a6   :  { %14342 = vmatpush3.msra.mxu0 %v12617_v10  ;;  %14371 = vmatpush3.msra.mxu1 %v6488_v11  ;;  %v12651_v10 = vld [vmem:[%s20271_s8 + $0x88] sm:$0xff]  ;;  %v12650_v11 = vld [vmem:[%s20271_s8 + $0x80] sm:$0xff] }
0x12a7   :  { %14343 = vmatprep.subr.mxu0 %v12616_v17  ;;  %14372 = vmatprep.subr.mxu1 %v6487_v18 }
0x12a8   :  { %14344 = vmatpush3.msra.mxu0 %v12616_v17  ;;  %14373 = vmatpush3.msra.mxu1 %v6487_v18 }
0x12a9   :  { %14345 = vmatprep.subr.mxu0 %v12615_v19  ;;  %14374 = vmatprep.subr.mxu1 %v6486_v20 }
0x12aa   :  { %14346 = vmatpush3.msra.mxu0 %v12615_v19  ;;  %14375 = vmatpush3.msra.mxu1 %v6486_v20  ;;  %v12638_v20 = vld [vmem:[%s20272_s6] ss:$0 sm:$0xff] }
0x12ab   :  { %14347 = vmatprep.subr.mxu0 %v12614_v22  ;;  %14376 = vmatprep.subr.mxu1 %v6485_v23 }
0x12ac   :  { %14348 = vmatpush3.msra.mxu0 %v12614_v22  ;;  %14377 = vmatpush3.msra.mxu1 %v6485_v23 }
0x12ad   :  { %14349 = vmatprep.subr.mxu0 %v12613_v24  ;;  %14378 = vmatprep.subr.mxu1 %v6484_v25 }
0x12ae   :  { %14350 = vmatpush3.msra.mxu0 %v12613_v24  ;;  %14379 = vmatpush3.msra.mxu1 %v6484_v25 }
0x12af   :  { %14351 = vmatprep.subr.mxu0 %v12612_v26  ;;  %14380 = vmatprep.subr.mxu1 %v6483_v27 }
0x12b0   :  { %14352 = vmatpush3.msra.mxu0 %v12612_v26  ;;  %14381 = vmatpush3.msra.mxu1 %v6483_v27 }
0x12b1   :  { %14353 = vmatprep.subr.mxu0 %v12611_v28  ;;  %14382 = vmatprep.subr.mxu1 %v6482_v29 }
0x12b2   :  { %14354 = vmatpush3.msra.mxu0 %v12611_v28  ;;  %14383 = vmatpush3.msra.mxu1 %v6482_v29 }
0x12b3   :  { %14355 = vmatprep.subr.mxu0 %v12610_v30  ;;  %14384 = vmatprep.subr.mxu1 %v6481_v31 }
0x12b4   :  { %14356 = vmatpush3.msra.mxu0 %v12610_v30  ;;  %14385 = vmatpush3.msra.mxu1 %v6481_v31  ;;  %v6776_v30 = vld [vmem:[%s20273_s7] sm:$0x1f]  ;;  %v12641_v31 = vld [vmem:[%s20273_s7 + $0x8] sm:$0x1f] }
0x12b5   :  { %14357 = vmatprep.subr.mxu0 %v12609_v32  ;;  %14386 = vmatprep.subr.mxu1 %v6480_v33 }
0x12b6   :  { %14358 = vmatpush3.msra.mxu0 %v12609_v32  ;;  %14387 = vmatpush3.msra.mxu1 %v6480_v33  ;;  %v6938_v32 = vld [vmem:[%s20271_s8 + $0x50] sm:$0xff]  ;;  %v6937_v33 = vld [vmem:[%s20271_s8 + $0x48] sm:$0xff] }
0x12b7   :  { %14359 = vmatprep.subr.mxu0 %v12608_v34  ;;  %14388 = vmatprep.subr.mxu1 %v6479_v35 }
0x12b8   :  { %14360 = vmatpush3.msra.mxu0 %v12608_v34  ;;  %14389 = vmatpush3.msra.mxu1 %v6479_v35  ;;  %v6936_v34 = vld [vmem:[%s20271_s8 + $0x40] sm:$0xff]  ;;  %v6935_v35 = vld [vmem:[%s20271_s8 + $0x38] sm:$0xff] }
0x12b9   :  { %14361 = vmatprep.subr.mxu0 %v12607_v36  ;;  %14390 = vmatprep.subr.mxu1 %v6478_v37 }
0x12ba   :  { %14362 = vmatpush3.msra.mxu0 %v12607_v36  ;;  %14391 = vmatpush3.msra.mxu1 %v6478_v37  ;;  %v6934_v36 = vld [vmem:[%s20271_s8 + $0x30] sm:$0xff]  ;;  %v6933_v37 = vld [vmem:[%s20271_s8 + $0x28] sm:$0xff] }
0x12bb   :  { %14363 = vmatprep.subr.mxu0 %v12606_v38  ;;  %14392 = vmatprep.subr.mxu1 %v6477_v39 }
0x12bc   :  { %14364 = vmatpush3.msra.mxu0 %v12606_v38  ;;  %14393 = vmatpush3.msra.mxu1 %v6477_v39  ;;  %v6932_v38 = vld [vmem:[%s20271_s8 + $0x20] sm:$0xff]  ;;  %v6931_v39 = vld [vmem:[%s20271_s8 + $0x18] sm:$0xff] }
0x12bd   :  { %14397 = vmatprep.subr.mxu0 %v12635_v40  ;;  %14426 = vmatprep.subr.mxu1 %v15033_v3 }
0x1361   :  { %v6361_v41 = vpop.f32.mrf.mxu0  ;;  %v6462_v42 = vpop.f32.mrf.mxu1 }
0x1362   :  { %v6471_v43 = vmax.f32 %v6361_v41, %v6462_v42  ;;  %v6930_v41 = vld [vmem:[%s20271_s8 + $0x10] sm:$0xff]  ;;  %v12647_v42 = vld [vmem:[%s20271_s8 + $0x68] sm:$0xff] }
0x1363   :  { %v6363_v44 = vpop.f32.mrf.mxu0  ;;  %v6464_v45 = vpop.f32.mrf.mxu1 }
0x1364   :  { %6473 = vst.msk [vmem:[#allocation2] sm:$0xff] %vm836_vm5, %v6471_v43  ;;  %v6929_v43 = vld [vmem:[%s20271_s8 + $0x8] sm:$0xff]  ;;  %v12646_v44 = vld [vmem:[%s20271_s8 + $0x60] sm:$0xff] }
0x1365   :  { %v6366_v46 = vpop.f32.mrf.mxu0  ;;  %v6467_v47 = vpop.f32.mrf.mxu1  ;;  %v6928_v45 = vld [vmem:[%s20271_s8] sm:$0xff] }
0x1366   :  { %v6472_v48 = vmax.f32 %v6366_v46, %v6467_v47  ;;  %v12645_v46 = vld [vmem:[%s20271_s8 + $0x58] sm:$0xff] }
0x1367   :  { %v6368_v49 = vpop.f32.mrf.mxu0  ;;  %v6469_v50 = vpop.f32.mrf.mxu1  ;;  %v12672_v47 = vld [vmem:[%s20265_s1 + $0x78] sm:$0xf] }
0x1368   :  { %6474 = vst.msk [vmem:[#allocation2 + $0x8] sm:$0x1f] %vm838_vm6, %v6472_v48  ;;  %v12696_v48 = vld [vmem:[%s20265_s1 + $0xb8] sm:$0xf] }
0x136b   :  { %v6475_v51 = vld [vmem:[#allocation2] sm:$0xff] }
0x136c   :  { %14394 = vmatprep.mubr.msk.f32.mxu1 %vm836_vm5, %v6475_v51 }
0x136f   :  { %v6490_v52 = vld [vmem:[#allocation2 + $0x1] sm:$0xff]  ;;  %v6491_v54 = vld [vmem:[#allocation2 + $0x9] sm:$0x7] }
0x1370   :  { %v6476_v53 = vld [vmem:[#allocation2 + $0x8] sm:$0x7]  ;;  %14365 = vmatprep.mubr.msk.f32.mxu0 %vm836_vm5, %v6490_v52 }
0x1371   :  { %14395 = vmatmul.mubr.msk.f32.vlgmr.msra.gmra.mxu1 %vm836_vm5, %v6476_v53  ;;  %14366 = vmatmul.mubr.msk.f32.vlgmr.msra.gmra.mxu0 %vm836_vm5, %v6491_v54  ;;  %v6667_v56 = vld [vmem:[#allocation2 + $0x2] sm:$0xff]  ;;  %v6668_v5 = vld [vmem:[#allocation2 + $0xa] sm:$0x7]  ;;  %v12671_v53 = vld [vmem:[%s20265_s1 + $0x70] sm:$0xf] }
0x1372   :  { %14430 = vmatprep.mubr.msk.f32.mxu1 %vm15034_vm7, %v15033_v3  ;;  %14398 = vmatpush3.msra.mxu0 %v12635_v40  ;;  %v12648_v40 = vld [vmem:[%s20271_s8 + $0x70] sm:$0xff] }
0x1373   :  { %14423 = vmatprep.mubr.msk.f32.mxu0 %vm836_vm5, %v6667_v56  ;;  %14399 = vmatprep.subr.mxu0 %v12634_v55  ;;  %v12695_v56 = vld [vmem:[%s20265_s1 + $0xb0] sm:$0xf] }
0x1374   :  { %14400 = vmatpush3.msra.mxu0 %v12634_v55  ;;  %v12670_v55 = vld [vmem:[%s20265_s1 + $0x68] sm:$0xff] }
0x1375   :  { %14401 = vmatprep.subr.mxu0 %v12633_v57 }
0x1376   :  { %14402 = vmatpush3.msra.mxu0 %v12633_v57  ;;  %v12669_v57 = vld [vmem:[%s20265_s1 + $0x60] sm:$0xff] }
0x1377   :  { %14403 = vmatprep.subr.mxu0 %v12632_v58 }
0x1378   :  { %14404 = vmatpush3.msra.mxu0 %v12632_v58  ;;  %v12694_v58 = vld [vmem:[%s20265_s1 + $0xa8] sm:$0xff] }
0x1379   :  { %14405 = vmatprep.subr.mxu0 %v12631_v59 }
0x137a   :  { %14406 = vmatpush3.msra.mxu0 %v12631_v59  ;;  %v12668_v59 = vld [vmem:[%s20265_s1 + $0x58] sm:$0xff] }
0x137b   :  { %14407 = vmatprep.subr.mxu0 %v12630_v60 }
0x137c   :  { %14408 = vmatpush3.msra.mxu0 %v12630_v60  ;;  %v12693_v60 = vld [vmem:[%s20265_s1 + $0xa0] sm:$0xff] }
0x137d   :  { %14409 = vmatprep.subr.mxu0 %v12629_v61 }
0x137e   :  { %14410 = vmatpush3.msra.mxu0 %v12629_v61  ;;  %v12667_v61 = vld [vmem:[%s20265_s1 + $0x50] sm:$0xff] }
0x137f   :  { %14411 = vmatprep.subr.mxu0 %v12628_v62 }
0x1380   :  { %14412 = vmatpush3.msra.mxu0 %v12628_v62  ;;  %v12692_v62 = vld [vmem:[%s20265_s1 + $0x98] sm:$0xff] }
0x1381   :  { %14413 = vmatprep.subr.mxu0 %v12627_v63 }
0x1382   :  { %14414 = vmatpush3.msra.mxu0 %v12627_v63  ;;  %v12666_v63 = vld [vmem:[%s20265_s1 + $0x48] sm:$0xff] }
0x1383   :  { %14415 = vmatprep.subr.mxu0 %v12626_v0 }
0x1384   :  { %14416 = vmatpush3.msra.mxu0 %v12626_v0  ;;  %v12691_v0 = vld [vmem:[%s20265_s1 + $0x90] sm:$0xff] }
0x1385   :  { %14417 = vmatprep.subr.mxu0 %v12625_v1 }
0x1386   :  { %14418 = vmatpush3.msra.mxu0 %v12625_v1  ;;  %v12665_v1 = vld [vmem:[%s20265_s1 + $0x40] sm:$0xff] }
0x1387   :  { %14419 = vmatprep.subr.mxu0 %v12624_v2 }
0x1388   :  { %14420 = vmatpush3.msra.mxu0 %v12624_v2  ;;  %v12690_v2 = vld [vmem:[%s20265_s1 + $0x88] sm:$0xff] }
0x1389   :  { %14421 = vmatprep.subr.mxu0 %v12623_v4 }
0x138a   :  { %14422 = vmatpush3.msra.mxu0 %v12623_v4  ;;  %v12661_v4 = vld [vmem:[%s20266_s0 + $0xa1] sm:$0xff] }
0x138b   :  { %14424 = vmatmul.mubr.msk.f32.vlgmr.msra.gmra.mxu0 %vm836_vm5, %v6668_v5  ;;  %14465 = vmatprep.subr.mxu0 %v15033_v3  ;;  %v7108_v5 = vld [vmem:[%s20265_s1 + $0x38] sm:$0xf] }
0x138c   :  { %14487 = vmatprep.mubr.msk.f32.mxu0 %vm15034_vm7, %v15033_v3  ;;  %14466 = vmatpush3.msra.mxu0 %v12655_v6  ;;  %v7107_v6 = vld [vmem:[%s20265_s1 + $0x30] sm:$0xf] }
0x138d   :  { %14467 = vmatprep.subr.mxu0 %v15033_v3 }
0x138e   :  { %14468 = vmatpush3.msra.mxu0 %v12654_v7  ;;  %v7106_v7 = vld [vmem:[%s20265_s1 + $0x28] sm:$0xff] }
0x138f   :  { %14469 = vmatprep.subr.mxu0 %v15033_v3 }
0x1390   :  { %14470 = vmatpush3.msra.mxu0 %v12653_v8  ;;  %v12689_v8 = vld [vmem:[%s20265_s1 + $0x80] sm:$0xff] }
0x1391   :  { %14471 = vmatprep.subr.mxu0 %v15033_v3 }
0x1392   :  { %14472 = vmatpush3.msra.mxu0 %v12652_v9  ;;  %v7105_v9 = vld [vmem:[%s20265_s1 + $0x20] sm:$0xff] }
0x1393   :  { %14473 = vmatprep.subr.mxu0 %v15033_v3 }
0x1394   :  { %14474 = vmatpush3.msra.mxu0 %v12651_v10  ;;  %v12662_v10 = vld [vmem:[%s20266_s0 + $0xa9] sm:$0xff] }
0x1395   :  { %14475 = vmatprep.subr.mxu0 %v15033_v3 }
0x1396   :  { %14476 = vmatpush3.msra.mxu0 %v12650_v11  ;;  %v7104_v11 = vld [vmem:[%s20265_s1 + $0x18] sm:$0xff] }
0x1397   :  { %14477 = vmatprep.subr.mxu0 %v15033_v3 }
0x1398   :  { %14478 = vmatpush3.msra.mxu0 %v12649_v12  ;;  %v7103_v12 = vld [vmem:[%s20265_s1 + $0x10] sm:$0xff] }
0x1399   :  { %14479 = vmatprep.subr.mxu0 %v15033_v3 }
0x139a   :  { %14480 = vmatpush3.msra.mxu0 %v12648_v40 }
0x139b   :  { %14481 = vmatprep.subr.mxu0 %v15033_v3 }
0x139c   :  { %14482 = vmatpush3.msra.mxu0 %v12647_v42 }
0x139d   :  { %14483 = vmatprep.subr.mxu0 %v15033_v3 }
0x139e   :  { %14484 = vmatpush3.msra.mxu0 %v12646_v44 }
0x139f   :  { %14485 = vmatprep.subr.mxu0 %v15033_v3 }
0x13a0   :  { %14486 = vmatpush3.msra.mxu0 %v12645_v46 }
0x13a1   :  { %12697 = vmatprep.subr.msk.mxu0 %vm82_vm0, %v12696_v48 }
0x1431   :  { %v14396_v13 = vpop.f32.mrf.mxu1  ;;  %v14367_v14 = vpop.f32.mrf.mxu0 }
0x1432   :  { %v6664_v18 = vadd.f32 %v14396_v13, %v14367_v14  ;;  %v7102_v13 = vld [vmem:[%s20265_s1 + $0x8] sm:$0xff] }
0x1433   :  { %v6658_v15 = vpop.f32.mrf.mxu1  ;;  %v6577_v17 = vpop.f32.mrf.mxu0  ;;  %v12685_v14 = vld [vmem:[%s20266_s0 + $0xa2] sm:$0xff] }
0x1434   :  { %v6659_v22 = vadd.f32 %v6658_v15, %v6577_v17  ;;  %v7101_v15 = vld [vmem:[%s20265_s1] sm:$0xff]  ;;  %v12663_v17 = vld [vmem:[%s20266_s0 + $0xb1] sm:$0xff] }
0x144b   :  { %v14425_v19 = vpop.f32.mrf.mxu0 }
0x144c   :  { %v6764_v23 = vadd.f32 %v14425_v19, %v6664_v18  ;;  %v12686_v18 = vld [vmem:[%s20266_s0 + $0xaa] sm:$0xff]  ;;  %v12664_v19 = vld [vmem:[%s20266_s0 + $0xb9] sm:$0x3] }
0x144d   :  { %v6754_v24 = vpop.f32.mrf.mxu0 }
0x144e   :  { %v6773_v25 = vadd.f32 %v12638_v20, %v6764_v23  ;;  %v6763_v26 = vadd.f32 %v6754_v24, %v6659_v22  ;;  %v12657_v22 = vld [vmem:[%s20266_s0 + $0xa0] sm:$0xff]  ;;  %v12688_v23 = vld [vmem:[%s20266_s0 + $0xba] sm:$0x3]  ;;  %v12658_v24 = vld [vmem:[%s20266_s0 + $0xa8] sm:$0xff] }
0x1450   :  { %v6775_v27 = vmax.f32 %v6773_v25, 0.0  ;;  %v6772_v28 = vadd.f32 %v12638_v20, %v6763_v26  ;;  %v12687_v20 = vld [vmem:[%s20266_s0 + $0xb2] sm:$0xff] }
0x1451   :  { %v12659_v25 = vld [vmem:[%s20266_s0 + $0xb0] sm:$0xff]  ;;  %v12660_v26 = vld [vmem:[%s20266_s0 + $0xb8] sm:$0x3] }
0x1452   :  { %v6774_v29 = vmax.f32 %v6772_v28, 0.0  ;;  %14427 = vmatpush3.msk.msra.mxu1 %vm1148_vm8, %v6775_v27 }
0x1453   :  { %14428 = vmatprep.subr.mxu1 %v15033_v3 }
0x1454   :  { %14429 = vmatpush3.msra.mxu1 %v6774_v29 }
0x1455   :  { %14431 = vmatmul.mubr.msk.f32.vlgmr.msra.gmra.mxu1 %vm1144_vm9, %v6776_v30  ;;  %14433 = vmatprep.subr.mxu1 %v15033_v3 }
0x1456   :  { %14434 = vmatpush3.msk.msra.mxu1 %vm1148_vm8, %v6775_v27  ;;  %14437 = vmatprep.mubr.msk.f32.mxu1 %vm15034_vm7, %v15033_v3 }
0x1457   :  { %14435 = vmatprep.subr.mxu1 %v15033_v3 }
0x1458   :  { %14436 = vmatpush3.msra.mxu1 %v6774_v29 }
0x1459   :  { %14438 = vmatmul.mubr.msk.f32.vlgmr.msra.gmra.mxu1 %vm1144_vm9, %v12641_v31  ;;  %14440 = vmatprep.subr.mxu1 %v15033_v3 }
0x145a   :  { %14441 = vmatpush3.msra.mxu1 %v6938_v32  ;;  %14462 = vmatprep.mubr.msk.f32.mxu1 %vm15034_vm7, %v15033_v3 }
0x145b   :  { %14442 = vmatprep.subr.mxu1 %v15033_v3 }
0x145c   :  { %14443 = vmatpush3.msra.mxu1 %v6937_v33 }
0x145d   :  { %14444 = vmatprep.subr.mxu1 %v15033_v3 }
0x145e   :  { %14445 = vmatpush3.msra.mxu1 %v6936_v34 }
0x145f   :  { %14446 = vmatprep.subr.mxu1 %v15033_v3 }
0x1460   :  { %14447 = vmatpush3.msra.mxu1 %v6935_v35 }
0x1461   :  { %14448 = vmatprep.subr.mxu1 %v15033_v3 }
0x1462   :  { %14449 = vmatpush3.msra.mxu1 %v6934_v36 }
0x1463   :  { %14450 = vmatprep.subr.mxu1 %v15033_v3 }
0x1464   :  { %14451 = vmatpush3.msra.mxu1 %v6933_v37 }
0x1465   :  { %14452 = vmatprep.subr.mxu1 %v15033_v3 }
0x1466   :  { %14453 = vmatpush3.msra.mxu1 %v6932_v38 }
0x1467   :  { %14454 = vmatprep.subr.mxu1 %v15033_v3 }
0x1468   :  { %14455 = vmatpush3.msra.mxu1 %v6931_v39 }
0x1469   :  { %14456 = vmatprep.subr.mxu1 %v15033_v3 }
0x146a   :  { %14457 = vmatpush3.msra.mxu1 %v6930_v41 }
0x146b   :  { %14458 = vmatprep.subr.mxu1 %v15033_v3 }
0x146c   :  { %14459 = vmatpush3.msra.mxu1 %v6929_v43 }
0x146d   :  { %14460 = vmatprep.subr.mxu1 %v15033_v3 }
0x146e   :  { %14461 = vmatpush3.msra.mxu1 %v6928_v45 }
0x146f   :  { %12673 = vmatprep.subr.msk.mxu1 %vm82_vm0, %v12672_v47 }
0x1515   :  { %v6849_v49 = vpop.f32.mrf.mxu1 }
0x1517   :  { %v14432_v50 = vpop.f32.mrf.mxu1 }
0x1519   :  { %v6923_v51 = vpop.f32.mrf.mxu1 }
0x151a   :  { %v6927_v52 = vmax.f32 %v6849_v49, %v6923_v51 }
0x151b   :  { %v14439_v54 = vpop.f32.mrf.mxu1 }
0x151c   :  { %14463 = vmatmul.mubr.msk.f32.vlgmr.msra.gmra.mxu1 %vm1309_vm10, %v6927_v52  ;;  %14488 = vmatmul.mubr.msk.f32.vlgmr.msra.gmra.mxu0 %vm1309_vm10, %v6927_v52 }
0x151d   :  { %12674 = vmatpush1.msk.msra.mxu1 %vm82_vm0, %v12671_v53  ;;  %7203 = vmatprep.mubr.f32.mxu1 %v15033_v3 }
0x151e   :  { %7165 = vmatprep.subr.mxu1 %v12670_v55  ;;  %12698 = vmatpush1.msk.msra.mxu0 %vm82_vm0, %v12695_v56  ;;  %v7462_v56 = vld [vmem:[%s20268_s2] sm:$0x3] }
0x151f   :  { %7166 = vmatpush1.msra.mxu1 %v12669_v57  ;;  %7391 = vmatprep.subr.mxu0 %v12694_v58 }
0x1520   :  { %7167 = vmatprep.subr.mxu1 %v12668_v59  ;;  %7392 = vmatpush1.msra.mxu0 %v12693_v60 }
0x1521   :  { %7168 = vmatpush1.msra.mxu1 %v12667_v61  ;;  %7393 = vmatprep.subr.mxu0 %v12692_v62 }
0x1522   :  { %7169 = vmatprep.subr.mxu1 %v12666_v63  ;;  %7394 = vmatpush1.msra.mxu0 %v12691_v0 }
0x1523   :  { %7170 = vmatpush1.msra.mxu1 %v12665_v1  ;;  %7395 = vmatprep.subr.mxu0 %v12690_v2  ;;  %v7467_v2 = vrot.slane %v7462_v56, %v15321_v16 }
0x1524   :  { %12675 = vmatmul.mubr.msk.f32.vlgmr.msra.gmra.mxu1 %vm69_vm1, %v12661_v4  ;;  %12679 = vmatprep.subr.msk.mxu1 %vm82_vm0, %v7108_v5 }
0x1525   :  { %7209 = vmatprep.mubr.f32.mxu1 %v15033_v3  ;;  %12680 = vmatpush1.msk.msra.mxu1 %vm82_vm0, %v7107_v6  ;;  %v7471_v6 = vrot.slane %v7462_v56, %v15326_v21  ;;  %v7674_v56 = vld [vmem:[%s20267_s4 + $0x20] sm:$0xff] }
0x1526   :  { %7272 = vmatprep.subr.mxu1 %v7106_v7  ;;  %7396 = vmatpush1.msra.mxu0 %v12689_v8 }
0x1527   :  { %7273 = vmatpush1.msra.mxu1 %v7105_v9  ;;  %7429 = vmatprep.mubr.f32.mxu0 %v15033_v3 }
0x1528   :  { %12676 = vmatmul.mubr.msk.f32.gmra.mxu1 %vm69_vm1, %v12662_v10  ;;  %7274 = vmatprep.subr.mxu1 %v7104_v11 }
0x1529   :  { %7215 = vmatprep.mubr.f32.mxu1 %v15033_v3  ;;  %7275 = vmatpush1.msra.mxu1 %v7103_v12 }
0x152a   :  { %7276 = vmatprep.subr.mxu1 %v7102_v13  ;;  %12699 = vmatmul.mubr.msk.f32.vlgmr.msra.gmra.mxu0 %vm69_vm1, %v12685_v14 }
0x152b   :  { %7277 = vmatpush1.msra.mxu1 %v7101_v15  ;;  %7435 = vmatprep.mubr.f32.mxu0 %v15033_v3 }
0x152c   :  { %12677 = vmatmul.mubr.msk.f32.gmra.mxu1 %vm69_vm1, %v12663_v17 }
0x152d   :  { %7221 = vmatprep.mubr.f32.mxu1 %v15033_v3 }
0x152e   :  { %12700 = vmatmul.mubr.msk.f32.gmra.mxu0 %vm69_vm1, %v12686_v18 }
0x152f   :  { %7441 = vmatprep.mubr.f32.mxu0 %v15033_v3 }
0x1530   :  { %12678 = vmatmul.mubr.msk.f32.gmra.mxu1 %vm69_vm1, %v12664_v19 }
0x1531   :  { %7310 = vmatprep.mubr.f32.mxu1 %v15033_v3 }
0x1532   :  { %12701 = vmatmul.mubr.msk.f32.gmra.mxu0 %vm69_vm1, %v12687_v20 }
0x1533   :  { %7447 = vmatprep.mubr.f32.mxu0 %v15033_v3 }
0x1534   :  { %12681 = vmatmul.mubr.msk.f32.vlgmr.msra.gmra.mxu1 %vm69_vm1, %v12657_v22 }
0x1535   :  { %7316 = vmatprep.mubr.f32.mxu1 %v15033_v3 }
0x1536   :  { %12702 = vmatmul.mubr.msk.f32.gmra.mxu0 %vm69_vm1, %v12688_v23 }
0x1537   :  { %7653 = vmatprep.mubr.f32.mxu0 %v15033_v3 }
0x1538   :  { %12682 = vmatmul.mubr.msk.f32.gmra.mxu1 %vm69_vm1, %v12658_v24 }
0x1539   :  { %7322 = vmatprep.mubr.f32.mxu1 %v15033_v3 }
0x153c   :  { %12683 = vmatmul.mubr.msk.f32.gmra.mxu1 %vm69_vm1, %v12659_v25 }
0x153d   :  { %7328 = vmatprep.mubr.f32.mxu1 %v15033_v3 }
0x1540   :  { %12684 = vmatmul.mubr.msk.f32.gmra.mxu1 %vm69_vm1, %v12660_v26 }
0x1541   :  { %7568 = vmatprep.mubr.f32.mxu1 %v15033_v3 }
0x15dc   :  { %v7008_v27 = vpop.f32.mrf.mxu1  ;;  %v7089_v28 = vpop.f32.mrf.mxu0 }
0x15dd   :  { %v7093_v29 = vmax.f32 %v7008_v27, %v7089_v28 }
0x15de   :  { %v14464_v30 = vpop.f32.mrf.mxu1  ;;  %v14489_v31 = vpop.f32.mrf.mxu0 }
0x15df   :  { %7095 = vst.msk [vmem:[#allocation3 + $0x20] sm:$0x1f] %vm1466_vm11, %v7093_v29  ;;  %v7490_v30 = vld [vmem:[%s20269_s3] sm:$0xff]  ;;  %v12707_v31 = vld [vmem:[%s20269_s3 + $0x10] sm:$0xff] }
0x15e4   :  { %v7205_v32 = vpop.f32.mrf.mxu1 }
0x15e6   :  { %v7207_v33 = vpop.f32.mrf.mxu1 }
0x15e8   :  { %v7211_v34 = vpop.f32.mrf.mxu1 }
0x15ea   :  { %v7213_v35 = vpop.f32.mrf.mxu1  ;;  %v7431_v36 = vpop.f32.mrf.mxu0 }
0x15ec   :  { %v7217_v37 = vpop.f32.mrf.mxu1  ;;  %v7433_v38 = vpop.f32.mrf.mxu0 }
0x15ee   :  { %v7219_v39 = vpop.f32.mrf.mxu1  ;;  %v7437_v41 = vpop.f32.mrf.mxu0 }
0x15f0   :  { %v7223_v40 = vpop.f32.mrf.mxu1  ;;  %v7439_v44 = vpop.f32.mrf.mxu0 }
0x15f2   :  { %v7225_v42 = vpop.f32.mrf.mxu1  ;;  %v7443_v47 = vpop.f32.mrf.mxu0 }
0x15f4   :  { %v7312_v43 = vpop.f32.mrf.mxu1  ;;  %v7445_v50 = vpop.f32.mrf.mxu0 }
0x15f5   :  { %v7313_v1 = vadd.f32 %v7312_v43, %v7205_v32  ;;  %v7685_v32 = vld [vmem:[%s20267_s4 + $0x78] sm:$0xff]  ;;  %v12726_v43 = vld [vmem:[%s20267_s4 + $0x128] sm:$0xff] }
0x15f6   :  { %v7314_v45 = vpop.f32.mrf.mxu1  ;;  %v7449_v55 = vpop.f32.mrf.mxu0 }
0x15f7   :  { %v7315_v61 = vadd.f32 %v7314_v45, %v7207_v33  ;;  %v7454_v14 = vadd.f32 %v7431_v36, %v7313_v1  ;;  %v12730_v33 = vld [vmem:[%s20267_s4 + $0x148] sm:$0xff]  ;;  %v7684_v36 = vld [vmem:[%s20267_s4 + $0x70] sm:$0xff]  ;;  %v12725_v45 = vld [vmem:[%s20267_s4 + $0x120] sm:$0xff] }
0x15f8   :  { %v7318_v46 = vpop.f32.mrf.mxu1  ;;  %v7451_v5 = vpop.f32.mrf.mxu0  ;;  %v12715_v1 = vld [vmem:[%s20267_s4 + $0xd0] sm:$0xff] }
0x15f9   :  { %v7319_v59 = vadd.f32 %v7318_v46, %v7211_v34  ;;  %v7455_v11 = vadd.f32 %v7433_v38, %v7315_v61  ;;  %v7474_v24 = vadd.f32 %v7467_v2, %v7454_v14  ;;  %v7491_v34 = vld [vmem:[%s20269_s3 + $0x8] sm:$0x1f]  ;;  %v12717_v61 = vld [vmem:[%s20267_s4 + $0xe0] sm:$0xff]  ;;  %v12735_v14 = vld [vmem:[%s20267_s4 + $0x170] sm:$0xff] }
0x15fa   :  { %v7320_v48 = vpop.f32.mrf.mxu1  ;;  %v7683_v38 = vld [vmem:[%s20267_s4 + $0x68] sm:$0xff] }
0x15fb   :  { %v7321_v57 = vadd.f32 %v7320_v48, %v7213_v35  ;;  %v7456_v9 = vadd.f32 %v7437_v41, %v7319_v59  ;;  %v7475_v22 = vadd.f32 %v7471_v6, %v7455_v11  ;;  %v7482_v29 = vmax.f32 %v7474_v24, 0.0  ;;  %v12708_v35 = vld [vmem:[%s20269_s3 + $0x18] sm:$0x1f]  ;;  %v12727_v41 = vld [vmem:[%s20267_s4 + $0x130] sm:$0xff]  ;;  %v7679_v46 = vld [vmem:[%s20267_s4 + $0x48] sm:$0xff] }
0x15fc   :  { %v7324_v49 = vpop.f32.mrf.mxu1  ;;  %v7678_v48 = vld [vmem:[%s20267_s4 + $0x40] sm:$0xff]  ;;  %v12718_v59 = vld [vmem:[%s20267_s4 + $0xe8] sm:$0xff]  ;;  %v12731_v24 = vld [vmem:[%s20267_s4 + $0x150] sm:$0xff] }
0x15fd   :  { %v7325_v53 = vadd.f32 %v7324_v49, %v7217_v37  ;;  %v7457_v7 = vadd.f32 %v7439_v44, %v7321_v57  ;;  %v7476_v19 = vadd.f32 %v7467_v2, %v7456_v9  ;;  %v7483_v28 = vmax.f32 %v7475_v22, 0.0  ;;  %v12729_v37 = vld [vmem:[%s20267_s4 + $0x140] sm:$0xff]  ;;  %v7680_v44 = vld [vmem:[%s20267_s4 + $0x50] sm:$0xff]  ;;  %v7691_v11 = vld [vmem:[%s20267_s4 + $0xa8] sm:$0xff] }
0x15fe   :  { %v7326_v51 = vpop.f32.mrf.mxu1  ;;  %v12723_v49 = vld [vmem:[%s20267_s4 + $0x110] sm:$0xff]  ;;  %v12732_v22 = vld [vmem:[%s20267_s4 + $0x158] sm:$0xff] }
0x15ff   :  { %v7327_v52 = vadd.f32 %v7326_v51, %v7219_v39  ;;  %v7458_v4 = vadd.f32 %v7443_v47, %v7325_v53  ;;  %v7477_v17 = vadd.f32 %v7471_v6, %v7457_v7  ;;  %v7484_v27 = vmax.f32 %v7476_v19, 0.0  ;;  %v12728_v39 = vld [vmem:[%s20267_s4 + $0x138] sm:$0xff]  ;;  %v12722_v51 = vld [vmem:[%s20267_s4 + $0x108] sm:$0xff]  ;;  %v12721_v53 = vld [vmem:[%s20267_s4 + $0x100] sm:$0xff] }
0x1600   :  { %v7330_v54 = vpop.f32.mrf.mxu1  ;;  %v12724_v47 = vld [vmem:[%s20267_s4 + $0x118] sm:$0xff]  ;;  %v12719_v57 = vld [vmem:[%s20267_s4 + $0xf0] sm:$0xff]  ;;  %v12733_v19 = vld [vmem:[%s20267_s4 + $0x160] sm:$0xff] }
0x1601   :  { %v7331_v58 = vadd.f32 %v7330_v54, %v7223_v40  ;;  %v7459_v62 = vadd.f32 %v7445_v50, %v7327_v52  ;;  %v7478_v15 = vadd.f32 %v7467_v2, %v7458_v4  ;;  %v7485_v26 = vmax.f32 %v7477_v17, 0.0  ;;  %v7682_v40 = vld [vmem:[%s20267_s4 + $0x60] sm:$0xff]  ;;  %v7677_v50 = vld [vmem:[%s20267_s4 + $0x38] sm:$0xff]  ;;  %v7676_v52 = vld [vmem:[%s20267_s4 + $0x30] sm:$0xff] }
0x1602   :  { %v7332_v60 = vpop.f32.mrf.mxu1  ;;  %v7675_v54 = vld [vmem:[%s20267_s4 + $0x28] sm:$0xff]  ;;  %v12740_v4 = vld [vmem:[%s20267_s4 + $0x198] sm:$0xff]  ;;  %v7692_v9 = vld [vmem:[%s20267_s4 + $0xb0] sm:$0xff] }
0x1603   :  { %v7460_v63 = vadd.f32 %v7449_v55, %v7331_v58  ;;  %v7333_v0 = vadd.f32 %v7332_v60, %v7225_v42  ;;  %v7479_v12 = vadd.f32 %v7471_v6, %v7459_v62  ;;  %v7486_v25 = vmax.f32 %v7478_v15, 0.0  ;;  %v7681_v42 = vld [vmem:[%s20267_s4 + $0x58] sm:$0xff]  ;;  %v7672_v60 = vld [vmem:[%s20267_s4 + $0x10] sm:$0xff]  ;;  %v7671_v62 = vld [vmem:[%s20267_s4 + $0x8] sm:$0xff] }
0x1604   :  { %v12720_v55 = vld [vmem:[%s20267_s4 + $0xf8] sm:$0xff]  ;;  %v12734_v17 = vld [vmem:[%s20267_s4 + $0x168] sm:$0xff] }
0x1605   :  { %v7461_v8 = vadd.f32 %v7451_v5, %v7333_v0  ;;  %v7480_v10 = vadd.f32 %v7467_v2, %v7460_v63  ;;  %v7487_v23 = vmax.f32 %v7479_v12, 0.0  ;;  %v7673_v58 = vld [vmem:[%s20267_s4 + $0x18] sm:$0xff]  ;;  %v7670_v0 = vld [vmem:[%s20267_s4] sm:$0xff]  ;;  %v7695_v2 = vld [vmem:[%s20267_s4 + $0xc8] sm:$0xff] }
0x1606   :  { %v12716_v63 = vld [vmem:[%s20267_s4 + $0xd8] sm:$0xff]  ;;  %v7694_v5 = vld [vmem:[%s20267_s4 + $0xc0] sm:$0xff] }
0x1607   :  { %v7481_v13 = vadd.f32 %v7471_v6, %v7461_v8  ;;  %v7488_v20 = vmax.f32 %v7480_v10, 0.0  ;;  %v12739_v6 = vld [vmem:[%s20267_s4 + $0x190] sm:$0xff]  ;;  %v7693_v7 = vld [vmem:[%s20267_s4 + $0xb8] sm:$0xff]  ;;  %v12738_v8 = vld [vmem:[%s20267_s4 + $0x188] sm:$0xff] }
0x1608   :  { %v12737_v10 = vld [vmem:[%s20267_s4 + $0x180] sm:$0xff]  ;;  %v12736_v12 = vld [vmem:[%s20267_s4 + $0x178] sm:$0xff] }
0x1609   :  { %v7489_v18 = vmax.f32 %v7481_v13, 0.0  ;;  %v7690_v13 = vld [vmem:[%s20267_s4 + $0xa0] sm:$0xff]  ;;  %v7689_v15 = vld [vmem:[%s20267_s4 + $0x98] sm:$0xff] }
0x160b   :  { %12703 = vmatprep.subr.msk.mxu1 %vm450_vm2, %v7489_v18  ;;  %12709 = vmatprep.subr.msk.mxu0 %vm450_vm2, %v7489_v18  ;;  %v7688_v18 = vld [vmem:[%s20267_s4 + $0x90] sm:$0xff] }
0x160c   :  { %12704 = vmatpush1.msk.msra.mxu1 %vm450_vm2, %v7488_v20  ;;  %12710 = vmatpush1.msk.msra.mxu0 %vm450_vm2, %v7488_v20  ;;  %v7687_v20 = vld [vmem:[%s20267_s4 + $0x88] sm:$0xff] }
0x160d   :  { %7530 = vmatprep.subr.mxu1 %v7487_v23  ;;  %7615 = vmatprep.subr.mxu0 %v7487_v23  ;;  %v7686_v23 = vld [vmem:[%s20267_s4 + $0x80] sm:$0xff] }
0x160e   :  { %7531 = vmatpush1.msra.mxu1 %v7486_v25  ;;  %7616 = vmatpush1.msra.mxu0 %v7486_v25  ;;  %v12755_v25 = vld [vmem:[%s20270_s5 + $0xc8] sm:$0xff] }
0x160f   :  { %7532 = vmatprep.subr.mxu1 %v7485_v26  ;;  %7617 = vmatprep.subr.mxu0 %v7485_v26  ;;  %v7896_v26 = vld [vmem:[%s20270_s5 + $0x60] sm:$0xff] }
0x1610   :  { %7533 = vmatpush1.msra.mxu1 %v7484_v27  ;;  %7618 = vmatpush1.msra.mxu0 %v7484_v27 }
0x1611   :  { %7534 = vmatprep.subr.mxu1 %v7483_v28  ;;  %7619 = vmatprep.subr.mxu0 %v7483_v28 }
0x1612   :  { %7535 = vmatpush1.msra.mxu1 %v7482_v29  ;;  %7620 = vmatpush1.msra.mxu0 %v7482_v29 }
0x1613   :  { %12705 = vmatmul.mubr.msk.f32.vlgmr.msra.gmra.mxu1 %vm443_vm3, %v7490_v30  ;;  %12711 = vmatmul.mubr.msk.f32.vlgmr.msra.gmra.mxu0 %vm443_vm3, %v12707_v31 }
0x1614   :  { %7574 = vmatprep.mubr.f32.mxu1 %v15033_v3  ;;  %7659 = vmatprep.mubr.f32.mxu0 %v15033_v3 }
0x1615   :  { %7702 = vmatprep.subr.mxu1 %v15033_v3  ;;  %7803 = vmatprep.subr.mxu0 %v15033_v3 }
0x1616   :  { %7703 = vmatpush1.msra.mxu1 %v7685_v32  ;;  %7804 = vmatpush1.msra.mxu0 %v12730_v33 }
0x1617   :  { %12706 = vmatmul.mubr.msk.f32.gmra.mxu1 %vm443_vm3, %v7491_v34  ;;  %12712 = vmatmul.mubr.msk.f32.gmra.mxu0 %vm443_vm3, %v12708_v35  ;;  %v12754_v35 = vld [vmem:[%s20270_s5 + $0xc0] sm:$0xff] }
0x1618   :  { %7704 = vmatprep.subr.mxu1 %v15033_v3  ;;  %7805 = vmatprep.subr.mxu0 %v15033_v3 }
0x1619   :  { %7705 = vmatpush1.msra.mxu1 %v7684_v36  ;;  %7806 = vmatpush1.msra.mxu0 %v12729_v37  ;;  %v7895_v36 = vld [vmem:[%s20270_s5 + $0x58] sm:$0xff] }
0x161a   :  { %7706 = vmatprep.subr.mxu1 %v15033_v3  ;;  %7807 = vmatprep.subr.mxu0 %v15033_v3 }
0x161b   :  { %7707 = vmatpush1.msra.mxu1 %v7683_v38  ;;  %7808 = vmatpush1.msra.mxu0 %v12728_v39 }
0x161c   :  { %7708 = vmatprep.subr.mxu1 %v15033_v3  ;;  %7809 = vmatprep.subr.mxu0 %v15033_v3 }
0x161d   :  { %7709 = vmatpush1.msra.mxu1 %v7682_v40  ;;  %7810 = vmatpush1.msra.mxu0 %v12727_v41  ;;  %v12753_v41 = vld [vmem:[%s20270_s5 + $0xb8] sm:$0xff] }
0x161e   :  { %7710 = vmatprep.subr.mxu1 %v15033_v3  ;;  %7811 = vmatprep.subr.mxu0 %v15033_v3 }
0x161f   :  { %7711 = vmatpush1.msra.mxu1 %v7681_v42  ;;  %7812 = vmatpush1.msra.mxu0 %v12726_v43  ;;  %v7894_v42 = vld [vmem:[%s20270_s5 + $0x50] sm:$0xff] }
0x1620   :  { %7712 = vmatprep.subr.mxu1 %v15033_v3  ;;  %7813 = vmatprep.subr.mxu0 %v15033_v3  ;;  %v12752_v43 = vld [vmem:[%s20270_s5 + $0xb0] sm:$0xff] }
0x1621   :  { %7713 = vmatpush1.msra.mxu1 %v7680_v44  ;;  %7814 = vmatpush1.msra.mxu0 %v12725_v45  ;;  %v7893_v44 = vld [vmem:[%s20270_s5 + $0x48] sm:$0xff] }
0x1622   :  { %7714 = vmatprep.subr.mxu1 %v15033_v3  ;;  %7815 = vmatprep.subr.mxu0 %v15033_v3  ;;  %v12751_v45 = vld [vmem:[%s20270_s5 + $0xa8] sm:$0xff] }
0x1623   :  { %7715 = vmatpush1.msra.mxu1 %v7679_v46  ;;  %7816 = vmatpush1.msra.mxu0 %v12724_v47  ;;  %v7892_v46 = vld [vmem:[%s20270_s5 + $0x40] sm:$0xff] }
0x1624   :  { %7716 = vmatprep.subr.mxu1 %v15033_v3  ;;  %7817 = vmatprep.subr.mxu0 %v15033_v3  ;;  %v12750_v47 = vld [vmem:[%s20270_s5 + $0xa0] sm:$0xff] }
0x1625   :  { %7717 = vmatpush1.msra.mxu1 %v7678_v48  ;;  %7818 = vmatpush1.msra.mxu0 %v12723_v49  ;;  %v7891_v48 = vld [vmem:[%s20270_s5 + $0x38] sm:$0xff] }
0x1626   :  { %7718 = vmatprep.subr.mxu1 %v15033_v3  ;;  %7819 = vmatprep.subr.mxu0 %v15033_v3  ;;  %v12749_v49 = vld [vmem:[%s20270_s5 + $0x98] sm:$0xff] }
0x1627   :  { %7719 = vmatpush1.msra.mxu1 %v7677_v50  ;;  %7820 = vmatpush1.msra.mxu0 %v12722_v51  ;;  %v7890_v50 = vld [vmem:[%s20270_s5 + $0x30] sm:$0xff] }
0x1628   :  { %7720 = vmatprep.subr.mxu1 %v15033_v3  ;;  %7821 = vmatprep.subr.mxu0 %v15033_v3  ;;  %v12748_v51 = vld [vmem:[%s20270_s5 + $0x90] sm:$0xff] }
0x1629   :  { %7721 = vmatpush1.msra.mxu1 %v7676_v52  ;;  %7822 = vmatpush1.msra.mxu0 %v12721_v53  ;;  %v7889_v52 = vld [vmem:[%s20270_s5 + $0x28] sm:$0xff] }
0x162a   :  { %7722 = vmatprep.subr.mxu1 %v15033_v3  ;;  %7823 = vmatprep.subr.mxu0 %v15033_v3  ;;  %v12747_v53 = vld [vmem:[%s20270_s5 + $0x88] sm:$0xff] }
0x162b   :  { %7723 = vmatpush1.msra.mxu1 %v7675_v54  ;;  %7824 = vmatpush1.msra.mxu0 %v12720_v55  ;;  %v7888_v54 = vld [vmem:[%s20270_s5 + $0x20] sm:$0xff] }
0x162c   :  { %7724 = vmatprep.subr.mxu1 %v15033_v3  ;;  %7825 = vmatprep.subr.mxu0 %v15033_v3  ;;  %v12746_v55 = vld [vmem:[%s20270_s5 + $0x80] sm:$0xff] }
0x162d   :  { %7725 = vmatpush1.msra.mxu1 %v7674_v56  ;;  %7826 = vmatpush1.msra.mxu0 %v12719_v57  ;;  %v7887_v56 = vld [vmem:[%s20270_s5 + $0x18] sm:$0xff] }
0x162e   :  { %7726 = vmatprep.subr.mxu1 %v15033_v3  ;;  %7827 = vmatprep.subr.mxu0 %v15033_v3  ;;  %v12745_v57 = vld [vmem:[%s20270_s5 + $0x78] sm:$0xff] }
0x162f   :  { %7727 = vmatpush1.msra.mxu1 %v7673_v58  ;;  %7828 = vmatpush1.msra.mxu0 %v12718_v59  ;;  %v7886_v58 = vld [vmem:[%s20270_s5 + $0x10] sm:$0xff] }
0x1630   :  { %7728 = vmatprep.subr.mxu1 %v15033_v3  ;;  %7829 = vmatprep.subr.mxu0 %v15033_v3  ;;  %v12744_v59 = vld [vmem:[%s20270_s5 + $0x70] sm:$0xff] }
0x1631   :  { %7729 = vmatpush1.msra.mxu1 %v7672_v60  ;;  %7830 = vmatpush1.msra.mxu0 %v12717_v61  ;;  %v7885_v60 = vld [vmem:[%s20270_s5 + $0x8] sm:$0xff] }
0x1632   :  { %7730 = vmatprep.subr.mxu1 %v15033_v3  ;;  %7831 = vmatprep.subr.mxu0 %v15033_v3  ;;  %v12743_v61 = vld [vmem:[%s20270_s5 + $0x68] sm:$0xff] }
0x1633   :  { %7731 = vmatpush1.msra.mxu1 %v7671_v62  ;;  %7832 = vmatpush1.msra.mxu0 %v12716_v63  ;;  %v7884_v62 = vld [vmem:[%s20270_s5] sm:$0xff]  ;;  %v12772_v63 = vld [vmem:[%s20270_s5 + $0x130] sm:$0xff] }
0x1634   :  { %7732 = vmatprep.subr.mxu1 %v15033_v3  ;;  %7833 = vmatprep.subr.mxu0 %v15033_v3 }
0x1635   :  { %7733 = vmatpush1.msra.mxu1 %v7670_v0  ;;  %7834 = vmatpush1.msra.mxu0 %v12715_v1 }
0x1636   :  { %7746 = vmatprep.subr.mxu1 %v15033_v3  ;;  %7847 = vmatprep.subr.mxu0 %v15033_v3 }
0x1637   :  { %7747 = vmatpush2.msra.mxu1 %v7695_v2  ;;  %7848 = vmatpush2.msra.mxu0 %v12740_v4 }
0x1638   :  { %7748 = vmatprep.subr.mxu1 %v15033_v3  ;;  %7849 = vmatprep.subr.mxu0 %v15033_v3 }
0x1639   :  { %7749 = vmatpush2.msra.mxu1 %v7694_v5  ;;  %7850 = vmatpush2.msra.mxu0 %v12739_v6 }
0x163a   :  { %7750 = vmatprep.subr.mxu1 %v15033_v3  ;;  %7851 = vmatprep.subr.mxu0 %v15033_v3 }
0x163b   :  { %7751 = vmatpush2.msra.mxu1 %v7693_v7  ;;  %7852 = vmatpush2.msra.mxu0 %v12738_v8 }
0x163c   :  { %7752 = vmatprep.subr.mxu1 %v15033_v3  ;;  %7853 = vmatprep.subr.mxu0 %v15033_v3 }
0x163d   :  { %7753 = vmatpush2.msra.mxu1 %v7692_v9  ;;  %7854 = vmatpush2.msra.mxu0 %v12737_v10 }
0x163e   :  { %7754 = vmatprep.subr.mxu1 %v15033_v3  ;;  %7855 = vmatprep.subr.mxu0 %v15033_v3 }
0x163f   :  { %7755 = vmatpush2.msra.mxu1 %v7691_v11  ;;  %7856 = vmatpush2.msra.mxu0 %v12736_v12 }
0x1640   :  { %7756 = vmatprep.subr.mxu1 %v15033_v3  ;;  %7857 = vmatprep.subr.mxu0 %v15033_v3 }
0x1641   :  { %7757 = vmatpush2.msra.mxu1 %v7690_v13  ;;  %7858 = vmatpush2.msra.mxu0 %v12735_v14 }
0x1642   :  { %7758 = vmatprep.subr.mxu1 %v15033_v3  ;;  %7859 = vmatprep.subr.mxu0 %v15033_v3 }
0x1643   :  { %7759 = vmatpush2.msra.mxu1 %v7689_v15  ;;  %7860 = vmatpush2.msra.mxu0 %v12734_v17  ;;  %v12771_v15 = vld [vmem:[%s20270_s5 + $0x128] sm:$0xff] }
0x1644   :  { %7760 = vmatprep.subr.mxu1 %v15033_v3  ;;  %7861 = vmatprep.subr.mxu0 %v15033_v3 }
0x1645   :  { %7761 = vmatpush2.msra.mxu1 %v7688_v18  ;;  %7862 = vmatpush2.msra.mxu0 %v12733_v19  ;;  %v12770_v18 = vld [vmem:[%s20270_s5 + $0x120] sm:$0xff]  ;;  %v12769_v19 = vld [vmem:[%s20270_s5 + $0x118] sm:$0xff] }
0x1646   :  { %7762 = vmatprep.subr.mxu1 %v15033_v3  ;;  %7863 = vmatprep.subr.mxu0 %v15033_v3 }
0x1647   :  { %7763 = vmatpush2.msra.mxu1 %v7687_v20  ;;  %7864 = vmatpush2.msra.mxu0 %v12732_v22  ;;  %v12768_v20 = vld [vmem:[%s20270_s5 + $0x110] sm:$0xff]  ;;  %v12767_v22 = vld [vmem:[%s20270_s5 + $0x108] sm:$0xff] }
0x1648   :  { %7764 = vmatprep.subr.mxu1 %v15033_v3  ;;  %7865 = vmatprep.subr.mxu0 %v15033_v3 }
0x1649   :  { %7765 = vmatpush2.msra.mxu1 %v7686_v23  ;;  %7866 = vmatpush2.msra.mxu0 %v12731_v24  ;;  %v12766_v23 = vld [vmem:[%s20270_s5 + $0x100] sm:$0xff]  ;;  %v12765_v24 = vld [vmem:[%s20270_s5 + $0xf8] sm:$0xff] }
0x164a   :  { %14490 = vmatprep.subr.mxu1 %v12755_v25  ;;  %14519 = vmatprep.subr.mxu0 %v7896_v26 }
0x16d3   :  { %v7570_v27 = vpop.f32.mrf.mxu1  ;;  %v7655_v28 = vpop.f32.mrf.mxu0 }
0x16d4   :  { %v7666_v32 = vmax.f32 %v7570_v27, %v7655_v28  ;;  %v12762_v27 = vld [vmem:[%s20270_s5 + $0xe0] sm:$0xff]  ;;  %v12761_v28 = vld [vmem:[%s20270_s5 + $0xd8] sm:$0xff] }
0x16d5   :  { %v7572_v29 = vpop.f32.mrf.mxu1  ;;  %v7657_v30 = vpop.f32.mrf.mxu0 }
0x16d6   :  { %v7667_v31 = vmax.f32 %v7572_v29, %v7657_v30  ;;  %v12760_v29 = vld [vmem:[%s20270_s5 + $0xd0] sm:$0xff] }
0x16d7   :  { %v7576_v33 = vpop.f32.mrf.mxu1  ;;  %v7661_v34 = vpop.f32.mrf.mxu0 }
0x16d8   :  { %12713 = vmatprep.mubr.msk.f32.mxu1 %vm650_vm4, %v7667_v31  ;;  %12741 = vmatprep.mubr.msk.f32.mxu0 %vm650_vm4, %v7667_v31  ;;  %v7668_v40 = vmax.f32 %v7576_v33, %v7661_v34 }
0x16d9   :  { %v7578_v37 = vpop.f32.mrf.mxu1  ;;  %v7663_v38 = vpop.f32.mrf.mxu0  ;;  %7767 = vmatmul.mubr.f32.vlgmr.msra.gmra.mxu1 %v7666_v32  ;;  %7868 = vmatmul.mubr.f32.vlgmr.msra.gmra.mxu0 %v7666_v32 }
0x16da   :  { %v7669_v39 = vmax.f32 %v7578_v37, %v7663_v38  ;;  %14491 = vmatpush3.msra.mxu1 %v12755_v25  ;;  %14520 = vmatpush3.msra.mxu0 %v7896_v26  ;;  %v12764_v25 = vld [vmem:[%s20270_s5 + $0xf0] sm:$0xff]  ;;  %v12763_v26 = vld [vmem:[%s20270_s5 + $0xe8] sm:$0xff]  ;;  %v12775_v37 = vld [vmem:[%s20272_s6] ss:$0 sm:$0xff] }
0x16db   :  { %14492 = vmatprep.subr.mxu1 %v12754_v35  ;;  %14521 = vmatprep.subr.mxu0 %v7895_v36 }
0x16dc   :  { %12714 = vmatprep.mubr.msk.f32.mxu1 %vm650_vm4, %v7669_v39  ;;  %12742 = vmatprep.mubr.msk.f32.mxu0 %vm650_vm4, %v7669_v39 }
0x16dd   :  { %7772 = vmatmul.mubr.f32.gmra.mxu1 %v7668_v40  ;;  %7873 = vmatmul.mubr.f32.gmra.mxu0 %v7668_v40 }
0x16de   :  { %14493 = vmatpush3.msra.mxu1 %v12754_v35  ;;  %14522 = vmatpush3.msra.mxu0 %v7895_v36 }
0x16df   :  { %14494 = vmatprep.subr.mxu1 %v12753_v41  ;;  %14523 = vmatprep.subr.mxu0 %v7894_v42 }
0x16e0   :  { %14495 = vmatpush3.msra.mxu1 %v12753_v41  ;;  %14524 = vmatpush3.msra.mxu0 %v7894_v42 }
0x16e1   :  { %14496 = vmatprep.subr.mxu1 %v12752_v43  ;;  %14525 = vmatprep.subr.mxu0 %v7893_v44 }
0x16e2   :  { %14497 = vmatpush3.msra.mxu1 %v12752_v43  ;;  %14526 = vmatpush3.msra.mxu0 %v7893_v44 }
0x16e3   :  { %14498 = vmatprep.subr.mxu1 %v12751_v45  ;;  %14527 = vmatprep.subr.mxu0 %v7892_v46 }
0x16e4   :  { %14499 = vmatpush3.msra.mxu1 %v12751_v45  ;;  %14528 = vmatpush3.msra.mxu0 %v7892_v46  ;;  %v8183_v46 = vld [vmem:[%s20273_s7] sm:$0x1f] }
0x16e5   :  { %14500 = vmatprep.subr.mxu1 %v12750_v47  ;;  %14529 = vmatprep.subr.mxu0 %v7891_v48 }
0x16e6   :  { %14501 = vmatpush3.msra.mxu1 %v12750_v47  ;;  %14530 = vmatpush3.msra.mxu0 %v7891_v48  ;;  %v12778_v47 = vld [vmem:[%s20273_s7 + $0x8] sm:$0x1f]  ;;  %v8345_v48 = vld [vmem:[%s20271_s8 + $0x50] sm:$0xff] }
0x16e7   :  { %14502 = vmatprep.subr.mxu1 %v12749_v49  ;;  %14531 = vmatprep.subr.mxu0 %v7890_v50 }
0x16e8   :  { %14503 = vmatpush3.msra.mxu1 %v12749_v49  ;;  %14532 = vmatpush3.msra.mxu0 %v7890_v50  ;;  %v12792_v49 = vld [vmem:[%s20271_s8 + $0xa8] sm:$0xff] }
0x16e9   :  { %14504 = vmatprep.subr.mxu1 %v12748_v51  ;;  %14533 = vmatprep.subr.mxu0 %v7889_v52  ;;  %v8344_v50 = vld [vmem:[%s20271_s8 + $0x48] sm:$0xff] }
0x16ea   :  { %14505 = vmatpush3.msra.mxu1 %v12748_v51  ;;  %14534 = vmatpush3.msra.mxu0 %v7889_v52  ;;  %v12791_v51 = vld [vmem:[%s20271_s8 + $0xa0] sm:$0xff] }
0x16eb   :  { %14506 = vmatprep.subr.mxu1 %v12747_v53  ;;  %14535 = vmatprep.subr.mxu0 %v7888_v54  ;;  %v8343_v52 = vld [vmem:[%s20271_s8 + $0x40] sm:$0xff] }
0x16ec   :  { %14507 = vmatpush3.msra.mxu1 %v12747_v53  ;;  %14536 = vmatpush3.msra.mxu0 %v7888_v54  ;;  %v12790_v53 = vld [vmem:[%s20271_s8 + $0x98] sm:$0xff] }
0x16ed   :  { %14508 = vmatprep.subr.mxu1 %v12746_v55  ;;  %14537 = vmatprep.subr.mxu0 %v7887_v56  ;;  %v8342_v54 = vld [vmem:[%s20271_s8 + $0x38] sm:$0xff] }
0x16ee   :  { %14509 = vmatpush3.msra.mxu1 %v12746_v55  ;;  %14538 = vmatpush3.msra.mxu0 %v7887_v56  ;;  %v12789_v55 = vld [vmem:[%s20271_s8 + $0x90] sm:$0xff] }
0x16ef   :  { %14510 = vmatprep.subr.mxu1 %v12745_v57  ;;  %14539 = vmatprep.subr.mxu0 %v7886_v58  ;;  %v8341_v56 = vld [vmem:[%s20271_s8 + $0x30] sm:$0xff] }
0x16f0   :  { %14511 = vmatpush3.msra.mxu1 %v12745_v57  ;;  %14540 = vmatpush3.msra.mxu0 %v7886_v58  ;;  %v12788_v57 = vld [vmem:[%s20271_s8 + $0x88] sm:$0xff] }
0x16f1   :  { %14512 = vmatprep.subr.mxu1 %v12744_v59  ;;  %14541 = vmatprep.subr.mxu0 %v7885_v60  ;;  %v8340_v58 = vld [vmem:[%s20271_s8 + $0x28] sm:$0xff] }
0x16f2   :  { %14513 = vmatpush3.msra.mxu1 %v12744_v59  ;;  %14542 = vmatpush3.msra.mxu0 %v7885_v60  ;;  %v12787_v59 = vld [vmem:[%s20271_s8 + $0x80] sm:$0xff] }
0x16f3   :  { %14514 = vmatprep.subr.mxu1 %v12743_v61  ;;  %14543 = vmatprep.subr.mxu0 %v7884_v62  ;;  %v8339_v60 = vld [vmem:[%s20271_s8 + $0x20] sm:$0xff] }
0x16f4   :  { %14515 = vmatpush3.msra.mxu1 %v12743_v61  ;;  %14544 = vmatpush3.msra.mxu0 %v7884_v62  ;;  %v12786_v61 = vld [vmem:[%s20271_s8 + $0x78] sm:$0xff] }
0x16f5   :  { %14548 = vmatprep.subr.mxu1 %v12772_v63  ;;  %14584 = vmatprep.subr.mxu0 %v15033_v3  ;;  %v8338_v62 = vld [vmem:[%s20271_s8 + $0x18] sm:$0xff] }
0x1799   :  { %v7768_v0 = vpop.f32.mrf.mxu1  ;;  %v7869_v1 = vpop.f32.mrf.mxu0 }
0x179a   :  { %v7878_v2 = vmax.f32 %v7768_v0, %v7869_v1  ;;  %v8337_v0 = vld [vmem:[%s20271_s8 + $0x10] sm:$0xff]  ;;  %v12784_v1 = vld [vmem:[%s20271_s8 + $0x68] sm:$0xff] }
0x179b   :  { %v7770_v4 = vpop.f32.mrf.mxu1  ;;  %v7871_v5 = vpop.f32.mrf.mxu0 }
0x179c   :  { %7880 = vst.msk [vmem:[#allocation2] sm:$0xff] %vm836_vm5, %v7878_v2  ;;  %v8336_v2 = vld [vmem:[%s20271_s8 + $0x8] sm:$0xff]  ;;  %v12783_v4 = vld [vmem:[%s20271_s8 + $0x60] sm:$0xff] }
0x179d   :  { %v7773_v6 = vpop.f32.mrf.mxu1  ;;  %v7874_v7 = vpop.f32.mrf.mxu0  ;;  %v8335_v5 = vld [vmem:[%s20271_s8] sm:$0xff] }
0x179e   :  { %v7879_v8 = vmax.f32 %v7773_v6, %v7874_v7  ;;  %v12782_v6 = vld [vmem:[%s20271_s8 + $0x58] sm:$0xff] }
0x179f   :  { %v7775_v9 = vpop.f32.mrf.mxu1  ;;  %v7876_v10 = vpop.f32.mrf.mxu0  ;;  %v12809_v7 = vld [vmem:[%s20265_s1 + $0x78] sm:$0xf] }
0x17a0   :  { %7881 = vst.msk [vmem:[#allocation2 + $0x8] sm:$0x1f] %vm838_vm6, %v7879_v8  ;;  %v12833_v8 = vld [vmem:[%s20265_s1 + $0xb8] sm:$0xf] }
0x17a3   :  { %v7882_v11 = vld [vmem:[#allocation2] sm:$0xff] }
0x17a4   :  { %14545 = vmatprep.mubr.msk.f32.mxu0 %vm836_vm5, %v7882_v11 }
0x17a7   :  { %v7897_v12 = vld [vmem:[#allocation2 + $0x1] sm:$0xff]  ;;  %v7898_v14 = vld [vmem:[#allocation2 + $0x9] sm:$0x7] }
0x17a8   :  { %v7883_v13 = vld [vmem:[#allocation2 + $0x8] sm:$0x7]  ;;  %14516 = vmatprep.mubr.msk.f32.mxu1 %vm836_vm5, %v7897_v12  ;;  %v12808_v12 = vld [vmem:[%s20265_s1 + $0x70] sm:$0xf] }
0x17a9   :  { %14546 = vmatmul.mubr.msk.f32.vlgmr.msra.gmra.mxu0 %vm836_vm5, %v7883_v13  ;;  %14517 = vmatmul.mubr.msk.f32.vlgmr.msra.gmra.mxu1 %vm836_vm5, %v7898_v14  ;;  %v8074_v17 = vld [vmem:[#allocation2 + $0x2] sm:$0xff]  ;;  %v8075_v30 = vld [vmem:[#allocation2 + $0xa] sm:$0x7] }
0x17aa   :  { %14588 = vmatprep.mubr.msk.f32.mxu0 %vm15034_vm7, %v15033_v3  ;;  %14549 = vmatpush3.msra.mxu1 %v12772_v63  ;;  %v12785_v63 = vld [vmem:[%s20271_s8 + $0x70] sm:$0xff] }
0x17ab   :  { %14574 = vmatprep.mubr.msk.f32.mxu1 %vm836_vm5, %v8074_v17  ;;  %14550 = vmatprep.subr.mxu1 %v12771_v15  ;;  %v12832_v17 = vld [vmem:[%s20265_s1 + $0xb0] sm:$0xf] }
0x17ac   :  { %14551 = vmatpush3.msra.mxu1 %v12771_v15  ;;  %v12807_v15 = vld [vmem:[%s20265_s1 + $0x68] sm:$0xff] }
0x17ad   :  { %14552 = vmatprep.subr.mxu1 %v12770_v18 }
0x17ae   :  { %14553 = vmatpush3.msra.mxu1 %v12770_v18  ;;  %v12806_v18 = vld [vmem:[%s20265_s1 + $0x60] sm:$0xff] }
0x17af   :  { %14554 = vmatprep.subr.mxu1 %v12769_v19 }
0x17b0   :  { %14555 = vmatpush3.msra.mxu1 %v12769_v19  ;;  %v12831_v19 = vld [vmem:[%s20265_s1 + $0xa8] sm:$0xff] }
0x17b1   :  { %14556 = vmatprep.subr.mxu1 %v12768_v20 }
0x17b2   :  { %14557 = vmatpush3.msra.mxu1 %v12768_v20  ;;  %v12805_v20 = vld [vmem:[%s20265_s1 + $0x58] sm:$0xff] }
0x17b3   :  { %14558 = vmatprep.subr.mxu1 %v12767_v22 }
0x17b4   :  { %14559 = vmatpush3.msra.mxu1 %v12767_v22  ;;  %v12830_v22 = vld [vmem:[%s20265_s1 + $0xa0] sm:$0xff] }
0x17b5   :  { %14560 = vmatprep.subr.mxu1 %v12766_v23 }
0x17b6   :  { %14561 = vmatpush3.msra.mxu1 %v12766_v23  ;;  %v12804_v23 = vld [vmem:[%s20265_s1 + $0x50] sm:$0xff] }
0x17b7   :  { %14562 = vmatprep.subr.mxu1 %v12765_v24 }
0x17b8   :  { %14563 = vmatpush3.msra.mxu1 %v12765_v24  ;;  %v12829_v24 = vld [vmem:[%s20265_s1 + $0x98] sm:$0xff] }
0x17b9   :  { %14564 = vmatprep.subr.mxu1 %v12764_v25 }
0x17ba   :  { %14565 = vmatpush3.msra.mxu1 %v12764_v25  ;;  %v12803_v25 = vld [vmem:[%s20265_s1 + $0x48] sm:$0xff] }
0x17bb   :  { %14566 = vmatprep.subr.mxu1 %v12763_v26 }
0x17bc   :  { %14567 = vmatpush3.msra.mxu1 %v12763_v26  ;;  %v12828_v26 = vld [vmem:[%s20265_s1 + $0x90] sm:$0xff] }
0x17bd   :  { %14568 = vmatprep.subr.mxu1 %v12762_v27 }
0x17be   :  { %14569 = vmatpush3.msra.mxu1 %v12762_v27  ;;  %v12802_v27 = vld [vmem:[%s20265_s1 + $0x40] sm:$0xff] }
0x17bf   :  { %14570 = vmatprep.subr.mxu1 %v12761_v28 }
0x17c0   :  { %14571 = vmatpush3.msra.mxu1 %v12761_v28  ;;  %v12827_v28 = vld [vmem:[%s20265_s1 + $0x88] sm:$0xff] }
0x17c1   :  { %14572 = vmatprep.subr.mxu1 %v12760_v29 }
0x17c2   :  { %14573 = vmatpush3.msra.mxu1 %v12760_v29  ;;  %v12798_v29 = vld [vmem:[%s20266_s0 + $0xc1] sm:$0xff] }
0x17c3   :  { %14575 = vmatmul.mubr.msk.f32.vlgmr.msra.gmra.mxu1 %vm836_vm5, %v8075_v30  ;;  %14577 = vmatprep.subr.mxu1 %v15033_v3  ;;  %v8515_v30 = vld [vmem:[%s20265_s1 + $0x38] sm:$0xf] }
0x17c4   :  { %14581 = vmatprep.mubr.msk.f32.mxu1 %vm15034_vm7, %v15033_v3 }
0x1869   :  { %v14547_v31 = vpop.f32.mrf.mxu0  ;;  %v14518_v32 = vpop.f32.mrf.mxu1 }
0x186a   :  { %v8071_v35 = vadd.f32 %v14547_v31, %v14518_v32  ;;  %v8514_v31 = vld [vmem:[%s20265_s1 + $0x30] sm:$0xf]  ;;  %v8513_v32 = vld [vmem:[%s20265_s1 + $0x28] sm:$0xff] }
0x186b   :  { %v8065_v33 = vpop.f32.mrf.mxu0  ;;  %v7984_v34 = vpop.f32.mrf.mxu1 }
0x186c   :  { %v8066_v38 = vadd.f32 %v8065_v33, %v7984_v34  ;;  %v12826_v33 = vld [vmem:[%s20265_s1 + $0x80] sm:$0xff] }
0x186d   :  { %v8512_v34 = vld [vmem:[%s20265_s1 + $0x20] sm:$0xff] }
0x1883   :  { %v14576_v36 = vpop.f32.mrf.mxu1 }
0x1884   :  { %v8171_v39 = vadd.f32 %v14576_v36, %v8071_v35  ;;  %v12799_v35 = vld [vmem:[%s20266_s0 + $0xc9] sm:$0xff]  ;;  %v8511_v36 = vld [vmem:[%s20265_s1 + $0x18] sm:$0xff] }
0x1885   :  { %v8161_v40 = vpop.f32.mrf.mxu1 }
0x1886   :  { %v8180_v41 = vadd.f32 %v12775_v37, %v8171_v39  ;;  %v8170_v42 = vadd.f32 %v8161_v40, %v8066_v38  ;;  %v8509_v38 = vld [vmem:[%s20265_s1 + $0x8] sm:$0xff]  ;;  %v8508_v40 = vld [vmem:[%s20265_s1] sm:$0xff] }
0x1887   :  { %v12822_v39 = vld [vmem:[%s20266_s0 + $0xc2] sm:$0xff] }
0x1888   :  { %v8182_v43 = vmax.f32 %v8180_v41, 0.0  ;;  %v8179_v44 = vadd.f32 %v12775_v37, %v8170_v42  ;;  %v8510_v37 = vld [vmem:[%s20265_s1 + $0x10] sm:$0xff] }
0x1889   :  { %v12800_v41 = vld [vmem:[%s20266_s0 + $0xd1] sm:$0xff] }
0x188a   :  { %v8181_v45 = vmax.f32 %v8179_v44, 0.0  ;;  %14578 = vmatpush3.msk.msra.mxu1 %vm1148_vm8, %v8182_v43  ;;  %14585 = vmatpush3.msk.msra.mxu0 %vm1148_vm8, %v8182_v43  ;;  %v12823_v42 = vld [vmem:[%s20266_s0 + $0xca] sm:$0xff]  ;;  %v12801_v43 = vld [vmem:[%s20266_s0 + $0xd9] sm:$0x3] }
0x188b   :  { %14579 = vmatprep.subr.mxu1 %v15033_v3  ;;  %14586 = vmatprep.subr.mxu0 %v15033_v3  ;;  %v12824_v44 = vld [vmem:[%s20266_s0 + $0xd2] sm:$0xff] }
0x188c   :  { %14580 = vmatpush3.msra.mxu1 %v8181_v45  ;;  %14587 = vmatpush3.msra.mxu0 %v8181_v45  ;;  %v12794_v45 = vld [vmem:[%s20266_s0 + $0xc0] sm:$0xff] }
0x188d   :  { %14582 = vmatmul.mubr.msk.f32.vlgmr.msra.gmra.mxu1 %vm1144_vm9, %v8183_v46  ;;  %14589 = vmatmul.mubr.msk.f32.vlgmr.msra.gmra.mxu0 %vm1144_vm9, %v12778_v47  ;;  %v12825_v46 = vld [vmem:[%s20266_s0 + $0xda] sm:$0x3]  ;;  %v12795_v47 = vld [vmem:[%s20266_s0 + $0xc8] sm:$0xff] }
0x188e   :  { %14591 = vmatprep.subr.mxu0 %v15033_v3  ;;  %14616 = vmatprep.subr.mxu1 %v15033_v3 }
0x188f   :  { %14592 = vmatpush3.msra.mxu0 %v8345_v48  ;;  %14617 = vmatpush3.msra.mxu1 %v12792_v49  ;;  %v12796_v48 = vld [vmem:[%s20266_s0 + $0xd0] sm:$0xff]  ;;  %v12797_v49 = vld [vmem:[%s20266_s0 + $0xd8] sm:$0x3] }
0x1890   :  { %14593 = vmatprep.subr.mxu0 %v15033_v3  ;;  %14618 = vmatprep.subr.mxu1 %v15033_v3 }
0x1891   :  { %14594 = vmatpush3.msra.mxu0 %v8344_v50  ;;  %14619 = vmatpush3.msra.mxu1 %v12791_v51 }
0x1892   :  { %14595 = vmatprep.subr.mxu0 %v15033_v3  ;;  %14620 = vmatprep.subr.mxu1 %v15033_v3 }
0x1893   :  { %14596 = vmatpush3.msra.mxu0 %v8343_v52  ;;  %14621 = vmatpush3.msra.mxu1 %v12790_v53 }
0x1894   :  { %14597 = vmatprep.subr.mxu0 %v15033_v3  ;;  %14622 = vmatprep.subr.mxu1 %v15033_v3 }
0x1895   :  { %14598 = vmatpush3.msra.mxu0 %v8342_v54  ;;  %14623 = vmatpush3.msra.mxu1 %v12789_v55 }
0x1896   :  { %14599 = vmatprep.subr.mxu0 %v15033_v3  ;;  %14624 = vmatprep.subr.mxu1 %v15033_v3 }
0x1897   :  { %14600 = vmatpush3.msra.mxu0 %v8341_v56  ;;  %14625 = vmatpush3.msra.mxu1 %v12788_v57 }
0x1898   :  { %14601 = vmatprep.subr.mxu0 %v15033_v3  ;;  %14626 = vmatprep.subr.mxu1 %v15033_v3 }
0x1899   :  { %14602 = vmatpush3.msra.mxu0 %v8340_v58  ;;  %14627 = vmatpush3.msra.mxu1 %v12787_v59 }
0x189a   :  { %14603 = vmatprep.subr.mxu0 %v15033_v3  ;;  %14628 = vmatprep.subr.mxu1 %v15033_v3 }
0x189b   :  { %14604 = vmatpush3.msra.mxu0 %v8339_v60  ;;  %14629 = vmatpush3.msra.mxu1 %v12786_v61 }
0x189c   :  { %14605 = vmatprep.subr.mxu0 %v15033_v3  ;;  %14630 = vmatprep.subr.mxu1 %v15033_v3 }
0x189d   :  { %14606 = vmatpush3.msra.mxu0 %v8338_v62  ;;  %14631 = vmatpush3.msra.mxu1 %v12785_v63 }
0x189e   :  { %14607 = vmatprep.subr.mxu0 %v15033_v3  ;;  %14632 = vmatprep.subr.mxu1 %v15033_v3 }
0x189f   :  { %14608 = vmatpush3.msra.mxu0 %v8337_v0  ;;  %14633 = vmatpush3.msra.mxu1 %v12784_v1 }
0x18a0   :  { %14609 = vmatprep.subr.mxu0 %v15033_v3  ;;  %14634 = vmatprep.subr.mxu1 %v15033_v3 }
0x18a1   :  { %14610 = vmatpush3.msra.mxu0 %v8336_v2  ;;  %14613 = vmatprep.mubr.msk.f32.mxu0 %vm15034_vm7, %v15033_v3 }
0x18a2   :  { %14611 = vmatprep.subr.mxu0 %v15033_v3  ;;  %14638 = vmatprep.mubr.msk.f32.mxu1 %vm15034_vm7, %v15033_v3 }
0x18a3   :  { %14635 = vmatpush3.msra.mxu1 %v12783_v4  ;;  %14612 = vmatpush3.msra.mxu0 %v8335_v5 }
0x18a4   :  { %14636 = vmatprep.subr.mxu1 %v15033_v3  ;;  %12810 = vmatprep.subr.msk.mxu0 %vm82_vm0, %v12809_v7 }
0x18a5   :  { %14637 = vmatpush3.msra.mxu1 %v12782_v6 }
0x18a6   :  { %12834 = vmatprep.subr.msk.mxu1 %vm82_vm0, %v12833_v8 }
0x194d   :  { %v8256_v9 = vpop.f32.mrf.mxu1  ;;  %v8330_v10 = vpop.f32.mrf.mxu0 }
0x194e   :  { %v8334_v11 = vmax.f32 %v8256_v9, %v8330_v10 }
0x194f   :  { %v14583_v13 = vpop.f32.mrf.mxu1  ;;  %v14590_v14 = vpop.f32.mrf.mxu0 }
0x1950   :  { %14614 = vmatmul.mubr.msk.f32.vlgmr.msra.gmra.mxu0 %vm1309_vm10, %v8334_v11  ;;  %14639 = vmatmul.mubr.msk.f32.vlgmr.msra.gmra.mxu1 %vm1309_vm10, %v8334_v11 }
0x1951   :  { %12811 = vmatpush1.msk.msra.mxu0 %vm82_vm0, %v12808_v12  ;;  %8610 = vmatprep.mubr.f32.mxu0 %v15033_v3 }
0x1952   :  { %8572 = vmatprep.subr.mxu0 %v12807_v15  ;;  %12835 = vmatpush1.msk.msra.mxu1 %vm82_vm0, %v12832_v17  ;;  %v8869_v17 = vld [vmem:[%s20268_s2] sm:$0x3] }
0x1953   :  { %8573 = vmatpush1.msra.mxu0 %v12806_v18  ;;  %8798 = vmatprep.subr.mxu1 %v12831_v19 }
0x1954   :  { %8574 = vmatprep.subr.mxu0 %v12805_v20  ;;  %8799 = vmatpush1.msra.mxu1 %v12830_v22 }
0x1955   :  { %8575 = vmatpush1.msra.mxu0 %v12804_v23  ;;  %8800 = vmatprep.subr.mxu1 %v12829_v24 }
0x1956   :  { %8576 = vmatprep.subr.mxu0 %v12803_v25  ;;  %8801 = vmatpush1.msra.mxu1 %v12828_v26 }
0x1957   :  { %8577 = vmatpush1.msra.mxu0 %v12802_v27  ;;  %8802 = vmatprep.subr.mxu1 %v12827_v28  ;;  %v8874_v28 = vrot.slane %v8869_v17, %v15321_v16 }
0x1958   :  { %12812 = vmatmul.mubr.msk.f32.vlgmr.msra.gmra.mxu0 %vm69_vm1, %v12798_v29  ;;  %12816 = vmatprep.subr.msk.mxu0 %vm82_vm0, %v8515_v30 }
0x1959   :  { %8616 = vmatprep.mubr.f32.mxu0 %v15033_v3  ;;  %12817 = vmatpush1.msk.msra.mxu0 %vm82_vm0, %v8514_v31  ;;  %v8878_v31 = vrot.slane %v8869_v17, %v15326_v21  ;;  %v9081_v17 = vld [vmem:[%s20267_s4 + $0x20] sm:$0xff] }
0x195a   :  { %8679 = vmatprep.subr.mxu0 %v8513_v32  ;;  %8803 = vmatpush1.msra.mxu1 %v12826_v33 }
0x195b   :  { %8680 = vmatpush1.msra.mxu0 %v8512_v34  ;;  %8836 = vmatprep.mubr.f32.mxu1 %v15033_v3 }
0x195c   :  { %12813 = vmatmul.mubr.msk.f32.gmra.mxu0 %vm69_vm1, %v12799_v35  ;;  %8681 = vmatprep.subr.mxu0 %v8511_v36 }
0x195d   :  { %8622 = vmatprep.mubr.f32.mxu0 %v15033_v3  ;;  %8682 = vmatpush1.msra.mxu0 %v8510_v37 }
0x195e   :  { %8683 = vmatprep.subr.mxu0 %v8509_v38  ;;  %12836 = vmatmul.mubr.msk.f32.vlgmr.msra.gmra.mxu1 %vm69_vm1, %v12822_v39 }
0x195f   :  { %8684 = vmatpush1.msra.mxu0 %v8508_v40  ;;  %8842 = vmatprep.mubr.f32.mxu1 %v15033_v3 }
0x1960   :  { %12814 = vmatmul.mubr.msk.f32.gmra.mxu0 %vm69_vm1, %v12800_v41 }
0x1961   :  { %8628 = vmatprep.mubr.f32.mxu0 %v15033_v3 }
0x1962   :  { %12837 = vmatmul.mubr.msk.f32.gmra.mxu1 %vm69_vm1, %v12823_v42 }
0x1963   :  { %8848 = vmatprep.mubr.f32.mxu1 %v15033_v3 }
0x1964   :  { %12815 = vmatmul.mubr.msk.f32.gmra.mxu0 %vm69_vm1, %v12801_v43 }
0x1965   :  { %8717 = vmatprep.mubr.f32.mxu0 %v15033_v3 }
0x1966   :  { %12838 = vmatmul.mubr.msk.f32.gmra.mxu1 %vm69_vm1, %v12824_v44 }
0x1967   :  { %8854 = vmatprep.mubr.f32.mxu1 %v15033_v3 }
0x1968   :  { %12818 = vmatmul.mubr.msk.f32.vlgmr.msra.gmra.mxu0 %vm69_vm1, %v12794_v45 }
0x1969   :  { %8723 = vmatprep.mubr.f32.mxu0 %v15033_v3 }
0x196a   :  { %12839 = vmatmul.mubr.msk.f32.gmra.mxu1 %vm69_vm1, %v12825_v46 }
0x196b   :  { %9060 = vmatprep.mubr.f32.mxu1 %v15033_v3 }
0x196c   :  { %12819 = vmatmul.mubr.msk.f32.gmra.mxu0 %vm69_vm1, %v12795_v47 }
0x196d   :  { %8729 = vmatprep.mubr.f32.mxu0 %v15033_v3 }
0x1970   :  { %12820 = vmatmul.mubr.msk.f32.gmra.mxu0 %vm69_vm1, %v12796_v48 }
0x1971   :  { %8735 = vmatprep.mubr.f32.mxu0 %v15033_v3 }
0x1974   :  { %12821 = vmatmul.mubr.msk.f32.gmra.mxu0 %vm69_vm1, %v12797_v49 }
0x1975   :  { %8975 = vmatprep.mubr.f32.mxu0 %v15033_v3 }
0x1a10   :  { %v8415_v50 = vpop.f32.mrf.mxu0  ;;  %v8496_v51 = vpop.f32.mrf.mxu1 }
0x1a11   :  { %v8500_v52 = vmax.f32 %v8415_v50, %v8496_v51 }
0x1a12   :  { %v14615_v53 = vpop.f32.mrf.mxu0  ;;  %v14640_v54 = vpop.f32.mrf.mxu1 }
0x1a13   :  { %8502 = vst.msk [vmem:[#allocation3 + $0x28] sm:$0x1f] %vm1466_vm11, %v8500_v52  ;;  %v8897_v53 = vld [vmem:[%s20269_s3] sm:$0xff]  ;;  %v12844_v54 = vld [vmem:[%s20269_s3 + $0x10] sm:$0xff] }
0x1a18   :  { %v8612_v55 = vpop.f32.mrf.mxu0 }
0x1a1a   :  { %v8614_v56 = vpop.f32.mrf.mxu0 }
0x1a1c   :  { %v8618_v57 = vpop.f32.mrf.mxu0 }
0x1a1e   :  { %v8620_v58 = vpop.f32.mrf.mxu0  ;;  %v8838_v59 = vpop.f32.mrf.mxu1 }
0x1a20   :  { %v8624_v60 = vpop.f32.mrf.mxu0  ;;  %v8840_v61 = vpop.f32.mrf.mxu1 }
0x1a22   :  { %v8626_v62 = vpop.f32.mrf.mxu0  ;;  %v8844_v0 = vpop.f32.mrf.mxu1 }
0x1a24   :  { %v8630_v63 = vpop.f32.mrf.mxu0  ;;  %v8846_v4 = vpop.f32.mrf.mxu1 }
0x1a26   :  { %v8632_v1 = vpop.f32.mrf.mxu0  ;;  %v8850_v7 = vpop.f32.mrf.mxu1 }
0x1a28   :  { %v8719_v2 = vpop.f32.mrf.mxu0  ;;  %v8852_v10 = vpop.f32.mrf.mxu1 }
0x1a29   :  { %v8720_v27 = vadd.f32 %v8719_v2, %v8612_v55  ;;  %v9092_v55 = vld [vmem:[%s20267_s4 + $0x78] sm:$0xff]  ;;  %v12863_v2 = vld [vmem:[%s20267_s4 + $0x128] sm:$0xff] }
0x1a2a   :  { %v8721_v5 = vpop.f32.mrf.mxu0  ;;  %v8856_v15 = vpop.f32.mrf.mxu1 }
0x1a2b   :  { %v8722_v23 = vadd.f32 %v8721_v5, %v8614_v56  ;;  %v8861_v39 = vadd.f32 %v8838_v59, %v8720_v27  ;;  %v12867_v56 = vld [vmem:[%s20267_s4 + $0x148] sm:$0xff]  ;;  %v9091_v59 = vld [vmem:[%s20267_s4 + $0x70] sm:$0xff]  ;;  %v12862_v5 = vld [vmem:[%s20267_s4 + $0x120] sm:$0xff] }
0x1a2c   :  { %v8725_v6 = vpop.f32.mrf.mxu0  ;;  %v8858_v30 = vpop.f32.mrf.mxu1  ;;  %v12852_v27 = vld [vmem:[%s20267_s4 + $0xd0] sm:$0xff] }
0x1a2d   :  { %v8726_v20 = vadd.f32 %v8725_v6, %v8618_v57  ;;  %v8862_v36 = vadd.f32 %v8840_v61, %v8722_v23  ;;  %v8881_v47 = vadd.f32 %v8874_v28, %v8861_v39  ;;  %v8898_v57 = vld [vmem:[%s20269_s3 + $0x8] sm:$0x1f]  ;;  %v12854_v23 = vld [vmem:[%s20267_s4 + $0xe0] sm:$0xff]  ;;  %v12872_v39 = vld [vmem:[%s20267_s4 + $0x170] sm:$0xff] }
0x1a2e   :  { %v8727_v8 = vpop.f32.mrf.mxu0  ;;  %v9090_v61 = vld [vmem:[%s20267_s4 + $0x68] sm:$0xff] }
0x1a2f   :  { %v8728_v18 = vadd.f32 %v8727_v8, %v8620_v58  ;;  %v8863_v34 = vadd.f32 %v8844_v0, %v8726_v20  ;;  %v8882_v45 = vadd.f32 %v8878_v31, %v8862_v36  ;;  %v8889_v52 = vmax.f32 %v8881_v47, 0.0  ;;  %v12845_v58 = vld [vmem:[%s20269_s3 + $0x18] sm:$0x1f]  ;;  %v12864_v0 = vld [vmem:[%s20267_s4 + $0x130] sm:$0xff]  ;;  %v9086_v6 = vld [vmem:[%s20267_s4 + $0x48] sm:$0xff] }
0x1a30   :  { %v8731_v9 = vpop.f32.mrf.mxu0  ;;  %v9085_v8 = vld [vmem:[%s20267_s4 + $0x40] sm:$0xff]  ;;  %v12855_v20 = vld [vmem:[%s20267_s4 + $0xe8] sm:$0xff]  ;;  %v12868_v47 = vld [vmem:[%s20267_s4 + $0x150] sm:$0xff] }
0x1a31   :  { %v8732_v13 = vadd.f32 %v8731_v9, %v8624_v60  ;;  %v8864_v32 = vadd.f32 %v8846_v4, %v8728_v18  ;;  %v8883_v43 = vadd.f32 %v8874_v28, %v8863_v34  ;;  %v8890_v51 = vmax.f32 %v8882_v45, 0.0  ;;  %v12866_v60 = vld [vmem:[%s20267_s4 + $0x140] sm:$0xff]  ;;  %v9087_v4 = vld [vmem:[%s20267_s4 + $0x50] sm:$0xff]  ;;  %v9098_v36 = vld [vmem:[%s20267_s4 + $0xa8] sm:$0xff] }
0x1a32   :  { %v8733_v11 = vpop.f32.mrf.mxu0  ;;  %v12860_v9 = vld [vmem:[%s20267_s4 + $0x110] sm:$0xff]  ;;  %v12869_v45 = vld [vmem:[%s20267_s4 + $0x158] sm:$0xff] }
0x1a33   :  { %v8734_v12 = vadd.f32 %v8733_v11, %v8626_v62  ;;  %v8865_v29 = vadd.f32 %v8850_v7, %v8732_v13  ;;  %v8884_v41 = vadd.f32 %v8878_v31, %v8864_v32  ;;  %v8891_v50 = vmax.f32 %v8883_v43, 0.0  ;;  %v12865_v62 = vld [vmem:[%s20267_s4 + $0x138] sm:$0xff]  ;;  %v12859_v11 = vld [vmem:[%s20267_s4 + $0x108] sm:$0xff]  ;;  %v12858_v13 = vld [vmem:[%s20267_s4 + $0x100] sm:$0xff] }
0x1a34   :  { %v8737_v14 = vpop.f32.mrf.mxu0  ;;  %v12861_v7 = vld [vmem:[%s20267_s4 + $0x118] sm:$0xff]  ;;  %v12856_v18 = vld [vmem:[%s20267_s4 + $0xf0] sm:$0xff]  ;;  %v12870_v43 = vld [vmem:[%s20267_s4 + $0x160] sm:$0xff] }
0x1a35   :  { %v8738_v19 = vadd.f32 %v8737_v14, %v8630_v63  ;;  %v8866_v24 = vadd.f32 %v8852_v10, %v8734_v12  ;;  %v8885_v40 = vadd.f32 %v8874_v28, %v8865_v29  ;;  %v8892_v49 = vmax.f32 %v8884_v41, 0.0  ;;  %v9089_v63 = vld [vmem:[%s20267_s4 + $0x60] sm:$0xff]  ;;  %v9084_v10 = vld [vmem:[%s20267_s4 + $0x38] sm:$0xff]  ;;  %v9083_v12 = vld [vmem:[%s20267_s4 + $0x30] sm:$0xff] }
0x1a36   :  { %v8739_v22 = vpop.f32.mrf.mxu0  ;;  %v9082_v14 = vld [vmem:[%s20267_s4 + $0x28] sm:$0xff]  ;;  %v12877_v29 = vld [vmem:[%s20267_s4 + $0x198] sm:$0xff]  ;;  %v9099_v34 = vld [vmem:[%s20267_s4 + $0xb0] sm:$0xff] }
0x1a37   :  { %v8867_v25 = vadd.f32 %v8856_v15, %v8738_v19  ;;  %v8740_v26 = vadd.f32 %v8739_v22, %v8632_v1  ;;  %v8886_v37 = vadd.f32 %v8878_v31, %v8866_v24  ;;  %v8893_v48 = vmax.f32 %v8885_v40, 0.0  ;;  %v9088_v1 = vld [vmem:[%s20267_s4 + $0x58] sm:$0xff]  ;;  %v9079_v22 = vld [vmem:[%s20267_s4 + $0x10] sm:$0xff]  ;;  %v9078_v24 = vld [vmem:[%s20267_s4 + $0x8] sm:$0xff] }
0x1a38   :  { %v12857_v15 = vld [vmem:[%s20267_s4 + $0xf8] sm:$0xff]  ;;  %v12871_v41 = vld [vmem:[%s20267_s4 + $0x168] sm:$0xff] }
0x1a39   :  { %v8868_v33 = vadd.f32 %v8858_v30, %v8740_v26  ;;  %v8887_v35 = vadd.f32 %v8874_v28, %v8867_v25  ;;  %v8894_v46 = vmax.f32 %v8886_v37, 0.0  ;;  %v9080_v19 = vld [vmem:[%s20267_s4 + $0x18] sm:$0xff]  ;;  %v9077_v26 = vld [vmem:[%s20267_s4] sm:$0xff]  ;;  %v9102_v28 = vld [vmem:[%s20267_s4 + $0xc8] sm:$0xff] }
0x1a3a   :  { %v12853_v25 = vld [vmem:[%s20267_s4 + $0xd8] sm:$0xff]  ;;  %v9101_v30 = vld [vmem:[%s20267_s4 + $0xc0] sm:$0xff] }
0x1a3b   :  { %v8888_v38 = vadd.f32 %v8878_v31, %v8868_v33  ;;  %v8895_v44 = vmax.f32 %v8887_v35, 0.0  ;;  %v12876_v31 = vld [vmem:[%s20267_s4 + $0x190] sm:$0xff]  ;;  %v9100_v32 = vld [vmem:[%s20267_s4 + $0xb8] sm:$0xff]  ;;  %v12875_v33 = vld [vmem:[%s20267_s4 + $0x188] sm:$0xff] }
0x1a3c   :  { %v12874_v35 = vld [vmem:[%s20267_s4 + $0x180] sm:$0xff]  ;;  %v12873_v37 = vld [vmem:[%s20267_s4 + $0x178] sm:$0xff] }
0x1a3d   :  { %v8896_v42 = vmax.f32 %v8888_v38, 0.0  ;;  %v9097_v38 = vld [vmem:[%s20267_s4 + $0xa0] sm:$0xff]  ;;  %v9096_v40 = vld [vmem:[%s20267_s4 + $0x98] sm:$0xff] }
0x1a3f   :  { %12840 = vmatprep.subr.msk.mxu0 %vm450_vm2, %v8896_v42  ;;  %12846 = vmatprep.subr.msk.mxu1 %vm450_vm2, %v8896_v42  ;;  %v9095_v42 = vld [vmem:[%s20267_s4 + $0x90] sm:$0xff] }
0x1a40   :  { %12841 = vmatpush1.msk.msra.mxu0 %vm450_vm2, %v8895_v44  ;;  %12847 = vmatpush1.msk.msra.mxu1 %vm450_vm2, %v8895_v44  ;;  %v9094_v44 = vld [vmem:[%s20267_s4 + $0x88] sm:$0xff] }
0x1a41   :  { %8937 = vmatprep.subr.mxu0 %v8894_v46  ;;  %9022 = vmatprep.subr.mxu1 %v8894_v46  ;;  %v9093_v46 = vld [vmem:[%s20267_s4 + $0x80] sm:$0xff] }
0x1a42   :  { %8938 = vmatpush1.msra.mxu0 %v8893_v48  ;;  %9023 = vmatpush1.msra.mxu1 %v8893_v48  ;;  %v12892_v48 = vld [vmem:[%s20270_s5 + $0xc8] sm:$0xff] }
0x1a43   :  { %8939 = vmatprep.subr.mxu0 %v8892_v49  ;;  %9024 = vmatprep.subr.mxu1 %v8892_v49  ;;  %v9303_v49 = vld [vmem:[%s20270_s5 + $0x60] sm:$0xff] }
0x1a44   :  { %8940 = vmatpush1.msra.mxu0 %v8891_v50  ;;  %9025 = vmatpush1.msra.mxu1 %v8891_v50 }
0x1a45   :  { %8941 = vmatprep.subr.mxu0 %v8890_v51  ;;  %9026 = vmatprep.subr.mxu1 %v8890_v51 }
0x1a46   :  { %8942 = vmatpush1.msra.mxu0 %v8889_v52  ;;  %9027 = vmatpush1.msra.mxu1 %v8889_v52 }
0x1a47   :  { %12842 = vmatmul.mubr.msk.f32.vlgmr.msra.gmra.mxu0 %vm443_vm3, %v8897_v53  ;;  %12848 = vmatmul.mubr.msk.f32.vlgmr.msra.gmra.mxu1 %vm443_vm3, %v12844_v54 }
0x1a48   :  { %8981 = vmatprep.mubr.f32.mxu0 %v15033_v3  ;;  %9066 = vmatprep.mubr.f32.mxu1 %v15033_v3 }
0x1a49   :  { %9109 = vmatprep.subr.mxu0 %v15033_v3  ;;  %9210 = vmatprep.subr.mxu1 %v15033_v3 }
0x1a4a   :  { %9110 = vmatpush1.msra.mxu0 %v9092_v55  ;;  %9211 = vmatpush1.msra.mxu1 %v12867_v56 }
0x1a4b   :  { %12843 = vmatmul.mubr.msk.f32.gmra.mxu0 %vm443_vm3, %v8898_v57  ;;  %12849 = vmatmul.mubr.msk.f32.gmra.mxu1 %vm443_vm3, %v12845_v58  ;;  %v12891_v58 = vld [vmem:[%s20270_s5 + $0xc0] sm:$0xff] }
0x1a4c   :  { %9111 = vmatprep.subr.mxu0 %v15033_v3  ;;  %9212 = vmatprep.subr.mxu1 %v15033_v3 }
0x1a4d   :  { %9112 = vmatpush1.msra.mxu0 %v9091_v59  ;;  %9213 = vmatpush1.msra.mxu1 %v12866_v60  ;;  %v9302_v59 = vld [vmem:[%s20270_s5 + $0x58] sm:$0xff] }
0x1a4e   :  { %9113 = vmatprep.subr.mxu0 %v15033_v3  ;;  %9214 = vmatprep.subr.mxu1 %v15033_v3 }
0x1a4f   :  { %9114 = vmatpush1.msra.mxu0 %v9090_v61  ;;  %9215 = vmatpush1.msra.mxu1 %v12865_v62 }
0x1a50   :  { %9115 = vmatprep.subr.mxu0 %v15033_v3  ;;  %9216 = vmatprep.subr.mxu1 %v15033_v3 }
0x1a51   :  { %9116 = vmatpush1.msra.mxu0 %v9089_v63  ;;  %9217 = vmatpush1.msra.mxu1 %v12864_v0  ;;  %v12890_v0 = vld [vmem:[%s20270_s5 + $0xb8] sm:$0xff] }
0x1a52   :  { %9117 = vmatprep.subr.mxu0 %v15033_v3  ;;  %9218 = vmatprep.subr.mxu1 %v15033_v3 }
0x1a53   :  { %9118 = vmatpush1.msra.mxu0 %v9088_v1  ;;  %9219 = vmatpush1.msra.mxu1 %v12863_v2  ;;  %v9301_v1 = vld [vmem:[%s20270_s5 + $0x50] sm:$0xff] }
0x1a54   :  { %9119 = vmatprep.subr.mxu0 %v15033_v3  ;;  %9220 = vmatprep.subr.mxu1 %v15033_v3  ;;  %v12889_v2 = vld [vmem:[%s20270_s5 + $0xb0] sm:$0xff] }
0x1a55   :  { %9120 = vmatpush1.msra.mxu0 %v9087_v4  ;;  %9221 = vmatpush1.msra.mxu1 %v12862_v5  ;;  %v9300_v4 = vld [vmem:[%s20270_s5 + $0x48] sm:$0xff] }
0x1a56   :  { %9121 = vmatprep.subr.mxu0 %v15033_v3  ;;  %9222 = vmatprep.subr.mxu1 %v15033_v3  ;;  %v12888_v5 = vld [vmem:[%s20270_s5 + $0xa8] sm:$0xff] }
0x1a57   :  { %9122 = vmatpush1.msra.mxu0 %v9086_v6  ;;  %9223 = vmatpush1.msra.mxu1 %v12861_v7  ;;  %v9299_v6 = vld [vmem:[%s20270_s5 + $0x40] sm:$0xff] }
0x1a58   :  { %9123 = vmatprep.subr.mxu0 %v15033_v3  ;;  %9224 = vmatprep.subr.mxu1 %v15033_v3  ;;  %v12887_v7 = vld [vmem:[%s20270_s5 + $0xa0] sm:$0xff] }
0x1a59   :  { %9124 = vmatpush1.msra.mxu0 %v9085_v8  ;;  %9225 = vmatpush1.msra.mxu1 %v12860_v9  ;;  %v9298_v8 = vld [vmem:[%s20270_s5 + $0x38] sm:$0xff] }
0x1a5a   :  { %9125 = vmatprep.subr.mxu0 %v15033_v3  ;;  %9226 = vmatprep.subr.mxu1 %v15033_v3  ;;  %v12886_v9 = vld [vmem:[%s20270_s5 + $0x98] sm:$0xff] }
0x1a5b   :  { %9126 = vmatpush1.msra.mxu0 %v9084_v10  ;;  %9227 = vmatpush1.msra.mxu1 %v12859_v11  ;;  %v9297_v10 = vld [vmem:[%s20270_s5 + $0x30] sm:$0xff] }
0x1a5c   :  { %9127 = vmatprep.subr.mxu0 %v15033_v3  ;;  %9228 = vmatprep.subr.mxu1 %v15033_v3  ;;  %v12885_v11 = vld [vmem:[%s20270_s5 + $0x90] sm:$0xff] }
0x1a5d   :  { %9128 = vmatpush1.msra.mxu0 %v9083_v12  ;;  %9229 = vmatpush1.msra.mxu1 %v12858_v13  ;;  %v9296_v12 = vld [vmem:[%s20270_s5 + $0x28] sm:$0xff] }
0x1a5e   :  { %9129 = vmatprep.subr.mxu0 %v15033_v3  ;;  %9230 = vmatprep.subr.mxu1 %v15033_v3  ;;  %v12884_v13 = vld [vmem:[%s20270_s5 + $0x88] sm:$0xff] }
0x1a5f   :  { %9130 = vmatpush1.msra.mxu0 %v9082_v14  ;;  %9231 = vmatpush1.msra.mxu1 %v12857_v15  ;;  %v9295_v14 = vld [vmem:[%s20270_s5 + $0x20] sm:$0xff] }
0x1a60   :  { %9131 = vmatprep.subr.mxu0 %v15033_v3  ;;  %9232 = vmatprep.subr.mxu1 %v15033_v3  ;;  %v12883_v15 = vld [vmem:[%s20270_s5 + $0x80] sm:$0xff] }
0x1a61   :  { %9132 = vmatpush1.msra.mxu0 %v9081_v17  ;;  %9233 = vmatpush1.msra.mxu1 %v12856_v18  ;;  %v9294_v17 = vld [vmem:[%s20270_s5 + $0x18] sm:$0xff] }
0x1a62   :  { %9133 = vmatprep.subr.mxu0 %v15033_v3  ;;  %9234 = vmatprep.subr.mxu1 %v15033_v3  ;;  %v12882_v18 = vld [vmem:[%s20270_s5 + $0x78] sm:$0xff] }
0x1a63   :  { %9134 = vmatpush1.msra.mxu0 %v9080_v19  ;;  %9235 = vmatpush1.msra.mxu1 %v12855_v20  ;;  %v9293_v19 = vld [vmem:[%s20270_s5 + $0x10] sm:$0xff] }
0x1a64   :  { %9135 = vmatprep.subr.mxu0 %v15033_v3  ;;  %9236 = vmatprep.subr.mxu1 %v15033_v3  ;;  %v12881_v20 = vld [vmem:[%s20270_s5 + $0x70] sm:$0xff] }
0x1a65   :  { %9136 = vmatpush1.msra.mxu0 %v9079_v22  ;;  %9237 = vmatpush1.msra.mxu1 %v12854_v23  ;;  %v9292_v22 = vld [vmem:[%s20270_s5 + $0x8] sm:$0xff] }
0x1a66   :  { %9137 = vmatprep.subr.mxu0 %v15033_v3  ;;  %9238 = vmatprep.subr.mxu1 %v15033_v3  ;;  %v12880_v23 = vld [vmem:[%s20270_s5 + $0x68] sm:$0xff] }
0x1a67   :  { %9138 = vmatpush1.msra.mxu0 %v9078_v24  ;;  %9239 = vmatpush1.msra.mxu1 %v12853_v25  ;;  %v9291_v24 = vld [vmem:[%s20270_s5] sm:$0xff]  ;;  %v12909_v25 = vld [vmem:[%s20270_s5 + $0x130] sm:$0xff] }
0x1a68   :  { %9139 = vmatprep.subr.mxu0 %v15033_v3  ;;  %9240 = vmatprep.subr.mxu1 %v15033_v3 }
0x1a69   :  { %9140 = vmatpush1.msra.mxu0 %v9077_v26  ;;  %9241 = vmatpush1.msra.mxu1 %v12852_v27 }
0x1a6a   :  { %9153 = vmatprep.subr.mxu0 %v15033_v3  ;;  %9254 = vmatprep.subr.mxu1 %v15033_v3 }
0x1a6b   :  { %9154 = vmatpush2.msra.mxu0 %v9102_v28  ;;  %9255 = vmatpush2.msra.mxu1 %v12877_v29 }
0x1a6c   :  { %9155 = vmatprep.subr.mxu0 %v15033_v3  ;;  %9256 = vmatprep.subr.mxu1 %v15033_v3 }
0x1a6d   :  { %9156 = vmatpush2.msra.mxu0 %v9101_v30  ;;  %9257 = vmatpush2.msra.mxu1 %v12876_v31 }
0x1a6e   :  { %9157 = vmatprep.subr.mxu0 %v15033_v3  ;;  %9258 = vmatprep.subr.mxu1 %v15033_v3 }
0x1a6f   :  { %9158 = vmatpush2.msra.mxu0 %v9100_v32  ;;  %9259 = vmatpush2.msra.mxu1 %v12875_v33 }
0x1a70   :  { %9159 = vmatprep.subr.mxu0 %v15033_v3  ;;  %9260 = vmatprep.subr.mxu1 %v15033_v3 }
0x1a71   :  { %9160 = vmatpush2.msra.mxu0 %v9099_v34  ;;  %9261 = vmatpush2.msra.mxu1 %v12874_v35 }
0x1a72   :  { %9161 = vmatprep.subr.mxu0 %v15033_v3  ;;  %9262 = vmatprep.subr.mxu1 %v15033_v3 }
0x1a73   :  { %9162 = vmatpush2.msra.mxu0 %v9098_v36  ;;  %9263 = vmatpush2.msra.mxu1 %v12873_v37 }
0x1a74   :  { %9163 = vmatprep.subr.mxu0 %v15033_v3  ;;  %9264 = vmatprep.subr.mxu1 %v15033_v3 }
0x1a75   :  { %9164 = vmatpush2.msra.mxu0 %v9097_v38  ;;  %9265 = vmatpush2.msra.mxu1 %v12872_v39 }
0x1a76   :  { %9165 = vmatprep.subr.mxu0 %v15033_v3  ;;  %9266 = vmatprep.subr.mxu1 %v15033_v3 }
0x1a77   :  { %9166 = vmatpush2.msra.mxu0 %v9096_v40  ;;  %9267 = vmatpush2.msra.mxu1 %v12871_v41  ;;  %v12908_v40 = vld [vmem:[%s20270_s5 + $0x128] sm:$0xff] }
0x1a78   :  { %9167 = vmatprep.subr.mxu0 %v15033_v3  ;;  %9268 = vmatprep.subr.mxu1 %v15033_v3 }
0x1a79   :  { %9168 = vmatpush2.msra.mxu0 %v9095_v42  ;;  %9269 = vmatpush2.msra.mxu1 %v12870_v43  ;;  %v12907_v42 = vld [vmem:[%s20270_s5 + $0x120] sm:$0xff]  ;;  %v12906_v43 = vld [vmem:[%s20270_s5 + $0x118] sm:$0xff] }
0x1a7a   :  { %9169 = vmatprep.subr.mxu0 %v15033_v3  ;;  %9270 = vmatprep.subr.mxu1 %v15033_v3 }
0x1a7b   :  { %9170 = vmatpush2.msra.mxu0 %v9094_v44  ;;  %9271 = vmatpush2.msra.mxu1 %v12869_v45  ;;  %v12905_v44 = vld [vmem:[%s20270_s5 + $0x110] sm:$0xff]  ;;  %v12904_v45 = vld [vmem:[%s20270_s5 + $0x108] sm:$0xff] }
0x1a7c   :  { %9171 = vmatprep.subr.mxu0 %v15033_v3  ;;  %9272 = vmatprep.subr.mxu1 %v15033_v3 }
0x1a7d   :  { %9172 = vmatpush2.msra.mxu0 %v9093_v46  ;;  %9273 = vmatpush2.msra.mxu1 %v12868_v47  ;;  %v12903_v46 = vld [vmem:[%s20270_s5 + $0x100] sm:$0xff]  ;;  %v12902_v47 = vld [vmem:[%s20270_s5 + $0xf8] sm:$0xff] }
0x1a7e   :  { %14641 = vmatprep.subr.mxu0 %v12892_v48  ;;  %14670 = vmatprep.subr.mxu1 %v9303_v49 }
0x1b07   :  { %v8977_v50 = vpop.f32.mrf.mxu0  ;;  %v9062_v51 = vpop.f32.mrf.mxu1 }
0x1b08   :  { %v9073_v55 = vmax.f32 %v8977_v50, %v9062_v51  ;;  %v12899_v50 = vld [vmem:[%s20270_s5 + $0xe0] sm:$0xff]  ;;  %v12898_v51 = vld [vmem:[%s20270_s5 + $0xd8] sm:$0xff] }
0x1b09   :  { %v8979_v52 = vpop.f32.mrf.mxu0  ;;  %v9064_v53 = vpop.f32.mrf.mxu1 }
0x1b0a   :  { %v9074_v54 = vmax.f32 %v8979_v52, %v9064_v53  ;;  %v12897_v52 = vld [vmem:[%s20270_s5 + $0xd0] sm:$0xff] }
0x1b0b   :  { %v8983_v56 = vpop.f32.mrf.mxu0  ;;  %v9068_v57 = vpop.f32.mrf.mxu1 }
0x1b0c   :  { %12850 = vmatprep.mubr.msk.f32.mxu0 %vm650_vm4, %v9074_v54  ;;  %12878 = vmatprep.mubr.msk.f32.mxu1 %vm650_vm4, %v9074_v54  ;;  %v9075_v63 = vmax.f32 %v8983_v56, %v9068_v57  ;;  %v12929_v54 = vld [vmem:[%s20271_s8 + $0xa8] sm:$0xff]  ;;  %v12927_v56 = vld [vmem:[%s20271_s8 + $0x98] sm:$0xff]  ;;  %v12926_v57 = vld [vmem:[%s20271_s8 + $0x90] sm:$0xff] }
0x1b0d   :  { %v8985_v60 = vpop.f32.mrf.mxu0  ;;  %v9070_v61 = vpop.f32.mrf.mxu1  ;;  %9174 = vmatmul.mubr.f32.vlgmr.msra.gmra.mxu0 %v9073_v55  ;;  %9275 = vmatmul.mubr.f32.vlgmr.msra.gmra.mxu1 %v9073_v55  ;;  %v12928_v55 = vld [vmem:[%s20271_s8 + $0xa0] sm:$0xff] }
0x1b0e   :  { %v9076_v62 = vmax.f32 %v8985_v60, %v9070_v61  ;;  %14642 = vmatpush3.msra.mxu0 %v12892_v48  ;;  %14671 = vmatpush3.msra.mxu1 %v9303_v49  ;;  %v12901_v48 = vld [vmem:[%s20270_s5 + $0xf0] sm:$0xff]  ;;  %v12900_v49 = vld [vmem:[%s20270_s5 + $0xe8] sm:$0xff]  ;;  %v12923_v60 = vld [vmem:[%s20271_s8 + $0x78] sm:$0xff] }
0x1b0f   :  { %14643 = vmatprep.subr.mxu0 %v12891_v58  ;;  %14672 = vmatprep.subr.mxu1 %v9302_v59 }
0x1b10   :  { %12851 = vmatprep.mubr.msk.f32.mxu0 %vm650_vm4, %v9076_v62  ;;  %12879 = vmatprep.mubr.msk.f32.mxu1 %vm650_vm4, %v9076_v62 }
0x1b11   :  { %9179 = vmatmul.mubr.f32.gmra.mxu0 %v9075_v63  ;;  %9280 = vmatmul.mubr.f32.gmra.mxu1 %v9075_v63 }
0x1b12   :  { %14644 = vmatpush3.msra.mxu0 %v12891_v58  ;;  %14673 = vmatpush3.msra.mxu1 %v9302_v59  ;;  %v12925_v58 = vld [vmem:[%s20271_s8 + $0x88] sm:$0xff]  ;;  %v12924_v59 = vld [vmem:[%s20271_s8 + $0x80] sm:$0xff] }
0x1b13   :  { %14645 = vmatprep.subr.mxu0 %v12890_v0  ;;  %14674 = vmatprep.subr.mxu1 %v9301_v1 }
0x1b14   :  { %14646 = vmatpush3.msra.mxu0 %v12890_v0  ;;  %14675 = vmatpush3.msra.mxu1 %v9301_v1 }
0x1b15   :  { %14647 = vmatprep.subr.mxu0 %v12889_v2  ;;  %14676 = vmatprep.subr.mxu1 %v9300_v4 }
0x1b16   :  { %14648 = vmatpush3.msra.mxu0 %v12889_v2  ;;  %14677 = vmatpush3.msra.mxu1 %v9300_v4  ;;  %v12912_v4 = vld [vmem:[%s20272_s6] ss:$0 sm:$0xff] }
0x1b17   :  { %14649 = vmatprep.subr.mxu0 %v12888_v5  ;;  %14678 = vmatprep.subr.mxu1 %v9299_v6 }
0x1b18   :  { %14650 = vmatpush3.msra.mxu0 %v12888_v5  ;;  %14679 = vmatpush3.msra.mxu1 %v9299_v6 }
0x1b19   :  { %14651 = vmatprep.subr.mxu0 %v12887_v7  ;;  %14680 = vmatprep.subr.mxu1 %v9298_v8 }
0x1b1a   :  { %14652 = vmatpush3.msra.mxu0 %v12887_v7  ;;  %14681 = vmatpush3.msra.mxu1 %v9298_v8 }
0x1b1b   :  { %14653 = vmatprep.subr.mxu0 %v12886_v9  ;;  %14682 = vmatprep.subr.mxu1 %v9297_v10 }
0x1b1c   :  { %14654 = vmatpush3.msra.mxu0 %v12886_v9  ;;  %14683 = vmatpush3.msra.mxu1 %v9297_v10 }
0x1b1d   :  { %14655 = vmatprep.subr.mxu0 %v12885_v11  ;;  %14684 = vmatprep.subr.mxu1 %v9296_v12 }
0x1b1e   :  { %14656 = vmatpush3.msra.mxu0 %v12885_v11  ;;  %14685 = vmatpush3.msra.mxu1 %v9296_v12 }
0x1b1f   :  { %14657 = vmatprep.subr.mxu0 %v12884_v13  ;;  %14686 = vmatprep.subr.mxu1 %v9295_v14 }
0x1b20   :  { %14658 = vmatpush3.msra.mxu0 %v12884_v13  ;;  %14687 = vmatpush3.msra.mxu1 %v9295_v14  ;;  %v9590_v13 = vld [vmem:[%s20273_s7] sm:$0x1f]  ;;  %v12915_v14 = vld [vmem:[%s20273_s7 + $0x8] sm:$0x1f] }
0x1b21   :  { %14659 = vmatprep.subr.mxu0 %v12883_v15  ;;  %14688 = vmatprep.subr.mxu1 %v9294_v17 }
0x1b22   :  { %14660 = vmatpush3.msra.mxu0 %v12883_v15  ;;  %14689 = vmatpush3.msra.mxu1 %v9294_v17  ;;  %v9752_v15 = vld [vmem:[%s20271_s8 + $0x50] sm:$0xff]  ;;  %v9751_v17 = vld [vmem:[%s20271_s8 + $0x48] sm:$0xff] }
0x1b23   :  { %14661 = vmatprep.subr.mxu0 %v12882_v18  ;;  %14690 = vmatprep.subr.mxu1 %v9293_v19 }
0x1b24   :  { %14662 = vmatpush3.msra.mxu0 %v12882_v18  ;;  %14691 = vmatpush3.msra.mxu1 %v9293_v19  ;;  %v9750_v18 = vld [vmem:[%s20271_s8 + $0x40] sm:$0xff]  ;;  %v9749_v19 = vld [vmem:[%s20271_s8 + $0x38] sm:$0xff] }
0x1b25   :  { %14663 = vmatprep.subr.mxu0 %v12881_v20  ;;  %14692 = vmatprep.subr.mxu1 %v9292_v22 }
0x1b26   :  { %14664 = vmatpush3.msra.mxu0 %v12881_v20  ;;  %14693 = vmatpush3.msra.mxu1 %v9292_v22  ;;  %v9748_v20 = vld [vmem:[%s20271_s8 + $0x30] sm:$0xff]  ;;  %v9747_v22 = vld [vmem:[%s20271_s8 + $0x28] sm:$0xff] }
0x1b27   :  { %14665 = vmatprep.subr.mxu0 %v12880_v23  ;;  %14694 = vmatprep.subr.mxu1 %v9291_v24 }
0x1b28   :  { %14666 = vmatpush3.msra.mxu0 %v12880_v23  ;;  %14695 = vmatpush3.msra.mxu1 %v9291_v24  ;;  %v9746_v23 = vld [vmem:[%s20271_s8 + $0x20] sm:$0xff]  ;;  %v9745_v24 = vld [vmem:[%s20271_s8 + $0x18] sm:$0xff] }
0x1b29   :  { %14699 = vmatprep.subr.mxu0 %v12909_v25  ;;  %14728 = vmatprep.subr.mxu1 %v15033_v3 }
0x1bcd   :  { %v9175_v26 = vpop.f32.mrf.mxu0  ;;  %v9276_v27 = vpop.f32.mrf.mxu1 }
0x1bce   :  { %v9285_v28 = vmax.f32 %v9175_v26, %v9276_v27  ;;  %v9744_v26 = vld [vmem:[%s20271_s8 + $0x10] sm:$0xff]  ;;  %v12921_v27 = vld [vmem:[%s20271_s8 + $0x68] sm:$0xff] }
0x1bcf   :  { %v9177_v29 = vpop.f32.mrf.mxu0  ;;  %v9278_v30 = vpop.f32.mrf.mxu1 }
0x1bd0   :  { %9287 = vst.msk [vmem:[#allocation2] sm:$0xff] %vm836_vm5, %v9285_v28  ;;  %v9743_v28 = vld [vmem:[%s20271_s8 + $0x8] sm:$0xff]  ;;  %v12920_v29 = vld [vmem:[%s20271_s8 + $0x60] sm:$0xff] }
0x1bd1   :  { %v9180_v31 = vpop.f32.mrf.mxu0  ;;  %v9281_v32 = vpop.f32.mrf.mxu1  ;;  %v9742_v30 = vld [vmem:[%s20271_s8] sm:$0xff] }
0x1bd2   :  { %v9286_v33 = vmax.f32 %v9180_v31, %v9281_v32  ;;  %v12919_v31 = vld [vmem:[%s20271_s8 + $0x58] sm:$0xff] }
0x1bd3   :  { %v9182_v34 = vpop.f32.mrf.mxu0  ;;  %v9283_v35 = vpop.f32.mrf.mxu1  ;;  %v12946_v32 = vld [vmem:[%s20265_s1 + $0x78] sm:$0xf] }
0x1bd4   :  { %9288 = vst.msk [vmem:[#allocation2 + $0x8] sm:$0x1f] %vm838_vm6, %v9286_v33  ;;  %v12970_v33 = vld [vmem:[%s20265_s1 + $0xb8] sm:$0xf] }
0x1bd7   :  { %v9289_v36 = vld [vmem:[#allocation2] sm:$0xff] }
0x1bd8   :  { %14696 = vmatprep.mubr.msk.f32.mxu1 %vm836_vm5, %v9289_v36 }
0x1bdb   :  { %v9304_v37 = vld [vmem:[#allocation2 + $0x1] sm:$0xff]  ;;  %v9305_v39 = vld [vmem:[#allocation2 + $0x9] sm:$0x7] }
0x1bdc   :  { %v9290_v38 = vld [vmem:[#allocation2 + $0x8] sm:$0x7]  ;;  %14667 = vmatprep.mubr.msk.f32.mxu0 %vm836_vm5, %v9304_v37 }
0x1bdd   :  { %14697 = vmatmul.mubr.msk.f32.vlgmr.msra.gmra.mxu1 %vm836_vm5, %v9290_v38  ;;  %14668 = vmatmul.mubr.msk.f32.vlgmr.msra.gmra.mxu0 %vm836_vm5, %v9305_v39  ;;  %v9481_v41 = vld [vmem:[#allocation2 + $0x2] sm:$0xff]  ;;  %v9482_v53 = vld [vmem:[#allocation2 + $0xa] sm:$0x7]  ;;  %v12945_v38 = vld [vmem:[%s20265_s1 + $0x70] sm:$0xf] }
0x1bde   :  { %14732 = vmatprep.mubr.msk.f32.mxu1 %vm15034_vm7, %v15033_v3  ;;  %14700 = vmatpush3.msra.mxu0 %v12909_v25  ;;  %v12922_v25 = vld [vmem:[%s20271_s8 + $0x70] sm:$0xff] }
0x1bdf   :  { %14725 = vmatprep.mubr.msk.f32.mxu0 %vm836_vm5, %v9481_v41  ;;  %14701 = vmatprep.subr.mxu0 %v12908_v40  ;;  %v12969_v41 = vld [vmem:[%s20265_s1 + $0xb0] sm:$0xf] }
0x1be0   :  { %14702 = vmatpush3.msra.mxu0 %v12908_v40  ;;  %v12944_v40 = vld [vmem:[%s20265_s1 + $0x68] sm:$0xff] }
0x1be1   :  { %14703 = vmatprep.subr.mxu0 %v12907_v42 }
0x1be2   :  { %14704 = vmatpush3.msra.mxu0 %v12907_v42  ;;  %v12943_v42 = vld [vmem:[%s20265_s1 + $0x60] sm:$0xff] }
0x1be3   :  { %14705 = vmatprep.subr.mxu0 %v12906_v43 }
0x1be4   :  { %14706 = vmatpush3.msra.mxu0 %v12906_v43  ;;  %v12968_v43 = vld [vmem:[%s20265_s1 + $0xa8] sm:$0xff] }
0x1be5   :  { %14707 = vmatprep.subr.mxu0 %v12905_v44 }
0x1be6   :  { %14708 = vmatpush3.msra.mxu0 %v12905_v44  ;;  %v12942_v44 = vld [vmem:[%s20265_s1 + $0x58] sm:$0xff] }
0x1be7   :  { %14709 = vmatprep.subr.mxu0 %v12904_v45 }
0x1be8   :  { %14710 = vmatpush3.msra.mxu0 %v12904_v45  ;;  %v12967_v45 = vld [vmem:[%s20265_s1 + $0xa0] sm:$0xff] }
0x1be9   :  { %14711 = vmatprep.subr.mxu0 %v12903_v46 }
0x1bea   :  { %14712 = vmatpush3.msra.mxu0 %v12903_v46  ;;  %v12941_v46 = vld [vmem:[%s20265_s1 + $0x50] sm:$0xff] }
0x1beb   :  { %14713 = vmatprep.subr.mxu0 %v12902_v47 }
0x1bec   :  { %14714 = vmatpush3.msra.mxu0 %v12902_v47  ;;  %v12966_v47 = vld [vmem:[%s20265_s1 + $0x98] sm:$0xff] }
0x1bed   :  { %14715 = vmatprep.subr.mxu0 %v12901_v48 }
0x1bee   :  { %14716 = vmatpush3.msra.mxu0 %v12901_v48  ;;  %v12940_v48 = vld [vmem:[%s20265_s1 + $0x48] sm:$0xff] }
0x1bef   :  { %14717 = vmatprep.subr.mxu0 %v12900_v49 }
0x1bf0   :  { %14718 = vmatpush3.msra.mxu0 %v12900_v49  ;;  %v12965_v49 = vld [vmem:[%s20265_s1 + $0x90] sm:$0xff] }
0x1bf1   :  { %14719 = vmatprep.subr.mxu0 %v12899_v50 }
0x1bf2   :  { %14720 = vmatpush3.msra.mxu0 %v12899_v50  ;;  %v12939_v50 = vld [vmem:[%s20265_s1 + $0x40] sm:$0xff] }
0x1bf3   :  { %14721 = vmatprep.subr.mxu0 %v12898_v51 }
0x1bf4   :  { %14722 = vmatpush3.msra.mxu0 %v12898_v51  ;;  %v12964_v51 = vld [vmem:[%s20265_s1 + $0x88] sm:$0xff] }
0x1bf5   :  { %14723 = vmatprep.subr.mxu0 %v12897_v52 }
0x1bf6   :  { %14724 = vmatpush3.msra.mxu0 %v12897_v52  ;;  %v12935_v52 = vld [vmem:[%s20266_s0 + $0xe1] sm:$0xff] }
0x1bf7   :  { %14726 = vmatmul.mubr.msk.f32.vlgmr.msra.gmra.mxu0 %vm836_vm5, %v9482_v53  ;;  %14767 = vmatprep.subr.mxu0 %v15033_v3  ;;  %v9922_v53 = vld [vmem:[%s20265_s1 + $0x38] sm:$0xf] }
0x1bf8   :  { %14789 = vmatprep.mubr.msk.f32.mxu0 %vm15034_vm7, %v15033_v3  ;;  %14768 = vmatpush3.msra.mxu0 %v12929_v54  ;;  %v9921_v54 = vld [vmem:[%s20265_s1 + $0x30] sm:$0xf] }
0x1bf9   :  { %14769 = vmatprep.subr.mxu0 %v15033_v3 }
0x1bfa   :  { %14770 = vmatpush3.msra.mxu0 %v12928_v55  ;;  %v9920_v55 = vld [vmem:[%s20265_s1 + $0x28] sm:$0xff] }
0x1bfb   :  { %14771 = vmatprep.subr.mxu0 %v15033_v3 }
0x1bfc   :  { %14772 = vmatpush3.msra.mxu0 %v12927_v56  ;;  %v12963_v56 = vld [vmem:[%s20265_s1 + $0x80] sm:$0xff] }
0x1bfd   :  { %14773 = vmatprep.subr.mxu0 %v15033_v3 }
0x1bfe   :  { %14774 = vmatpush3.msra.mxu0 %v12926_v57  ;;  %v9919_v57 = vld [vmem:[%s20265_s1 + $0x20] sm:$0xff] }
0x1bff   :  { %14775 = vmatprep.subr.mxu0 %v15033_v3 }
0x1c00   :  { %14776 = vmatpush3.msra.mxu0 %v12925_v58  ;;  %v12936_v58 = vld [vmem:[%s20266_s0 + $0xe9] sm:$0xff] }
0x1c01   :  { %14777 = vmatprep.subr.mxu0 %v15033_v3 }
0x1c02   :  { %14778 = vmatpush3.msra.mxu0 %v12924_v59  ;;  %v9918_v59 = vld [vmem:[%s20265_s1 + $0x18] sm:$0xff] }
0x1c03   :  { %14779 = vmatprep.subr.mxu0 %v15033_v3 }
0x1c04   :  { %14780 = vmatpush3.msra.mxu0 %v12923_v60  ;;  %v9917_v60 = vld [vmem:[%s20265_s1 + $0x10] sm:$0xff] }
0x1c05   :  { %14781 = vmatprep.subr.mxu0 %v15033_v3 }
0x1c06   :  { %14782 = vmatpush3.msra.mxu0 %v12922_v25 }
0x1c07   :  { %14783 = vmatprep.subr.mxu0 %v15033_v3 }
0x1c08   :  { %14784 = vmatpush3.msra.mxu0 %v12921_v27 }
0x1c09   :  { %14785 = vmatprep.subr.mxu0 %v15033_v3 }
0x1c0a   :  { %14786 = vmatpush3.msra.mxu0 %v12920_v29 }
0x1c0b   :  { %14787 = vmatprep.subr.mxu0 %v15033_v3 }
0x1c0c   :  { %14788 = vmatpush3.msra.mxu0 %v12919_v31 }
0x1c0d   :  { %12971 = vmatprep.subr.msk.mxu0 %vm82_vm0, %v12970_v33 }
0x1c9d   :  { %v14698_v61 = vpop.f32.mrf.mxu1  ;;  %v14669_v62 = vpop.f32.mrf.mxu0 }
0x1c9e   :  { %v9478_v1 = vadd.f32 %v14698_v61, %v14669_v62  ;;  %v9916_v61 = vld [vmem:[%s20265_s1 + $0x8] sm:$0xff] }
0x1c9f   :  { %v9472_v63 = vpop.f32.mrf.mxu1  ;;  %v9391_v0 = vpop.f32.mrf.mxu0  ;;  %v12959_v62 = vld [vmem:[%s20266_s0 + $0xe2] sm:$0xff] }
0x1ca0   :  { %v9473_v5 = vadd.f32 %v9472_v63, %v9391_v0  ;;  %v9915_v63 = vld [vmem:[%s20265_s1] sm:$0xff]  ;;  %v12937_v0 = vld [vmem:[%s20266_s0 + $0xf1] sm:$0xff] }
0x1cb7   :  { %v14727_v2 = vpop.f32.mrf.mxu0 }
0x1cb8   :  { %v9578_v6 = vadd.f32 %v14727_v2, %v9478_v1  ;;  %v12960_v1 = vld [vmem:[%s20266_s0 + $0xea] sm:$0xff]  ;;  %v12938_v2 = vld [vmem:[%s20266_s0 + $0xf9] sm:$0x3] }
0x1cb9   :  { %v9568_v7 = vpop.f32.mrf.mxu0 }
0x1cba   :  { %v9587_v8 = vadd.f32 %v12912_v4, %v9578_v6  ;;  %v9577_v9 = vadd.f32 %v9568_v7, %v9473_v5  ;;  %v12931_v5 = vld [vmem:[%s20266_s0 + $0xe0] sm:$0xff]  ;;  %v12962_v6 = vld [vmem:[%s20266_s0 + $0xfa] sm:$0x3]  ;;  %v12932_v7 = vld [vmem:[%s20266_s0 + $0xe8] sm:$0xff] }
0x1cbc   :  { %v9589_v10 = vmax.f32 %v9587_v8, 0.0  ;;  %v9586_v11 = vadd.f32 %v12912_v4, %v9577_v9  ;;  %v12961_v4 = vld [vmem:[%s20266_s0 + $0xf2] sm:$0xff] }
0x1cbd   :  { %v12933_v8 = vld [vmem:[%s20266_s0 + $0xf0] sm:$0xff]  ;;  %v12934_v9 = vld [vmem:[%s20266_s0 + $0xf8] sm:$0x3] }
0x1cbe   :  { %v9588_v12 = vmax.f32 %v9586_v11, 0.0  ;;  %14729 = vmatpush3.msk.msra.mxu1 %vm1148_vm8, %v9589_v10 }
0x1cbf   :  { %14730 = vmatprep.subr.mxu1 %v15033_v3 }
0x1cc0   :  { %14731 = vmatpush3.msra.mxu1 %v9588_v12 }
0x1cc1   :  { %14733 = vmatmul.mubr.msk.f32.vlgmr.msra.gmra.mxu1 %vm1144_vm9, %v9590_v13  ;;  %14735 = vmatprep.subr.mxu1 %v15033_v3 }
0x1cc2   :  { %14736 = vmatpush3.msk.msra.mxu1 %vm1148_vm8, %v9589_v10  ;;  %14739 = vmatprep.mubr.msk.f32.mxu1 %vm15034_vm7, %v15033_v3 }
0x1cc3   :  { %14737 = vmatprep.subr.mxu1 %v15033_v3 }
0x1cc4   :  { %14738 = vmatpush3.msra.mxu1 %v9588_v12 }
0x1cc5   :  { %14740 = vmatmul.mubr.msk.f32.vlgmr.msra.gmra.mxu1 %vm1144_vm9, %v12915_v14  ;;  %14742 = vmatprep.subr.mxu1 %v15033_v3 }
0x1cc6   :  { %14743 = vmatpush3.msra.mxu1 %v9752_v15  ;;  %14764 = vmatprep.mubr.msk.f32.mxu1 %vm15034_vm7, %v15033_v3 }
0x1cc7   :  { %14744 = vmatprep.subr.mxu1 %v15033_v3 }
0x1cc8   :  { %14745 = vmatpush3.msra.mxu1 %v9751_v17 }
0x1cc9   :  { %14746 = vmatprep.subr.mxu1 %v15033_v3 }
0x1cca   :  { %14747 = vmatpush3.msra.mxu1 %v9750_v18 }
0x1ccb   :  { %14748 = vmatprep.subr.mxu1 %v15033_v3 }
0x1ccc   :  { %14749 = vmatpush3.msra.mxu1 %v9749_v19 }
0x1ccd   :  { %14750 = vmatprep.subr.mxu1 %v15033_v3 }
0x1cce   :  { %14751 = vmatpush3.msra.mxu1 %v9748_v20 }
0x1ccf   :  { %14752 = vmatprep.subr.mxu1 %v15033_v3 }
0x1cd0   :  { %14753 = vmatpush3.msra.mxu1 %v9747_v22 }
0x1cd1   :  { %14754 = vmatprep.subr.mxu1 %v15033_v3 }
0x1cd2   :  { %14755 = vmatpush3.msra.mxu1 %v9746_v23 }
0x1cd3   :  { %14756 = vmatprep.subr.mxu1 %v15033_v3 }
0x1cd4   :  { %14757 = vmatpush3.msra.mxu1 %v9745_v24 }
0x1cd5   :  { %14758 = vmatprep.subr.mxu1 %v15033_v3 }
0x1cd6   :  { %14759 = vmatpush3.msra.mxu1 %v9744_v26 }
0x1cd7   :  { %14760 = vmatprep.subr.mxu1 %v15033_v3 }
0x1cd8   :  { %14761 = vmatpush3.msra.mxu1 %v9743_v28 }
0x1cd9   :  { %14762 = vmatprep.subr.mxu1 %v15033_v3 }
0x1cda   :  { %14763 = vmatpush3.msra.mxu1 %v9742_v30 }
0x1cdb   :  { %12947 = vmatprep.subr.msk.mxu1 %vm82_vm0, %v12946_v32 }
0x1d81   :  { %v9663_v34 = vpop.f32.mrf.mxu1 }
0x1d83   :  { %v14734_v35 = vpop.f32.mrf.mxu1 }
0x1d85   :  { %v9737_v36 = vpop.f32.mrf.mxu1 }
0x1d86   :  { %v9741_v37 = vmax.f32 %v9663_v34, %v9737_v36 }
0x1d87   :  { %v14741_v39 = vpop.f32.mrf.mxu1 }
0x1d88   :  { %14765 = vmatmul.mubr.msk.f32.vlgmr.msra.gmra.mxu1 %vm1309_vm10, %v9741_v37  ;;  %14790 = vmatmul.mubr.msk.f32.vlgmr.msra.gmra.mxu0 %vm1309_vm10, %v9741_v37 }
0x1d89   :  { %12948 = vmatpush1.msk.msra.mxu1 %vm82_vm0, %v12945_v38  ;;  %10017 = vmatprep.mubr.f32.mxu1 %v15033_v3 }
0x1d8a   :  { %9979 = vmatprep.subr.mxu1 %v12944_v40  ;;  %12972 = vmatpush1.msk.msra.mxu0 %vm82_vm0, %v12969_v41  ;;  %v10276_v41 = vld [vmem:[%s20268_s2] sm:$0x3] }
0x1d8b   :  { %9980 = vmatpush1.msra.mxu1 %v12943_v42  ;;  %10205 = vmatprep.subr.mxu0 %v12968_v43 }
0x1d8c   :  { %9981 = vmatprep.subr.mxu1 %v12942_v44  ;;  %10206 = vmatpush1.msra.mxu0 %v12967_v45 }
0x1d8d   :  { %9982 = vmatpush1.msra.mxu1 %v12941_v46  ;;  %10207 = vmatprep.subr.mxu0 %v12966_v47 }
0x1d8e   :  { %9983 = vmatprep.subr.mxu1 %v12940_v48  ;;  %10208 = vmatpush1.msra.mxu0 %v12965_v49 }
0x1d8f   :  { %9984 = vmatpush1.msra.mxu1 %v12939_v50  ;;  %10209 = vmatprep.subr.mxu0 %v12964_v51  ;;  %v10281_v51 = vrot.slane %v10276_v41, %v15321_v16 }
0x1d90   :  { %12949 = vmatmul.mubr.msk.f32.vlgmr.msra.gmra.mxu1 %vm69_vm1, %v12935_v52  ;;  %12953 = vmatprep.subr.msk.mxu1 %vm82_vm0, %v9922_v53 }
0x1d91   :  { %10023 = vmatprep.mubr.f32.mxu1 %v15033_v3  ;;  %12954 = vmatpush1.msk.msra.mxu1 %vm82_vm0, %v9921_v54  ;;  %v10285_v54 = vrot.slane %v10276_v41, %v15326_v21  ;;  %v10487_v41 = vld [vmem:[%s20267_s4 + $0x18] sm:$0xff]  ;;  %vm11365_vm0 = vcmask 1045509  }
0x1d92   :  { %10086 = vmatprep.subr.mxu1 %v9920_v55  ;;  %10210 = vmatpush1.msra.mxu0 %v12963_v56 }
0x1d93   :  { %10087 = vmatpush1.msra.mxu1 %v9919_v57  ;;  %10243 = vmatprep.mubr.f32.mxu0 %v15033_v3 }
0x1d94   :  { %12950 = vmatmul.mubr.msk.f32.gmra.mxu1 %vm69_vm1, %v12936_v58  ;;  %10088 = vmatprep.subr.mxu1 %v9918_v59 }
0x1d95   :  { %10029 = vmatprep.mubr.f32.mxu1 %v15033_v3  ;;  %10089 = vmatpush1.msra.mxu1 %v9917_v60 }
0x1d96   :  { %10090 = vmatprep.subr.mxu1 %v9916_v61  ;;  %12973 = vmatmul.mubr.msk.f32.vlgmr.msra.gmra.mxu0 %vm69_vm1, %v12959_v62 }
0x1d97   :  { %10091 = vmatpush1.msra.mxu1 %v9915_v63  ;;  %10249 = vmatprep.mubr.f32.mxu0 %v15033_v3 }
0x1d98   :  { %12951 = vmatmul.mubr.msk.f32.gmra.mxu1 %vm69_vm1, %v12937_v0 }
0x1d99   :  { %10035 = vmatprep.mubr.f32.mxu1 %v15033_v3 }
0x1d9a   :  { %12974 = vmatmul.mubr.msk.f32.gmra.mxu0 %vm69_vm1, %v12960_v1 }
0x1d9b   :  { %10255 = vmatprep.mubr.f32.mxu0 %v15033_v3 }
0x1d9c   :  { %12952 = vmatmul.mubr.msk.f32.gmra.mxu1 %vm69_vm1, %v12938_v2 }
0x1d9d   :  { %10124 = vmatprep.mubr.f32.mxu1 %v15033_v3 }
0x1d9e   :  { %12975 = vmatmul.mubr.msk.f32.gmra.mxu0 %vm69_vm1, %v12961_v4 }
0x1d9f   :  { %10261 = vmatprep.mubr.f32.mxu0 %v15033_v3 }
0x1da0   :  { %12955 = vmatmul.mubr.msk.f32.vlgmr.msra.gmra.mxu1 %vm69_vm1, %v12931_v5 }
0x1da1   :  { %10130 = vmatprep.mubr.f32.mxu1 %v15033_v3 }
0x1da2   :  { %12976 = vmatmul.mubr.msk.f32.gmra.mxu0 %vm69_vm1, %v12962_v6 }
0x1da3   :  { %10467 = vmatprep.mubr.f32.mxu0 %v15033_v3 }
0x1da4   :  { %12956 = vmatmul.mubr.msk.f32.gmra.mxu1 %vm69_vm1, %v12932_v7 }
0x1da5   :  { %10136 = vmatprep.mubr.f32.mxu1 %v15033_v3 }
0x1da8   :  { %12957 = vmatmul.mubr.msk.f32.gmra.mxu1 %vm69_vm1, %v12933_v8 }
0x1da9   :  { %10142 = vmatprep.mubr.f32.mxu1 %v15033_v3 }
0x1dac   :  { %12958 = vmatmul.mubr.msk.f32.gmra.mxu1 %vm69_vm1, %v12934_v9  ;;  %vm11368_vm1 = vcmask 1046534  }
0x1dad   :  { %10382 = vmatprep.mubr.f32.mxu1 %v15033_v3 }
0x1e48   :  { %v9822_v10 = vpop.f32.mrf.mxu1  ;;  %v9903_v11 = vpop.f32.mrf.mxu0 }
0x1e49   :  { %v9907_v12 = vmax.f32 %v9822_v10, %v9903_v11  ;;  %v10304_v11 = vld [vmem:[%s20269_s3] sm:$0xff] }
0x1e4a   :  { %v14766_v13 = vpop.f32.mrf.mxu1  ;;  %v14791_v14 = vpop.f32.mrf.mxu0 }
0x1e4b   :  { %9909 = vst.msk [vmem:[#allocation3 + $0x30] sm:$0x1f] %vm1466_vm11, %v9907_v12  ;;  %v12981_v12 = vld [vmem:[%s20269_s3 + $0x10] sm:$0xff]  ;;  %v10499_v13 = vld [vmem:[%s20267_s4 + $0x78] sm:$0xff]  ;;  %v13004_v14 = vld [vmem:[%s20267_s4 + $0x148] sm:$0xff] }
0x1e50   :  { %v10019_v15 = vpop.f32.mrf.mxu1 }
0x1e52   :  { %v10021_v17 = vpop.f32.mrf.mxu1 }
0x1e54   :  { %v10025_v18 = vpop.f32.mrf.mxu1 }
0x1e56   :  { %v10027_v19 = vpop.f32.mrf.mxu1  ;;  %v10245_v20 = vpop.f32.mrf.mxu0 }
0x1e58   :  { %v10031_v22 = vpop.f32.mrf.mxu1  ;;  %v10247_v23 = vpop.f32.mrf.mxu0 }
0x1e5a   :  { %v10033_v24 = vpop.f32.mrf.mxu1  ;;  %v10251_v26 = vpop.f32.mrf.mxu0 }
0x1e5c   :  { %v10037_v25 = vpop.f32.mrf.mxu1  ;;  %v10253_v29 = vpop.f32.mrf.mxu0 }
0x1e5e   :  { %v10039_v27 = vpop.f32.mrf.mxu1  ;;  %v10257_v32 = vpop.f32.mrf.mxu0 }
0x1e60   :  { %v10126_v28 = vpop.f32.mrf.mxu1  ;;  %v10259_v35 = vpop.f32.mrf.mxu0 }
0x1e61   :  { %v10127_v50 = vadd.f32 %v10126_v28, %v10019_v15  ;;  %v10305_v15 = vld [vmem:[%s20269_s3 + $0x8] sm:$0x1f]  ;;  %v12999_v28 = vld [vmem:[%s20267_s4 + $0x120] sm:$0xff] }
0x1e62   :  { %v10128_v30 = vpop.f32.mrf.mxu1  ;;  %v10263_v40 = vpop.f32.mrf.mxu0 }
0x1e63   :  { %v10129_v46 = vadd.f32 %v10128_v30, %v10021_v17  ;;  %v10268_v62 = vadd.f32 %v10245_v20, %v10127_v50  ;;  %v12982_v17 = vld [vmem:[%s20269_s3 + $0x18] sm:$0x1f]  ;;  %v10497_v20 = vld [vmem:[%s20267_s4 + $0x68] sm:$0xff] }
0x1e64   :  { %v10132_v31 = vpop.f32.mrf.mxu1  ;;  %v10265_v53 = vpop.f32.mrf.mxu0  ;;  %v12998_v30 = vld [vmem:[%s20267_s4 + $0x118] sm:$0xff] }
0x1e65   :  { %v10133_v44 = vadd.f32 %v10132_v31, %v10025_v18  ;;  %v10269_v59 = vadd.f32 %v10247_v23, %v10129_v46  ;;  %v10288_v16 = vadd.f32 %v10281_v51, %v10268_v62  ;;  %v10498_v18 = vld [vmem:[%s20267_s4 + $0x70] sm:$0xff]  ;;  %v10496_v23 = vld [vmem:[%s20267_s4 + $0x60] sm:$0xff]  ;;  %v12990_v46 = vld [vmem:[%s20267_s4 + $0xd8] sm:$0xff] }
0x1e66   :  { %v10134_v33 = vpop.f32.mrf.mxu1  ;;  %v10492_v31 = vld [vmem:[%s20267_s4 + $0x40] sm:$0xff]  ;;  %v13014_v50 = vld [vmem:[%s20267_s4 + $0x198] sm:$0xff]  ;;  %v13008_v62 = vld [vmem:[%s20267_s4 + $0x168] sm:$0xff] }
0x1e67   :  { %v10135_v42 = vadd.f32 %v10134_v33, %v10027_v19  ;;  %v10270_v57 = vadd.f32 %v10251_v26, %v10133_v44  ;;  %v10289_v5 = vadd.f32 %v10285_v54, %v10269_v59  ;;  %v10296_v10 = vmax.f32 %v10288_v16, 0.0  ;;  %v13003_v19 = vld [vmem:[%s20267_s4 + $0x140] sm:$0xff]  ;;  %v13000_v26 = vld [vmem:[%s20267_s4 + $0x128] sm:$0xff]  ;;  %v10491_v33 = vld [vmem:[%s20267_s4 + $0x38] sm:$0xff] }
0x1e68   :  { %v10138_v34 = vpop.f32.mrf.mxu1  ;;  %v12991_v44 = vld [vmem:[%s20267_s4 + $0xe0] sm:$0xff] }
0x1e69   :  { %v10139_v38 = vadd.f32 %v10138_v34, %v10031_v22  ;;  %v10271_v55 = vadd.f32 %v10253_v29, %v10135_v42  ;;  %v10290_v2 = vadd.f32 %v10281_v51, %v10270_v57  ;;  %v10297_v9 = vmax.f32 %v10289_v5, 0.0  ;;  %v13002_v22 = vld [vmem:[%s20267_s4 + $0x138] sm:$0xff]  ;;  %v10493_v29 = vld [vmem:[%s20267_s4 + $0x48] sm:$0xff]  ;;  %v10504_v59 = vld [vmem:[%s20267_s4 + $0xa0] sm:$0xff] }
0x1e6a   :  { %v10140_v36 = vpop.f32.mrf.mxu1  ;;  %v12996_v34 = vld [vmem:[%s20267_s4 + $0x108] sm:$0xff]  ;;  %v13005_v5 = vld [vmem:[%s20267_s4 + $0x150] sm:$0xff]  ;;  %v10710_v16 = vld [vmem:[%s20270_s5 + $0x60] sm:$0xff] }
0x1e6b   :  { %v10141_v37 = vadd.f32 %v10140_v36, %v10033_v24  ;;  %v10272_v52 = vadd.f32 %v10257_v32, %v10139_v38  ;;  %v10291_v0 = vadd.f32 %v10285_v54, %v10271_v55  ;;  %v10298_v8 = vmax.f32 %v10290_v2, 0.0  ;;  %v13001_v24 = vld [vmem:[%s20267_s4 + $0x130] sm:$0xff]  ;;  %v12995_v36 = vld [vmem:[%s20267_s4 + $0x100] sm:$0xff]  ;;  %v12994_v38 = vld [vmem:[%s20267_s4 + $0xf8] sm:$0xff] }
0x1e6c   :  { %v10144_v39 = vpop.f32.mrf.mxu1  ;;  %v12997_v32 = vld [vmem:[%s20267_s4 + $0x110] sm:$0xff]  ;;  %v12992_v42 = vld [vmem:[%s20267_s4 + $0xe8] sm:$0xff]  ;;  %v13006_v2 = vld [vmem:[%s20267_s4 + $0x158] sm:$0xff] }
0x1e6d   :  { %v10145_v43 = vadd.f32 %v10144_v39, %v10037_v25  ;;  %v10273_v47 = vadd.f32 %v10259_v35, %v10141_v37  ;;  %v10292_v63 = vadd.f32 %v10281_v51, %v10272_v52  ;;  %v10299_v7 = vmax.f32 %v10291_v0, 0.0  ;;  %v10495_v25 = vld [vmem:[%s20267_s4 + $0x58] sm:$0xff]  ;;  %v10490_v35 = vld [vmem:[%s20267_s4 + $0x30] sm:$0xff]  ;;  %v10489_v37 = vld [vmem:[%s20267_s4 + $0x28] sm:$0xff] }
0x1e6e   :  { %v10146_v45 = vpop.f32.mrf.mxu1  ;;  %v10488_v39 = vld [vmem:[%s20267_s4 + $0x20] sm:$0xff]  ;;  %v13013_v52 = vld [vmem:[%s20267_s4 + $0x190] sm:$0xff]  ;;  %v10505_v57 = vld [vmem:[%s20267_s4 + $0xa8] sm:$0xff] }
0x1e6f   :  { %v10274_v48 = vadd.f32 %v10263_v40, %v10145_v43  ;;  %v10147_v49 = vadd.f32 %v10146_v45, %v10039_v27  ;;  %v10293_v60 = vadd.f32 %v10285_v54, %v10273_v47  ;;  %v10300_v21 = vmax.f32 %v10292_v63, 0.0  ;;  %v10494_v27 = vld [vmem:[%s20267_s4 + $0x50] sm:$0xff]  ;;  %v10485_v45 = vld [vmem:[%s20267_s4 + $0x8] sm:$0xff]  ;;  %v10484_v47 = vld [vmem:[%s20267_s4] sm:$0xff] }
0x1e70   :  { %v12993_v40 = vld [vmem:[%s20267_s4 + $0xf0] sm:$0xff]  ;;  %v13007_v0 = vld [vmem:[%s20267_s4 + $0x160] sm:$0xff] }
0x1e71   :  { %v10275_v56 = vadd.f32 %v10265_v53, %v10147_v49  ;;  %v10294_v58 = vadd.f32 %v10281_v51, %v10274_v48  ;;  %v10301_v6 = vmax.f32 %v10293_v60, 0.0  ;;  %v10486_v43 = vld [vmem:[%s20267_s4 + $0x10] sm:$0xff]  ;;  %v10509_v49 = vld [vmem:[%s20267_s4 + $0xc8] sm:$0xff]  ;;  %v10508_v51 = vld [vmem:[%s20267_s4 + $0xc0] sm:$0xff] }
0x1e72   :  { %v12989_v48 = vld [vmem:[%s20267_s4 + $0xd0] sm:$0xff]  ;;  %v10507_v53 = vld [vmem:[%s20267_s4 + $0xb8] sm:$0xff] }
0x1e73   :  { %v10295_v61 = vadd.f32 %v10285_v54, %v10275_v56  ;;  %v10302_v4 = vmax.f32 %v10294_v58, 0.0  ;;  %v13012_v54 = vld [vmem:[%s20267_s4 + $0x188] sm:$0xff]  ;;  %v10506_v55 = vld [vmem:[%s20267_s4 + $0xb0] sm:$0xff]  ;;  %v13011_v56 = vld [vmem:[%s20267_s4 + $0x180] sm:$0xff] }
0x1e74   :  { %v13010_v58 = vld [vmem:[%s20267_s4 + $0x178] sm:$0xff]  ;;  %v13009_v60 = vld [vmem:[%s20267_s4 + $0x170] sm:$0xff] }
0x1e75   :  { %v10303_v1 = vmax.f32 %v10295_v61, 0.0  ;;  %v10503_v61 = vld [vmem:[%s20267_s4 + $0x98] sm:$0xff]  ;;  %v10502_v63 = vld [vmem:[%s20267_s4 + $0x90] sm:$0xff] }
0x1e77   :  { %12977 = vmatprep.subr.msk.mxu1 %vm450_vm2, %v10303_v1  ;;  %12983 = vmatprep.subr.msk.mxu0 %vm450_vm2, %v10303_v1  ;;  %v10501_v1 = vld [vmem:[%s20267_s4 + $0x88] sm:$0xff] }
0x1e78   :  { %12978 = vmatpush1.msk.msra.mxu1 %vm450_vm2, %v10302_v4  ;;  %12984 = vmatpush1.msk.msra.mxu0 %vm450_vm2, %v10302_v4  ;;  %v10500_v4 = vld [vmem:[%s20267_s4 + $0x80] sm:$0xff]  ;;  %vm11371_vm2 = vcmask 1047559  }
0x1e79   :  { %10344 = vmatprep.subr.mxu1 %v10301_v6  ;;  %10429 = vmatprep.subr.mxu0 %v10301_v6  ;;  %v13029_v6 = vld [vmem:[%s20270_s5 + $0xc8] sm:$0xff] }
0x1e7a   :  { %10345 = vmatpush1.msra.mxu1 %v10300_v21  ;;  %10430 = vmatpush1.msra.mxu0 %v10300_v21 }
0x1e7b   :  { %10346 = vmatprep.subr.mxu1 %v10299_v7  ;;  %10431 = vmatprep.subr.mxu0 %v10299_v7 }
0x1e7c   :  { %10347 = vmatpush1.msra.mxu1 %v10298_v8  ;;  %10432 = vmatpush1.msra.mxu0 %v10298_v8 }
0x1e7d   :  { %10348 = vmatprep.subr.mxu1 %v10297_v9  ;;  %10433 = vmatprep.subr.mxu0 %v10297_v9 }
0x1e7e   :  { %10349 = vmatpush1.msra.mxu1 %v10296_v10  ;;  %10434 = vmatpush1.msra.mxu0 %v10296_v10 }
0x1e7f   :  { %12979 = vmatmul.mubr.msk.f32.vlgmr.msra.gmra.mxu1 %vm443_vm3, %v10304_v11  ;;  %12985 = vmatmul.mubr.msk.f32.vlgmr.msra.gmra.mxu0 %vm443_vm3, %v12981_v12 }
0x1e80   :  { %10388 = vmatprep.mubr.f32.mxu1 %v15033_v3  ;;  %10473 = vmatprep.mubr.f32.mxu0 %v15033_v3 }
0x1e81   :  { %10516 = vmatprep.subr.mxu1 %v15033_v3  ;;  %10617 = vmatprep.subr.mxu0 %v15033_v3 }
0x1e82   :  { %10517 = vmatpush1.msra.mxu1 %v10499_v13  ;;  %10618 = vmatpush1.msra.mxu0 %v13004_v14  ;;  %v13028_v14 = vld [vmem:[%s20270_s5 + $0xc0] sm:$0xff] }
0x1e83   :  { %12980 = vmatmul.mubr.msk.f32.gmra.mxu1 %vm443_vm3, %v10305_v15  ;;  %12986 = vmatmul.mubr.msk.f32.gmra.mxu0 %vm443_vm3, %v12982_v17  ;;  %v10709_v15 = vld [vmem:[%s20270_s5 + $0x58] sm:$0xff]  ;;  %vm11373_vm3 = vcmask 326656  }
0x1e84   :  { %10518 = vmatprep.subr.mxu1 %v15033_v3  ;;  %10619 = vmatprep.subr.mxu0 %v15033_v3 }
0x1e85   :  { %10519 = vmatpush1.msra.mxu1 %v10498_v18  ;;  %10620 = vmatpush1.msra.mxu0 %v13003_v19 }
0x1e86   :  { %10520 = vmatprep.subr.mxu1 %v15033_v3  ;;  %10621 = vmatprep.subr.mxu0 %v15033_v3 }
0x1e87   :  { %10521 = vmatpush1.msra.mxu1 %v10497_v20  ;;  %10622 = vmatpush1.msra.mxu0 %v13002_v22  ;;  %v13027_v22 = vld [vmem:[%s20270_s5 + $0xb8] sm:$0xff] }
0x1e88   :  { %10522 = vmatprep.subr.mxu1 %v15033_v3  ;;  %10623 = vmatprep.subr.mxu0 %v15033_v3 }
0x1e89   :  { %10523 = vmatpush1.msra.mxu1 %v10496_v23  ;;  %10624 = vmatpush1.msra.mxu0 %v13001_v24  ;;  %v10708_v23 = vld [vmem:[%s20270_s5 + $0x50] sm:$0xff] }
0x1e8a   :  { %10524 = vmatprep.subr.mxu1 %v15033_v3  ;;  %10625 = vmatprep.subr.mxu0 %v15033_v3  ;;  %v13026_v24 = vld [vmem:[%s20270_s5 + $0xb0] sm:$0xff] }
0x1e8b   :  { %10525 = vmatpush1.msra.mxu1 %v10495_v25  ;;  %10626 = vmatpush1.msra.mxu0 %v13000_v26  ;;  %v10707_v25 = vld [vmem:[%s20270_s5 + $0x48] sm:$0xff] }
0x1e8c   :  { %10526 = vmatprep.subr.mxu1 %v15033_v3  ;;  %10627 = vmatprep.subr.mxu0 %v15033_v3  ;;  %v13025_v26 = vld [vmem:[%s20270_s5 + $0xa8] sm:$0xff] }
0x1e8d   :  { %10527 = vmatpush1.msra.mxu1 %v10494_v27  ;;  %10628 = vmatpush1.msra.mxu0 %v12999_v28  ;;  %v13024_v27 = vld [vmem:[%s20270_s5 + $0xa0] sm:$0xff] }
0x1e8e   :  { %10528 = vmatprep.subr.mxu1 %v15033_v3  ;;  %10629 = vmatprep.subr.mxu0 %v15033_v3  ;;  %v10706_v28 = vld [vmem:[%s20270_s5 + $0x40] sm:$0xff] }
0x1e8f   :  { %10529 = vmatpush1.msra.mxu1 %v10493_v29  ;;  %10630 = vmatpush1.msra.mxu0 %v12998_v30  ;;  %v10705_v29 = vld [vmem:[%s20270_s5 + $0x38] sm:$0xff] }
0x1e90   :  { %10530 = vmatprep.subr.mxu1 %v15033_v3  ;;  %10631 = vmatprep.subr.mxu0 %v15033_v3  ;;  %v13023_v30 = vld [vmem:[%s20270_s5 + $0x98] sm:$0xff] }
0x1e91   :  { %10531 = vmatpush1.msra.mxu1 %v10492_v31  ;;  %10632 = vmatpush1.msra.mxu0 %v12997_v32  ;;  %v10704_v31 = vld [vmem:[%s20270_s5 + $0x30] sm:$0xff] }
0x1e92   :  { %10532 = vmatprep.subr.mxu1 %v15033_v3  ;;  %10633 = vmatprep.subr.mxu0 %v15033_v3  ;;  %v13022_v32 = vld [vmem:[%s20270_s5 + $0x90] sm:$0xff] }
0x1e93   :  { %10533 = vmatpush1.msra.mxu1 %v10491_v33  ;;  %10634 = vmatpush1.msra.mxu0 %v12996_v34  ;;  %v10703_v33 = vld [vmem:[%s20270_s5 + $0x28] sm:$0xff] }
0x1e94   :  { %10534 = vmatprep.subr.mxu1 %v15033_v3  ;;  %10635 = vmatprep.subr.mxu0 %v15033_v3  ;;  %v13021_v34 = vld [vmem:[%s20270_s5 + $0x88] sm:$0xff] }
0x1e95   :  { %10535 = vmatpush1.msra.mxu1 %v10490_v35  ;;  %10636 = vmatpush1.msra.mxu0 %v12995_v36  ;;  %v10702_v35 = vld [vmem:[%s20270_s5 + $0x20] sm:$0xff] }
0x1e96   :  { %10536 = vmatprep.subr.mxu1 %v15033_v3  ;;  %10637 = vmatprep.subr.mxu0 %v15033_v3  ;;  %v13020_v36 = vld [vmem:[%s20270_s5 + $0x80] sm:$0xff] }
0x1e97   :  { %10537 = vmatpush1.msra.mxu1 %v10489_v37  ;;  %10638 = vmatpush1.msra.mxu0 %v12994_v38  ;;  %v10701_v37 = vld [vmem:[%s20270_s5 + $0x18] sm:$0xff] }
0x1e98   :  { %10538 = vmatprep.subr.mxu1 %v15033_v3  ;;  %10639 = vmatprep.subr.mxu0 %v15033_v3  ;;  %v13019_v38 = vld [vmem:[%s20270_s5 + $0x78] sm:$0xff] }
0x1e99   :  { %10539 = vmatpush1.msra.mxu1 %v10488_v39  ;;  %10640 = vmatpush1.msra.mxu0 %v12993_v40  ;;  %v10700_v39 = vld [vmem:[%s20270_s5 + $0x10] sm:$0xff] }
0x1e9a   :  { %10540 = vmatprep.subr.mxu1 %v15033_v3  ;;  %10641 = vmatprep.subr.mxu0 %v15033_v3  ;;  %v13018_v40 = vld [vmem:[%s20270_s5 + $0x70] sm:$0xff] }
0x1e9b   :  { %10541 = vmatpush1.msra.mxu1 %v10487_v41  ;;  %10642 = vmatpush1.msra.mxu0 %v12992_v42  ;;  %v10699_v41 = vld [vmem:[%s20270_s5 + $0x8] sm:$0xff] }
0x1e9c   :  { %10542 = vmatprep.subr.mxu1 %v15033_v3  ;;  %10643 = vmatprep.subr.mxu0 %v15033_v3  ;;  %v13017_v42 = vld [vmem:[%s20270_s5 + $0x68] sm:$0xff] }
0x1e9d   :  { %10543 = vmatpush1.msra.mxu1 %v10486_v43  ;;  %10644 = vmatpush1.msra.mxu0 %v12991_v44  ;;  %v10698_v43 = vld [vmem:[%s20270_s5] sm:$0xff]  ;;  %v13046_v44 = vld [vmem:[%s20270_s5 + $0x130] sm:$0xff] }
0x1e9e   :  { %10544 = vmatprep.subr.mxu1 %v15033_v3  ;;  %10645 = vmatprep.subr.mxu0 %v15033_v3 }
0x1e9f   :  { %10545 = vmatpush1.msra.mxu1 %v10485_v45  ;;  %10646 = vmatpush1.msra.mxu0 %v12990_v46 }
0x1ea0   :  { %10546 = vmatprep.subr.mxu1 %v15033_v3  ;;  %10647 = vmatprep.subr.mxu0 %v15033_v3 }
0x1ea1   :  { %10547 = vmatpush1.msra.mxu1 %v10484_v47  ;;  %10648 = vmatpush1.msra.mxu0 %v12989_v48 }
0x1ea2   :  { %10560 = vmatprep.subr.mxu1 %v15033_v3  ;;  %10661 = vmatprep.subr.mxu0 %v15033_v3 }
0x1ea3   :  { %10561 = vmatpush2.msra.mxu1 %v10509_v49  ;;  %10662 = vmatpush2.msra.mxu0 %v13014_v50 }
0x1ea4   :  { %10562 = vmatprep.subr.mxu1 %v15033_v3  ;;  %10663 = vmatprep.subr.mxu0 %v15033_v3 }
0x1ea5   :  { %10563 = vmatpush2.msra.mxu1 %v10508_v51  ;;  %10664 = vmatpush2.msra.mxu0 %v13013_v52 }
0x1ea6   :  { %10564 = vmatprep.subr.mxu1 %v15033_v3  ;;  %10665 = vmatprep.subr.mxu0 %v15033_v3 }
0x1ea7   :  { %10565 = vmatpush2.msra.mxu1 %v10507_v53  ;;  %10666 = vmatpush2.msra.mxu0 %v13012_v54 }
0x1ea8   :  { %10566 = vmatprep.subr.mxu1 %v15033_v3  ;;  %10667 = vmatprep.subr.mxu0 %v15033_v3 }
0x1ea9   :  { %10567 = vmatpush2.msra.mxu1 %v10506_v55  ;;  %10668 = vmatpush2.msra.mxu0 %v13011_v56 }
0x1eaa   :  { %10568 = vmatprep.subr.mxu1 %v15033_v3  ;;  %10669 = vmatprep.subr.mxu0 %v15033_v3 }
0x1eab   :  { %10569 = vmatpush2.msra.mxu1 %v10505_v57  ;;  %10670 = vmatpush2.msra.mxu0 %v13010_v58  ;;  %v13045_v58 = vld [vmem:[%s20270_s5 + $0x128] sm:$0xff] }
0x1eac   :  { %10570 = vmatprep.subr.mxu1 %v15033_v3  ;;  %10671 = vmatprep.subr.mxu0 %v15033_v3 }
0x1ead   :  { %10571 = vmatpush2.msra.mxu1 %v10504_v59  ;;  %10672 = vmatpush2.msra.mxu0 %v13009_v60 }
0x1eae   :  { %10572 = vmatprep.subr.mxu1 %v15033_v3  ;;  %10673 = vmatprep.subr.mxu0 %v15033_v3 }
0x1eaf   :  { %10573 = vmatpush2.msra.mxu1 %v10503_v61  ;;  %10674 = vmatpush2.msra.mxu0 %v13008_v62  ;;  %v13044_v61 = vld [vmem:[%s20270_s5 + $0x120] sm:$0xff]  ;;  %v13043_v62 = vld [vmem:[%s20270_s5 + $0x118] sm:$0xff] }
0x1eb0   :  { %10574 = vmatprep.subr.mxu1 %v15033_v3  ;;  %10675 = vmatprep.subr.mxu0 %v15033_v3 }
0x1eb1   :  { %10575 = vmatpush2.msra.mxu1 %v10502_v63  ;;  %10676 = vmatpush2.msra.mxu0 %v13007_v0  ;;  %v13042_v63 = vld [vmem:[%s20270_s5 + $0x110] sm:$0xff]  ;;  %v13041_v0 = vld [vmem:[%s20270_s5 + $0x108] sm:$0xff] }
0x1eb2   :  { %10576 = vmatprep.subr.mxu1 %v15033_v3  ;;  %10677 = vmatprep.subr.mxu0 %v15033_v3 }
0x1eb3   :  { %10577 = vmatpush2.msra.mxu1 %v10501_v1  ;;  %10678 = vmatpush2.msra.mxu0 %v13006_v2  ;;  %v13040_v1 = vld [vmem:[%s20270_s5 + $0x100] sm:$0xff]  ;;  %v13039_v2 = vld [vmem:[%s20270_s5 + $0xf8] sm:$0xff] }
0x1eb4   :  { %10578 = vmatprep.subr.mxu1 %v15033_v3  ;;  %10679 = vmatprep.subr.mxu0 %v15033_v3 }
0x1eb5   :  { %10579 = vmatpush2.msra.mxu1 %v10500_v4  ;;  %10680 = vmatpush2.msra.mxu0 %v13005_v5  ;;  %v13038_v4 = vld [vmem:[%s20270_s5 + $0xf0] sm:$0xff]  ;;  %v13037_v5 = vld [vmem:[%s20270_s5 + $0xe8] sm:$0xff] }
0x1eb6   :  { %14792 = vmatprep.subr.mxu1 %v13029_v6  ;;  %14821 = vmatprep.subr.mxu0 %v10710_v16 }
0x1f3f   :  { %v10384_v21 = vpop.f32.mrf.mxu1  ;;  %v10469_v7 = vpop.f32.mrf.mxu0 }
0x1f40   :  { %v10480_v11 = vmax.f32 %v10384_v21, %v10469_v7  ;;  %v13034_v21 = vld [vmem:[%s20270_s5 + $0xd0] sm:$0xff] }
0x1f41   :  { %v10386_v8 = vpop.f32.mrf.mxu1  ;;  %v10471_v9 = vpop.f32.mrf.mxu0 }
0x1f42   :  { %v10481_v10 = vmax.f32 %v10386_v8, %v10471_v9  ;;  %v13066_v8 = vld [vmem:[%s20271_s8 + $0xa8] sm:$0xff]  ;;  %v13065_v9 = vld [vmem:[%s20271_s8 + $0xa0] sm:$0xff] }
0x1f43   :  { %v10390_v12 = vpop.f32.mrf.mxu1  ;;  %v10475_v13 = vpop.f32.mrf.mxu0 }
0x1f44   :  { %12987 = vmatprep.mubr.msk.f32.mxu1 %vm650_vm4, %v10481_v10  ;;  %13015 = vmatprep.mubr.msk.f32.mxu0 %vm650_vm4, %v10481_v10  ;;  %v10482_v20 = vmax.f32 %v10390_v12, %v10475_v13  ;;  %v13064_v10 = vld [vmem:[%s20271_s8 + $0x98] sm:$0xff]  ;;  %v13062_v12 = vld [vmem:[%s20271_s8 + $0x88] sm:$0xff]  ;;  %v13061_v13 = vld [vmem:[%s20271_s8 + $0x80] sm:$0xff] }
0x1f45   :  { %v10392_v17 = vpop.f32.mrf.mxu1  ;;  %v10477_v18 = vpop.f32.mrf.mxu0  ;;  %10581 = vmatmul.mubr.f32.vlgmr.msra.gmra.mxu1 %v10480_v11  ;;  %10682 = vmatmul.mubr.f32.vlgmr.msra.gmra.mxu0 %v10480_v11  ;;  %v13063_v11 = vld [vmem:[%s20271_s8 + $0x90] sm:$0xff] }
0x1f46   :  { %v10483_v19 = vmax.f32 %v10392_v17, %v10477_v18  ;;  %14793 = vmatpush3.msra.mxu1 %v13029_v6  ;;  %14822 = vmatpush3.msra.mxu0 %v10710_v16  ;;  %v13036_v6 = vld [vmem:[%s20270_s5 + $0xe0] sm:$0xff]  ;;  %v13035_v16 = vld [vmem:[%s20270_s5 + $0xd8] sm:$0xff] }
0x1f47   :  { %14794 = vmatprep.subr.mxu1 %v13028_v14  ;;  %14823 = vmatprep.subr.mxu0 %v10709_v15 }
0x1f48   :  { %12988 = vmatprep.mubr.msk.f32.mxu1 %vm650_vm4, %v10483_v19  ;;  %13016 = vmatprep.mubr.msk.f32.mxu0 %vm650_vm4, %v10483_v19  ;;  %vm11891_vm4 = vcmask 523264  }
0x1f49   :  { %10586 = vmatmul.mubr.f32.gmra.mxu1 %v10482_v20  ;;  %10687 = vmatmul.mubr.f32.gmra.mxu0 %v10482_v20 }
0x1f4a   :  { %14795 = vmatpush3.msra.mxu1 %v13028_v14  ;;  %14824 = vmatpush3.msra.mxu0 %v10709_v15  ;;  %v13060_v14 = vld [vmem:[%s20271_s8 + $0x78] sm:$0xff] }
0x1f4b   :  { %14796 = vmatprep.subr.mxu1 %v13027_v22  ;;  %14825 = vmatprep.subr.mxu0 %v10708_v23 }
0x1f4c   :  { %14797 = vmatpush3.msra.mxu1 %v13027_v22  ;;  %14826 = vmatpush3.msra.mxu0 %v10708_v23  ;;  %v13049_v23 = vld [vmem:[%s20272_s6] ss:$0 sm:$0xff] }
0x1f4d   :  { %14798 = vmatprep.subr.mxu1 %v13026_v24  ;;  %14827 = vmatprep.subr.mxu0 %v10707_v25 }
0x1f4e   :  { %14799 = vmatpush3.msra.mxu1 %v13026_v24  ;;  %14828 = vmatpush3.msra.mxu0 %v10707_v25 }
0x1f4f   :  { %14800 = vmatprep.subr.mxu1 %v13025_v26  ;;  %14829 = vmatprep.subr.mxu0 %v10706_v28 }
0x1f50   :  { %14801 = vmatpush3.msra.mxu1 %v13025_v26  ;;  %14830 = vmatpush3.msra.mxu0 %v10706_v28 }
0x1f51   :  { %14802 = vmatprep.subr.mxu1 %v13024_v27  ;;  %14831 = vmatprep.subr.mxu0 %v10705_v29 }
0x1f52   :  { %14803 = vmatpush3.msra.mxu1 %v13024_v27  ;;  %14832 = vmatpush3.msra.mxu0 %v10705_v29 }
0x1f53   :  { %14804 = vmatprep.subr.mxu1 %v13023_v30  ;;  %14833 = vmatprep.subr.mxu0 %v10704_v31 }
0x1f54   :  { %14805 = vmatpush3.msra.mxu1 %v13023_v30  ;;  %14834 = vmatpush3.msra.mxu0 %v10704_v31 }
0x1f55   :  { %14806 = vmatprep.subr.mxu1 %v13022_v32  ;;  %14835 = vmatprep.subr.mxu0 %v10703_v33 }
0x1f56   :  { %14807 = vmatpush3.msra.mxu1 %v13022_v32  ;;  %14836 = vmatpush3.msra.mxu0 %v10703_v33  ;;  %v10997_v32 = vld [vmem:[%s20273_s7] sm:$0x1f]  ;;  %v13052_v33 = vld [vmem:[%s20273_s7 + $0x8] sm:$0x1f] }
0x1f57   :  { %14808 = vmatprep.subr.mxu1 %v13021_v34  ;;  %14837 = vmatprep.subr.mxu0 %v10702_v35 }
0x1f58   :  { %14809 = vmatpush3.msra.mxu1 %v13021_v34  ;;  %14838 = vmatpush3.msra.mxu0 %v10702_v35  ;;  %v11159_v34 = vld [vmem:[%s20271_s8 + $0x50] sm:$0xff]  ;;  %v11158_v35 = vld [vmem:[%s20271_s8 + $0x48] sm:$0xff] }
0x1f59   :  { %14810 = vmatprep.subr.mxu1 %v13020_v36  ;;  %14839 = vmatprep.subr.mxu0 %v10701_v37 }
0x1f5a   :  { %14811 = vmatpush3.msra.mxu1 %v13020_v36  ;;  %14840 = vmatpush3.msra.mxu0 %v10701_v37  ;;  %v11157_v36 = vld [vmem:[%s20271_s8 + $0x40] sm:$0xff]  ;;  %v11156_v37 = vld [vmem:[%s20271_s8 + $0x38] sm:$0xff] }
0x1f5b   :  { %14812 = vmatprep.subr.mxu1 %v13019_v38  ;;  %14841 = vmatprep.subr.mxu0 %v10700_v39 }
0x1f5c   :  { %14813 = vmatpush3.msra.mxu1 %v13019_v38  ;;  %14842 = vmatpush3.msra.mxu0 %v10700_v39  ;;  %v11155_v38 = vld [vmem:[%s20271_s8 + $0x30] sm:$0xff]  ;;  %v11154_v39 = vld [vmem:[%s20271_s8 + $0x28] sm:$0xff] }
0x1f5d   :  { %14814 = vmatprep.subr.mxu1 %v13018_v40  ;;  %14843 = vmatprep.subr.mxu0 %v10699_v41 }
0x1f5e   :  { %14815 = vmatpush3.msra.mxu1 %v13018_v40  ;;  %14844 = vmatpush3.msra.mxu0 %v10699_v41  ;;  %v11153_v40 = vld [vmem:[%s20271_s8 + $0x20] sm:$0xff]  ;;  %v11152_v41 = vld [vmem:[%s20271_s8 + $0x18] sm:$0xff] }
0x1f5f   :  { %14816 = vmatprep.subr.mxu1 %v13017_v42  ;;  %14845 = vmatprep.subr.mxu0 %v10698_v43 }
0x1f60   :  { %14817 = vmatpush3.msra.mxu1 %v13017_v42  ;;  %14846 = vmatpush3.msra.mxu0 %v10698_v43  ;;  %v13059_v42 = vld [vmem:[%s20271_s8 + $0x70] sm:$0xff] }
0x1f61   :  { %14850 = vmatprep.subr.mxu1 %v13046_v44  ;;  %14879 = vmatprep.subr.mxu0 %v15033_v3  ;;  %v11151_v43 = vld [vmem:[%s20271_s8 + $0x10] sm:$0xff] }
0x2005   :  { %v10582_v45 = vpop.f32.mrf.mxu1  ;;  %v10683_v46 = vpop.f32.mrf.mxu0 }
0x2006   :  { %v10692_v47 = vmax.f32 %v10582_v45, %v10683_v46  ;;  %v11150_v45 = vld [vmem:[%s20271_s8 + $0x8] sm:$0xff]  ;;  %v13057_v46 = vld [vmem:[%s20271_s8 + $0x60] sm:$0xff] }
0x2007   :  { %v10584_v48 = vpop.f32.mrf.mxu1  ;;  %v10685_v49 = vpop.f32.mrf.mxu0 }
0x2008   :  { %10694 = vst.msk [vmem:[#allocation2] sm:$0xff] %vm836_vm5, %v10692_v47  ;;  %v11149_v47 = vld [vmem:[%s20271_s8] sm:$0xff]  ;;  %v13056_v48 = vld [vmem:[%s20271_s8 + $0x58] sm:$0xff] }
0x2009   :  { %v10587_v50 = vpop.f32.mrf.mxu1  ;;  %v10688_v51 = vpop.f32.mrf.mxu0 }
0x200a   :  { %v10693_v52 = vmax.f32 %v10587_v50, %v10688_v51 }
0x200b   :  { %v10589_v53 = vpop.f32.mrf.mxu1  ;;  %v10690_v54 = vpop.f32.mrf.mxu0 }
0x200c   :  { %10695 = vst.msk [vmem:[#allocation2 + $0x8] sm:$0x1f] %vm838_vm6, %v10693_v52  ;;  %v13072_v54 = vld [vmem:[%s20274_s9 + $0x48] sm:$0xff] }
0x200f   :  { %v10696_v55 = vld [vmem:[#allocation2] sm:$0xff] }
0x2010   :  { %14847 = vmatprep.mubr.msk.f32.mxu0 %vm836_vm5, %v10696_v55  ;;  %v13079_v55 = vld [vmem:[%s20274_s9 + $0x70] sm:$0xff] }
0x2013   :  { %v10711_v56 = vld [vmem:[#allocation2 + $0x1] sm:$0xff]  ;;  %v10712_v57 = vld [vmem:[#allocation2 + $0x9] sm:$0x7] }
0x2014   :  { %14818 = vmatprep.mubr.msk.f32.mxu1 %vm836_vm5, %v10711_v56  ;;  %v10697_v59 = vld [vmem:[#allocation2 + $0x8] sm:$0x7]  ;;  %v13071_v56 = vld [vmem:[%s20274_s9 + $0x40] sm:$0xff] }
0x2015   :  { %14819 = vmatmul.mubr.msk.f32.vlgmr.msra.gmra.mxu1 %vm836_vm5, %v10712_v57  ;;  %v10888_v60 = vld [vmem:[#allocation2 + $0x2] sm:$0xff]  ;;  %14848 = vmatmul.mubr.msk.f32.vlgmr.msra.gmra.mxu0 %vm836_vm5, %v10697_v59  ;;  %v10889_v7 = vld [vmem:[#allocation2 + $0xa] sm:$0x7] }
0x2016   :  { %14851 = vmatpush3.msra.mxu1 %v13046_v44  ;;  %14876 = vmatprep.mubr.msk.f32.mxu1 %vm836_vm5, %v10888_v60  ;;  %v13058_v44 = vld [vmem:[%s20271_s8 + $0x68] sm:$0xff]  ;;  %v13077_v59 = vld [vmem:[%s20274_s9 + $0x60] sm:$0xff]  ;;  %v13069_v60 = vld [vmem:[%s20274_s9 + $0x30] sm:$0xff] }
0x2017   :  { %14852 = vmatprep.subr.mxu1 %v13045_v58  ;;  %14883 = vmatprep.mubr.msk.f32.mxu0 %vm15034_vm7, %v15033_v3  ;;  %v13078_v57 = vld [vmem:[%s20274_s9 + $0x68] sm:$0xff] }
0x2018   :  { %14853 = vmatpush3.msra.mxu1 %v13045_v58  ;;  %v13070_v58 = vld [vmem:[%s20274_s9 + $0x38] sm:$0xff] }
0x2019   :  { %14854 = vmatprep.subr.mxu1 %v13044_v61 }
0x201a   :  { %14855 = vmatpush3.msra.mxu1 %v13044_v61  ;;  %v13076_v61 = vld [vmem:[%s20274_s9 + $0x58] sm:$0xff] }
0x201b   :  { %14856 = vmatprep.subr.mxu1 %v13043_v62 }
0x201c   :  { %14857 = vmatpush3.msra.mxu1 %v13043_v62  ;;  %v13068_v62 = vld [vmem:[%s20274_s9 + $0x28] sm:$0xff] }
0x201d   :  { %14858 = vmatprep.subr.mxu1 %v13042_v63 }
0x201e   :  { %14859 = vmatpush3.msra.mxu1 %v13042_v63  ;;  %v13075_v63 = vld [vmem:[%s20274_s9 + $0x50] sm:$0xff] }
0x201f   :  { %14860 = vmatprep.subr.mxu1 %v13041_v0 }
0x2020   :  { %14861 = vmatpush3.msra.mxu1 %v13041_v0  ;;  %v11331_v0 = vld [vmem:[#allocation3 + $0x9] sm:$0x1] }
0x2021   :  { %14862 = vmatprep.subr.mxu1 %v13040_v1 }
0x2022   :  { %14863 = vmatpush3.msra.mxu1 %v13040_v1 }
0x2023   :  { %14864 = vmatprep.subr.mxu1 %v13039_v2 }
0x2024   :  { %14865 = vmatpush3.msra.mxu1 %v13039_v2 }
0x2025   :  { %14866 = vmatprep.subr.mxu1 %v13038_v4 }
0x2026   :  { %14867 = vmatpush3.msra.mxu1 %v13038_v4  ;;  %v11332_v4 = vld [vmem:[#allocation3 + $0x11] sm:$0x1] }
0x2027   :  { %14868 = vmatprep.subr.mxu1 %v13037_v5 }
0x2028   :  { %14869 = vmatpush3.msra.mxu1 %v13037_v5  ;;  %v11541_v5 = vld [vmem:[#allocation3 + $0xa] sm:$0x1] }
0x2029   :  { %14870 = vmatprep.subr.mxu1 %v13036_v6 }
0x202a   :  { %14871 = vmatpush3.msra.mxu1 %v13036_v6 }
0x202b   :  { %14872 = vmatprep.subr.mxu1 %v13035_v16 }
0x202c   :  { %14873 = vmatpush3.msra.mxu1 %v13035_v16  ;;  %v11333_v16 = vld [vmem:[#allocation3 + $0x19] sm:$0x1] }
0x202d   :  { %14874 = vmatprep.subr.mxu1 %v13034_v21 }
0x202e   :  { %14875 = vmatpush3.msra.mxu1 %v13034_v21  ;;  %v11542_v21 = vld [vmem:[#allocation3 + $0x12] sm:$0x1] }
0x202f   :  { %14877 = vmatmul.mubr.msk.f32.vlgmr.msra.gmra.mxu1 %vm836_vm5, %v10889_v7  ;;  %14918 = vmatprep.subr.mxu1 %v15033_v3  ;;  %vm11965_vm5 = vcmask 80896  }
0x2030   :  { %14940 = vmatprep.mubr.msk.f32.mxu1 %vm15034_vm7, %v15033_v3  ;;  %14919 = vmatpush3.msra.mxu1 %v13066_v8 }
0x2031   :  { %14920 = vmatprep.subr.mxu1 %v15033_v3 }
0x2032   :  { %14921 = vmatpush3.msra.mxu1 %v13065_v9  ;;  %v11334_v9 = vld [vmem:[#allocation3 + $0x21] sm:$0x1] }
0x2033   :  { %14922 = vmatprep.subr.mxu1 %v15033_v3 }
0x2034   :  { %14923 = vmatpush3.msra.mxu1 %v13064_v10  ;;  %v11352_v10 = vrot.slane %v11331_v0, 7  ;;  %v11317_v0 = vld [vmem:[#allocation3] sm:$0x1] }
0x2035   :  { %14924 = vmatprep.subr.mxu1 %v15033_v3 }
0x2036   :  { %14925 = vmatpush3.msra.mxu1 %v13063_v11  ;;  %v11543_v11 = vld [vmem:[#allocation3 + $0x1a] sm:$0x1] }
0x2037   :  { %14926 = vmatprep.subr.mxu1 %v15033_v3 }
0x2038   :  { %14927 = vmatpush3.msra.mxu1 %v13062_v12  ;;  %v11330_v12 = vld [vmem:[#allocation3 + $0x1] sm:$0x1] }
0x2039   :  { %14928 = vmatprep.subr.mxu1 %v15033_v3 }
0x203a   :  { %14929 = vmatpush3.msra.mxu1 %v13061_v13  ;;  %v11335_v13 = vld [vmem:[#allocation3 + $0x29] sm:$0x1] }
0x203b   :  { %14930 = vmatprep.subr.mxu1 %v15033_v3 }
0x203c   :  { %14931 = vmatpush3.msra.mxu1 %v13060_v14  ;;  %v11355_v14 = vrot.slane %v11332_v4, 6  ;;  %v11763_v4 = vld [vmem:[#allocation3 + $0x2c] sm:$0x1] }
0x203d   :  { %14932 = vmatprep.subr.mxu1 %v15033_v3 }
0x203e   :  { %14933 = vmatpush3.msra.mxu1 %v13059_v42 }
0x203f   :  { %14934 = vmatprep.subr.mxu1 %v15033_v3 }
0x2040   :  { %14935 = vmatpush3.msra.mxu1 %v13058_v44 }
0x2041   :  { %14936 = vmatprep.subr.mxu1 %v15033_v3 }
0x2042   :  { %14937 = vmatpush3.msra.mxu1 %v13057_v46 }
0x2043   :  { %14938 = vmatprep.subr.mxu1 %v15033_v3 }
0x2044   :  { %14939 = vmatpush3.msra.mxu1 %v13056_v48  ;;  %v11319_v48 = vld [vmem:[#allocation3 + $0x10] sm:$0x1] }
0x2045   :  { %14969 = vmatprep.subr.mxu1 %v15033_v3 }
0x20d5   :  { %v14820_v15 = vpop.f32.mrf.mxu1  ;;  %v14849_v17 = vpop.f32.mrf.mxu0 }
0x20d6   :  { %v10885_v20 = vadd.f32 %v14849_v17, %v14820_v15  ;;  %v11544_v15 = vld [vmem:[#allocation3 + $0x22] sm:$0x1]  ;;  %v11562_v17 = vrot.slane %v11541_v5, 7 }
0x20d7   :  { %v10798_v18 = vpop.f32.mrf.mxu1  ;;  %v10879_v19 = vpop.f32.mrf.mxu0  ;;  %v11327_v5 = vld [vmem:[%s20274_s9 + $0x10] sm:$0xff] }
0x20d8   :  { %v10880_v24 = vadd.f32 %v10879_v19, %v10798_v18  ;;  %v11358_v18 = vrot.slane %v11333_v16, 5  ;;  %v11545_v19 = vld [vmem:[#allocation3 + $0x2a] sm:$0x1]  ;;  %v11323_v16 = vld [vmem:[#allocation3 + $0x30] sm:$0x1] }
0x20ef   :  { %v14878_v22 = vpop.f32.mrf.mxu1 }
0x20f0   :  { %v10985_v25 = vadd.f32 %v14878_v22, %v10885_v20  ;;  %v11564_v20 = vrot.slane %v11542_v21, 6  ;;  %v11336_v22 = vld [vmem:[#allocation3 + $0x31] sm:$0x1] }
0x20f1   :  { %v10975_v26 = vpop.f32.mrf.mxu1 }
0x20f2   :  { %v10994_v27 = vadd.f32 %v13049_v23, %v10985_v25  ;;  %v10984_v28 = vadd.f32 %v10975_v26, %v10880_v24  ;;  %v11546_v24 = vld [vmem:[#allocation3 + $0x32] sm:$0x1]  ;;  %v11566_v25 = vrot.slane %v11543_v11, 5  ;;  %v11354_v26 = vsel %vm11353_vm12, %v11352_v10, %v11330_v12  ;;  %v11764_v11 = vld [vmem:[#allocation3 + $0x34] sm:$0x1] }
0x20f4   :  { %v10996_v29 = vmax.f32 %v10994_v27, 0.0  ;;  %v10993_v30 = vadd.f32 %v13049_v23, %v10984_v28  ;;  %v11361_v23 = vrot.slane %v11334_v9, 4  ;;  %v11364_v27 = vrot.slane %v11335_v13, 3  ;;  %v11540_v28 = vld [vmem:[#allocation3 + $0x2] sm:$0x1]  ;;  %v11326_v13 = vld [vmem:[%s20274_s9 + $0x8] sm:$0xff] }
0x20f6   :  { %v10995_v31 = vmax.f32 %v10993_v30, 0.0  ;;  %14880 = vmatpush3.msk.msra.mxu0 %vm1148_vm8, %v10996_v29  ;;  %v11357_v30 = vsel %vm11356_vm13, %v11355_v14, %v11354_v26  ;;  %v13088_v14 = vld [vmem:[%s20274_s9 + $0xa8] sm:$0xff] }
0x20f7   :  { %14881 = vmatprep.subr.mxu0 %v15033_v3 }
0x20f8   :  { %14882 = vmatpush3.msra.mxu0 %v10995_v31 }
0x20f9   :  { %14884 = vmatmul.mubr.msk.f32.vlgmr.msra.gmra.mxu0 %vm1144_vm9, %v10997_v32  ;;  %14886 = vmatprep.subr.mxu0 %v15033_v3  ;;  %v11570_v32 = vrot.slane %v11545_v19, 3 }
0x20fa   :  { %14887 = vmatpush3.msk.msra.mxu0 %vm1148_vm8, %v10996_v29  ;;  %14890 = vmatprep.mubr.msk.f32.mxu0 %vm15034_vm7, %v15033_v3  ;;  %v11568_v29 = vrot.slane %v11544_v15, 4 }
0x20fb   :  { %14888 = vmatprep.subr.mxu0 %v15033_v3 }
0x20fc   :  { %14889 = vmatpush3.msra.mxu0 %v10995_v31  ;;  %v11563_v31 = vsel %vm11353_vm12, %v11562_v17, %v11540_v28 }
0x20fd   :  { %14891 = vmatmul.mubr.msk.f32.vlgmr.msra.gmra.mxu0 %vm1144_vm9, %v13052_v33  ;;  %14893 = vmatprep.subr.mxu0 %v15033_v3  ;;  %v11360_v33 = vsel %vm11359_vm14, %v11358_v18, %v11357_v30  ;;  %v13087_v30 = vld [vmem:[%s20274_s9 + $0xa0] sm:$0xff] }
0x20fe   :  { %14894 = vmatpush3.msra.mxu0 %v11159_v34  ;;  %14915 = vmatprep.mubr.msk.f32.mxu0 %vm15034_vm7, %v15033_v3  ;;  %v11367_v34 = vrot.slane %v11336_v22, 2  ;;  %v11464_v22 = vrot.slane %v11323_v16, 2  ;;  %v11881_v16 = vld [vmem:[%s20275_s11 + $0x28] sm:$0xff] }
0x20ff   :  { %14895 = vmatprep.subr.mxu0 %v15033_v3 }
0x2100   :  { %14896 = vmatpush3.msra.mxu0 %v11158_v35  ;;  %v11565_v35 = vsel %vm11356_vm13, %v11564_v20, %v11563_v31 }
0x2101   :  { %14897 = vmatprep.subr.mxu0 %v15033_v3 }
0x2102   :  { %14898 = vmatpush3.msra.mxu0 %v11157_v36  ;;  %v11572_v36 = vrot.slane %v11546_v24, 2  ;;  %v11788_v24 = vrot.slane %v11763_v4, 3 }
0x2103   :  { %14899 = vmatprep.subr.mxu0 %v15033_v3 }
0x2104   :  { %14900 = vmatpush3.msra.mxu0 %v11156_v37  ;;  %v11363_v37 = vsel %vm11362_vm15, %v11361_v23, %v11360_v33 }
0x2105   :  { %14901 = vmatprep.subr.mxu0 %v15033_v3  ;;  %v11366_v42 = vsel %vm11365_vm0, %v11364_v27, %v11363_v37  ;;  %v11651_v37 = vld [vmem:[#allocation3 + $0x13] sm:$0x1] }
0x2106   :  { %14902 = vmatpush3.msra.mxu0 %v11155_v38  ;;  %v11567_v38 = vsel %vm11359_vm14, %v11566_v25, %v11565_v35  ;;  %v11325_v25 = vld [vmem:[%s20274_s9] sm:$0xff] }
0x2107   :  { %14903 = vmatprep.subr.mxu0 %v15033_v3  ;;  %v11569_v44 = vsel %vm11362_vm15, %v11568_v29, %v11567_v38  ;;  %v11790_v29 = vrot.slane %v11764_v11, 2 }
0x2108   :  { %14904 = vmatpush3.msra.mxu0 %v11154_v39  ;;  %v11318_v39 = vld [vmem:[#allocation3 + $0x8] sm:$0x1]  ;;  %v11571_v46 = vsel %vm11365_vm0, %v11570_v32, %v11569_v44  ;;  %v11653_v44 = vld [vmem:[#allocation3 + $0x23] sm:$0x1] }
0x2109   :  { %14905 = vmatprep.subr.mxu0 %v15033_v3 }
0x210a   :  { %14906 = vmatpush3.msra.mxu0 %v11153_v40  ;;  %v11759_v40 = vld [vmem:[#allocation3 + $0xc] sm:$0x1] }
0x210b   :  { %14907 = vmatprep.subr.mxu0 %v15033_v3 }
0x210c   :  { %14908 = vmatpush3.msra.mxu0 %v11152_v41 }
0x210d   :  { %14909 = vmatprep.subr.mxu0 %v15033_v3 }
0x210e   :  { %14910 = vmatpush3.msra.mxu0 %v11151_v43 }
0x210f   :  { %14911 = vmatprep.subr.mxu0 %v15033_v3 }
0x2110   :  { %14912 = vmatpush3.msra.mxu0 %v11150_v45 }
0x2111   :  { %14913 = vmatprep.subr.mxu0 %v15033_v3 }
0x2112   :  { %14914 = vmatpush3.msra.mxu0 %v11149_v47 }
0x2113   :  { %14943 = vmatprep.subr.mxu0 %v15033_v3 }
0x21b9   :  { %v11070_v49 = vpop.f32.mrf.mxu0 }
0x21bb   :  { %v14885_v50 = vpop.f32.mrf.mxu0 }
0x21bc   :  { %v11329_v50 = vld [vmem:[%s20274_s9 + $0x20] sm:$0xff] }
0x21bd   :  { %v11144_v51 = vpop.f32.mrf.mxu0 }
0x21be   :  { %v11148_v52 = vmax.f32 %v11070_v49, %v11144_v51  ;;  %v11369_v49 = vsel %vm11368_vm1, %v11367_v34, %v11366_v42  ;;  %v11573_v51 = vsel %vm11368_vm1, %v11572_v36, %v11571_v46  ;;  %v11650_v34 = vld [vmem:[#allocation3 + $0xb] sm:$0x1] }
0x21bf   :  { %v14892_v53 = vpop.f32.mrf.mxu0 }
0x21c0   :  { %14916 = vmatmul.mubr.msk.f32.vlgmr.msra.gmra.mxu0 %vm1309_vm10, %v11148_v52  ;;  %14941 = vmatmul.mubr.msk.f32.vlgmr.msra.gmra.mxu1 %vm1309_vm10, %v11148_v52  ;;  %v13091_v52 = vld [vmem:[%s20274_s9 + $0xc0] sm:$0xff]  ;;  %v11454_v53 = vrot.slane %v11318_v39, 7 }
0x21c1   :  { %14953 = vmatprep.mubr.msk.f32.mxu0 %vm15034_vm7, %v15033_v3  ;;  %14979 = vmatprep.mubr.msk.f32.mxu1 %vm15034_vm7, %v15033_v3 }
0x21c2   :  { %14944 = vmatpush3.msra.mxu0 %v13072_v54  ;;  %14970 = vmatpush3.msra.mxu1 %v13079_v55  ;;  %v11455_v15 = vsel %vm11353_vm12, %v11454_v53, %v11317_v0  ;;  %v11649_v53 = vld [vmem:[#allocation3 + $0x3] sm:$0x1] }
0x21c3   :  { %14945 = vmatprep.subr.mxu0 %v15033_v3  ;;  %14971 = vmatprep.subr.mxu1 %v15033_v3 }
0x21c4   :  { %14946 = vmatpush3.msra.mxu0 %v13071_v56  ;;  %14972 = vmatpush3.msra.mxu1 %v13078_v57  ;;  %v11320_v56 = vld [vmem:[#allocation3 + $0x18] sm:$0x1]  ;;  %v11760_v57 = vld [vmem:[#allocation3 + $0x14] sm:$0x1] }
0x21c5   :  { %14947 = vmatprep.subr.mxu0 %v15033_v3  ;;  %14973 = vmatprep.subr.mxu1 %v15033_v3  ;;  %v11458_v21 = vrot.slane %v11320_v56, 5 }
0x21c6   :  { %14948 = vmatpush3.msra.mxu0 %v13070_v58  ;;  %14974 = vmatpush3.msra.mxu1 %v13077_v59  ;;  %v11761_v58 = vld [vmem:[#allocation3 + $0x1c] sm:$0x1]  ;;  %v11328_v59 = vld [vmem:[%s20274_s9 + $0x18] sm:$0xff] }
0x21c7   :  { %14949 = vmatprep.subr.mxu0 %v15033_v3  ;;  %14975 = vmatprep.subr.mxu1 %v15033_v3  ;;  %v11784_v12 = vrot.slane %v11761_v58, 5  ;;  %v13082_v58 = vld [vmem:[%s20274_s9 + $0x80] sm:$0xff] }
0x21c8   :  { %14950 = vmatpush3.msra.mxu0 %v13069_v60  ;;  %14976 = vmatpush3.msra.mxu1 %v13076_v61  ;;  %v13090_v60 = vld [vmem:[%s20274_s9 + $0xb8] sm:$0xff]  ;;  %v11321_v61 = vld [vmem:[#allocation3 + $0x20] sm:$0x1] }
0x21c9   :  { %14951 = vmatprep.subr.mxu0 %v15033_v3  ;;  %14977 = vmatprep.subr.mxu1 %v15033_v3  ;;  %v11460_v10 = vrot.slane %v11321_v61, 4 }
0x21ca   :  { %14952 = vmatpush3.msra.mxu0 %v13068_v62  ;;  %14978 = vmatpush3.msra.mxu1 %v13075_v63  ;;  %v11456_v62 = vrot.slane %v11319_v48, 6  ;;  %v11780_v63 = vrot.slane %v11759_v40, 7  ;;  %v13085_v40 = vld [vmem:[%s20274_s9 + $0x98] sm:$0xff] }
0x21cb   :  { %14956 = vmatprep.subr.mxu0 %v15033_v3  ;;  %14995 = vmatprep.subr.mxu1 %v15033_v3  ;;  %v11654_v48 = vld [vmem:[#allocation3 + $0x2b] sm:$0x1] }
0x21cc   :  { %v11457_v20 = vsel %vm11356_vm13, %v11456_v62, %v11455_v15 }
0x21cd   :  { %v11459_v26 = vsel %vm11359_vm14, %v11458_v21, %v11457_v20  ;;  %v11880_v21 = vld [vmem:[%s20275_s11 + $0x20] sm:$0xff] }
0x21ce   :  { %v11461_v31 = vsel %vm11362_vm15, %v11460_v10, %v11459_v26  ;;  %v11876_v10 = vld [vmem:[%s20275_s11] sm:$0xff] }
0x2280   :  { %v11229_v1 = vpop.f32.mrf.mxu0  ;;  %v11310_v2 = vpop.f32.mrf.mxu1 }
0x2281   :  { %v11314_v6 = vmax.f32 %v11229_v1, %v11310_v2  ;;  %v11322_v1 = vld [vmem:[#allocation3 + $0x28] sm:$0x1]  ;;  %v11762_v2 = vld [vmem:[#allocation3 + $0x24] sm:$0x1] }
0x2282   :  { %v14917_v7 = vpop.f32.mrf.mxu0  ;;  %v14942_v8 = vpop.f32.mrf.mxu1  ;;  %v11462_v17 = vrot.slane %v11322_v1, 3  ;;  %v11786_v19 = vrot.slane %v11762_v2, 4 }
0x2283   :  { %11316 = vst.msk [vmem:[#allocation3 + $0x38] sm:$0x1f] %vm1466_vm11, %v11314_v6  ;;  %v13089_v6 = vld [vmem:[%s20274_s9 + $0xb0] sm:$0xff]  ;;  %v11782_v8 = vrot.slane %v11760_v57, 6  ;;  %v11679_v57 = vrot.slane %v11654_v48, 3 }
0x2284   :  { %v11758_v7 = vld [vmem:[#allocation3 + $0x4] sm:$0x1]  ;;  %v11463_v35 = vsel %vm11365_vm0, %v11462_v17, %v11461_v31 }
0x2285   :  { %v11781_v23 = vsel %vm11353_vm12, %v11780_v63, %v11758_v7  ;;  %v11465_v38 = vsel %vm11368_vm1, %v11464_v22, %v11463_v35  ;;  %v13081_v63 = vld [vmem:[%s20274_s9 + $0x78] sm:$0xff] }
0x2286   :  { %v11783_v28 = vsel %vm11356_vm13, %v11782_v8, %v11781_v23  ;;  %v11879_v7 = vld [vmem:[%s20275_s11 + $0x18] sm:$0xff]  ;;  %v11878_v8 = vld [vmem:[%s20275_s11 + $0x10] sm:$0xff] }
0x2287   :  { %v11785_v32 = vsel %vm11359_vm14, %v11784_v12, %v11783_v28 }
0x2288   :  { %v11787_v36 = vsel %vm11362_vm15, %v11786_v19, %v11785_v32 }
0x2289   :  { %v11789_v39 = vsel %vm11365_vm0, %v11788_v24, %v11787_v36 }
0x228a   :  { %v11337_v41 = vld [vmem:[#allocation3 + $0x39] sm:$0x1]  ;;  %v11547_v43 = vld [vmem:[#allocation3 + $0x3a] sm:$0x1]  ;;  %v11324_v9 = vld [vmem:[#allocation3 + $0x38] sm:$0x1] }
0x228b   :  { %v11370_v45 = vrot.slane %v11337_v41, 1  ;;  %v11574_v47 = vrot.slane %v11547_v43, 1  ;;  %v11765_v18 = vld [vmem:[#allocation3 + $0x3c] sm:$0x1]  ;;  %v11466_v27 = vrot.slane %v11324_v9, 1  ;;  %v11791_v43 = vsel %vm11368_vm1, %v11790_v29, %v11789_v39 }
0x228c   :  { %v11792_v33 = vrot.slane %v11765_v18, 1  ;;  %v11652_v41 = vld [vmem:[#allocation3 + $0x1b] sm:$0x1]  ;;  %v13094_v29 = vld [vmem:[%s20277_s12] ss:$0 sm:$0xff] }
0x228d   :  { %v11372_v54 = vsel %vm11371_vm2, %v11370_v45, %v11369_v49  ;;  %v11575_v55 = vsel %vm11371_vm2, %v11574_v47, %v11573_v51  ;;  %v11467_v42 = vsel %vm11371_vm2, %v11466_v27, %v11465_v38  ;;  %v11671_v45 = vrot.slane %v11650_v34, 7  ;;  %v13084_v47 = vld [vmem:[%s20274_s9 + $0x90] sm:$0xff]  ;;  %v11877_v9 = vld [vmem:[%s20275_s11 + $0x8] sm:$0xff] }
0x228e   :  { %14954 = vmatmul.mubr.msk.f32.vlgmr.msra.gmra.mxu0 %vm11373_vm3, %v11372_v54  ;;  %14980 = vmatmul.mubr.msk.f32.vlgmr.msra.gmra.mxu1 %vm11373_vm3, %v11575_v55  ;;  %v11793_v46 = vsel %vm11371_vm2, %v11792_v33, %v11791_v43  ;;  %v11673_v49 = vrot.slane %v11651_v37, 6  ;;  %v11675_v51 = vrot.slane %v11652_v41, 5  ;;  %v11656_v54 = vld [vmem:[#allocation3 + $0x3b] sm:$0x1]  ;;  %v11677_v55 = vrot.slane %v11653_v44, 4 }
0x228f   :  { %14957 = vmatpush3.msra.mxu0 %v11329_v50  ;;  %14996 = vmatpush3.msra.mxu1 %v13091_v52  ;;  %v11655_v50 = vld [vmem:[#allocation3 + $0x33] sm:$0x1]  ;;  %v13083_v52 = vld [vmem:[%s20274_s9 + $0x88] sm:$0xff]  ;;  %v11672_v56 = vsel %vm11353_vm12, %v11671_v45, %v11649_v53  ;;  %v11683_v62 = vrot.slane %v11656_v54, 1 }
0x2290   :  { %14958 = vmatprep.subr.mxu0 %v15033_v3  ;;  %14997 = vmatprep.subr.mxu1 %v15033_v3 }
0x2291   :  { %14959 = vmatpush3.msra.mxu0 %v11328_v59  ;;  %14998 = vmatpush3.msra.mxu1 %v13090_v60  ;;  %v11674_v59 = vsel %vm11356_vm13, %v11673_v49, %v11672_v56  ;;  %v11681_v60 = vrot.slane %v11655_v50, 2 }
0x2292   :  { %14960 = vmatprep.subr.mxu0 %v15033_v3  ;;  %14999 = vmatprep.subr.mxu1 %v15033_v3  ;;  %v11676_v61 = vsel %vm11359_vm14, %v11675_v51, %v11674_v59 }
0x2293   :  { %14961 = vmatpush3.msra.mxu0 %v11327_v5  ;;  %15000 = vmatpush3.msra.mxu1 %v13089_v6  ;;  %v11678_v0 = vsel %vm11362_vm15, %v11677_v55, %v11676_v61  ;;  %v11883_v5 = vld [vmem:[%s20275_s11 + $0x38] sm:$0xff]  ;;  %v11882_v6 = vld [vmem:[%s20275_s11 + $0x30] sm:$0xff] }
0x2294   :  { %14962 = vmatprep.subr.mxu0 %v15033_v3  ;;  %15001 = vmatprep.subr.mxu1 %v15033_v3  ;;  %v11680_v1 = vsel %vm11365_vm0, %v11679_v57, %v11678_v0 }
0x2295   :  { %14963 = vmatpush3.msra.mxu0 %v11326_v13  ;;  %15002 = vmatpush3.msra.mxu1 %v13088_v14  ;;  %v11682_v2 = vsel %vm11368_vm1, %v11681_v60, %v11680_v1 }
0x2296   :  { %14964 = vmatprep.subr.mxu0 %v15033_v3  ;;  %15003 = vmatprep.subr.mxu1 %v15033_v3  ;;  %v11684_v4 = vsel %vm11371_vm2, %v11683_v62, %v11682_v2 }
0x2297   :  { %14965 = vmatpush3.msra.mxu0 %v11325_v25  ;;  %14966 = vmatprep.mubr.msk.f32.mxu0 %vm15034_vm7, %v15033_v3  ;;  %v13093_v25 = vld [vmem:[%s20276_s10] ss:$0 sm:$0xff] }
0x2298   :  { %15004 = vmatpush3.msra.mxu1 %v13087_v30  ;;  %15005 = vmatprep.mubr.msk.f32.mxu1 %vm15034_vm7, %v15033_v3 }
0x2299   :  { %14967 = vmatmul.mubr.msk.f32.vlgmr.msra.gmra.mxu0 %vm11373_vm3, %v11467_v42  ;;  %14982 = vmatprep.subr.mxu0 %v15033_v3 }
0x229a   :  { %15006 = vmatmul.mubr.msk.f32.vlgmr.msra.gmra.mxu1 %vm11373_vm3, %v11793_v46  ;;  %14983 = vmatpush3.msra.mxu0 %v13085_v40 }
0x229b   :  { %14984 = vmatprep.subr.mxu0 %v15033_v3  ;;  %14992 = vmatprep.mubr.msk.f32.mxu0 %vm15034_vm7, %v15033_v3 }
0x229c   :  { %14985 = vmatpush3.msra.mxu0 %v13084_v47 }
0x229d   :  { %14986 = vmatprep.subr.mxu0 %v15033_v3 }
0x229e   :  { %14987 = vmatpush3.msra.mxu0 %v13083_v52 }
0x229f   :  { %14988 = vmatprep.subr.mxu0 %v15033_v3 }
0x22a0   :  { %14989 = vmatpush3.msra.mxu0 %v13082_v58 }
0x22a1   :  { %14990 = vmatprep.subr.mxu0 %v15033_v3 }
0x22a2   :  { %14991 = vmatpush3.msra.mxu0 %v13081_v63 }
0x22a3   :  { %14993 = vmatmul.mubr.msk.f32.vlgmr.msra.gmra.mxu0 %vm11373_vm3, %v11684_v4  ;;  %15008 = vmatprep.subr.mxu0 %v15033_v3 }
0x22a4   :  { %15024 = vmatprep.mubr.msk.f32.mxu0 %vm15034_vm7, %v15033_v3  ;;  %15009 = vmatpush3.msra.mxu0 %v11883_v5 }
0x22a5   :  { %15010 = vmatprep.subr.mxu0 %v15033_v3 }
0x22a6   :  { %15011 = vmatpush3.msra.mxu0 %v11882_v6 }
0x22a7   :  { %15012 = vmatprep.subr.mxu0 %v15033_v3 }
0x22a8   :  { %15013 = vmatpush3.msra.mxu0 %v11881_v16 }
0x22a9   :  { %15014 = vmatprep.subr.mxu0 %v15033_v3 }
0x22aa   :  { %15015 = vmatpush3.msra.mxu0 %v11880_v21 }
0x22ab   :  { %15016 = vmatprep.subr.mxu0 %v15033_v3 }
0x22ac   :  { %15017 = vmatpush3.msra.mxu0 %v11879_v7 }
0x22ad   :  { %15018 = vmatprep.subr.mxu0 %v15033_v3 }
0x22ae   :  { %15019 = vmatpush3.msra.mxu0 %v11878_v8 }
0x22af   :  { %15020 = vmatprep.subr.mxu0 %v15033_v3 }
0x22b0   :  { %15021 = vmatpush3.msra.mxu0 %v11877_v9 }
0x22b1   :  { %15022 = vmatprep.subr.mxu0 %v15033_v3 }
0x22b2   :  { %15023 = vmatpush3.msra.mxu0 %v11876_v10 }
0x234e   :  { %v11442_v11 = vpop.f32.mrf.mxu0  ;;  %v11644_v12 = vpop.f32.mrf.mxu1 }
0x2350   :  { %v14955_v13 = vpop.f32.mrf.mxu0  ;;  %v14981_v14 = vpop.f32.mrf.mxu1 }
0x2359   :  { %v11536_v15 = vpop.f32.mrf.mxu0 }
0x235a   :  { %v11862_v17 = vpop.f32.mrf.mxu1  ;;  %v11537_v20 = vadd.f32 %v11536_v15, %v11442_v11 }
0x235b   :  { %v14968_v18 = vpop.f32.mrf.mxu0 }
0x235c   :  { %v15007_v19 = vpop.f32.mrf.mxu1  ;;  %v11648_v22 = vadd.f32 %v11644_v12, %v11537_v20 }
0x2363   :  { %v11753_v23 = vpop.f32.mrf.mxu0 }
0x2364   :  { %v11757_v24 = vadd.f32 %v11753_v23, %v11648_v22 }
0x2365   :  { %v14994_v26 = vpop.f32.mrf.mxu0 }
0x2366   :  { %v11866_v27 = vadd.f32 %v11862_v17, %v11757_v24 }
0x2368   :  { %v11874_v3 = vadd.f32 %v13093_v25, %v11866_v27 }
0x236a   :  { %v11875_v28 = vmax.f32 %v11874_v3, 0.0 }
0x236c   :  { %15025 = vmatmul.mubr.msk.f32.vlgmr.msra.gmra.mxu0 %vm11891_vm4, %v11875_v28 }
0x242c   :  { %v11961_v30 = vpop.f32.mrf.mxu0 }
0x242d   :  { %v11962_v31 = vadd.f32 %v13094_v29, %v11961_v30 }
0x242e   :  { %v15026_v32 = vpop.f32.mrf.mxu0 }
0x242f   :  { %v11966_v33 = vsel %vm11965_vm5, %v11962_v31, -inf }
0x2430   :  { %11967 = vmax.xlane.f32.xlu0 %v11966_v33 }
0x24b9   :  { %v11968_v34 = vpop.xlane.xlu0 %11967 }
0x24ba   :  { %v11969_v35 = vsub.f32 %v11962_v31, %v11968_v34 }
0x24bc   :  { %v11970_v36 = vmul.f32 1.442695, %v11969_v35 }
0x24be   :  { %15029 = vpow2.f32 %v11970_v36 }
0x24cb   :  { %v15030_v37 = vpop.eup %15029 }
0x24cc   :  { %v11972_v38 = vsel %vm11965_vm5, %v15030_v37, 0.0 }
0x24cd   :  { %11973 = vadd.xlane.f32.xlu0 %v11972_v38 }
0x2556   :  { %v11974_v39 = vpop.xlane.xlu0 %11973 }
0x2557   :  { %15031 = vlog2.f32 %v11974_v39 }
0x2564   :  { %v15032_v40 = vpop.eup %15031 }
0x2565   :  { %v11976_v41 = vmul.f32 0.6931472, %v15032_v40 }
0x2567   :  { %v11977_v42 = vadd.f32 %v11976_v41, %v11968_v34 }
0x2569   :  { %v11978_v43 = vsub.f32 %v11962_v31, %v11977_v42 }
0x256b   :  { %11979 = vst.msk [vmem:[%s20278_s13] sm:$0xff] %vm11965_vm5, %v11978_v43 }

</bundles_post_ra>
